<compile_context>
chip_gen: v7x
topology: tpu7x:2x2x1
jax: 0.10.0
libtpu: 0.0.40
codegen_flags: <defaults>
</compile_context>

<pallas_src>
import jax
import jax.numpy as jnp
from jax import lax
from jax.experimental import pallas as pl
from jax.experimental.pallas import tpu as pltpu

# ----------------------------- problem sizes -------------------------------
B, S, C, H, W = 2, 2, 4, 16, 16      # batch, frames, coils, spatial
HW = H * W                           # 256 pixels per frame -> lane dimension
P = S * C                            # 8 coil-images per batch element
F_HIDDEN = 8                         # hidden channels of the regularizer CNN
NUM_ITER = 2                         # num_iter_total (shared_params=True)
LAM = 0.05                           # data-term step size (deterministic init)


# ------------------------------ fused kernel -------------------------------
def _sn_kernel(mean_ref, wmat_ref, umat_ref,                        # SMEM
               xr_ref, xi_ref, smr_ref, smi_ref, msq_ref, ym_ref,   # per-batch
               fks_ref, ifks_ref, w1_ref, b1_ref, w2_ref, b2_ref,   # shared
               cmask_ref, rep_ref, comb_ref,
               or_ref, oi_ref):
    b = pl.program_id(0)

    # -- per-batch normalization scalars (hoisted out of the cascade loop) --
    mr = mean_ref[2 * b + 0]
    mi = mean_ref[2 * b + 1]
    n00 = wmat_ref[4 * b + 0]; n01 = wmat_ref[4 * b + 1]
    n10 = wmat_ref[4 * b + 2]; n11 = wmat_ref[4 * b + 3]
    u00 = umat_ref[4 * b + 0]; u01 = umat_ref[4 * b + 1]
    u10 = umat_ref[4 * b + 2]; u11 = umat_ref[4 * b + 3]

    # -- VMEM-resident data / constants, loaded once per grid step --
    smr = smr_ref[0]            # (P, HW)   coil maps, replicated over frames
    smi = smi_ref[0]
    msq = msq_ref[0]            # (P, 2*HW) mask^2, duplicated re|im lanes
    ym = ym_ref[0]              # (P, 2*HW) mask * y, [real | imag] lanes
    fks = fks_ref[...]          # (2*HW, 2*HW) stacked forward Kronecker DFT
    ifks = ifks_ref[...]        # (2*HW, 2*HW) stacked inverse Kronecker DFT
    w1 = w1_ref[...]            # (F_HIDDEN, 18)
    b1 = b1_ref[...]            # (F_HIDDEN, 1)
    w2 = w2_ref[...]            # (2, 9*F_HIDDEN)
    b2 = b2_ref[...]            # (2, 1)
    cmask = cmask_ref[...]      # (9, HW)   zero-padding boundary masks
    rep = rep_ref[...]          # (P, S)    frame -> coil-image replication
    comb = comb_ref[...]        # (S, P)    coil-combine (sum over coils)

    tap_offsets = [(dy, dx) for dy in (-1, 0, 1) for dx in (-1, 0, 1)]

    def shift_taps(z):
        # z: (c, HW) channel planes -> (9*c, HW) im2col rows, (tap, ch) order.
        # Lane roll on the XLU + boundary mask on the VPU == zero-padded shift.
        parts = []
        for t, (dy, dx) in enumerate(tap_offsets):
            d = dy * W + dx
            if d == 0:
                parts.append(z)
            else:
                rolled = pltpu.roll(z, (-d) % HW, axis=1)
                parts.append(cmask[t:t + 1, :] * rolled)
        return jnp.concatenate(parts, axis=0)

    def grad_r(xr, xi):
        # x_thalf = x - unnormalize(CNN(normalize(x)));  xr/xi: (S, HW)
        vr = xr - mr
        vi = xi - mi
        zr = n00 * vr + n01 * vi
        zi = n10 * vr + n11 * vi
        rr_rows, ri_rows = [], []
        for s in range(S):                      # per-frame NCHW Conv2d
            z = jnp.concatenate([zr[s:s + 1], zi[s:s + 1]], axis=0)   # (2, HW)
            t1 = shift_taps(z)                                        # (18, HW)
            h = jnp.maximum(
                jnp.dot(w1, t1, preferred_element_type=jnp.float32) + b1, 0.0)
            t2 = shift_taps(h)                                        # (72, HW)
            o = jnp.dot(w2, t2, preferred_element_type=jnp.float32) + b2
            rr_rows.append(o[0:1])
            ri_rows.append(o[1:2])
        rr = jnp.concatenate(rr_rows, axis=0)   # (S, HW)
        ri = jnp.concatenate(ri_rows, axis=0)
        gr = u00 * rr + u01 * ri + mr
        gi = u10 * rr + u11 * ri + mi
        return xr - gr, xi - gi

    def grad_d(xr, xi):
        # x - lam * A^H(A x - y),  A = mask o DFT2 o smaps (coils+frames batched)
        er = jnp.dot(rep, xr, preferred_element_type=jnp.float32)     # (P, HW)
        ei = jnp.dot(rep, xi, preferred_element_type=jnp.float32)
        pr = smr * er - smi * ei                                      # smap * x
        pim = smr * ei + smi * er
        pstk = jnp.concatenate([pr, pim], axis=1)                     # (P, 2*HW)
        kstk = jnp.dot(pstk, fks, preferred_element_type=jnp.float32)
        rstk = msq * kstk - ym                 # m*(m*k - y) == m^2*k - m*y
        vstk = jnp.dot(rstk, ifks, preferred_element_type=jnp.float32)
        vr = vstk[:, :HW]
        vi = vstk[:, HW:]
        gr_p = smr * vr + smi * vi             # conj(smap) * v
        gi_p = smr * vi - smi * vr
        gr = jnp.dot(comb, gr_p, preferred_element_type=jnp.float32)  # (S, HW)
        gi = jnp.dot(comb, gi_p, preferred_element_type=jnp.float32)
        return xr - LAM * gr, xi - LAM * gi

    def cascade(_, carry):
        cr, ci = carry
        hr, hi = grad_r(cr, ci)
        return grad_d(hr, hi)

    xr, xi = lax.fori_loop(0, NUM_ITER, cascade, (xr_ref[0], xi_ref[0]),
                           unroll=True)

    or_ref[0] = xr
    oi_ref[0] = xi


# --------------------------- forward-pass wrapper ---------------------------
def sensitivity_network_forward(x, y, smaps, mask, attrs, params):
    """SensitivityNetwork.forward with shared_params=True:
    for i in range(num_iter_total):
        x_thalf = x - gradR(x, attrs);  x = gradD(x_thalf, y, smaps, mask)
    """
    # ComplexInstanceNorm.set_normalization: whitening mats from mean / cov.
    mean = attrs['mean'].astype(jnp.float32)          # (B, 2)
    cov = attrs['cov'].astype(jnp.float32)            # (B, 2, 2) SPD
    L = jnp.linalg.cholesky(cov)
    Linv = jnp.linalg.inv(L)
    mean_f = mean.reshape(-1)
    wmat_f = Linv.reshape(-1)
    umat_f = L.reshape(-1)

    # 2-D DFT as a Kronecker matrix acting on row-major (H*W) pixel lanes,
    # in stacked-real form so one matmul performs the complex product.
    idx = jnp.arange(H, dtype=jnp.float32)
    ang = -2.0 * jnp.pi * jnp.outer(idx, idx) / H
    Fc = jnp.exp(1j * ang)                            # forward DFT (H == W)
    IFc = jnp.exp(-1j * ang) / H                      # inverse, 1/H per axis
    FK = jnp.kron(Fc, Fc)                             # (HW, HW) complex
    IFK = jnp.kron(IFc, IFc)
    fks = jnp.block([[FK.real, FK.imag],
                     [-FK.imag, FK.real]]).astype(jnp.float32)     # (512, 512)
    ifks = jnp.block([[IFK.real, IFK.imag],
                      [-IFK.imag, IFK.real]]).astype(jnp.float32)  # (512, 512)

    # complex planes split into real/imag with 256-pixel lane axis
    xr0 = x[..., 0].reshape(B, S, HW)
    xi0 = x[..., 1].reshape(B, S, HW)

    # coil maps replicated over frames: row p = s*C + c
    smr = jnp.broadcast_to(smaps[..., 0].reshape(B, 1, C, HW),
                           (B, S, C, HW)).reshape(B, P, HW)
    smi = jnp.broadcast_to(smaps[..., 1].reshape(B, 1, C, HW),
                           (B, S, C, HW)).reshape(B, P, HW)

    m = mask.astype(jnp.float32)                      # (B, 1, H, W)
    mflat = m.reshape(B, 1, HW)
    msq = jnp.broadcast_to(mflat * mflat, (B, P, HW))
    msq2 = jnp.concatenate([msq, msq], axis=-1)       # (B, P, 2*HW)

    ym = m[:, :, None, :, :, None] * y                # (B, C, S, H, W, 2)
    ym = jnp.transpose(ym, (0, 2, 1, 3, 4, 5)).reshape(B, P, HW, 2)
    ym_stack = jnp.concatenate([ym[..., 0], ym[..., 1]], axis=-1)  # (B,P,2*HW)

    # CNN weights as im2col matrices with rows in (tap, channel) order.
    w1m = params['w1'].reshape(F_HIDDEN, 2, 9).transpose(0, 2, 1).reshape(
        F_HIDDEN, 18)
    b1c = params['b1'].reshape(F_HIDDEN, 1)
    w2m = params['w2'].reshape(2, F_HIDDEN, 9).transpose(0, 2, 1).reshape(
        2, 9 * F_HIDDEN)
    b2c = params['b2'].reshape(2, 1)

    # conv zero-padding masks for the 9 taps; coil replicate / combine matrices
    pix = jnp.arange(HW)
    py, px = pix // W, pix % W
    cmask = jnp.stack(
        [((py + dy >= 0) & (py + dy < H) &
          (px + dx >= 0) & (px + dx < W)).astype(jnp.float32)
         for dy in (-1, 0, 1) for dx in (-1, 0, 1)], axis=0)       # (9, HW)
    rep = (jnp.arange(P)[:, None] // C ==
           jnp.arange(S)[None, :]).astype(jnp.float32)             # (P, S)
    comb = rep.T                                                   # (S, P)

    smem = pl.BlockSpec(memory_space=pltpu.MemorySpace.SMEM)
    bx = pl.BlockSpec((1, S, HW), lambda b: (b, 0, 0))
    bsm = pl.BlockSpec((1, P, HW), lambda b: (b, 0, 0))
    bst = pl.BlockSpec((1, P, 2 * HW), lambda b: (b, 0, 0))

    def const2d(a):
        return pl.BlockSpec(a.shape, lambda b: (0, 0))

    out_r, out_i = pl.pallas_call(
        _sn_kernel,
        grid=(B,),
        in_specs=[smem, smem, smem,
                  bx, bx, bsm, bsm, bst, bst,
                  const2d(fks), const2d(ifks), const2d(w1m), const2d(b1c),
                  const2d(w2m), const2d(b2c), const2d(cmask), const2d(rep),
                  const2d(comb)],
        out_specs=[bx, bx],
        out_shape=[jax.ShapeDtypeStruct((B, S, HW), jnp.float32)] * 2,
        compiler_params=pltpu.CompilerParams(
            dimension_semantics=("parallel",)),
    )(mean_f, wmat_f, umat_f, xr0, xi0, smr, smi, msq2, ym_stack,
      fks, ifks, w1m, b1c, w2m, b2c, cmask, rep, comb)

    return jnp.stack([out_r, out_i], axis=-1).reshape(B, S, H, W, 2)


# --------------------------------- demo -------------------------------------
if __name__ == "__main__":
    key = jax.random.PRNGKey(0)
    ks = jax.random.split(key, 10)

    x = jax.random.normal(ks[0], (B, S, H, W, 2), jnp.float32)
    y = 0.5 * jax.random.normal(ks[1], (B, C, S, H, W, 2), jnp.float32)
    smaps = 0.5 * jax.random.normal(ks[2], (B, C, H, W, 2), jnp.float32)
    mask = (jax.random.uniform(ks[3], (B, 1, H, W)) > 0.5).astype(jnp.float32)

    a = 0.3 * jax.random.normal(ks[4], (B, 2, 2), jnp.float32)
    cov = jnp.einsum('bij,bkj->bik', a, a) + 0.5 * jnp.eye(2, dtype=jnp.float32)[None]
    attrs = {'mean': 0.1 * jax.random.normal(ks[5], (B, 2), jnp.float32),
             'cov': cov}

    params = {
        'w1': 0.1 * jax.random.normal(ks[6], (F_HIDDEN * 2 * 3 * 3,), jnp.float32),
        'b1': 0.01 * jax.random.normal(ks[7], (F_HIDDEN,), jnp.float32),
        'w2': 0.1 * jax.random.normal(ks[8], (2 * F_HIDDEN * 3 * 3,), jnp.float32),
        'b2': 0.01 * jax.random.normal(ks[9], (2,), jnp.float32),
    }

    out = jax.jit(sensitivity_network_forward)(x, y, smaps, mask, attrs, params)
    out = jax.block_until_ready(out)

    assert out.shape == (B, S, H, W, 2)
    assert bool(jnp.all(jnp.isfinite(out)))
    print("KERNEL_OK")
</pallas_src>

<mosaic_0001>
module attributes {stable_mosaic.version = 11 : i64} {
  func.func @_sn_kernel(%arg0: i32, %arg1: memref<4xf32, #tpu.memory_space<smem>>, %arg2: memref<8xf32, #tpu.memory_space<smem>>, %arg3: memref<8xf32, #tpu.memory_space<smem>>, %arg4: memref<1x2x256xf32, #tpu.memory_space<vmem>>, %arg5: memref<1x2x256xf32, #tpu.memory_space<vmem>>, %arg6: memref<1x8x256xf32, #tpu.memory_space<vmem>>, %arg7: memref<1x8x256xf32, #tpu.memory_space<vmem>>, %arg8: memref<1x8x512xf32, #tpu.memory_space<vmem>>, %arg9: memref<1x8x512xf32, #tpu.memory_space<vmem>>, %arg10: memref<512x512xf32, #tpu.memory_space<vmem>>, %arg11: memref<512x512xf32, #tpu.memory_space<vmem>>, %arg12: memref<8x18xf32, #tpu.memory_space<vmem>>, %arg13: memref<8x1xf32, #tpu.memory_space<vmem>>, %arg14: memref<2x72xf32, #tpu.memory_space<vmem>>, %arg15: memref<2x1xf32, #tpu.memory_space<vmem>>, %arg16: memref<9x256xf32, #tpu.memory_space<vmem>>, %arg17: memref<8x2xf32, #tpu.memory_space<vmem>>, %arg18: memref<2x8xf32, #tpu.memory_space<vmem>>, %arg19: memref<1x2x256xf32, #tpu.memory_space<vmem>>, %arg20: memref<1x2x256xf32, #tpu.memory_space<vmem>>) attributes {dimension_semantics = [#tpu.dimension_semantics<parallel>], iteration_bounds = array<i64: 2>, scalar_prefetch = 0 : i64, scratch_operands = 0 : i64, tpu.core_type = #tpu.core_type<tc>, window_params = [{transform_indices = @transform_0, window_bounds = array<i64: 4>}, {transform_indices = @transform_1, window_bounds = array<i64: 8>}, {transform_indices = @transform_2, window_bounds = array<i64: 8>}, {transform_indices = @transform_3, window_bounds = array<i64: 1, 2, 256>}, {transform_indices = @transform_4, window_bounds = array<i64: 1, 2, 256>}, {transform_indices = @transform_5, window_bounds = array<i64: 1, 8, 256>}, {transform_indices = @transform_6, window_bounds = array<i64: 1, 8, 256>}, {transform_indices = @transform_7, window_bounds = array<i64: 1, 8, 512>}, {transform_indices = @transform_8, window_bounds = array<i64: 1, 8, 512>}, {pipeline_mode = #tpu.pipeline_mode<synchronous>, transform_indices = @transform_9, window_bounds = array<i64: 512, 512>}, {pipeline_mode = #tpu.pipeline_mode<synchronous>, transform_indices = @transform_10, window_bounds = array<i64: 512, 512>}, {pipeline_mode = #tpu.pipeline_mode<synchronous>, transform_indices = @transform_11, window_bounds = array<i64: 8, 18>}, {pipeline_mode = #tpu.pipeline_mode<synchronous>, transform_indices = @transform_12, window_bounds = array<i64: 8, 1>}, {pipeline_mode = #tpu.pipeline_mode<synchronous>, transform_indices = @transform_13, window_bounds = array<i64: 2, 72>}, {pipeline_mode = #tpu.pipeline_mode<synchronous>, transform_indices = @transform_14, window_bounds = array<i64: 2, 1>}, {pipeline_mode = #tpu.pipeline_mode<synchronous>, transform_indices = @transform_15, window_bounds = array<i64: 9, 256>}, {pipeline_mode = #tpu.pipeline_mode<synchronous>, transform_indices = @transform_16, window_bounds = array<i64: 8, 2>}, {pipeline_mode = #tpu.pipeline_mode<synchronous>, transform_indices = @transform_17, window_bounds = array<i64: 2, 8>}, {transform_indices = @transform_18, window_bounds = array<i64: 1, 2, 256>}, {transform_indices = @transform_19, window_bounds = array<i64: 1, 2, 256>}]} {
    %c2_i32 = arith.constant 2 : i32
    %0 = arith.muli %c2_i32, %arg0 : i32
    %c0_i32 = arith.constant 0 : i32
    %1 = arith.addi %0, %c0_i32 : i32
    %2 = arith.index_cast %1 : i32 to index
    %3 = memref.load %arg1[%2] : memref<4xf32, #tpu.memory_space<smem>>
    %c2_i32_0 = arith.constant 2 : i32
    %4 = arith.muli %c2_i32_0, %arg0 : i32
    %c1_i32 = arith.constant 1 : i32
    %5 = arith.addi %4, %c1_i32 : i32
    %6 = arith.index_cast %5 : i32 to index
    %7 = memref.load %arg1[%6] : memref<4xf32, #tpu.memory_space<smem>>
    %c4_i32 = arith.constant 4 : i32
    %8 = arith.muli %c4_i32, %arg0 : i32
    %c0_i32_1 = arith.constant 0 : i32
    %9 = arith.addi %8, %c0_i32_1 : i32
    %10 = arith.index_cast %9 : i32 to index
    %11 = memref.load %arg2[%10] : memref<8xf32, #tpu.memory_space<smem>>
    %c4_i32_2 = arith.constant 4 : i32
    %12 = arith.muli %c4_i32_2, %arg0 : i32
    %c1_i32_3 = arith.constant 1 : i32
    %13 = arith.addi %12, %c1_i32_3 : i32
    %14 = arith.index_cast %13 : i32 to index
    %15 = memref.load %arg2[%14] : memref<8xf32, #tpu.memory_space<smem>>
    %c4_i32_4 = arith.constant 4 : i32
    %16 = arith.muli %c4_i32_4, %arg0 : i32
    %c2_i32_5 = arith.constant 2 : i32
    %17 = arith.addi %16, %c2_i32_5 : i32
    %18 = arith.index_cast %17 : i32 to index
    %19 = memref.load %arg2[%18] : memref<8xf32, #tpu.memory_space<smem>>
    %c4_i32_6 = arith.constant 4 : i32
    %20 = arith.muli %c4_i32_6, %arg0 : i32
    %c3_i32 = arith.constant 3 : i32
    %21 = arith.addi %20, %c3_i32 : i32
    %22 = arith.index_cast %21 : i32 to index
    %23 = memref.load %arg2[%22] : memref<8xf32, #tpu.memory_space<smem>>
    %c4_i32_7 = arith.constant 4 : i32
    %24 = arith.muli %c4_i32_7, %arg0 : i32
    %c0_i32_8 = arith.constant 0 : i32
    %25 = arith.addi %24, %c0_i32_8 : i32
    %26 = arith.index_cast %25 : i32 to index
    %27 = memref.load %arg3[%26] : memref<8xf32, #tpu.memory_space<smem>>
    %c4_i32_9 = arith.constant 4 : i32
    %28 = arith.muli %c4_i32_9, %arg0 : i32
    %c1_i32_10 = arith.constant 1 : i32
    %29 = arith.addi %28, %c1_i32_10 : i32
    %30 = arith.index_cast %29 : i32 to index
    %31 = memref.load %arg3[%30] : memref<8xf32, #tpu.memory_space<smem>>
    %c4_i32_11 = arith.constant 4 : i32
    %32 = arith.muli %c4_i32_11, %arg0 : i32
    %c2_i32_12 = arith.constant 2 : i32
    %33 = arith.addi %32, %c2_i32_12 : i32
    %34 = arith.index_cast %33 : i32 to index
    %35 = memref.load %arg3[%34] : memref<8xf32, #tpu.memory_space<smem>>
    %c4_i32_13 = arith.constant 4 : i32
    %36 = arith.muli %c4_i32_13, %arg0 : i32
    %c3_i32_14 = arith.constant 3 : i32
    %37 = arith.addi %36, %c3_i32_14 : i32
    %38 = arith.index_cast %37 : i32 to index
    %39 = memref.load %arg3[%38] : memref<8xf32, #tpu.memory_space<smem>>
    %c0 = arith.constant 0 : index
    %c0_15 = arith.constant 0 : index
    %c0_16 = arith.constant 0 : index
    %40 = vector.load %arg6[%c0, %c0_15, %c0_16] : memref<1x8x256xf32, #tpu.memory_space<vmem>>, vector<1x8x256xf32>
    %41 = vector.shape_cast %40 : vector<1x8x256xf32> to vector<8x256xf32>
    %c0_17 = arith.constant 0 : index
    %c0_18 = arith.constant 0 : index
    %c0_19 = arith.constant 0 : index
    %42 = vector.load %arg7[%c0_17, %c0_18, %c0_19] : memref<1x8x256xf32, #tpu.memory_space<vmem>>, vector<1x8x256xf32>
    %43 = vector.shape_cast %42 : vector<1x8x256xf32> to vector<8x256xf32>
    %c0_20 = arith.constant 0 : index
    %c0_21 = arith.constant 0 : index
    %c0_22 = arith.constant 0 : index
    %44 = vector.load %arg8[%c0_20, %c0_21, %c0_22] : memref<1x8x512xf32, #tpu.memory_space<vmem>>, vector<1x8x512xf32>
    %45 = vector.shape_cast %44 : vector<1x8x512xf32> to vector<8x512xf32>
    %c0_23 = arith.constant 0 : index
    %c0_24 = arith.constant 0 : index
    %c0_25 = arith.constant 0 : index
    %46 = vector.load %arg9[%c0_23, %c0_24, %c0_25] : memref<1x8x512xf32, #tpu.memory_space<vmem>>, vector<1x8x512xf32>
    %47 = vector.shape_cast %46 : vector<1x8x512xf32> to vector<8x512xf32>
    %c0_26 = arith.constant 0 : index
    %c0_27 = arith.constant 0 : index
    %48 = vector.load %arg10[%c0_26, %c0_27] : memref<512x512xf32, #tpu.memory_space<vmem>>, vector<512x512xf32>
    %c0_28 = arith.constant 0 : index
    %c0_29 = arith.constant 0 : index
    %49 = vector.load %arg11[%c0_28, %c0_29] : memref<512x512xf32, #tpu.memory_space<vmem>>, vector<512x512xf32>
    %c0_30 = arith.constant 0 : index
    %c0_31 = arith.constant 0 : index
    %50 = vector.load %arg12[%c0_30, %c0_31] : memref<8x18xf32, #tpu.memory_space<vmem>>, vector<8x18xf32>
    %c0_32 = arith.constant 0 : index
    %c0_33 = arith.constant 0 : index
    %51 = vector.load %arg13[%c0_32, %c0_33] : memref<8x1xf32, #tpu.memory_space<vmem>>, vector<8x1xf32>
    %c0_34 = arith.constant 0 : index
    %c0_35 = arith.constant 0 : index
    %52 = vector.load %arg14[%c0_34, %c0_35] : memref<2x72xf32, #tpu.memory_space<vmem>>, vector<2x72xf32>
    %c0_36 = arith.constant 0 : index
    %c0_37 = arith.constant 0 : index
    %53 = vector.load %arg15[%c0_36, %c0_37] : memref<2x1xf32, #tpu.memory_space<vmem>>, vector<2x1xf32>
    %c0_38 = arith.constant 0 : index
    %c0_39 = arith.constant 0 : index
    %54 = vector.load %arg16[%c0_38, %c0_39] : memref<9x256xf32, #tpu.memory_space<vmem>>, vector<9x256xf32>
    %c0_40 = arith.constant 0 : index
    %c0_41 = arith.constant 0 : index
    %55 = vector.load %arg17[%c0_40, %c0_41] : memref<8x2xf32, #tpu.memory_space<vmem>>, vector<8x2xf32>
    %c0_42 = arith.constant 0 : index
    %c0_43 = arith.constant 0 : index
    %56 = vector.load %arg18[%c0_42, %c0_43] : memref<2x8xf32, #tpu.memory_space<vmem>>, vector<2x8xf32>
    %c0_44 = arith.constant 0 : index
    %c0_45 = arith.constant 0 : index
    %c0_46 = arith.constant 0 : index
    %57 = vector.load %arg4[%c0_44, %c0_45, %c0_46] : memref<1x2x256xf32, #tpu.memory_space<vmem>>, vector<1x2x256xf32>
    %58 = vector.shape_cast %57 : vector<1x2x256xf32> to vector<2x256xf32>
    %c0_47 = arith.constant 0 : index
    %c0_48 = arith.constant 0 : index
    %c0_49 = arith.constant 0 : index
    %59 = vector.load %arg5[%c0_47, %c0_48, %c0_49] : memref<1x2x256xf32, #tpu.memory_space<vmem>>, vector<1x2x256xf32>
    %60 = vector.shape_cast %59 : vector<1x2x256xf32> to vector<2x256xf32>
    %c0_i32_50 = arith.constant 0 : i32
    %61 = vector.broadcast %3 : f32 to vector<2x256xf32>
    %62 = arith.subf %58, %61 : vector<2x256xf32>
    %63 = vector.broadcast %7 : f32 to vector<2x256xf32>
    %64 = arith.subf %60, %63 : vector<2x256xf32>
    %65 = vector.broadcast %11 : f32 to vector<2x256xf32>
    %66 = arith.mulf %65, %62 : vector<2x256xf32>
    %67 = vector.broadcast %15 : f32 to vector<2x256xf32>
    %68 = arith.mulf %67, %64 : vector<2x256xf32>
    %69 = arith.addf %66, %68 : vector<2x256xf32>
    %70 = vector.broadcast %19 : f32 to vector<2x256xf32>
    %71 = arith.mulf %70, %62 : vector<2x256xf32>
    %72 = vector.broadcast %23 : f32 to vector<2x256xf32>
    %73 = arith.mulf %72, %64 : vector<2x256xf32>
    %74 = arith.addf %71, %73 : vector<2x256xf32>
    %75 = vector.extract_strided_slice %69 {offsets = [0, 0], sizes = [1, 256], strides = [1, 1]} : vector<2x256xf32> to vector<1x256xf32>
    %76 = vector.extract_strided_slice %74 {offsets = [0, 0], sizes = [1, 256], strides = [1, 1]} : vector<2x256xf32> to vector<1x256xf32>
    %77 = tpu.concatenate %75, %76 in 0 : vector<1x256xf32>, vector<1x256xf32> -> vector<2x256xf32>
    %c17_i32 = arith.constant 17 : i32
    %78 = tpu.dynamic_rotate %77 by %c17_i32 dim 1 : vector<2x256xf32>, i32 -> vector<2x256xf32>
    %79 = vector.extract_strided_slice %54 {offsets = [0, 0], sizes = [1, 256], strides = [1, 1]} : vector<9x256xf32> to vector<1x256xf32>
    %80 = vector.broadcast %79 : vector<1x256xf32> to vector<2x256xf32>
    %81 = arith.mulf %80, %78 : vector<2x256xf32>
    %c16_i32 = arith.constant 16 : i32
    %82 = tpu.dynamic_rotate %77 by %c16_i32 dim 1 : vector<2x256xf32>, i32 -> vector<2x256xf32>
    %83 = vector.extract_strided_slice %54 {offsets = [1, 0], sizes = [1, 256], strides = [1, 1]} : vector<9x256xf32> to vector<1x256xf32>
    %84 = vector.broadcast %83 : vector<1x256xf32> to vector<2x256xf32>
    %85 = arith.mulf %84, %82 : vector<2x256xf32>
    %c15_i32 = arith.constant 15 : i32
    %86 = tpu.dynamic_rotate %77 by %c15_i32 dim 1 : vector<2x256xf32>, i32 -> vector<2x256xf32>
    %87 = vector.extract_strided_slice %54 {offsets = [2, 0], sizes = [1, 256], strides = [1, 1]} : vector<9x256xf32> to vector<1x256xf32>
    %88 = vector.broadcast %87 : vector<1x256xf32> to vector<2x256xf32>
    %89 = arith.mulf %88, %86 : vector<2x256xf32>
    %c1_i32_51 = arith.constant 1 : i32
    %90 = tpu.dynamic_rotate %77 by %c1_i32_51 dim 1 : vector<2x256xf32>, i32 -> vector<2x256xf32>
    %91 = vector.extract_strided_slice %54 {offsets = [3, 0], sizes = [1, 256], strides = [1, 1]} : vector<9x256xf32> to vector<1x256xf32>
    %92 = vector.broadcast %91 : vector<1x256xf32> to vector<2x256xf32>
    %93 = arith.mulf %92, %90 : vector<2x256xf32>
    %c255_i32 = arith.constant 255 : i32
    %94 = tpu.dynamic_rotate %77 by %c255_i32 dim 1 : vector<2x256xf32>, i32 -> vector<2x256xf32>
    %95 = vector.extract_strided_slice %54 {offsets = [5, 0], sizes = [1, 256], strides = [1, 1]} : vector<9x256xf32> to vector<1x256xf32>
    %96 = vector.broadcast %95 : vector<1x256xf32> to vector<2x256xf32>
    %97 = arith.mulf %96, %94 : vector<2x256xf32>
    %c241_i32 = arith.constant 241 : i32
    %98 = tpu.dynamic_rotate %77 by %c241_i32 dim 1 : vector<2x256xf32>, i32 -> vector<2x256xf32>
    %99 = vector.extract_strided_slice %54 {offsets = [6, 0], sizes = [1, 256], strides = [1, 1]} : vector<9x256xf32> to vector<1x256xf32>
    %100 = vector.broadcast %99 : vector<1x256xf32> to vector<2x256xf32>
    %101 = arith.mulf %100, %98 : vector<2x256xf32>
    %c240_i32 = arith.constant 240 : i32
    %102 = tpu.dynamic_rotate %77 by %c240_i32 dim 1 : vector<2x256xf32>, i32 -> vector<2x256xf32>
    %103 = vector.extract_strided_slice %54 {offsets = [7, 0], sizes = [1, 256], strides = [1, 1]} : vector<9x256xf32> to vector<1x256xf32>
    %104 = vector.broadcast %103 : vector<1x256xf32> to vector<2x256xf32>
    %105 = arith.mulf %104, %102 : vector<2x256xf32>
    %c239_i32 = arith.constant 239 : i32
    %106 = tpu.dynamic_rotate %77 by %c239_i32 dim 1 : vector<2x256xf32>, i32 -> vector<2x256xf32>
    %107 = vector.extract_strided_slice %54 {offsets = [8, 0], sizes = [1, 256], strides = [1, 1]} : vector<9x256xf32> to vector<1x256xf32>
    %108 = vector.broadcast %107 : vector<1x256xf32> to vector<2x256xf32>
    %109 = arith.mulf %108, %106 : vector<2x256xf32>
    %110 = tpu.concatenate %81, %85, %89, %93, %77, %97, %101, %105, %109 in 0 : vector<2x256xf32>, vector<2x256xf32>, vector<2x256xf32>, vector<2x256xf32>, vector<2x256xf32>, vector<2x256xf32>, vector<2x256xf32>, vector<2x256xf32>, vector<2x256xf32> -> vector<18x256xf32>
    %cst = arith.constant dense<0.000000e+00> : vector<8x256xf32>
    %111 = tpu.matmul %50, %110, %cst {dimension_numbers = #tpu.dot_dimension_numbers<[1], [0], [0], [1], [0, 0, 1, 1], [], []>} : vector<8x18xf32>, vector<18x256xf32>, vector<8x256xf32> -> vector<8x256xf32>
    %112 = vector.broadcast %51 : vector<8x1xf32> to vector<8x256xf32>
    %113 = arith.addf %111, %112 : vector<8x256xf32>
    %cst_52 = arith.constant 0.000000e+00 : f32
    %114 = vector.broadcast %cst_52 : f32 to vector<8x256xf32>
    %115 = arith.maximumf %113, %114 : vector<8x256xf32>
    %c17_i32_53 = arith.constant 17 : i32
    %116 = tpu.dynamic_rotate %115 by %c17_i32_53 dim 1 : vector<8x256xf32>, i32 -> vector<8x256xf32>
    %117 = vector.extract_strided_slice %54 {offsets = [0, 0], sizes = [1, 256], strides = [1, 1]} : vector<9x256xf32> to vector<1x256xf32>
    %118 = vector.broadcast %117 : vector<1x256xf32> to vector<8x256xf32>
    %119 = arith.mulf %118, %116 : vector<8x256xf32>
    %c16_i32_54 = arith.constant 16 : i32
    %120 = tpu.dynamic_rotate %115 by %c16_i32_54 dim 1 : vector<8x256xf32>, i32 -> vector<8x256xf32>
    %121 = vector.extract_strided_slice %54 {offsets = [1, 0], sizes = [1, 256], strides = [1, 1]} : vector<9x256xf32> to vector<1x256xf32>
    %122 = vector.broadcast %121 : vector<1x256xf32> to vector<8x256xf32>
    %123 = arith.mulf %122, %120 : vector<8x256xf32>
    %c15_i32_55 = arith.constant 15 : i32
    %124 = tpu.dynamic_rotate %115 by %c15_i32_55 dim 1 : vector<8x256xf32>, i32 -> vector<8x256xf32>
    %125 = vector.extract_strided_slice %54 {offsets = [2, 0], sizes = [1, 256], strides = [1, 1]} : vector<9x256xf32> to vector<1x256xf32>
    %126 = vector.broadcast %125 : vector<1x256xf32> to vector<8x256xf32>
    %127 = arith.mulf %126, %124 : vector<8x256xf32>
    %c1_i32_56 = arith.constant 1 : i32
    %128 = tpu.dynamic_rotate %115 by %c1_i32_56 dim 1 : vector<8x256xf32>, i32 -> vector<8x256xf32>
    %129 = vector.extract_strided_slice %54 {offsets = [3, 0], sizes = [1, 256], strides = [1, 1]} : vector<9x256xf32> to vector<1x256xf32>
    %130 = vector.broadcast %129 : vector<1x256xf32> to vector<8x256xf32>
    %131 = arith.mulf %130, %128 : vector<8x256xf32>
    %c255_i32_57 = arith.constant 255 : i32
    %132 = tpu.dynamic_rotate %115 by %c255_i32_57 dim 1 : vector<8x256xf32>, i32 -> vector<8x256xf32>
    %133 = vector.extract_strided_slice %54 {offsets = [5, 0], sizes = [1, 256], strides = [1, 1]} : vector<9x256xf32> to vector<1x256xf32>
    %134 = vector.broadcast %133 : vector<1x256xf32> to vector<8x256xf32>
    %135 = arith.mulf %134, %132 : vector<8x256xf32>
    %c241_i32_58 = arith.constant 241 : i32
    %136 = tpu.dynamic_rotate %115 by %c241_i32_58 dim 1 : vector<8x256xf32>, i32 -> vector<8x256xf32>
    %137 = vector.extract_strided_slice %54 {offsets = [6, 0], sizes = [1, 256], strides = [1, 1]} : vector<9x256xf32> to vector<1x256xf32>
    %138 = vector.broadcast %137 : vector<1x256xf32> to vector<8x256xf32>
    %139 = arith.mulf %138, %136 : vector<8x256xf32>
    %c240_i32_59 = arith.constant 240 : i32
    %140 = tpu.dynamic_rotate %115 by %c240_i32_59 dim 1 : vector<8x256xf32>, i32 -> vector<8x256xf32>
    %141 = vector.extract_strided_slice %54 {offsets = [7, 0], sizes = [1, 256], strides = [1, 1]} : vector<9x256xf32> to vector<1x256xf32>
    %142 = vector.broadcast %141 : vector<1x256xf32> to vector<8x256xf32>
    %143 = arith.mulf %142, %140 : vector<8x256xf32>
    %c239_i32_60 = arith.constant 239 : i32
    %144 = tpu.dynamic_rotate %115 by %c239_i32_60 dim 1 : vector<8x256xf32>, i32 -> vector<8x256xf32>
    %145 = vector.extract_strided_slice %54 {offsets = [8, 0], sizes = [1, 256], strides = [1, 1]} : vector<9x256xf32> to vector<1x256xf32>
    %146 = vector.broadcast %145 : vector<1x256xf32> to vector<8x256xf32>
    %147 = arith.mulf %146, %144 : vector<8x256xf32>
    %148 = tpu.concatenate %119, %123, %127, %131, %115, %135, %139, %143, %147 in 0 : vector<8x256xf32>, vector<8x256xf32>, vector<8x256xf32>, vector<8x256xf32>, vector<8x256xf32>, vector<8x256xf32>, vector<8x256xf32>, vector<8x256xf32>, vector<8x256xf32> -> vector<72x256xf32>
    %cst_61 = arith.constant dense<0.000000e+00> : vector<2x256xf32>
    %149 = tpu.matmul %52, %148, %cst_61 {dimension_numbers = #tpu.dot_dimension_numbers<[1], [0], [0], [1], [0, 0, 1, 1], [], []>} : vector<2x72xf32>, vector<72x256xf32>, vector<2x256xf32> -> vector<2x256xf32>
    %150 = vector.broadcast %53 : vector<2x1xf32> to vector<2x256xf32>
    %151 = arith.addf %149, %150 : vector<2x256xf32>
    %152 = vector.extract_strided_slice %151 {offsets = [0, 0], sizes = [1, 256], strides = [1, 1]} : vector<2x256xf32> to vector<1x256xf32>
    %153 = vector.extract_strided_slice %151 {offsets = [1, 0], sizes = [1, 256], strides = [1, 1]} : vector<2x256xf32> to vector<1x256xf32>
    %154 = vector.extract_strided_slice %69 {offsets = [1, 0], sizes = [1, 256], strides = [1, 1]} : vector<2x256xf32> to vector<1x256xf32>
    %155 = vector.extract_strided_slice %74 {offsets = [1, 0], sizes = [1, 256], strides = [1, 1]} : vector<2x256xf32> to vector<1x256xf32>
    %156 = tpu.concatenate %154, %155 in 0 : vector<1x256xf32>, vector<1x256xf32> -> vector<2x256xf32>
    %c17_i32_62 = arith.constant 17 : i32
    %157 = tpu.dynamic_rotate %156 by %c17_i32_62 dim 1 : vector<2x256xf32>, i32 -> vector<2x256xf32>
    %158 = vector.extract_strided_slice %54 {offsets = [0, 0], sizes = [1, 256], strides = [1, 1]} : vector<9x256xf32> to vector<1x256xf32>
    %159 = vector.broadcast %158 : vector<1x256xf32> to vector<2x256xf32>
    %160 = arith.mulf %159, %157 : vector<2x256xf32>
    %c16_i32_63 = arith.constant 16 : i32
    %161 = tpu.dynamic_rotate %156 by %c16_i32_63 dim 1 : vector<2x256xf32>, i32 -> vector<2x256xf32>
    %162 = vector.extract_strided_slice %54 {offsets = [1, 0], sizes = [1, 256], strides = [1, 1]} : vector<9x256xf32> to vector<1x256xf32>
    %163 = vector.broadcast %162 : vector<1x256xf32> to vector<2x256xf32>
    %164 = arith.mulf %163, %161 : vector<2x256xf32>
    %c15_i32_64 = arith.constant 15 : i32
    %165 = tpu.dynamic_rotate %156 by %c15_i32_64 dim 1 : vector<2x256xf32>, i32 -> vector<2x256xf32>
    %166 = vector.extract_strided_slice %54 {offsets = [2, 0], sizes = [1, 256], strides = [1, 1]} : vector<9x256xf32> to vector<1x256xf32>
    %167 = vector.broadcast %166 : vector<1x256xf32> to vector<2x256xf32>
    %168 = arith.mulf %167, %165 : vector<2x256xf32>
    %c1_i32_65 = arith.constant 1 : i32
    %169 = tpu.dynamic_rotate %156 by %c1_i32_65 dim 1 : vector<2x256xf32>, i32 -> vector<2x256xf32>
    %170 = vector.extract_strided_slice %54 {offsets = [3, 0], sizes = [1, 256], strides = [1, 1]} : vector<9x256xf32> to vector<1x256xf32>
    %171 = vector.broadcast %170 : vector<1x256xf32> to vector<2x256xf32>
    %172 = arith.mulf %171, %169 : vector<2x256xf32>
    %c255_i32_66 = arith.constant 255 : i32
    %173 = tpu.dynamic_rotate %156 by %c255_i32_66 dim 1 : vector<2x256xf32>, i32 -> vector<2x256xf32>
    %174 = vector.extract_strided_slice %54 {offsets = [5, 0], sizes = [1, 256], strides = [1, 1]} : vector<9x256xf32> to vector<1x256xf32>
    %175 = vector.broadcast %174 : vector<1x256xf32> to vector<2x256xf32>
    %176 = arith.mulf %175, %173 : vector<2x256xf32>
    %c241_i32_67 = arith.constant 241 : i32
    %177 = tpu.dynamic_rotate %156 by %c241_i32_67 dim 1 : vector<2x256xf32>, i32 -> vector<2x256xf32>
    %178 = vector.extract_strided_slice %54 {offsets = [6, 0], sizes = [1, 256], strides = [1, 1]} : vector<9x256xf32> to vector<1x256xf32>
    %179 = vector.broadcast %178 : vector<1x256xf32> to vector<2x256xf32>
    %180 = arith.mulf %179, %177 : vector<2x256xf32>
    %c240_i32_68 = arith.constant 240 : i32
    %181 = tpu.dynamic_rotate %156 by %c240_i32_68 dim 1 : vector<2x256xf32>, i32 -> vector<2x256xf32>
    %182 = vector.extract_strided_slice %54 {offsets = [7, 0], sizes = [1, 256], strides = [1, 1]} : vector<9x256xf32> to vector<1x256xf32>
    %183 = vector.broadcast %182 : vector<1x256xf32> to vector<2x256xf32>
    %184 = arith.mulf %183, %181 : vector<2x256xf32>
    %c239_i32_69 = arith.constant 239 : i32
    %185 = tpu.dynamic_rotate %156 by %c239_i32_69 dim 1 : vector<2x256xf32>, i32 -> vector<2x256xf32>
    %186 = vector.extract_strided_slice %54 {offsets = [8, 0], sizes = [1, 256], strides = [1, 1]} : vector<9x256xf32> to vector<1x256xf32>
    %187 = vector.broadcast %186 : vector<1x256xf32> to vector<2x256xf32>
    %188 = arith.mulf %187, %185 : vector<2x256xf32>
    %189 = tpu.concatenate %160, %164, %168, %172, %156, %176, %180, %184, %188 in 0 : vector<2x256xf32>, vector<2x256xf32>, vector<2x256xf32>, vector<2x256xf32>, vector<2x256xf32>, vector<2x256xf32>, vector<2x256xf32>, vector<2x256xf32>, vector<2x256xf32> -> vector<18x256xf32>
    %cst_70 = arith.constant dense<0.000000e+00> : vector<8x256xf32>
    %190 = tpu.matmul %50, %189, %cst_70 {dimension_numbers = #tpu.dot_dimension_numbers<[1], [0], [0], [1], [0, 0, 1, 1], [], []>} : vector<8x18xf32>, vector<18x256xf32>, vector<8x256xf32> -> vector<8x256xf32>
    %191 = vector.broadcast %51 : vector<8x1xf32> to vector<8x256xf32>
    %192 = arith.addf %190, %191 : vector<8x256xf32>
    %cst_71 = arith.constant 0.000000e+00 : f32
    %193 = vector.broadcast %cst_71 : f32 to vector<8x256xf32>
    %194 = arith.maximumf %192, %193 : vector<8x256xf32>
    %c17_i32_72 = arith.constant 17 : i32
    %195 = tpu.dynamic_rotate %194 by %c17_i32_72 dim 1 : vector<8x256xf32>, i32 -> vector<8x256xf32>
    %196 = vector.extract_strided_slice %54 {offsets = [0, 0], sizes = [1, 256], strides = [1, 1]} : vector<9x256xf32> to vector<1x256xf32>
    %197 = vector.broadcast %196 : vector<1x256xf32> to vector<8x256xf32>
    %198 = arith.mulf %197, %195 : vector<8x256xf32>
    %c16_i32_73 = arith.constant 16 : i32
    %199 = tpu.dynamic_rotate %194 by %c16_i32_73 dim 1 : vector<8x256xf32>, i32 -> vector<8x256xf32>
    %200 = vector.extract_strided_slice %54 {offsets = [1, 0], sizes = [1, 256], strides = [1, 1]} : vector<9x256xf32> to vector<1x256xf32>
    %201 = vector.broadcast %200 : vector<1x256xf32> to vector<8x256xf32>
    %202 = arith.mulf %201, %199 : vector<8x256xf32>
    %c15_i32_74 = arith.constant 15 : i32
    %203 = tpu.dynamic_rotate %194 by %c15_i32_74 dim 1 : vector<8x256xf32>, i32 -> vector<8x256xf32>
    %204 = vector.extract_strided_slice %54 {offsets = [2, 0], sizes = [1, 256], strides = [1, 1]} : vector<9x256xf32> to vector<1x256xf32>
    %205 = vector.broadcast %204 : vector<1x256xf32> to vector<8x256xf32>
    %206 = arith.mulf %205, %203 : vector<8x256xf32>
    %c1_i32_75 = arith.constant 1 : i32
    %207 = tpu.dynamic_rotate %194 by %c1_i32_75 dim 1 : vector<8x256xf32>, i32 -> vector<8x256xf32>
    %208 = vector.extract_strided_slice %54 {offsets = [3, 0], sizes = [1, 256], strides = [1, 1]} : vector<9x256xf32> to vector<1x256xf32>
    %209 = vector.broadcast %208 : vector<1x256xf32> to vector<8x256xf32>
    %210 = arith.mulf %209, %207 : vector<8x256xf32>
    %c255_i32_76 = arith.constant 255 : i32
    %211 = tpu.dynamic_rotate %194 by %c255_i32_76 dim 1 : vector<8x256xf32>, i32 -> vector<8x256xf32>
    %212 = vector.extract_strided_slice %54 {offsets = [5, 0], sizes = [1, 256], strides = [1, 1]} : vector<9x256xf32> to vector<1x256xf32>
    %213 = vector.broadcast %212 : vector<1x256xf32> to vector<8x256xf32>
    %214 = arith.mulf %213, %211 : vector<8x256xf32>
    %c241_i32_77 = arith.constant 241 : i32
    %215 = tpu.dynamic_rotate %194 by %c241_i32_77 dim 1 : vector<8x256xf32>, i32 -> vector<8x256xf32>
    %216 = vector.extract_strided_slice %54 {offsets = [6, 0], sizes = [1, 256], strides = [1, 1]} : vector<9x256xf32> to vector<1x256xf32>
    %217 = vector.broadcast %216 : vector<1x256xf32> to vector<8x256xf32>
    %218 = arith.mulf %217, %215 : vector<8x256xf32>
    %c240_i32_78 = arith.constant 240 : i32
    %219 = tpu.dynamic_rotate %194 by %c240_i32_78 dim 1 : vector<8x256xf32>, i32 -> vector<8x256xf32>
    %220 = vector.extract_strided_slice %54 {offsets = [7, 0], sizes = [1, 256], strides = [1, 1]} : vector<9x256xf32> to vector<1x256xf32>
    %221 = vector.broadcast %220 : vector<1x256xf32> to vector<8x256xf32>
    %222 = arith.mulf %221, %219 : vector<8x256xf32>
    %c239_i32_79 = arith.constant 239 : i32
    %223 = tpu.dynamic_rotate %194 by %c239_i32_79 dim 1 : vector<8x256xf32>, i32 -> vector<8x256xf32>
    %224 = vector.extract_strided_slice %54 {offsets = [8, 0], sizes = [1, 256], strides = [1, 1]} : vector<9x256xf32> to vector<1x256xf32>
    %225 = vector.broadcast %224 : vector<1x256xf32> to vector<8x256xf32>
    %226 = arith.mulf %225, %223 : vector<8x256xf32>
    %227 = tpu.concatenate %198, %202, %206, %210, %194, %214, %218, %222, %226 in 0 : vector<8x256xf32>, vector<8x256xf32>, vector<8x256xf32>, vector<8x256xf32>, vector<8x256xf32>, vector<8x256xf32>, vector<8x256xf32>, vector<8x256xf32>, vector<8x256xf32> -> vector<72x256xf32>
    %cst_80 = arith.constant dense<0.000000e+00> : vector<2x256xf32>
    %228 = tpu.matmul %52, %227, %cst_80 {dimension_numbers = #tpu.dot_dimension_numbers<[1], [0], [0], [1], [0, 0, 1, 1], [], []>} : vector<2x72xf32>, vector<72x256xf32>, vector<2x256xf32> -> vector<2x256xf32>
    %229 = vector.broadcast %53 : vector<2x1xf32> to vector<2x256xf32>
    %230 = arith.addf %228, %229 : vector<2x256xf32>
    %231 = vector.extract_strided_slice %230 {offsets = [0, 0], sizes = [1, 256], strides = [1, 1]} : vector<2x256xf32> to vector<1x256xf32>
    %232 = vector.extract_strided_slice %230 {offsets = [1, 0], sizes = [1, 256], strides = [1, 1]} : vector<2x256xf32> to vector<1x256xf32>
    %233 = tpu.concatenate %152, %231 in 0 : vector<1x256xf32>, vector<1x256xf32> -> vector<2x256xf32>
    %234 = tpu.concatenate %153, %232 in 0 : vector<1x256xf32>, vector<1x256xf32> -> vector<2x256xf32>
    %235 = vector.broadcast %27 : f32 to vector<2x256xf32>
    %236 = arith.mulf %235, %233 : vector<2x256xf32>
    %237 = vector.broadcast %31 : f32 to vector<2x256xf32>
    %238 = arith.mulf %237, %234 : vector<2x256xf32>
    %239 = arith.addf %236, %238 : vector<2x256xf32>
    %240 = vector.broadcast %3 : f32 to vector<2x256xf32>
    %241 = arith.addf %239, %240 : vector<2x256xf32>
    %242 = vector.broadcast %35 : f32 to vector<2x256xf32>
    %243 = arith.mulf %242, %233 : vector<2x256xf32>
    %244 = vector.broadcast %39 : f32 to vector<2x256xf32>
    %245 = arith.mulf %244, %234 : vector<2x256xf32>
    %246 = arith.addf %243, %245 : vector<2x256xf32>
    %247 = vector.broadcast %7 : f32 to vector<2x256xf32>
    %248 = arith.addf %246, %247 : vector<2x256xf32>
    %249 = arith.subf %58, %241 : vector<2x256xf32>
    %250 = arith.subf %60, %248 : vector<2x256xf32>
    %cst_81 = arith.constant dense<0.000000e+00> : vector<8x256xf32>
    %251 = tpu.matmul %55, %249, %cst_81 {dimension_numbers = #tpu.dot_dimension_numbers<[1], [0], [0], [1], [0, 0, 1, 1], [], []>} : vector<8x2xf32>, vector<2x256xf32>, vector<8x256xf32> -> vector<8x256xf32>
    %cst_82 = arith.constant dense<0.000000e+00> : vector<8x256xf32>
    %252 = tpu.matmul %55, %250, %cst_82 {dimension_numbers = #tpu.dot_dimension_numbers<[1], [0], [0], [1], [0, 0, 1, 1], [], []>} : vector<8x2xf32>, vector<2x256xf32>, vector<8x256xf32> -> vector<8x256xf32>
    %253 = arith.mulf %41, %251 : vector<8x256xf32>
    %254 = arith.mulf %43, %252 : vector<8x256xf32>
    %255 = arith.subf %253, %254 : vector<8x256xf32>
    %256 = arith.mulf %41, %252 : vector<8x256xf32>
    %257 = arith.mulf %43, %251 : vector<8x256xf32>
    %258 = arith.addf %256, %257 : vector<8x256xf32>
    %259 = tpu.concatenate %255, %258 in 1 : vector<8x256xf32>, vector<8x256xf32> -> vector<8x512xf32>
    %cst_83 = arith.constant dense<0.000000e+00> : vector<8x512xf32>
    %260 = tpu.matmul %259, %48, %cst_83 {dimension_numbers = #tpu.dot_dimension_numbers<[1], [0], [0], [1], [0, 0, 1, 1], [], []>} : vector<8x512xf32>, vector<512x512xf32>, vector<8x512xf32> -> vector<8x512xf32>
    %261 = arith.mulf %45, %260 : vector<8x512xf32>
    %262 = arith.subf %261, %47 : vector<8x512xf32>
    %cst_84 = arith.constant dense<0.000000e+00> : vector<8x512xf32>
    %263 = tpu.matmul %262, %49, %cst_84 {dimension_numbers = #tpu.dot_dimension_numbers<[1], [0], [0], [1], [0, 0, 1, 1], [], []>} : vector<8x512xf32>, vector<512x512xf32>, vector<8x512xf32> -> vector<8x512xf32>
    %264 = vector.extract_strided_slice %263 {offsets = [0, 0], sizes = [8, 256], strides = [1, 1]} : vector<8x512xf32> to vector<8x256xf32>
    %265 = vector.extract_strided_slice %263 {offsets = [0, 256], sizes = [8, 256], strides = [1, 1]} : vector<8x512xf32> to vector<8x256xf32>
    %266 = arith.mulf %41, %264 : vector<8x256xf32>
    %267 = arith.mulf %43, %265 : vector<8x256xf32>
    %268 = arith.addf %266, %267 : vector<8x256xf32>
    %269 = arith.mulf %41, %265 : vector<8x256xf32>
    %270 = arith.mulf %43, %264 : vector<8x256xf32>
    %271 = arith.subf %269, %270 : vector<8x256xf32>
    %cst_85 = arith.constant dense<0.000000e+00> : vector<2x256xf32>
    %272 = tpu.matmul %56, %268, %cst_85 {dimension_numbers = #tpu.dot_dimension_numbers<[1], [0], [0], [1], [0, 0, 1, 1], [], []>} : vector<2x8xf32>, vector<8x256xf32>, vector<2x256xf32> -> vector<2x256xf32>
    %cst_86 = arith.constant dense<0.000000e+00> : vector<2x256xf32>
    %273 = tpu.matmul %56, %271, %cst_86 {dimension_numbers = #tpu.dot_dimension_numbers<[1], [0], [0], [1], [0, 0, 1, 1], [], []>} : vector<2x8xf32>, vector<8x256xf32>, vector<2x256xf32> -> vector<2x256xf32>
    %cst_87 = arith.constant 5.000000e-02 : f32
    %274 = vector.broadcast %cst_87 : f32 to vector<2x256xf32>
    %275 = arith.mulf %274, %272 : vector<2x256xf32>
    %276 = arith.subf %249, %275 : vector<2x256xf32>
    %cst_88 = arith.constant 5.000000e-02 : f32
    %277 = vector.broadcast %cst_88 : f32 to vector<2x256xf32>
    %278 = arith.mulf %277, %273 : vector<2x256xf32>
    %279 = arith.subf %250, %278 : vector<2x256xf32>
    %c1_i32_89 = arith.constant 1 : i32
    %280 = vector.broadcast %3 : f32 to vector<2x256xf32>
    %281 = arith.subf %276, %280 : vector<2x256xf32>
    %282 = vector.broadcast %7 : f32 to vector<2x256xf32>
    %283 = arith.subf %279, %282 : vector<2x256xf32>
    %284 = vector.broadcast %11 : f32 to vector<2x256xf32>
    %285 = arith.mulf %284, %281 : vector<2x256xf32>
    %286 = vector.broadcast %15 : f32 to vector<2x256xf32>
    %287 = arith.mulf %286, %283 : vector<2x256xf32>
    %288 = arith.addf %285, %287 : vector<2x256xf32>
    %289 = vector.broadcast %19 : f32 to vector<2x256xf32>
    %290 = arith.mulf %289, %281 : vector<2x256xf32>
    %291 = vector.broadcast %23 : f32 to vector<2x256xf32>
    %292 = arith.mulf %291, %283 : vector<2x256xf32>
    %293 = arith.addf %290, %292 : vector<2x256xf32>
    %294 = vector.extract_strided_slice %288 {offsets = [0, 0], sizes = [1, 256], strides = [1, 1]} : vector<2x256xf32> to vector<1x256xf32>
    %295 = vector.extract_strided_slice %293 {offsets = [0, 0], sizes = [1, 256], strides = [1, 1]} : vector<2x256xf32> to vector<1x256xf32>
    %296 = tpu.concatenate %294, %295 in 0 : vector<1x256xf32>, vector<1x256xf32> -> vector<2x256xf32>
    %c17_i32_90 = arith.constant 17 : i32
    %297 = tpu.dynamic_rotate %296 by %c17_i32_90 dim 1 : vector<2x256xf32>, i32 -> vector<2x256xf32>
    %298 = vector.extract_strided_slice %54 {offsets = [0, 0], sizes = [1, 256], strides = [1, 1]} : vector<9x256xf32> to vector<1x256xf32>
    %299 = vector.broadcast %298 : vector<1x256xf32> to vector<2x256xf32>
    %300 = arith.mulf %299, %297 : vector<2x256xf32>
    %c16_i32_91 = arith.constant 16 : i32
    %301 = tpu.dynamic_rotate %296 by %c16_i32_91 dim 1 : vector<2x256xf32>, i32 -> vector<2x256xf32>
    %302 = vector.extract_strided_slice %54 {offsets = [1, 0], sizes = [1, 256], strides = [1, 1]} : vector<9x256xf32> to vector<1x256xf32>
    %303 = vector.broadcast %302 : vector<1x256xf32> to vector<2x256xf32>
    %304 = arith.mulf %303, %301 : vector<2x256xf32>
    %c15_i32_92 = arith.constant 15 : i32
    %305 = tpu.dynamic_rotate %296 by %c15_i32_92 dim 1 : vector<2x256xf32>, i32 -> vector<2x256xf32>
    %306 = vector.extract_strided_slice %54 {offsets = [2, 0], sizes = [1, 256], strides = [1, 1]} : vector<9x256xf32> to vector<1x256xf32>
    %307 = vector.broadcast %306 : vector<1x256xf32> to vector<2x256xf32>
    %308 = arith.mulf %307, %305 : vector<2x256xf32>
    %c1_i32_93 = arith.constant 1 : i32
    %309 = tpu.dynamic_rotate %296 by %c1_i32_93 dim 1 : vector<2x256xf32>, i32 -> vector<2x256xf32>
    %310 = vector.extract_strided_slice %54 {offsets = [3, 0], sizes = [1, 256], strides = [1, 1]} : vector<9x256xf32> to vector<1x256xf32>
    %311 = vector.broadcast %310 : vector<1x256xf32> to vector<2x256xf32>
    %312 = arith.mulf %311, %309 : vector<2x256xf32>
    %c255_i32_94 = arith.constant 255 : i32
    %313 = tpu.dynamic_rotate %296 by %c255_i32_94 dim 1 : vector<2x256xf32>, i32 -> vector<2x256xf32>
    %314 = vector.extract_strided_slice %54 {offsets = [5, 0], sizes = [1, 256], strides = [1, 1]} : vector<9x256xf32> to vector<1x256xf32>
    %315 = vector.broadcast %314 : vector<1x256xf32> to vector<2x256xf32>
    %316 = arith.mulf %315, %313 : vector<2x256xf32>
    %c241_i32_95 = arith.constant 241 : i32
    %317 = tpu.dynamic_rotate %296 by %c241_i32_95 dim 1 : vector<2x256xf32>, i32 -> vector<2x256xf32>
    %318 = vector.extract_strided_slice %54 {offsets = [6, 0], sizes = [1, 256], strides = [1, 1]} : vector<9x256xf32> to vector<1x256xf32>
    %319 = vector.broadcast %318 : vector<1x256xf32> to vector<2x256xf32>
    %320 = arith.mulf %319, %317 : vector<2x256xf32>
    %c240_i32_96 = arith.constant 240 : i32
    %321 = tpu.dynamic_rotate %296 by %c240_i32_96 dim 1 : vector<2x256xf32>, i32 -> vector<2x256xf32>
    %322 = vector.extract_strided_slice %54 {offsets = [7, 0], sizes = [1, 256], strides = [1, 1]} : vector<9x256xf32> to vector<1x256xf32>
    %323 = vector.broadcast %322 : vector<1x256xf32> to vector<2x256xf32>
    %324 = arith.mulf %323, %321 : vector<2x256xf32>
    %c239_i32_97 = arith.constant 239 : i32
    %325 = tpu.dynamic_rotate %296 by %c239_i32_97 dim 1 : vector<2x256xf32>, i32 -> vector<2x256xf32>
    %326 = vector.extract_strided_slice %54 {offsets = [8, 0], sizes = [1, 256], strides = [1, 1]} : vector<9x256xf32> to vector<1x256xf32>
    %327 = vector.broadcast %326 : vector<1x256xf32> to vector<2x256xf32>
    %328 = arith.mulf %327, %325 : vector<2x256xf32>
    %329 = tpu.concatenate %300, %304, %308, %312, %296, %316, %320, %324, %328 in 0 : vector<2x256xf32>, vector<2x256xf32>, vector<2x256xf32>, vector<2x256xf32>, vector<2x256xf32>, vector<2x256xf32>, vector<2x256xf32>, vector<2x256xf32>, vector<2x256xf32> -> vector<18x256xf32>
    %cst_98 = arith.constant dense<0.000000e+00> : vector<8x256xf32>
    %330 = tpu.matmul %50, %329, %cst_98 {dimension_numbers = #tpu.dot_dimension_numbers<[1], [0], [0], [1], [0, 0, 1, 1], [], []>} : vector<8x18xf32>, vector<18x256xf32>, vector<8x256xf32> -> vector<8x256xf32>
    %331 = vector.broadcast %51 : vector<8x1xf32> to vector<8x256xf32>
    %332 = arith.addf %330, %331 : vector<8x256xf32>
    %cst_99 = arith.constant 0.000000e+00 : f32
    %333 = vector.broadcast %cst_99 : f32 to vector<8x256xf32>
    %334 = arith.maximumf %332, %333 : vector<8x256xf32>
    %c17_i32_100 = arith.constant 17 : i32
    %335 = tpu.dynamic_rotate %334 by %c17_i32_100 dim 1 : vector<8x256xf32>, i32 -> vector<8x256xf32>
    %336 = vector.extract_strided_slice %54 {offsets = [0, 0], sizes = [1, 256], strides = [1, 1]} : vector<9x256xf32> to vector<1x256xf32>
    %337 = vector.broadcast %336 : vector<1x256xf32> to vector<8x256xf32>
    %338 = arith.mulf %337, %335 : vector<8x256xf32>
    %c16_i32_101 = arith.constant 16 : i32
    %339 = tpu.dynamic_rotate %334 by %c16_i32_101 dim 1 : vector<8x256xf32>, i32 -> vector<8x256xf32>
    %340 = vector.extract_strided_slice %54 {offsets = [1, 0], sizes = [1, 256], strides = [1, 1]} : vector<9x256xf32> to vector<1x256xf32>
    %341 = vector.broadcast %340 : vector<1x256xf32> to vector<8x256xf32>
    %342 = arith.mulf %341, %339 : vector<8x256xf32>
    %c15_i32_102 = arith.constant 15 : i32
    %343 = tpu.dynamic_rotate %334 by %c15_i32_102 dim 1 : vector<8x256xf32>, i32 -> vector<8x256xf32>
    %344 = vector.extract_strided_slice %54 {offsets = [2, 0], sizes = [1, 256], strides = [1, 1]} : vector<9x256xf32> to vector<1x256xf32>
    %345 = vector.broadcast %344 : vector<1x256xf32> to vector<8x256xf32>
    %346 = arith.mulf %345, %343 : vector<8x256xf32>
    %c1_i32_103 = arith.constant 1 : i32
    %347 = tpu.dynamic_rotate %334 by %c1_i32_103 dim 1 : vector<8x256xf32>, i32 -> vector<8x256xf32>
    %348 = vector.extract_strided_slice %54 {offsets = [3, 0], sizes = [1, 256], strides = [1, 1]} : vector<9x256xf32> to vector<1x256xf32>
    %349 = vector.broadcast %348 : vector<1x256xf32> to vector<8x256xf32>
    %350 = arith.mulf %349, %347 : vector<8x256xf32>
    %c255_i32_104 = arith.constant 255 : i32
    %351 = tpu.dynamic_rotate %334 by %c255_i32_104 dim 1 : vector<8x256xf32>, i32 -> vector<8x256xf32>
    %352 = vector.extract_strided_slice %54 {offsets = [5, 0], sizes = [1, 256], strides = [1, 1]} : vector<9x256xf32> to vector<1x256xf32>
    %353 = vector.broadcast %352 : vector<1x256xf32> to vector<8x256xf32>
    %354 = arith.mulf %353, %351 : vector<8x256xf32>
    %c241_i32_105 = arith.constant 241 : i32
    %355 = tpu.dynamic_rotate %334 by %c241_i32_105 dim 1 : vector<8x256xf32>, i32 -> vector<8x256xf32>
    %356 = vector.extract_strided_slice %54 {offsets = [6, 0], sizes = [1, 256], strides = [1, 1]} : vector<9x256xf32> to vector<1x256xf32>
    %357 = vector.broadcast %356 : vector<1x256xf32> to vector<8x256xf32>
    %358 = arith.mulf %357, %355 : vector<8x256xf32>
    %c240_i32_106 = arith.constant 240 : i32
    %359 = tpu.dynamic_rotate %334 by %c240_i32_106 dim 1 : vector<8x256xf32>, i32 -> vector<8x256xf32>
    %360 = vector.extract_strided_slice %54 {offsets = [7, 0], sizes = [1, 256], strides = [1, 1]} : vector<9x256xf32> to vector<1x256xf32>
    %361 = vector.broadcast %360 : vector<1x256xf32> to vector<8x256xf32>
    %362 = arith.mulf %361, %359 : vector<8x256xf32>
    %c239_i32_107 = arith.constant 239 : i32
    %363 = tpu.dynamic_rotate %334 by %c239_i32_107 dim 1 : vector<8x256xf32>, i32 -> vector<8x256xf32>
    %364 = vector.extract_strided_slice %54 {offsets = [8, 0], sizes = [1, 256], strides = [1, 1]} : vector<9x256xf32> to vector<1x256xf32>
    %365 = vector.broadcast %364 : vector<1x256xf32> to vector<8x256xf32>
    %366 = arith.mulf %365, %363 : vector<8x256xf32>
    %367 = tpu.concatenate %338, %342, %346, %350, %334, %354, %358, %362, %366 in 0 : vector<8x256xf32>, vector<8x256xf32>, vector<8x256xf32>, vector<8x256xf32>, vector<8x256xf32>, vector<8x256xf32>, vector<8x256xf32>, vector<8x256xf32>, vector<8x256xf32> -> vector<72x256xf32>
    %cst_108 = arith.constant dense<0.000000e+00> : vector<2x256xf32>
    %368 = tpu.matmul %52, %367, %cst_108 {dimension_numbers = #tpu.dot_dimension_numbers<[1], [0], [0], [1], [0, 0, 1, 1], [], []>} : vector<2x72xf32>, vector<72x256xf32>, vector<2x256xf32> -> vector<2x256xf32>
    %369 = vector.broadcast %53 : vector<2x1xf32> to vector<2x256xf32>
    %370 = arith.addf %368, %369 : vector<2x256xf32>
    %371 = vector.extract_strided_slice %370 {offsets = [0, 0], sizes = [1, 256], strides = [1, 1]} : vector<2x256xf32> to vector<1x256xf32>
    %372 = vector.extract_strided_slice %370 {offsets = [1, 0], sizes = [1, 256], strides = [1, 1]} : vector<2x256xf32> to vector<1x256xf32>
    %373 = vector.extract_strided_slice %288 {offsets = [1, 0], sizes = [1, 256], strides = [1, 1]} : vector<2x256xf32> to vector<1x256xf32>
    %374 = vector.extract_strided_slice %293 {offsets = [1, 0], sizes = [1, 256], strides = [1, 1]} : vector<2x256xf32> to vector<1x256xf32>
    %375 = tpu.concatenate %373, %374 in 0 : vector<1x256xf32>, vector<1x256xf32> -> vector<2x256xf32>
    %c17_i32_109 = arith.constant 17 : i32
    %376 = tpu.dynamic_rotate %375 by %c17_i32_109 dim 1 : vector<2x256xf32>, i32 -> vector<2x256xf32>
    %377 = vector.extract_strided_slice %54 {offsets = [0, 0], sizes = [1, 256], strides = [1, 1]} : vector<9x256xf32> to vector<1x256xf32>
    %378 = vector.broadcast %377 : vector<1x256xf32> to vector<2x256xf32>
    %379 = arith.mulf %378, %376 : vector<2x256xf32>
    %c16_i32_110 = arith.constant 16 : i32
    %380 = tpu.dynamic_rotate %375 by %c16_i32_110 dim 1 : vector<2x256xf32>, i32 -> vector<2x256xf32>
    %381 = vector.extract_strided_slice %54 {offsets = [1, 0], sizes = [1, 256], strides = [1, 1]} : vector<9x256xf32> to vector<1x256xf32>
    %382 = vector.broadcast %381 : vector<1x256xf32> to vector<2x256xf32>
    %383 = arith.mulf %382, %380 : vector<2x256xf32>
    %c15_i32_111 = arith.constant 15 : i32
    %384 = tpu.dynamic_rotate %375 by %c15_i32_111 dim 1 : vector<2x256xf32>, i32 -> vector<2x256xf32>
    %385 = vector.extract_strided_slice %54 {offsets = [2, 0], sizes = [1, 256], strides = [1, 1]} : vector<9x256xf32> to vector<1x256xf32>
    %386 = vector.broadcast %385 : vector<1x256xf32> to vector<2x256xf32>
    %387 = arith.mulf %386, %384 : vector<2x256xf32>
    %c1_i32_112 = arith.constant 1 : i32
    %388 = tpu.dynamic_rotate %375 by %c1_i32_112 dim 1 : vector<2x256xf32>, i32 -> vector<2x256xf32>
    %389 = vector.extract_strided_slice %54 {offsets = [3, 0], sizes = [1, 256], strides = [1, 1]} : vector<9x256xf32> to vector<1x256xf32>
    %390 = vector.broadcast %389 : vector<1x256xf32> to vector<2x256xf32>
    %391 = arith.mulf %390, %388 : vector<2x256xf32>
    %c255_i32_113 = arith.constant 255 : i32
    %392 = tpu.dynamic_rotate %375 by %c255_i32_113 dim 1 : vector<2x256xf32>, i32 -> vector<2x256xf32>
    %393 = vector.extract_strided_slice %54 {offsets = [5, 0], sizes = [1, 256], strides = [1, 1]} : vector<9x256xf32> to vector<1x256xf32>
    %394 = vector.broadcast %393 : vector<1x256xf32> to vector<2x256xf32>
    %395 = arith.mulf %394, %392 : vector<2x256xf32>
    %c241_i32_114 = arith.constant 241 : i32
    %396 = tpu.dynamic_rotate %375 by %c241_i32_114 dim 1 : vector<2x256xf32>, i32 -> vector<2x256xf32>
    %397 = vector.extract_strided_slice %54 {offsets = [6, 0], sizes = [1, 256], strides = [1, 1]} : vector<9x256xf32> to vector<1x256xf32>
    %398 = vector.broadcast %397 : vector<1x256xf32> to vector<2x256xf32>
    %399 = arith.mulf %398, %396 : vector<2x256xf32>
    %c240_i32_115 = arith.constant 240 : i32
    %400 = tpu.dynamic_rotate %375 by %c240_i32_115 dim 1 : vector<2x256xf32>, i32 -> vector<2x256xf32>
    %401 = vector.extract_strided_slice %54 {offsets = [7, 0], sizes = [1, 256], strides = [1, 1]} : vector<9x256xf32> to vector<1x256xf32>
    %402 = vector.broadcast %401 : vector<1x256xf32> to vector<2x256xf32>
    %403 = arith.mulf %402, %400 : vector<2x256xf32>
    %c239_i32_116 = arith.constant 239 : i32
    %404 = tpu.dynamic_rotate %375 by %c239_i32_116 dim 1 : vector<2x256xf32>, i32 -> vector<2x256xf32>
    %405 = vector.extract_strided_slice %54 {offsets = [8, 0], sizes = [1, 256], strides = [1, 1]} : vector<9x256xf32> to vector<1x256xf32>
    %406 = vector.broadcast %405 : vector<1x256xf32> to vector<2x256xf32>
    %407 = arith.mulf %406, %404 : vector<2x256xf32>
    %408 = tpu.concatenate %379, %383, %387, %391, %375, %395, %399, %403, %407 in 0 : vector<2x256xf32>, vector<2x256xf32>, vector<2x256xf32>, vector<2x256xf32>, vector<2x256xf32>, vector<2x256xf32>, vector<2x256xf32>, vector<2x256xf32>, vector<2x256xf32> -> vector<18x256xf32>
    %cst_117 = arith.constant dense<0.000000e+00> : vector<8x256xf32>
    %409 = tpu.matmul %50, %408, %cst_117 {dimension_numbers = #tpu.dot_dimension_numbers<[1], [0], [0], [1], [0, 0, 1, 1], [], []>} : vector<8x18xf32>, vector<18x256xf32>, vector<8x256xf32> -> vector<8x256xf32>
    %410 = vector.broadcast %51 : vector<8x1xf32> to vector<8x256xf32>
    %411 = arith.addf %409, %410 : vector<8x256xf32>
    %cst_118 = arith.constant 0.000000e+00 : f32
    %412 = vector.broadcast %cst_118 : f32 to vector<8x256xf32>
    %413 = arith.maximumf %411, %412 : vector<8x256xf32>
    %c17_i32_119 = arith.constant 17 : i32
    %414 = tpu.dynamic_rotate %413 by %c17_i32_119 dim 1 : vector<8x256xf32>, i32 -> vector<8x256xf32>
    %415 = vector.extract_strided_slice %54 {offsets = [0, 0], sizes = [1, 256], strides = [1, 1]} : vector<9x256xf32> to vector<1x256xf32>
    %416 = vector.broadcast %415 : vector<1x256xf32> to vector<8x256xf32>
    %417 = arith.mulf %416, %414 : vector<8x256xf32>
    %c16_i32_120 = arith.constant 16 : i32
    %418 = tpu.dynamic_rotate %413 by %c16_i32_120 dim 1 : vector<8x256xf32>, i32 -> vector<8x256xf32>
    %419 = vector.extract_strided_slice %54 {offsets = [1, 0], sizes = [1, 256], strides = [1, 1]} : vector<9x256xf32> to vector<1x256xf32>
    %420 = vector.broadcast %419 : vector<1x256xf32> to vector<8x256xf32>
    %421 = arith.mulf %420, %418 : vector<8x256xf32>
    %c15_i32_121 = arith.constant 15 : i32
    %422 = tpu.dynamic_rotate %413 by %c15_i32_121 dim 1 : vector<8x256xf32>, i32 -> vector<8x256xf32>
    %423 = vector.extract_strided_slice %54 {offsets = [2, 0], sizes = [1, 256], strides = [1, 1]} : vector<9x256xf32> to vector<1x256xf32>
    %424 = vector.broadcast %423 : vector<1x256xf32> to vector<8x256xf32>
    %425 = arith.mulf %424, %422 : vector<8x256xf32>
    %c1_i32_122 = arith.constant 1 : i32
    %426 = tpu.dynamic_rotate %413 by %c1_i32_122 dim 1 : vector<8x256xf32>, i32 -> vector<8x256xf32>
    %427 = vector.extract_strided_slice %54 {offsets = [3, 0], sizes = [1, 256], strides = [1, 1]} : vector<9x256xf32> to vector<1x256xf32>
    %428 = vector.broadcast %427 : vector<1x256xf32> to vector<8x256xf32>
    %429 = arith.mulf %428, %426 : vector<8x256xf32>
    %c255_i32_123 = arith.constant 255 : i32
    %430 = tpu.dynamic_rotate %413 by %c255_i32_123 dim 1 : vector<8x256xf32>, i32 -> vector<8x256xf32>
    %431 = vector.extract_strided_slice %54 {offsets = [5, 0], sizes = [1, 256], strides = [1, 1]} : vector<9x256xf32> to vector<1x256xf32>
    %432 = vector.broadcast %431 : vector<1x256xf32> to vector<8x256xf32>
    %433 = arith.mulf %432, %430 : vector<8x256xf32>
    %c241_i32_124 = arith.constant 241 : i32
    %434 = tpu.dynamic_rotate %413 by %c241_i32_124 dim 1 : vector<8x256xf32>, i32 -> vector<8x256xf32>
    %435 = vector.extract_strided_slice %54 {offsets = [6, 0], sizes = [1, 256], strides = [1, 1]} : vector<9x256xf32> to vector<1x256xf32>
    %436 = vector.broadcast %435 : vector<1x256xf32> to vector<8x256xf32>
    %437 = arith.mulf %436, %434 : vector<8x256xf32>
    %c240_i32_125 = arith.constant 240 : i32
    %438 = tpu.dynamic_rotate %413 by %c240_i32_125 dim 1 : vector<8x256xf32>, i32 -> vector<8x256xf32>
    %439 = vector.extract_strided_slice %54 {offsets = [7, 0], sizes = [1, 256], strides = [1, 1]} : vector<9x256xf32> to vector<1x256xf32>
    %440 = vector.broadcast %439 : vector<1x256xf32> to vector<8x256xf32>
    %441 = arith.mulf %440, %438 : vector<8x256xf32>
    %c239_i32_126 = arith.constant 239 : i32
    %442 = tpu.dynamic_rotate %413 by %c239_i32_126 dim 1 : vector<8x256xf32>, i32 -> vector<8x256xf32>
    %443 = vector.extract_strided_slice %54 {offsets = [8, 0], sizes = [1, 256], strides = [1, 1]} : vector<9x256xf32> to vector<1x256xf32>
    %444 = vector.broadcast %443 : vector<1x256xf32> to vector<8x256xf32>
    %445 = arith.mulf %444, %442 : vector<8x256xf32>
    %446 = tpu.concatenate %417, %421, %425, %429, %413, %433, %437, %441, %445 in 0 : vector<8x256xf32>, vector<8x256xf32>, vector<8x256xf32>, vector<8x256xf32>, vector<8x256xf32>, vector<8x256xf32>, vector<8x256xf32>, vector<8x256xf32>, vector<8x256xf32> -> vector<72x256xf32>
    %cst_127 = arith.constant dense<0.000000e+00> : vector<2x256xf32>
    %447 = tpu.matmul %52, %446, %cst_127 {dimension_numbers = #tpu.dot_dimension_numbers<[1], [0], [0], [1], [0, 0, 1, 1], [], []>} : vector<2x72xf32>, vector<72x256xf32>, vector<2x256xf32> -> vector<2x256xf32>
    %448 = vector.broadcast %53 : vector<2x1xf32> to vector<2x256xf32>
    %449 = arith.addf %447, %448 : vector<2x256xf32>
    %450 = vector.extract_strided_slice %449 {offsets = [0, 0], sizes = [1, 256], strides = [1, 1]} : vector<2x256xf32> to vector<1x256xf32>
    %451 = vector.extract_strided_slice %449 {offsets = [1, 0], sizes = [1, 256], strides = [1, 1]} : vector<2x256xf32> to vector<1x256xf32>
    %452 = tpu.concatenate %371, %450 in 0 : vector<1x256xf32>, vector<1x256xf32> -> vector<2x256xf32>
    %453 = tpu.concatenate %372, %451 in 0 : vector<1x256xf32>, vector<1x256xf32> -> vector<2x256xf32>
    %454 = vector.broadcast %27 : f32 to vector<2x256xf32>
    %455 = arith.mulf %454, %452 : vector<2x256xf32>
    %456 = vector.broadcast %31 : f32 to vector<2x256xf32>
    %457 = arith.mulf %456, %453 : vector<2x256xf32>
    %458 = arith.addf %455, %457 : vector<2x256xf32>
    %459 = vector.broadcast %3 : f32 to vector<2x256xf32>
    %460 = arith.addf %458, %459 : vector<2x256xf32>
    %461 = vector.broadcast %35 : f32 to vector<2x256xf32>
    %462 = arith.mulf %461, %452 : vector<2x256xf32>
    %463 = vector.broadcast %39 : f32 to vector<2x256xf32>
    %464 = arith.mulf %463, %453 : vector<2x256xf32>
    %465 = arith.addf %462, %464 : vector<2x256xf32>
    %466 = vector.broadcast %7 : f32 to vector<2x256xf32>
    %467 = arith.addf %465, %466 : vector<2x256xf32>
    %468 = arith.subf %276, %460 : vector<2x256xf32>
    %469 = arith.subf %279, %467 : vector<2x256xf32>
    %cst_128 = arith.constant dense<0.000000e+00> : vector<8x256xf32>
    %470 = tpu.matmul %55, %468, %cst_128 {dimension_numbers = #tpu.dot_dimension_numbers<[1], [0], [0], [1], [0, 0, 1, 1], [], []>} : vector<8x2xf32>, vector<2x256xf32>, vector<8x256xf32> -> vector<8x256xf32>
    %cst_129 = arith.constant dense<0.000000e+00> : vector<8x256xf32>
    %471 = tpu.matmul %55, %469, %cst_129 {dimension_numbers = #tpu.dot_dimension_numbers<[1], [0], [0], [1], [0, 0, 1, 1], [], []>} : vector<8x2xf32>, vector<2x256xf32>, vector<8x256xf32> -> vector<8x256xf32>
    %472 = arith.mulf %41, %470 : vector<8x256xf32>
    %473 = arith.mulf %43, %471 : vector<8x256xf32>
    %474 = arith.subf %472, %473 : vector<8x256xf32>
    %475 = arith.mulf %41, %471 : vector<8x256xf32>
    %476 = arith.mulf %43, %470 : vector<8x256xf32>
    %477 = arith.addf %475, %476 : vector<8x256xf32>
    %478 = tpu.concatenate %474, %477 in 1 : vector<8x256xf32>, vector<8x256xf32> -> vector<8x512xf32>
    %cst_130 = arith.constant dense<0.000000e+00> : vector<8x512xf32>
    %479 = tpu.matmul %478, %48, %cst_130 {dimension_numbers = #tpu.dot_dimension_numbers<[1], [0], [0], [1], [0, 0, 1, 1], [], []>} : vector<8x512xf32>, vector<512x512xf32>, vector<8x512xf32> -> vector<8x512xf32>
    %480 = arith.mulf %45, %479 : vector<8x512xf32>
    %481 = arith.subf %480, %47 : vector<8x512xf32>
    %cst_131 = arith.constant dense<0.000000e+00> : vector<8x512xf32>
    %482 = tpu.matmul %481, %49, %cst_131 {dimension_numbers = #tpu.dot_dimension_numbers<[1], [0], [0], [1], [0, 0, 1, 1], [], []>} : vector<8x512xf32>, vector<512x512xf32>, vector<8x512xf32> -> vector<8x512xf32>
    %483 = vector.extract_strided_slice %482 {offsets = [0, 0], sizes = [8, 256], strides = [1, 1]} : vector<8x512xf32> to vector<8x256xf32>
    %484 = vector.extract_strided_slice %482 {offsets = [0, 256], sizes = [8, 256], strides = [1, 1]} : vector<8x512xf32> to vector<8x256xf32>
    %485 = arith.mulf %41, %483 : vector<8x256xf32>
    %486 = arith.mulf %43, %484 : vector<8x256xf32>
    %487 = arith.addf %485, %486 : vector<8x256xf32>
    %488 = arith.mulf %41, %484 : vector<8x256xf32>
    %489 = arith.mulf %43, %483 : vector<8x256xf32>
    %490 = arith.subf %488, %489 : vector<8x256xf32>
    %cst_132 = arith.constant dense<0.000000e+00> : vector<2x256xf32>
    %491 = tpu.matmul %56, %487, %cst_132 {dimension_numbers = #tpu.dot_dimension_numbers<[1], [0], [0], [1], [0, 0, 1, 1], [], []>} : vector<2x8xf32>, vector<8x256xf32>, vector<2x256xf32> -> vector<2x256xf32>
    %cst_133 = arith.constant dense<0.000000e+00> : vector<2x256xf32>
    %492 = tpu.matmul %56, %490, %cst_133 {dimension_numbers = #tpu.dot_dimension_numbers<[1], [0], [0], [1], [0, 0, 1, 1], [], []>} : vector<2x8xf32>, vector<8x256xf32>, vector<2x256xf32> -> vector<2x256xf32>
    %cst_134 = arith.constant 5.000000e-02 : f32
    %493 = vector.broadcast %cst_134 : f32 to vector<2x256xf32>
    %494 = arith.mulf %493, %491 : vector<2x256xf32>
    %495 = arith.subf %468, %494 : vector<2x256xf32>
    %cst_135 = arith.constant 5.000000e-02 : f32
    %496 = vector.broadcast %cst_135 : f32 to vector<2x256xf32>
    %497 = arith.mulf %496, %492 : vector<2x256xf32>
    %498 = arith.subf %469, %497 : vector<2x256xf32>
    %c0_136 = arith.constant 0 : index
    %c0_137 = arith.constant 0 : index
    %c0_138 = arith.constant 0 : index
    %499 = vector.load %arg19[%c0_136, %c0_137, %c0_138] : memref<1x2x256xf32, #tpu.memory_space<vmem>>, vector<1x2x256xf32>
    %500 = vector.shape_cast %499 : vector<1x2x256xf32> to vector<2x256xf32>
    %501 = vector.shape_cast %495 : vector<2x256xf32> to vector<1x2x256xf32>
    tpu.vector_store %arg19[%c0_136, %c0_137, %c0_138], %501 {strides = array<i32>} : memref<1x2x256xf32, #tpu.memory_space<vmem>>, vector<1x2x256xf32>,
    %c0_139 = arith.constant 0 : index
    %c0_140 = arith.constant 0 : index
    %c0_141 = arith.constant 0 : index
    %502 = vector.load %arg20[%c0_139, %c0_140, %c0_141] : memref<1x2x256xf32, #tpu.memory_space<vmem>>, vector<1x2x256xf32>
    %503 = vector.shape_cast %502 : vector<1x2x256xf32> to vector<2x256xf32>
    %504 = vector.shape_cast %498 : vector<2x256xf32> to vector<1x2x256xf32>
    tpu.vector_store %arg20[%c0_139, %c0_140, %c0_141], %504 {strides = array<i32>} : memref<1x2x256xf32, #tpu.memory_space<vmem>>, vector<1x2x256xf32>,
    return
  }
  func.func @transform_0(%arg0: i32) -> i32 {
    %c0_i32 = arith.constant 0 : i32
    %c0_i32_0 = arith.constant 0 : i32
    return %c0_i32 : i32
  }
  func.func @transform_1(%arg0: i32) -> i32 {
    %c0_i32 = arith.constant 0 : i32
    %c0_i32_0 = arith.constant 0 : i32
    return %c0_i32 : i32
  }
  func.func @transform_2(%arg0: i32) -> i32 {
    %c0_i32 = arith.constant 0 : i32
    %c0_i32_0 = arith.constant 0 : i32
    return %c0_i32 : i32
  }
  func.func @transform_3(%arg0: i32) -> (i32, i32, i32) {
    %c0_i32 = arith.constant 0 : i32
    %c0_i32_0 = arith.constant 0 : i32
    %c0_i32_1 = arith.constant 0 : i32
    return %arg0, %c0_i32, %c0_i32_0 : i32, i32, i32
  }
  func.func @transform_4(%arg0: i32) -> (i32, i32, i32) {
    %c0_i32 = arith.constant 0 : i32
    %c0_i32_0 = arith.constant 0 : i32
    %c0_i32_1 = arith.constant 0 : i32
    return %arg0, %c0_i32, %c0_i32_0 : i32, i32, i32
  }
  func.func @transform_5(%arg0: i32) -> (i32, i32, i32) {
    %c0_i32 = arith.constant 0 : i32
    %c0_i32_0 = arith.constant 0 : i32
    %c0_i32_1 = arith.constant 0 : i32
    return %arg0, %c0_i32, %c0_i32_0 : i32, i32, i32
  }
  func.func @transform_6(%arg0: i32) -> (i32, i32, i32) {
    %c0_i32 = arith.constant 0 : i32
    %c0_i32_0 = arith.constant 0 : i32
    %c0_i32_1 = arith.constant 0 : i32
    return %arg0, %c0_i32, %c0_i32_0 : i32, i32, i32
  }
  func.func @transform_7(%arg0: i32) -> (i32, i32, i32) {
    %c0_i32 = arith.constant 0 : i32
    %c0_i32_0 = arith.constant 0 : i32
    %c0_i32_1 = arith.constant 0 : i32
    return %arg0, %c0_i32, %c0_i32_0 : i32, i32, i32
  }
  func.func @transform_8(%arg0: i32) -> (i32, i32, i32) {
    %c0_i32 = arith.constant 0 : i32
    %c0_i32_0 = arith.constant 0 : i32
    %c0_i32_1 = arith.constant 0 : i32
    return %arg0, %c0_i32, %c0_i32_0 : i32, i32, i32
  }
  func.func @transform_9(%arg0: i32) -> (i32, i32) {
    %c0_i32 = arith.constant 0 : i32
    %c0_i32_0 = arith.constant 0 : i32
    %c0_i32_1 = arith.constant 0 : i32
    return %c0_i32, %c0_i32_0 : i32, i32
  }
  func.func @transform_10(%arg0: i32) -> (i32, i32) {
    %c0_i32 = arith.constant 0 : i32
    %c0_i32_0 = arith.constant 0 : i32
    %c0_i32_1 = arith.constant 0 : i32
    return %c0_i32, %c0_i32_0 : i32, i32
  }
  func.func @transform_11(%arg0: i32) -> (i32, i32) {
    %c0_i32 = arith.constant 0 : i32
    %c0_i32_0 = arith.constant 0 : i32
    %c0_i32_1 = arith.constant 0 : i32
    return %c0_i32, %c0_i32_0 : i32, i32
  }
  func.func @transform_12(%arg0: i32) -> (i32, i32) {
    %c0_i32 = arith.constant 0 : i32
    %c0_i32_0 = arith.constant 0 : i32
    %c0_i32_1 = arith.constant 0 : i32
    return %c0_i32, %c0_i32_0 : i32, i32
  }
  func.func @transform_13(%arg0: i32) -> (i32, i32) {
    %c0_i32 = arith.constant 0 : i32
    %c0_i32_0 = arith.constant 0 : i32
    %c0_i32_1 = arith.constant 0 : i32
    return %c0_i32, %c0_i32_0 : i32, i32
  }
  func.func @transform_14(%arg0: i32) -> (i32, i32) {
    %c0_i32 = arith.constant 0 : i32
    %c0_i32_0 = arith.constant 0 : i32
    %c0_i32_1 = arith.constant 0 : i32
    return %c0_i32, %c0_i32_0 : i32, i32
  }
  func.func @transform_15(%arg0: i32) -> (i32, i32) {
    %c0_i32 = arith.constant 0 : i32
    %c0_i32_0 = arith.constant 0 : i32
    %c0_i32_1 = arith.constant 0 : i32
    return %c0_i32, %c0_i32_0 : i32, i32
  }
  func.func @transform_16(%arg0: i32) -> (i32, i32) {
    %c0_i32 = arith.constant 0 : i32
    %c0_i32_0 = arith.constant 0 : i32
    %c0_i32_1 = arith.constant 0 : i32
    return %c0_i32, %c0_i32_0 : i32, i32
  }
  func.func @transform_17(%arg0: i32) -> (i32, i32) {
    %c0_i32 = arith.constant 0 : i32
    %c0_i32_0 = arith.constant 0 : i32
    %c0_i32_1 = arith.constant 0 : i32
    return %c0_i32, %c0_i32_0 : i32, i32
  }
  func.func @transform_18(%arg0: i32) -> (i32, i32, i32) {
    %c0_i32 = arith.constant 0 : i32
    %c0_i32_0 = arith.constant 0 : i32
    %c0_i32_1 = arith.constant 0 : i32
    return %arg0, %c0_i32, %c0_i32_0 : i32, i32, i32
  }
  func.func @transform_19(%arg0: i32) -> (i32, i32, i32) {
    %c0_i32 = arith.constant 0 : i32
    %c0_i32_0 = arith.constant 0 : i32
    %c0_i32_1 = arith.constant 0 : i32
    return %arg0, %c0_i32, %c0_i32_0 : i32, i32, i32
  }
}

</mosaic_0001>

<bundles_post_ra>
// kernel: custom-call.13
= control target key start
LH: loop header
LB: loop body
LE: loop exit
PB: predicated region body
PF: predicated region fallthrough
CT: control target
= control target key end

     0   :  { %s319_s6 = smov 0   ;;  %s321_s7 = smov 0   ;;  %s366_s0 = inlined_call_operand.vmem [shape: f32[2,2,2], index: 0, kind: input, shape index: {}]   ;;  %s367_s1 = inlined_call_operand.vmem [shape: f32[2,2,2], index: 1, kind: output, shape index: {}]  }
   0x1   :  { %s323_s8 = smov 0  }
   0x2 LB: > { %s243_s9 = sadd.s32 4294967295, %s306_s8   ;;  %s26_s10 = sadd.s32 1, %s302_s7  ;;  %s306_s8 = sphi %s323_s8, %s7_s8   ;;  %s302_s7 = sphi %s321_s7, %s369_s7   ;;  %s298_s6 = sphi %s319_s6, %s368_s6  }
   0x3   : > { %p28_p0 = scmp.ge.s32.totalorder %s26_s10, 2  ;;  %p245_p1 = scmp.ge.s32.totalorder %s306_s8, 2 }
   0x4   : > { %s42_s11 = sand.u32 (!%p245_p1), 1, %s306_s8   ;;  %s247_s12 = sshll.u32 (!%p245_p1), %s302_s7, 1 }
   0x5   : > { %s371_s10 = smov (%p28_p0, %s26_s10), 0  ;;  %40 = sbr.rel (%p245_p1) target bundleno = 12 (0xc), region = 16 }
   0x6   : > { %s246_s13 = sshll.u32 (!%p245_p1), %s42_s11, 1  ;;  %s48_s16 = scalar_lea.vmem (!%p245_p1), %s366_s0, %s247_s12 }
   0x7   : > { %v64_v0 = vld [vmem:[%s48_s16] sm:$0x3] (!%p245_p1)  ;;  %s44_s17 = scalar_lea.vmem (!%p245_p1), [#allocation1], %s246_s13 }
   0x8   : > { %65 = vst [vmem:[%s44_s17] sm:$0x3] (!%p245_p1), %v64_v0 }
   0xc PF: > { %p248_p2 = scmp.ge.s32.totalorder %s306_s8, 1  ;;  %p81_p3 = scmp.lt.s32.totalorder %s306_s8, 3 }
   0xe   : > { %p82_p4 = pnand %p248_p2, %p81_p3 }
   0xf   : > { %v308_v1 = vmov (!%p82_p4), 0.0   ;;  %s346_s18 = sand.u32 (!%p82_p4), 1, %s243_s9   ;;  %vm104_vm0 = vcmask (!%p82_p4), 7168   ;;  %vm122_vm1 = vcmask (!%p82_p4), 15368   ;;  %vm139_vm2 = vcmask (!%p82_p4), 1047553   ;;  %s252_s22 = sshll.u32 (!%p82_p4), %s298_s6, 1 }
  0x10   : > { %85 = sbr.rel (%p82_p4) target bundleno = 371 (0x173), region = 50  ;;  %103 = vst [vmem:[#allocation2] sm:$0xff] (!%p82_p4), %v308_v1  ;;  %s249_s19 = sshll.u32 (!%p82_p4), %s346_s18, 1  ;;  %vm140_vm3 = vmand (!%p82_p4), %vm122_vm1, %vm139_vm2 }
  0x11   : > { %s94_s20 = scalar_lea.vmem (!%p82_p4), [#allocation1], %s249_s19  ;;  %s98_s21 = scalar_lea.vmem (!%p82_p4), [#allocation3], %s249_s19 }
  0x12   : > { %v101_v5 = vld [vmem:[%s94_s20] sm:$0x3] (!%p82_p4)  ;;  %s157_s25 = scalar_lea.vmem (!%p82_p4), %s367_s1, %s252_s22 }
  0x13   : > { %102 = vst [vmem:[#allocation0] sm:$0x3] (!%p82_p4), %v101_v5 }
  0x17   : > { %v105_v2 = vld [vmem:[#allocation2] ss:$0 sm:$0xff] }
  0x18   : > { %v107_v3 = vmul.f32 %v105_v2, %v105_v2  ;;  %v114_v4 = vmul.f32 0.0, %v105_v2 }
  0x1a   : > { %108 = vadd.xlane.f32.xlu0 %v107_v3  ;;  %v106_v6 = vld [vmem:[#allocation0] ss:$0 sm:$0xff]  ;;  %v126_v18 = vld [vmem:[#allocation0 + $0x1] ss:$0 sm:$0xff] }
  0x1b   : > { %v112_v10 = vld [vmem:[#allocation0] sm:$0xff] }
  0x1e   : > { %115 = vadd.xlane.f32.xlu0 %v114_v4 }
  0xa7   : > { %v109_v7 = vpop.xlane.xlu0 %108 }
  0xa8   : > { %v110_v8 = vsub.f32 %v106_v6, %v109_v7 }
  0xaa   : > { %280 = vrsqrt.f32 %v110_v8 }
  0xab   : > { %v116_v9 = vpop.xlane.xlu0 %115 }
  0xac   : > { %v117_v11 = vsub.f32 %v112_v10, %v116_v9 }
  0xb4   : > { %v281_v12 = vpop.eup %280 }
  0xb5   : > { %v118_v13 = vmul.f32 %v281_v12, %v117_v11 }
  0xb7   : > { %v119_v14 = vsel %vm104_vm0, %v118_v13, 0.0 }
  0xb8   : > { %121 = vst [vmem:[#allocation2] sm:$0xff] %v119_v14 }
  0xbf   : > { %v124_v15 = vld [vmem:[#allocation2 + $0x1] ss:$0 sm:$0xff] }
  0xc0   : > { %v127_v16 = vmul.f32 %v124_v15, %v124_v15  ;;  %v134_v17 = vmul.f32 %v124_v15, %v119_v14 }
  0xc2   : > { %128 = vadd.xlane.f32.xlu1 %v127_v16 }
  0xc6   : > { %135 = vadd.xlane.f32.xlu1 %v134_v17 }
 0x14f   : > { %v129_v19 = vpop.xlane.xlu1 %128 }
 0x150   : > { %v130_v20 = vsub.f32 %v126_v18, %v129_v19 }
 0x152   : > { %282 = vrsqrt.f32 %v130_v20 }
 0x153   : > { %v136_v21 = vpop.xlane.xlu1 %135 }
 0x154   : > { %v137_v22 = vsub.f32 %v112_v10, %v136_v21 }
 0x15c   : > { %v283_v23 = vpop.eup %282 }
 0x15d   : > { %v138_v24 = vmul.f32 %v283_v23, %v137_v22 }
 0x15f   : > { %v141_v25 = vsel %vm140_vm3, %v138_v24, 0.0 }
 0x160   : > { %v142_v26 = vadd.f32 %v141_v25, %v119_v14 }
 0x162   : > { %143 = vst [vmem:[#allocation2] sm:$0xff] %v142_v26 }
 0x169   : > { %v147_v27 = vld [vmem:[#allocation2] sm:$0x3] }
 0x16a   : > { %149 = vst [vmem:[%s98_s21] sm:$0x3] %v147_v27 }
 0x171   : > { %v173_v28 = vld [vmem:[%s98_s21] sm:$0x3] }
 0x172   : > { %174 = vst [vmem:[%s157_s25] sm:$0x3] %v173_v28 }
 0x173 PF: > { %s7_s8 = sadd.s32 1, %s306_s8   ;;  %s368_s6 = smov %s302_s7 }
 0x174   : > { %p4_p5 = scmp.ge.s32.totalorder %s7_s8, 4   ;;  %s369_s7 = smov %s371_s10 }
 0x176   :  { %6 = sbr.rel (!%p4_p5) target bundleno = 2 (0x2), region = 112 }

// kernel: custom-call.14
= control target key start
LH: loop header
LB: loop body
LE: loop exit
PB: predicated region body
PF: predicated region fallthrough
CT: control target
= control target key end

     0   :  { %5 = vsyncpa [#allocation6], 0  ;;  %s896_s0 = inlined_call_operand.vmem [shape: f32[2,2,2], index: 0, kind: input, shape index: {}]   ;;  %s897_s1 = inlined_call_operand.vmem [shape: f32[2,2,2], index: 1, kind: output, shape index: {0}]   ;;  %s898_s2 = inlined_call_operand.hbm [shape: s32[2,2], index: 2, kind: output, shape index: {1}]   ;;  %s899_s3 = inlined_call_operand.vmem [shape: s32[2,2], index: 3, kind: output, shape index: {2}]  }
   0x1   :  { %7 = vsyncpa [#allocation6 + $0x1], 0  ;;  %s715_s12 = smov 0   ;;  %s717_s13 = smov 0  }
   0x2   :  { %s719_s14 = smov 0   ;;  %s721_s15 = smov 0  }
   0x3 LB: > { %s736_s16 = sadd.s32 4294967295, %s687_s15   ;;  %s550_s17 = sadd.s32 4294967294, %s687_s15   ;;  %s687_s15 = sphi %s721_s15, %s907_s15   ;;  %s683_s14 = sphi %s719_s14, %s906_s14   ;;  %s679_s13 = sphi %s717_s13, %s905_s13   ;;  %s675_s12 = sphi %s715_s12, %s904_s12  }
   0x4   : > { %s740_s18 = sadd.s32 1, %s687_s15   ;;  %s17_s19 = sshrl.u32 %s687_s15, 3 }
   0x5   : > { %s18_s20 = sshrl.u32 %s740_s18, 3  ;;  %s22_s21 = sadd.s32 1, %s683_s14 }
   0x6   : > { %s19_s22 = ssub.s32 %s17_s19, %s18_s20  ;;  %p32_p0 = scmp.ne.s32.totalorder %s683_s14, %s679_s13 }
   0x7   : > { %p20_p1 = scmp.eq.s32.totalorder %s19_s22, 0  ;;  %p33_p2 = scmp.eq.s32.totalorder %s736_s16, 1 }
   0x8   : > { %p38_p3 = scmp.ne.s32.totalorder %s679_s13, %s675_s12  ;;  %p39_p4 = scmp.eq.s32.totalorder %s550_s17, 1 }
   0x9   : > { %s751_s23 = scalar_select %p20_p1, %s683_s14, %s22_s21  }
   0xa   : > { %p753_p5 = por %p33_p2, %p32_p0  ;;  %p757_p6 = por %p39_p4, %p38_p3 }
   0xb   : > { %p552_p7 = scmp.ge.s32.totalorder %s687_s15, 2 }
   0xc   : > { %s85_s26 = sand.u32 (!%p552_p7), 1, %s687_s15   ;;  %s554_s27 = sshll.u32 (!%p552_p7), %s687_s15, 1 }
   0xd   : > { %83 = sbr.rel (%p552_p7) target bundleno = 20 (0x14), region = 16  ;;  %s553_s28 = sshll.u32 (!%p552_p7), %s85_s26, 1 }
   0xe   : > { %s89_s4 = scalar_lea.vmem (!%p552_p7), %s896_s0, %s554_s27  ;;  %s87_s5 = scalar_lea.vmem (!%p552_p7), [#allocation1], %s553_s28 }
   0xf   : > { %v105_v0 = vld [vmem:[%s89_s4] sm:$0x3] (!%p552_p7) }
  0x10   : > { %106 = vst [vmem:[%s87_s5] sm:$0x3] (!%p552_p7), %v105_v0 }
  0x14 PF: > { %p555_p8 = scmp.ge.s32.totalorder %s687_s15, 1  ;;  %p122_p9 = scmp.lt.s32.totalorder %s687_s15, 3 }
  0x16   : > { %p123_p10 = pnand %p555_p8, %p122_p9 }
  0x18   : > { %126 = sbr.rel (%p123_p10) target bundleno = 451 (0x1c3), region = 50 }
  0x1f   : > { %s133_s6 = sand.u32 1, %s736_s16   ;;  %s144_s7 = sand.u32 1, %s679_s13   ;;  %v166_v1 = vlaneseq  ;;  %v693_v4 = vmov 0  }
  0x20   : > { %s773_s8 = sshll.u32 %s133_s6, 1  ;;  %s777_s9 = sshll.u32 %s144_s7, 1 }
  0x21   : > { %v780_v2 = vshrl.u32 %v166_v1, 7  ;;  %s135_s10 = scalar_lea.vmem [#allocation1], %s773_s8  ;;  %s161_s11 = sand.u32 7, %s736_s16  }
  0x22   : > { %v155_v3 = vld [vmem:[%s135_s10] sm:$0x3]  ;;  %s785_s17 = scalar_lea.vmem [#allocation4], %s161_s11  ;;  %s139_s19 = scalar_lea.vmem [#allocation3], %s773_s8 }
  0x23   : > { %156 = vst [vmem:[#allocation0] sm:$0x3] %v155_v3  ;;  %170 = vst [vmem:[#allocation9] sm:$0xff] %v780_v2  ;;  %s146_s20 = scalar_lea.vmem [#allocation5], %s777_s9  ;;  %s152_s21 = scalar_lea.vmem [#allocation8], %s777_s9 }
  0x24   : > { %165 = vst [vmem:[%s785_s17] sm:$0x1] %v693_v4  ;;  %s791_s22 = scalar_lea.vmem [#allocation7], %s161_s11  ;;  %s793_s26 = smov 0  }
  0x2a   : > { %v159_v5 = vld [vmem:[#allocation0] sm:$0xff] }
  0x2b   : > { %160 = vst [vmem:[#allocation2] sm:$0xff] %v159_v5 }
  0x2c LB: >> { %vm186_vm0 = vcmp.lt.s32.totalorder %v780_v2, 2  ;;  %v800_v8 = vstv %s691_s26  ;;  %s227_s27 = ssub.s32 128, %s691_s26  ;;  %v233_v38 = vand.u32 127, %v166_v1  ;;  %v236_v40 = vld [vmem:[%s785_s17] ss:$0 sm:$0xff]  ;;  %s239_s28 = scalar_lea.vmem [#allocation2], %s691_s26  ;;  %s691_s26 = sphi %s793_s26, %s176_s26  }
  0x2d   : >> { %vm185_vm1 = vcmp.ge.s32.totalorder %v780_v2, %v800_v8  ;;  %s245_s30 = scalar_lea.vmem [#allocation9], %s691_s26  ;;  %vm265_vm15 = vcmp.gt.s32.totalorder %v780_v2, %v800_v8  ;;  %s176_s26 = sadd.s32 1, %s691_s26  }
  0x2e   : >> { %vm187_vm3 = vmand %vm185_vm1, %vm186_vm0  ;;  %vm257_vm12 = vcmp.gt.s32.totalorder %v233_v38, %v800_v8  ;;  %vm234_vm13 = vcmp.eq.s32.totalorder %v233_v38, %v800_v8  ;;  %v247_v42 = vld [vmem:[%s245_s30] ss:$0 sm:$0xff]  ;;  %p173_p11 = scmp.ge.s32.totalorder %s176_s26, 2  }
  0x2f   : >> { %vm269_vm1 = vmand %vm265_vm15, %vm234_vm13  ;;  %s900_s6 = sshrl.u32 (%p173_p11), %s736_s16, 3  ;;  %s564_s10 = sshll.u32 (%p173_p11), %s736_s16, 1 }
  0x30   : > { %s565_s11 = sshll.u32 (%p173_p11), %s900_s6, 5 }
  0x32   : >> { %v181_v6 = vld [vmem:[#allocation2] sm:$0xff]  ;;  %v241_v41 = vld [vmem:[%s239_s28] ss:$0 sm:$0xff] }
  0x33   : >> { %v182_v7 = vand.u32 2147483647, %v181_v6 }
  0x35   : >> { %vm560_vm2 = vcmp.gt.f32.partialorder %v182_v7, -inf }
  0x36   : >> { %vm189_vm4 = vmand %vm187_vm3, %vm560_vm2 }
  0x37   : >> { %v190_v9 = vsel %vm189_vm4, %v780_v2, %v800_v8  ;;  %v191_v10 = vsel %vm189_vm4, %v182_v7, -inf }
  0x38   : >> { %v192_v11 = vrot.slane %v191_v10, 1  ;;  %v193_v12 = vrot.slane %v190_v9, 1 }
  0x3a   : >> { %vm194_vm5 = vcmp.ge.f32.partialorder %v192_v11, %v191_v10  ;;  %v197_v13 = vrot.slane %v192_v11, 1  ;;  %v198_v14 = vrot.slane %v193_v12, 1 }
  0x3b   : >> { %v195_v15 = vsel %vm194_vm5, %v192_v11, %v191_v10  ;;  %v196_v16 = vsel %vm194_vm5, %v193_v12, %v190_v9 }
  0x3c   : >> { %vm199_vm6 = vcmp.ge.f32.partialorder %v197_v13, %v195_v15  ;;  %v202_v17 = vrot.slane %v197_v13, 1  ;;  %v203_v18 = vrot.slane %v198_v14, 1 }
  0x3d   : >> { %v200_v19 = vsel %vm199_vm6, %v197_v13, %v195_v15  ;;  %v201_v20 = vsel %vm199_vm6, %v198_v14, %v196_v16 }
  0x3e   : >> { %vm204_vm7 = vcmp.ge.f32.partialorder %v202_v17, %v200_v19  ;;  %v207_v21 = vrot.slane %v202_v17, 1  ;;  %v208_v22 = vrot.slane %v203_v18, 1 }
  0x3f   : >> { %v205_v23 = vsel %vm204_vm7, %v202_v17, %v200_v19  ;;  %v206_v24 = vsel %vm204_vm7, %v203_v18, %v201_v20 }
  0x40   : >> { %vm209_vm8 = vcmp.ge.f32.partialorder %v207_v21, %v205_v23  ;;  %v212_v25 = vrot.slane %v207_v21, 1  ;;  %v213_v26 = vrot.slane %v208_v22, 1 }
  0x41   : >> { %v210_v27 = vsel %vm209_vm8, %v207_v21, %v205_v23  ;;  %v211_v28 = vsel %vm209_vm8, %v208_v22, %v206_v24 }
  0x42   : >> { %vm214_vm9 = vcmp.ge.f32.partialorder %v212_v25, %v210_v27  ;;  %v217_v29 = vrot.slane %v212_v25, 1  ;;  %v218_v30 = vrot.slane %v213_v26, 1 }
  0x43   : >> { %v215_v31 = vsel %vm214_vm9, %v212_v25, %v210_v27  ;;  %v216_v32 = vsel %vm214_vm9, %v213_v26, %v211_v28 }
  0x44   : >> { %vm219_vm10 = vcmp.ge.f32.partialorder %v217_v29, %v215_v31  ;;  %v222_v33 = vrot.slane %v217_v29, 1  ;;  %v223_v34 = vrot.slane %v218_v30, 1 }
  0x45   : >> { %v220_v35 = vsel %vm219_vm10, %v217_v29, %v215_v31  ;;  %v221_v36 = vsel %vm219_vm10, %v218_v30, %v216_v32 }
  0x46   : >> { %vm224_vm11 = vcmp.ge.f32.partialorder %v222_v33, %v220_v35 }
  0x47   : >> { %v226_v37 = vsel %vm224_vm11, %v223_v34, %v221_v36 }
  0x48   : >> { %228 = vrot.lane.b32.xlu0 %v226_v37, %s227_s27  ;;  %s357_s27 = scalar_lea.vmem (%p173_p11), %s897_s1, %s564_s10 }
  0xba   : >> { %v229_v39 = vpop.permute.xlu0 %228 }
  0xbb   : >> { %569 = vpush %v229_v39 }
  0xec   : >> { %s570_s29 = spop %569 }
  0xed   : >> { %v235_v43 = vstv %s570_s29  ;;  %s240_s4 = scalar_lea.vmem [#allocation2], %s570_s29  ;;  %s246_s5 = scalar_lea.vmem [#allocation9], %s570_s29 }
  0xee   : >> { %v242_v44 = vld [vmem:[%s240_s4] ss:$0 sm:$0xff]  ;;  %v237_v46 = vsel %vm234_vm13, %v235_v43, %v236_v40 }
  0xef   : >> { %v248_v45 = vld [vmem:[%s246_s5] ss:$0 sm:$0xff]  ;;  %243 = vst [vmem:[%s240_s4] sm:$0x1] %v241_v41  ;;  %vm251_vm14 = vcmp.ne.f32.partialorder %v242_v44, 0.0  ;;  %238 = vst [vmem:[%s785_s17] sm:$0x1] %v237_v46  ;;  %v258_v53 = vsel %vm257_vm12, %v242_v44, 0.0 }
  0xf0   : >> { %249 = vst [vmem:[%s246_s5] sm:$0x1] %v247_v42  ;;  %244 = vst [vmem:[%s239_s28] sm:$0x1] %v242_v44  ;;  %s399_s4 = sshll.u32 (%p173_p11), %s146_s20, 4  ;;  %s348_s5 = scalar_lea.sflag (%p173_p11), [#allocation6], %s144_s7  ;;  %s400_s4 = int_to_ptr.vmem [resolvable:$true] %s399_s4 }
  0xf1   : >> { %250 = vst [vmem:[%s245_s30] sm:$0x1] %v248_v45  ;;  %vm252_vm0 = vmand %vm234_vm13, %vm251_vm14  ;;  %s843_s30 = scalar_lea.hbm (%p173_p11), %s898_s2, %s565_s11  ;;  %s621_s6 = scalar_lea.vmem (%p173_p11), %s400_s4, 32 }
  0xf2   : >> { %v253_v47 = vsel %vm252_vm0, %v242_v44, 1.0  ;;  %p622_p12 = scmp.ne.s32.totalorder (%p173_p11), %s400_s4, %s621_s6  ;;  %s694_s17 = smov (%p173_p11), [#allocation5]  }
  0xf3   : >> { %v266_v48 = vsel %vm265_vm15, %v253_v47, 1.0  ;;  %s625_s10 = sshll.u32 (%p173_p11), %s694_s17, 4  ;;  %s626_s10 = int_to_ptr.vmem [resolvable:$false] %s625_s10 }
  0xf4   : >> { %619 = vrcp.f32 %v266_v48  ;;  %p623_p13 = pnand (%p173_p11), %p622_p12, %p753_p5  ;;  %s627_s8 = scalar_lea.vmem (%p173_p11), %s626_s10, 64 }
  0xf5   : > { %p628_p1 = scmp.lt.s32.totalorder (%p173_p11), %s400_s4, %s626_s10  ;;  %p629_p2 = scmp.lt.s32.totalorder (%p173_p11), %s627_s8, %s621_s6 }
  0xf6   : > { %v334_v59 = vld [vmem:[#allocation4] sm:$0x3] (%p173_p11)  ;;  %p624_p0 = pneg (%p173_p11), %p623_p13 }
  0xf7   : >> { %v262_v50 = vld [vmem:[#allocation2] sm:$0xff]  ;;  %336 = vst [vmem:[%s146_s20] sm:$0x3] (%p173_p11), %v334_v59  ;;  %p630_p3 = por (%p173_p11), %p629_p2, %p628_p1 }
  0xf8   : > { %v276_v57 = vld [vmem:[#allocation9] sm:$0xff] (%p173_p11) }
  0xf9   : > { %p631_p4 = pnand (%p173_p11), %p630_p3, %p624_p0 }
  0xfe   : >> { %v620_v49 = vpop.eup %619 }
  0xff   : >> { %v268_v51 = vmul.f32 %v620_v49, %v262_v50 }
 0x101   : >> { %v270_v52 = vsel %vm269_vm1, %v268_v51, 0.0 }
 0x102   : >> { %271 = vadd.xlane.f32.xlu0 %v270_v52 }
 0x12f   : > { %292 = vxpose.xlu0.b32.start.end [1/1] (short) (narrow) (%p173_p11), %v276_v57, 8 }
 0x18e   : > { %175 = sbr.rel (!%p173_p11) target bundleno = 44 (0x2c), region = 202 }
 0x18f   : >> { %v272_v54 = vpop.xlane.xlu0 %271 }
 0x190   : >> { %v273_v55 = vmul.f32 %v272_v54, %v258_v53 }
 0x192   : >> { %v274_v56 = vsub.f32 %v268_v51, %v273_v55 }
 0x194   : >> { %275 = vst [vmem:[#allocation2] sm:$0xff] %v274_v56 }
 0x19b   : > { %v328_v58 = vld [vmem:[#allocation2] sm:$0x3] }
 0x19c   : > { %330 = vst [vmem:[%s139_s19] sm:$0x3] %v328_v58 }
 0x1a3   : > { %v373_v60 = vld [vmem:[%s139_s19] sm:$0x3] }
 0x1a4   : > { %374 = vst [vmem:[%s357_s27] sm:$0x3] %v373_v60 }
 0x1a5   : > { %634 = shalt.err (!%p631_p4)
}
 0x1a6   : > { %s635_s7 = scalar_lea.hbm %s843_s30, 32  ;;  %s639_s11 = scalar_lea.hbm %s898_s2, 32 }
 0x1a7   : > { %p636_p8 = scmp.ne.s32.totalorder %s843_s30, %s635_s7  ;;  %p640_p11 = scmp.lt.u32.totalorder %s843_s30, %s898_s2 }
 0x1a8   : > { %p641_p12 = scmp.lt.u32.totalorder %s639_s11, %s635_s7  ;;  %p643_p0 = scmp.lt.u32.totalorder %s635_s7, %s843_s30 }
 0x1a9   : > { %p637_p9 = pnand %p636_p8, %p753_p5 }
 0x1aa   : > { %p642_p13 = por %p641_p12, %p640_p11 }
 0x1ab   : > { %p638_p10 = pneg %p637_p9 }
 0x1ac   : > { %p644_p1 = por %p643_p0, %p642_p13 }
 0x1ae   : > { %p645_p2 = pnand %p644_p1, %p638_p10 }
 0x1b0   : > { %648 = shalt.err (!%p645_p2)
}
 0x1b1   : > { %571 = dma.vmem_to_hbm [thread:$0]  (%p753_p5), %s400_s4, 32, %s843_s30, %s348_s5   ;;  %v308_v61 = vpop.trf.xlu0 }
 0x1b2   : > { %324 = vst [vmem:[%s791_s22] sm:$0x1] %v308_v61  ;;  %s903_s6 = sshrl.u32 (%p753_p5), %s736_s16, 3 }
 0x1b3   : > { %s566_s28 = sshll.u32 (%p753_p5), %s903_s6, 1 }
 0x1b4   : > { %405 = sbr.rel (!%p753_p5) target bundleno = 451 (0x1c3), region = 96  ;;  %s408_s10 = scalar_lea.vmem (%p753_p5), %s899_s3, %s566_s28 }
 0x1b9   : > { %v340_v62 = vld [vmem:[#allocation7] sm:$0x3] }
 0x1ba   : > { %342 = vst [vmem:[%s152_s21] sm:$0x3] %v340_v62 }
 0x1c1   : > { %v424_v63 = vld [vmem:[%s152_s21] sm:$0x3] }
 0x1c2   : > { %425 = vst [vmem:[%s408_s10] sm:$0x3] %v424_v63 }
 0x1c3 PF: > { %s452_s22 = sand.u32 1, %s675_s12   ;;  %p574_p5 = pnand %p552_p7, %p757_p6 }
 0x1c4   : > { %s453_s24 = scalar_lea.sflag [#allocation6], %s452_s22 }
 0x1c5   : > { %670 = dma.done.wait (!%p574_p5), %s453_s24, 32  }
 0x1c6   : > { %672 = vsyncadd (!%p574_p5), %s453_s24, 4294967264  ;;  %p10_p3 = scmp.ge.s32.totalorder %s740_s18, 4   ;;  %s904_s12 = smov %s679_s13 }
 0x1c7   : > { %s905_s13 = smov %s683_s14  ;;  %s906_s14 = smov %s751_s23 }
 0x1c8   : > { %s907_s15 = smov %s740_s18  ;;  %12 = sbr.rel (!%p10_p3) target bundleno = 3 (0x3), region = 213 }
 0x1cf   :  { %465 = vsyncpa [#allocation6], 1 }
 0x1d0   :  { %467 = vsyncpa [#allocation6 + $0x1], 1 }

// kernel: custom-call.16
= control target key start
LH: loop header
LB: loop body
LE: loop exit
PB: predicated region body
PF: predicated region fallthrough
CT: control target
= control target key end

     0   :  { %s333_s6 = smov 0   ;;  %s335_s7 = smov 0   ;;  %s380_s0 = inlined_call_operand.vmem [shape: f32[2,1,2,2], index: 0, kind: input, shape index: {}]   ;;  %s381_s1 = inlined_call_operand.vmem [shape: f32[2,1,2,2], index: 1, kind: output, shape index: {}]  }
   0x1   :  { %s337_s8 = smov 0  }
   0x2 LB: > { %s259_s9 = sadd.s32 4294967295, %s320_s8   ;;  %s33_s10 = sadd.s32 1, %s316_s7  ;;  %s320_s8 = sphi %s337_s8, %s7_s8   ;;  %s316_s7 = sphi %s335_s7, %s383_s7   ;;  %s312_s6 = sphi %s333_s6, %s382_s6  }
   0x3   : > { %p35_p0 = scmp.ge.s32.totalorder %s33_s10, 2  ;;  %p261_p1 = scmp.ge.s32.totalorder %s320_s8, 2 }
   0x4   : > { %s49_s11 = sand.u32 (!%p261_p1), 1, %s320_s8   ;;  %s263_s12 = sshll.u32 (!%p261_p1), %s316_s7, 1 }
   0x5   : > { %s385_s10 = smov (%p35_p0, %s33_s10), 0  ;;  %47 = sbr.rel (%p261_p1) target bundleno = 12 (0xc), region = 16 }
   0x6   : > { %s262_s13 = sshll.u32 (!%p261_p1), %s49_s11, 1  ;;  %s56_s16 = scalar_lea.vmem (!%p261_p1), %s380_s0, %s263_s12 }
   0x7   : > { %v72_v0 = vld [vmem:[%s56_s16] sm:$0x3] (!%p261_p1)  ;;  %s51_s17 = scalar_lea.vmem (!%p261_p1), [#allocation1], %s262_s13 }
   0x8   : > { %73 = vst [vmem:[%s51_s17] sm:$0x3] (!%p261_p1), %v72_v0 }
   0xc PF: > { %p264_p2 = scmp.ge.s32.totalorder %s320_s8, 1  ;;  %p89_p3 = scmp.lt.s32.totalorder %s320_s8, 3 }
   0xe   : > { %p90_p4 = pnand %p264_p2, %p89_p3 }
  0x10   : > { %93 = sbr.rel (%p90_p4) target bundleno = 366 (0x16e), region = 50 }
  0x17   : > { %s360_s18 = sand.u32 1, %s259_s9   ;;  %v111_v1 = vlaneseq  ;;  %v322_v8 = vmov -1.0   ;;  %s268_s22 = sshll.u32 %s312_s6, 1 }
  0x18   : > { %s265_s19 = sshll.u32 %s360_s18, 1  ;;  %s168_s25 = scalar_lea.vmem %s381_s1, %s268_s22 }
  0x19   : > { %v112_v2 = vand.u32 127, %v111_v1  ;;  %v115_v3 = vshrl.u32 %v111_v1, 7  ;;  %s102_s20 = scalar_lea.vmem [#allocation1], %s265_s19  ;;  %s106_s21 = scalar_lea.vmem [#allocation3], %s265_s19 }
  0x1a   : > { %v109_v4 = vld [vmem:[%s102_s20] sm:$0x3] }
  0x1b   : > { %110 = vst [vmem:[#allocation0] sm:$0x3] %v109_v4  ;;  %vm113_vm0 = vcmp.lt.s32.totalorder %v112_v2, 2  ;;  %vm122_vm1 = vcmp.ge.s32.totalorder %v115_v3, %v112_v2  ;;  %vm117_vm3 = vcmp.eq.s32.totalorder %v115_v3, %v112_v2  ;;  %vm133_vm4 = vcmp.eq.s32.totalorder %v112_v2, %v115_v3 }
  0x1c   : > { %vm123_vm2 = vmand %vm122_vm1, %vm113_vm0  ;;  %vm136_vm5 = vcmp.eq.s32.totalorder %v112_v2, 0  ;;  %vm144_vm6 = vcmp.eq.s32.totalorder %v112_v2, 1 }
  0x1d   : > { %v137_v9 = vsel %vm136_vm5, 1.0, %v322_v8 }
  0x1e   : > { %v138_v10 = vsel %vm133_vm4, %v137_v9, 0.0 }
  0x22   : > { %v118_v5 = vld [vmem:[#allocation0] sm:$0xff] }
  0x23   : > { %v119_v6 = vsel %vm117_vm3, %v118_v5, 0.0  ;;  %v124_v7 = vsel %vm123_vm2, %v118_v5, 0.0 }
  0x24   : > { %120 = vadd.xlane.f32.xlu0 %v119_v6 }
  0xb1   : > { %v121_v11 = vpop.xlane.xlu0 %120 }
  0xb2   : > { %296 = vrcp.f32 %v121_v11  ;;  %vm151_vm7 = vweird.f32 %v121_v11 }
  0xbc   : > { %v297_v12 = vpop.eup %296 }
  0xbd   : > { %v126_v13 = vmul.f32 %v297_v12, %v124_v7 }
  0xbf   : > { %127 = vst [vmem:[#allocation4] sm:$0xff] %v126_v13 }
  0xc6   : > { %v140_v14 = vld [vmem:[#allocation4 + $0x1] ss:$0 sm:$0xff] }
  0xc7   : > { %v141_v15 = vxor.u32 2147483648, %v140_v14 }
  0xc9   : > { %v145_v16 = vmul.f32 %v141_v15, %v138_v10 }
  0xcb   : > { %146 = vadd.xlane.f32.xlu0 %v145_v16 }
 0x158   : > { %v147_v17 = vpop.xlane.xlu0 %146 }
 0x159   : > { %v148_v18 = vsel %vm144_vm6, %v147_v17, %v138_v10 }
 0x15a   : > { %v150_v19 = vmul.f32 %v297_v12, %v148_v18 }
 0x15c   : > { %v152_v20 = vsel %vm151_vm7, %v148_v18, %v150_v19 }
 0x15d   : > { %153 = vst [vmem:[#allocation2] sm:$0xff] %v152_v20 }
 0x164   : > { %v157_v21 = vld [vmem:[#allocation2] sm:$0x3] }
 0x165   : > { %159 = vst [vmem:[%s106_s21] sm:$0x3] %v157_v21 }
 0x16c   : > { %v184_v22 = vld [vmem:[%s106_s21] sm:$0x3] }
 0x16d   : > { %185 = vst [vmem:[%s168_s25] sm:$0x3] %v184_v22 }
 0x16e PF: > { %s7_s8 = sadd.s32 1, %s320_s8   ;;  %s382_s6 = smov %s316_s7 }
 0x16f   : > { %p4_p5 = scmp.ge.s32.totalorder %s7_s8, 4   ;;  %s383_s7 = smov %s385_s10 }
 0x171   :  { %6 = sbr.rel (!%p4_p5) target bundleno = 2 (0x2), region = 111 }

// kernel: custom-call.15
= control target key start
LH: loop header
LB: loop body
LE: loop exit
PB: predicated region body
PF: predicated region fallthrough
CT: control target
= control target key end

     0   :  { %s332_s6 = smov 0   ;;  %s334_s7 = smov 0   ;;  %s379_s0 = inlined_call_operand.vmem [shape: f32[2,1,2,2], index: 0, kind: input, shape index: {}]   ;;  %s380_s1 = inlined_call_operand.vmem [shape: f32[2,1,2,2], index: 1, kind: output, shape index: {}]  }
   0x1   :  { %s336_s8 = smov 0  }
   0x2 LB: > { %s258_s9 = sadd.s32 4294967295, %s319_s8   ;;  %s33_s10 = sadd.s32 1, %s315_s7  ;;  %s319_s8 = sphi %s336_s8, %s7_s8   ;;  %s315_s7 = sphi %s334_s7, %s382_s7   ;;  %s311_s6 = sphi %s332_s6, %s381_s6  }
   0x3   : > { %p35_p0 = scmp.ge.s32.totalorder %s33_s10, 2  ;;  %p260_p1 = scmp.ge.s32.totalorder %s319_s8, 2 }
   0x4   : > { %s49_s11 = sand.u32 (!%p260_p1), 1, %s319_s8   ;;  %s262_s12 = sshll.u32 (!%p260_p1), %s315_s7, 1 }
   0x5   : > { %s384_s10 = smov (%p35_p0, %s33_s10), 0  ;;  %47 = sbr.rel (%p260_p1) target bundleno = 12 (0xc), region = 16 }
   0x6   : > { %s261_s13 = sshll.u32 (!%p260_p1), %s49_s11, 1  ;;  %s56_s16 = scalar_lea.vmem (!%p260_p1), %s379_s0, %s262_s12 }
   0x7   : > { %v72_v0 = vld [vmem:[%s56_s16] sm:$0x3] (!%p260_p1)  ;;  %s51_s17 = scalar_lea.vmem (!%p260_p1), [#allocation1], %s261_s13 }
   0x8   : > { %73 = vst [vmem:[%s51_s17] sm:$0x3] (!%p260_p1), %v72_v0 }
   0xc PF: > { %p263_p2 = scmp.ge.s32.totalorder %s319_s8, 1  ;;  %p89_p3 = scmp.lt.s32.totalorder %s319_s8, 3 }
   0xe   : > { %p90_p4 = pnand %p263_p2, %p89_p3 }
  0x10   : > { %93 = sbr.rel (%p90_p4) target bundleno = 366 (0x16e), region = 50 }
  0x17   : > { %s359_s18 = sand.u32 1, %s258_s9   ;;  %v111_v1 = vlaneseq  ;;  %v321_v8 = vmov -1.0   ;;  %s267_s22 = sshll.u32 %s311_s6, 1 }
  0x18   : > { %s264_s19 = sshll.u32 %s359_s18, 1  ;;  %s167_s25 = scalar_lea.vmem %s380_s1, %s267_s22 }
  0x19   : > { %v112_v2 = vand.u32 127, %v111_v1  ;;  %v115_v3 = vshrl.u32 %v111_v1, 7  ;;  %s102_s20 = scalar_lea.vmem [#allocation1], %s264_s19  ;;  %s106_s21 = scalar_lea.vmem [#allocation3], %s264_s19 }
  0x1a   : > { %v109_v4 = vld [vmem:[%s102_s20] sm:$0x3] }
  0x1b   : > { %110 = vst [vmem:[#allocation0] sm:$0x3] %v109_v4  ;;  %vm113_vm0 = vcmp.lt.s32.totalorder %v112_v2, 2  ;;  %vm122_vm1 = vcmp.le.s32.totalorder %v115_v3, %v112_v2  ;;  %vm117_vm3 = vcmp.eq.s32.totalorder %v115_v3, %v112_v2  ;;  %vm133_vm4 = vcmp.eq.s32.totalorder %v112_v2, %v115_v3 }
  0x1c   : > { %vm123_vm2 = vmand %vm122_vm1, %vm113_vm0  ;;  %vm136_vm5 = vcmp.eq.s32.totalorder %v112_v2, 1  ;;  %vm143_vm6 = vcmp.eq.s32.totalorder %v112_v2, 0 }
  0x1d   : > { %v137_v9 = vsel %vm136_vm5, 1.0, %v321_v8 }
  0x1e   : > { %v138_v10 = vsel %vm133_vm4, %v137_v9, 0.0 }
  0x22   : > { %v118_v5 = vld [vmem:[#allocation0] sm:$0xff] }
  0x23   : > { %v119_v6 = vsel %vm117_vm3, %v118_v5, 0.0  ;;  %v124_v7 = vsel %vm123_vm2, %v118_v5, 0.0 }
  0x24   : > { %120 = vadd.xlane.f32.xlu0 %v119_v6 }
  0xb1   : > { %v121_v11 = vpop.xlane.xlu0 %120 }
  0xb2   : > { %295 = vrcp.f32 %v121_v11  ;;  %vm150_vm7 = vweird.f32 %v121_v11 }
  0xbc   : > { %v296_v12 = vpop.eup %295 }
  0xbd   : > { %v126_v13 = vmul.f32 %v296_v12, %v124_v7 }
  0xbf   : > { %127 = vst [vmem:[#allocation4] sm:$0xff] %v126_v13 }
  0xc6   : > { %v139_v14 = vld [vmem:[#allocation4] ss:$0 sm:$0xff] }
  0xc7   : > { %v140_v15 = vxor.u32 2147483648, %v139_v14 }
  0xc9   : > { %v144_v16 = vmul.f32 %v140_v15, %v138_v10 }
  0xcb   : > { %145 = vadd.xlane.f32.xlu0 %v144_v16 }
 0x158   : > { %v146_v17 = vpop.xlane.xlu0 %145 }
 0x159   : > { %v147_v18 = vsel %vm143_vm6, %v146_v17, %v138_v10 }
 0x15a   : > { %v149_v19 = vmul.f32 %v296_v12, %v147_v18 }
 0x15c   : > { %v151_v20 = vsel %vm150_vm7, %v147_v18, %v149_v19 }
 0x15d   : > { %152 = vst [vmem:[#allocation2] sm:$0xff] %v151_v20 }
 0x164   : > { %v156_v21 = vld [vmem:[#allocation2] sm:$0x3] }
 0x165   : > { %158 = vst [vmem:[%s106_s21] sm:$0x3] %v156_v21 }
 0x16c   : > { %v183_v22 = vld [vmem:[%s106_s21] sm:$0x3] }
 0x16d   : > { %184 = vst [vmem:[%s167_s25] sm:$0x3] %v183_v22 }
 0x16e PF: > { %s7_s8 = sadd.s32 1, %s319_s8   ;;  %s381_s6 = smov %s315_s7 }
 0x16f   : > { %p4_p5 = scmp.ge.s32.totalorder %s7_s8, 4   ;;  %s382_s7 = smov %s384_s10 }
 0x171   :  { %6 = sbr.rel (!%p4_p5) target bundleno = 2 (0x2), region = 110 }

// kernel: neg.3
= control target key start
LH: loop header
LB: loop body
LE: loop exit
PB: predicated region body
PF: predicated region fallthrough
CT: control target
= control target key end

     0   :  { %s1032_s0 = inlined_call_operand.vmem [shape: f32[256,256], index: 0, kind: input, shape index: {}]   ;;  %s1033_s1 = inlined_call_operand.vmem [shape: f32[256,256], index: 1, kind: output, shape index: {}]  }
   0x1   :  { %v2_v0 = vld [vmem:[%s1032_s0] sm:$0xff]  ;;  %v512_v1 = vld [vmem:[%s1032_s0 + $0x10] sm:$0xff]  ;;  %v574_v62 = vld [vmem:[%s1032_s0 + $0x8] sm:$0xff] }
   0x2   :  { %v514_v2 = vld [vmem:[%s1032_s0 + $0x20] sm:$0xff]  ;;  %v5_v3 = vxor.u32 2147483648, %v2_v0  ;;  %v12_v4 = vxor.u32 2147483648, %v512_v1  ;;  %v516_v6 = vld [vmem:[%s1032_s0 + $0x30] sm:$0xff]  ;;  %v260_v1 = vxor.u32 2147483648, %v574_v62  ;;  %v636_v62 = vld [vmem:[%s1032_s0 + $0x1f8] sm:$0xff] }
   0x3   :  { %v20_v5 = vxor.u32 2147483648, %v514_v2  ;;  %v518_v7 = vld [vmem:[%s1032_s0 + $0x40] sm:$0xff]  ;;  %v520_v8 = vld [vmem:[%s1032_s0 + $0x50] sm:$0xff]  ;;  %v28_v9 = vxor.u32 2147483648, %v516_v6  ;;  %v576_v2 = vld [vmem:[%s1032_s0 + $0x18] sm:$0xff] }
   0x4   :  { %v36_v10 = vxor.u32 2147483648, %v518_v7  ;;  %v44_v11 = vxor.u32 2147483648, %v520_v8  ;;  %v522_v12 = vld [vmem:[%s1032_s0 + $0x60] sm:$0xff]  ;;  %v524_v13 = vld [vmem:[%s1032_s0 + $0x70] sm:$0xff]  ;;  %7 = vst [vmem:[%s1033_s1] sm:$0xff] %v5_v3  ;;  %513 = vst [vmem:[%s1033_s1 + $0x10] sm:$0xff] %v12_v4 }
   0x5   :  { %v526_v14 = vld [vmem:[%s1032_s0 + $0x80] sm:$0xff]  ;;  %515 = vst [vmem:[%s1033_s1 + $0x20] sm:$0xff] %v20_v5  ;;  %v52_v15 = vxor.u32 2147483648, %v522_v12  ;;  %v60_v16 = vxor.u32 2147483648, %v524_v13  ;;  %v528_v18 = vld [vmem:[%s1032_s0 + $0x90] sm:$0xff]  ;;  %517 = vst [vmem:[%s1033_s1 + $0x30] sm:$0xff] %v28_v9 }
   0x6   :  { %v68_v17 = vxor.u32 2147483648, %v526_v14  ;;  %v530_v19 = vld [vmem:[%s1032_s0 + $0xa0] sm:$0xff]  ;;  %v532_v20 = vld [vmem:[%s1032_s0 + $0xb0] sm:$0xff]  ;;  %519 = vst [vmem:[%s1033_s1 + $0x40] sm:$0xff] %v36_v10  ;;  %521 = vst [vmem:[%s1033_s1 + $0x50] sm:$0xff] %v44_v11  ;;  %v76_v21 = vxor.u32 2147483648, %v528_v18 }
   0x7   :  { %v84_v22 = vxor.u32 2147483648, %v530_v19  ;;  %v92_v23 = vxor.u32 2147483648, %v532_v20  ;;  %v534_v24 = vld [vmem:[%s1032_s0 + $0xc0] sm:$0xff]  ;;  %v536_v25 = vld [vmem:[%s1032_s0 + $0xd0] sm:$0xff]  ;;  %523 = vst [vmem:[%s1033_s1 + $0x60] sm:$0xff] %v52_v15  ;;  %525 = vst [vmem:[%s1033_s1 + $0x70] sm:$0xff] %v60_v16 }
   0x8   :  { %v538_v26 = vld [vmem:[%s1032_s0 + $0xe0] sm:$0xff]  ;;  %527 = vst [vmem:[%s1033_s1 + $0x80] sm:$0xff] %v68_v17  ;;  %v100_v27 = vxor.u32 2147483648, %v534_v24  ;;  %v108_v28 = vxor.u32 2147483648, %v536_v25  ;;  %v540_v30 = vld [vmem:[%s1032_s0 + $0xf0] sm:$0xff]  ;;  %529 = vst [vmem:[%s1033_s1 + $0x90] sm:$0xff] %v76_v21 }
   0x9   :  { %v116_v29 = vxor.u32 2147483648, %v538_v26  ;;  %v542_v31 = vld [vmem:[%s1032_s0 + $0x100] sm:$0xff]  ;;  %v544_v32 = vld [vmem:[%s1032_s0 + $0x110] sm:$0xff]  ;;  %531 = vst [vmem:[%s1033_s1 + $0xa0] sm:$0xff] %v84_v22  ;;  %533 = vst [vmem:[%s1033_s1 + $0xb0] sm:$0xff] %v92_v23  ;;  %v124_v33 = vxor.u32 2147483648, %v540_v30 }
   0xa   :  { %v132_v34 = vxor.u32 2147483648, %v542_v31  ;;  %v140_v35 = vxor.u32 2147483648, %v544_v32  ;;  %v546_v36 = vld [vmem:[%s1032_s0 + $0x120] sm:$0xff]  ;;  %v548_v37 = vld [vmem:[%s1032_s0 + $0x130] sm:$0xff]  ;;  %535 = vst [vmem:[%s1033_s1 + $0xc0] sm:$0xff] %v100_v27  ;;  %537 = vst [vmem:[%s1033_s1 + $0xd0] sm:$0xff] %v108_v28 }
   0xb   :  { %v550_v38 = vld [vmem:[%s1032_s0 + $0x140] sm:$0xff]  ;;  %539 = vst [vmem:[%s1033_s1 + $0xe0] sm:$0xff] %v116_v29  ;;  %v148_v39 = vxor.u32 2147483648, %v546_v36  ;;  %v156_v40 = vxor.u32 2147483648, %v548_v37  ;;  %v552_v42 = vld [vmem:[%s1032_s0 + $0x150] sm:$0xff]  ;;  %541 = vst [vmem:[%s1033_s1 + $0xf0] sm:$0xff] %v124_v33 }
   0xc   :  { %v164_v41 = vxor.u32 2147483648, %v550_v38  ;;  %v554_v43 = vld [vmem:[%s1032_s0 + $0x160] sm:$0xff]  ;;  %v556_v44 = vld [vmem:[%s1032_s0 + $0x170] sm:$0xff]  ;;  %543 = vst [vmem:[%s1033_s1 + $0x100] sm:$0xff] %v132_v34  ;;  %545 = vst [vmem:[%s1033_s1 + $0x110] sm:$0xff] %v140_v35  ;;  %v172_v45 = vxor.u32 2147483648, %v552_v42 }
   0xd   :  { %v180_v46 = vxor.u32 2147483648, %v554_v43  ;;  %v188_v47 = vxor.u32 2147483648, %v556_v44  ;;  %v558_v48 = vld [vmem:[%s1032_s0 + $0x180] sm:$0xff]  ;;  %v560_v49 = vld [vmem:[%s1032_s0 + $0x190] sm:$0xff]  ;;  %547 = vst [vmem:[%s1033_s1 + $0x120] sm:$0xff] %v148_v39  ;;  %549 = vst [vmem:[%s1033_s1 + $0x130] sm:$0xff] %v156_v40 }
   0xe   :  { %v562_v50 = vld [vmem:[%s1032_s0 + $0x1a0] sm:$0xff]  ;;  %551 = vst [vmem:[%s1033_s1 + $0x140] sm:$0xff] %v164_v41  ;;  %v196_v51 = vxor.u32 2147483648, %v558_v48  ;;  %v204_v52 = vxor.u32 2147483648, %v560_v49  ;;  %v564_v54 = vld [vmem:[%s1032_s0 + $0x1b0] sm:$0xff]  ;;  %553 = vst [vmem:[%s1033_s1 + $0x150] sm:$0xff] %v172_v45 }
   0xf   :  { %v212_v53 = vxor.u32 2147483648, %v562_v50  ;;  %v566_v55 = vld [vmem:[%s1032_s0 + $0x1c0] sm:$0xff]  ;;  %v568_v56 = vld [vmem:[%s1032_s0 + $0x1d0] sm:$0xff]  ;;  %555 = vst [vmem:[%s1033_s1 + $0x160] sm:$0xff] %v180_v46  ;;  %557 = vst [vmem:[%s1033_s1 + $0x170] sm:$0xff] %v188_v47  ;;  %v220_v57 = vxor.u32 2147483648, %v564_v54 }
  0x10   :  { %v228_v58 = vxor.u32 2147483648, %v566_v55  ;;  %v236_v59 = vxor.u32 2147483648, %v568_v56  ;;  %v570_v60 = vld [vmem:[%s1032_s0 + $0x1e0] sm:$0xff]  ;;  %v572_v61 = vld [vmem:[%s1032_s0 + $0x1f0] sm:$0xff]  ;;  %559 = vst [vmem:[%s1033_s1 + $0x180] sm:$0xff] %v196_v51  ;;  %561 = vst [vmem:[%s1033_s1 + $0x190] sm:$0xff] %v204_v52 }
  0x11   :  { %563 = vst [vmem:[%s1033_s1 + $0x1a0] sm:$0xff] %v212_v53  ;;  %v244_v63 = vxor.u32 2147483648, %v570_v60  ;;  %v252_v0 = vxor.u32 2147483648, %v572_v61  ;;  %v578_v3 = vld [vmem:[%s1032_s0 + $0x28] sm:$0xff]  ;;  %v580_v4 = vld [vmem:[%s1032_s0 + $0x38] sm:$0xff]  ;;  %565 = vst [vmem:[%s1033_s1 + $0x1b0] sm:$0xff] %v220_v57 }
  0x12   :  { %567 = vst [vmem:[%s1033_s1 + $0x1c0] sm:$0xff] %v228_v58  ;;  %569 = vst [vmem:[%s1033_s1 + $0x1d0] sm:$0xff] %v236_v59  ;;  %v268_v5 = vxor.u32 2147483648, %v576_v2  ;;  %v276_v6 = vxor.u32 2147483648, %v578_v3  ;;  %v284_v7 = vxor.u32 2147483648, %v580_v4  ;;  %v582_v8 = vld [vmem:[%s1032_s0 + $0x48] sm:$0xff] }
  0x13   :  { %v584_v9 = vld [vmem:[%s1032_s0 + $0x58] sm:$0xff]  ;;  %v586_v10 = vld [vmem:[%s1032_s0 + $0x68] sm:$0xff]  ;;  %571 = vst [vmem:[%s1033_s1 + $0x1e0] sm:$0xff] %v244_v63  ;;  %573 = vst [vmem:[%s1033_s1 + $0x1f0] sm:$0xff] %v252_v0  ;;  %v292_v11 = vxor.u32 2147483648, %v582_v8  ;;  %v508_v63 = vxor.u32 2147483648, %v636_v62 }
  0x14   :  { %575 = vst [vmem:[%s1033_s1 + $0x8] sm:$0xff] %v260_v1  ;;  %v300_v12 = vxor.u32 2147483648, %v584_v9  ;;  %v308_v13 = vxor.u32 2147483648, %v586_v10  ;;  %v588_v14 = vld [vmem:[%s1032_s0 + $0x78] sm:$0xff]  ;;  %v590_v15 = vld [vmem:[%s1032_s0 + $0x88] sm:$0xff]  ;;  %577 = vst [vmem:[%s1033_s1 + $0x18] sm:$0xff] %v268_v5 }
  0x15   :  { %v592_v16 = vld [vmem:[%s1032_s0 + $0x98] sm:$0xff]  ;;  %579 = vst [vmem:[%s1033_s1 + $0x28] sm:$0xff] %v276_v6  ;;  %581 = vst [vmem:[%s1033_s1 + $0x38] sm:$0xff] %v284_v7  ;;  %v316_v17 = vxor.u32 2147483648, %v588_v14  ;;  %v324_v18 = vxor.u32 2147483648, %v590_v15  ;;  %v594_v20 = vld [vmem:[%s1032_s0 + $0xa8] sm:$0xff] }
  0x16   :  { %v332_v19 = vxor.u32 2147483648, %v592_v16  ;;  %v596_v21 = vld [vmem:[%s1032_s0 + $0xb8] sm:$0xff]  ;;  %v598_v22 = vld [vmem:[%s1032_s0 + $0xc8] sm:$0xff]  ;;  %583 = vst [vmem:[%s1033_s1 + $0x48] sm:$0xff] %v292_v11  ;;  %585 = vst [vmem:[%s1033_s1 + $0x58] sm:$0xff] %v300_v12  ;;  %v340_v23 = vxor.u32 2147483648, %v594_v20 }
  0x17   :  { %587 = vst [vmem:[%s1033_s1 + $0x68] sm:$0xff] %v308_v13  ;;  %v348_v24 = vxor.u32 2147483648, %v596_v21  ;;  %v356_v25 = vxor.u32 2147483648, %v598_v22  ;;  %v600_v26 = vld [vmem:[%s1032_s0 + $0xd8] sm:$0xff]  ;;  %v602_v27 = vld [vmem:[%s1032_s0 + $0xe8] sm:$0xff]  ;;  %589 = vst [vmem:[%s1033_s1 + $0x78] sm:$0xff] %v316_v17 }
  0x18   :  { %v604_v28 = vld [vmem:[%s1032_s0 + $0xf8] sm:$0xff]  ;;  %591 = vst [vmem:[%s1033_s1 + $0x88] sm:$0xff] %v324_v18  ;;  %593 = vst [vmem:[%s1033_s1 + $0x98] sm:$0xff] %v332_v19  ;;  %v364_v29 = vxor.u32 2147483648, %v600_v26  ;;  %v372_v30 = vxor.u32 2147483648, %v602_v27  ;;  %v606_v32 = vld [vmem:[%s1032_s0 + $0x108] sm:$0xff] }
  0x19   :  { %v380_v31 = vxor.u32 2147483648, %v604_v28  ;;  %v608_v33 = vld [vmem:[%s1032_s0 + $0x118] sm:$0xff]  ;;  %v610_v34 = vld [vmem:[%s1032_s0 + $0x128] sm:$0xff]  ;;  %595 = vst [vmem:[%s1033_s1 + $0xa8] sm:$0xff] %v340_v23  ;;  %597 = vst [vmem:[%s1033_s1 + $0xb8] sm:$0xff] %v348_v24  ;;  %v388_v35 = vxor.u32 2147483648, %v606_v32 }
  0x1a   :  { %599 = vst [vmem:[%s1033_s1 + $0xc8] sm:$0xff] %v356_v25  ;;  %v396_v36 = vxor.u32 2147483648, %v608_v33  ;;  %v404_v37 = vxor.u32 2147483648, %v610_v34  ;;  %v612_v38 = vld [vmem:[%s1032_s0 + $0x138] sm:$0xff]  ;;  %v614_v39 = vld [vmem:[%s1032_s0 + $0x148] sm:$0xff]  ;;  %601 = vst [vmem:[%s1033_s1 + $0xd8] sm:$0xff] %v364_v29 }
  0x1b   :  { %v616_v40 = vld [vmem:[%s1032_s0 + $0x158] sm:$0xff]  ;;  %603 = vst [vmem:[%s1033_s1 + $0xe8] sm:$0xff] %v372_v30  ;;  %605 = vst [vmem:[%s1033_s1 + $0xf8] sm:$0xff] %v380_v31  ;;  %v412_v41 = vxor.u32 2147483648, %v612_v38  ;;  %v420_v42 = vxor.u32 2147483648, %v614_v39  ;;  %v618_v44 = vld [vmem:[%s1032_s0 + $0x168] sm:$0xff] }
  0x1c   :  { %v428_v43 = vxor.u32 2147483648, %v616_v40  ;;  %v620_v45 = vld [vmem:[%s1032_s0 + $0x178] sm:$0xff]  ;;  %v622_v46 = vld [vmem:[%s1032_s0 + $0x188] sm:$0xff]  ;;  %607 = vst [vmem:[%s1033_s1 + $0x108] sm:$0xff] %v388_v35  ;;  %609 = vst [vmem:[%s1033_s1 + $0x118] sm:$0xff] %v396_v36  ;;  %v436_v47 = vxor.u32 2147483648, %v618_v44 }
  0x1d   :  { %611 = vst [vmem:[%s1033_s1 + $0x128] sm:$0xff] %v404_v37  ;;  %v444_v48 = vxor.u32 2147483648, %v620_v45  ;;  %v452_v49 = vxor.u32 2147483648, %v622_v46  ;;  %v624_v50 = vld [vmem:[%s1032_s0 + $0x198] sm:$0xff]  ;;  %v626_v51 = vld [vmem:[%s1032_s0 + $0x1a8] sm:$0xff]  ;;  %613 = vst [vmem:[%s1033_s1 + $0x138] sm:$0xff] %v412_v41 }
  0x1e   :  { %v628_v52 = vld [vmem:[%s1032_s0 + $0x1b8] sm:$0xff]  ;;  %615 = vst [vmem:[%s1033_s1 + $0x148] sm:$0xff] %v420_v42  ;;  %617 = vst [vmem:[%s1033_s1 + $0x158] sm:$0xff] %v428_v43  ;;  %v460_v53 = vxor.u32 2147483648, %v624_v50  ;;  %v468_v54 = vxor.u32 2147483648, %v626_v51  ;;  %v630_v56 = vld [vmem:[%s1032_s0 + $0x1c8] sm:$0xff] }
  0x1f   :  { %v476_v55 = vxor.u32 2147483648, %v628_v52  ;;  %v632_v57 = vld [vmem:[%s1032_s0 + $0x1d8] sm:$0xff]  ;;  %v634_v58 = vld [vmem:[%s1032_s0 + $0x1e8] sm:$0xff]  ;;  %619 = vst [vmem:[%s1033_s1 + $0x168] sm:$0xff] %v436_v47  ;;  %621 = vst [vmem:[%s1033_s1 + $0x178] sm:$0xff] %v444_v48  ;;  %v484_v59 = vxor.u32 2147483648, %v630_v56 }
  0x20   :  { %623 = vst [vmem:[%s1033_s1 + $0x188] sm:$0xff] %v452_v49  ;;  %v492_v60 = vxor.u32 2147483648, %v632_v57  ;;  %v500_v61 = vxor.u32 2147483648, %v634_v58  ;;  %625 = vst [vmem:[%s1033_s1 + $0x198] sm:$0xff] %v460_v53 }
  0x21   :  { %627 = vst [vmem:[%s1033_s1 + $0x1a8] sm:$0xff] %v468_v54  ;;  %629 = vst [vmem:[%s1033_s1 + $0x1b8] sm:$0xff] %v476_v55 }
  0x22   :  { %631 = vst [vmem:[%s1033_s1 + $0x1c8] sm:$0xff] %v484_v59  ;;  %633 = vst [vmem:[%s1033_s1 + $0x1d8] sm:$0xff] %v492_v60 }
  0x23   :  { %635 = vst [vmem:[%s1033_s1 + $0x1e8] sm:$0xff] %v500_v61  ;;  %637 = vst [vmem:[%s1033_s1 + $0x1f8] sm:$0xff] %v508_v63 }

// kernel: mul.77
= control target key start
LH: loop header
LB: loop body
LE: loop exit
PB: predicated region body
PF: predicated region fallthrough
CT: control target
= control target key end

     0   :  { %s100_s0 = inlined_call_operand.vmem [shape: f32[2,1,16,16], index: 0, kind: input, shape index: {}, may-alias: {0,1}]   ;;  %s101_s1 = inlined_call_operand.vmem [shape: f32[2,1,16,16], index: 1, kind: input, shape index: {}, may-alias: {0,1}]   ;;  %s102_s2 = inlined_call_operand.vmem [shape: f32[2,1,16,16], index: 2, kind: output, shape index: {}]  }
   0x1   :  { %v3_v0 = vld [vmem:[%s100_s0] sm:$0xff]  ;;  %v40_v2 = vld [vmem:[%s100_s0 + $0x10] sm:$0xff]  ;;  %v43_v5 = vld [vmem:[%s100_s0 + $0x8] sm:$0xff] }
   0x2   :  { %v4_v1 = vld [vmem:[%s101_s1] sm:$0xff]  ;;  %v41_v4 = vld [vmem:[%s101_s1 + $0x10] sm:$0xff]  ;;  %v44_v6 = vld [vmem:[%s101_s1 + $0x8] sm:$0xff] }
   0x3   :  { %v7_v3 = vmul.f32 %v4_v1, %v3_v0  ;;  %v16_v7 = vmul.f32 %v41_v4, %v40_v2  ;;  %v26_v8 = vmul.f32 %v44_v6, %v43_v5  ;;  %v46_v9 = vld [vmem:[%s100_s0 + $0x18] sm:$0xff] }
   0x4   :  { %v47_v10 = vld [vmem:[%s101_s1 + $0x18] sm:$0xff] }
   0x5   :  { %9 = vst [vmem:[%s102_s2] sm:$0xff] %v7_v3  ;;  %v36_v11 = vmul.f32 %v47_v10, %v46_v9  ;;  %42 = vst [vmem:[%s102_s2 + $0x10] sm:$0xff] %v16_v7 }
   0x6   :  { %45 = vst [vmem:[%s102_s2 + $0x8] sm:$0xff] %v26_v8 }
   0x7   :  { %48 = vst [vmem:[%s102_s2 + $0x18] sm:$0xff] %v36_v11 }

// kernel: squeeze.8
= control target key start
LH: loop header
LB: loop body
LE: loop exit
PB: predicated region body
PF: predicated region fallthrough
CT: control target
= control target key end

     0   :  { %s15_s6 = smov 3  ;;  %s18_s7 = smov 12  ;;  %vm20_vm0 = vcmask 1043458   ;;  %vm25_vm1 = vcmask 1045508   ;;  %vm30_vm2 = vcmask 1047558   ;;  %vm4_vm3 = vcmask 1047556   ;;  %s414_s0 = inlined_call_operand.vmem [shape: f32[2,2,16,16], index: 0, kind: input, shape index: {}]   ;;  %s415_s1 = inlined_call_operand.vmem [shape: f32[2,2,256], index: 1, kind: output, shape index: {}]  }
   0x1   :  { %v235_v0 = vld [vmem:[%s414_s0 + $0x7] ss:$16 sm:%s15_s6]   ;;  %v236_v1 = vld [vmem:[%s414_s0 - $0x11] ss:$16 sm:%s18_s7]   ;;  %s23_s12 = smov 48  ;;  %s28_s13 = smov 192 }
   0x2   :  { %v21_v2 = vsel %vm20_vm0, %v236_v1, %v235_v0  ;;  %v237_v3 = vld [vmem:[%s414_s0 - $0x19] ss:$16 sm:%s23_s12]   ;;  %v238_v4 = vld [vmem:[%s414_s0 - $0x31] ss:$16 sm:%s28_s13]   ;;  %s71_s18 = smov 3  ;;  %s74_s21 = smov 12 }
   0x3   :  { %v26_v5 = vsel %vm25_vm1, %v237_v3, %v21_v2  ;;  %v243_v6 = vld [vmem:[%s414_s0 + $0x5] ss:$16 sm:%s71_s18]   ;;  %s79_s22 = smov 48  ;;  %v244_v8 = vld [vmem:[%s414_s0 - $0x13] ss:$16 sm:%s74_s21]   ;;  %s84_s27 = smov 192 }
   0x4   :  { %v31_v7 = vsel %vm30_vm2, %v238_v4, %v26_v5  ;;  %v245_v9 = vld [vmem:[%s414_s0 - $0x1b] ss:$16 sm:%s79_s22]   ;;  %s273_s28 = smov 112   ;;  %v77_v10 = vsel %vm20_vm0, %v244_v8, %v243_v6  ;;  %v246_v11 = vld [vmem:[%s414_s0 - $0x33] ss:$16 sm:%s84_s27]   ;;  %s43_s2 = smov 3 }
   0x5   :  { %32 = vrot.lane.b32.xlu0 %v31_v7, %s273_s28  ;;  %s46_s3 = smov 12  ;;  %v82_v12 = vsel %vm25_vm1, %v245_v9, %v77_v10  ;;  %v239_v13 = vld [vmem:[%s414_s0 + $0x6] ss:$16 sm:%s43_s2]   ;;  %s51_s8 = smov 48  ;;  %vm6_vm4 = vcmask 130048   ;;  %vm34_vm5 = vcmask 1048448  }
   0x6   :  { %v240_v14 = vld [vmem:[%s414_s0 - $0x12] ss:$16 sm:%s46_s3]   ;;  %s56_s9 = smov 192  ;;  %v87_v15 = vsel %vm30_vm2, %v246_v11, %v82_v12  ;;  %v241_v17 = vld [vmem:[%s414_s0 - $0x1a] ss:$16 sm:%s51_s8]   ;;  %s99_s14 = smov 3 }
   0x7   :  { %v49_v16 = vsel %vm20_vm0, %v240_v14, %v239_v13  ;;  %v242_v18 = vld [vmem:[%s414_s0 - $0x32] ss:$16 sm:%s56_s9]   ;;  %s274_s15 = smov 80   ;;  %v247_v20 = vld [vmem:[%s414_s0 + $0x4] ss:$16 sm:%s99_s14]   ;;  %s102_s18 = smov 12 }
   0x8   :  { %88 = vrot.lane.b32.xlu1 %v87_v15, %s274_s15  ;;  %v54_v19 = vsel %vm25_vm1, %v241_v17, %v49_v16  ;;  %s107_s19 = smov 48  ;;  %v248_v22 = vld [vmem:[%s414_s0 - $0x14] ss:$16 sm:%s102_s18]   ;;  %s112_s24 = smov 192  ;;  %vm62_vm6 = vcmask 917248   ;;  %vm90_vm7 = vcmask 786048  }
   0x9   :  { %v59_v21 = vsel %vm30_vm2, %v242_v18, %v54_v19  ;;  %v249_v23 = vld [vmem:[%s414_s0 - $0x1c] ss:$16 sm:%s107_s19]   ;;  %s275_s25 = smov 96   ;;  %v105_v24 = vsel %vm20_vm0, %v248_v22, %v247_v20  ;;  %v250_v25 = vld [vmem:[%s414_s0 - $0x34] ss:$16 sm:%s112_s24]   ;;  %s127_s28 = smov 3 }
   0xa   :  { %60 = vrot.lane.b32.xlu0 %v59_v21, %s275_s25  ;;  %s130_s29 = smov 12  ;;  %v110_v26 = vsel %vm25_vm1, %v249_v23, %v105_v24  ;;  %v251_v27 = vld [vmem:[%s414_s0 + $0x3] ss:$16 sm:%s127_s28]   ;;  %s135_s5 = smov 48  ;;  %vm118_vm8 = vcmask 654848   ;;  %vm146_vm9 = vcmask 523648  }
   0xb   :  { %v252_v28 = vld [vmem:[%s414_s0 - $0x15] ss:$16 sm:%s130_s29]   ;;  %s140_s6 = smov 192  ;;  %v115_v29 = vsel %vm30_vm2, %v250_v25, %v110_v26  ;;  %v253_v31 = vld [vmem:[%s414_s0 - $0x1d] ss:$16 sm:%s135_s5]   ;;  %s155_s11 = smov 3 }
   0xc   :  { %v133_v30 = vsel %vm20_vm0, %v252_v28, %v251_v27  ;;  %v254_v32 = vld [vmem:[%s414_s0 - $0x35] ss:$16 sm:%s140_s6]   ;;  %s276_s12 = smov 64   ;;  %v255_v34 = vld [vmem:[%s414_s0 + $0x2] ss:$16 sm:%s155_s11]   ;;  %s158_s15 = smov 12 }
   0xd   :  { %116 = vrot.lane.b32.xlu1 %v115_v29, %s276_s12  ;;  %v138_v33 = vsel %vm25_vm1, %v253_v31, %v133_v30  ;;  %s163_s16 = smov 48  ;;  %v256_v36 = vld [vmem:[%s414_s0 - $0x16] ss:$16 sm:%s158_s15]   ;;  %s168_s21 = smov 192  ;;  %vm174_vm10 = vcmask 392448   ;;  %vm202_vm11 = vcmask 261248  }
   0xe   :  { %v143_v35 = vsel %vm30_vm2, %v254_v32, %v138_v33  ;;  %v257_v37 = vld [vmem:[%s414_s0 - $0x1e] ss:$16 sm:%s163_s16]   ;;  %s277_s22 = smov 48   ;;  %v161_v38 = vsel %vm20_vm0, %v256_v36, %v255_v34  ;;  %v258_v39 = vld [vmem:[%s414_s0 - $0x36] ss:$16 sm:%s168_s21]   ;;  %s183_s25 = smov 3 }
   0xf   :  { %144 = vrot.lane.b32.xlu0 %v143_v35, %s277_s22  ;;  %s186_s26 = smov 12  ;;  %v166_v40 = vsel %vm25_vm1, %v257_v37, %v161_v38  ;;  %v259_v41 = vld [vmem:[%s414_s0 + $0x1] ss:$16 sm:%s183_s25]   ;;  %s191_s2 = smov 48 }
  0x10   :  { %v260_v42 = vld [vmem:[%s414_s0 - $0x17] ss:$16 sm:%s186_s26]   ;;  %s196_s3 = smov 192  ;;  %v171_v43 = vsel %vm30_vm2, %v258_v39, %v166_v40  ;;  %v261_v45 = vld [vmem:[%s414_s0 - $0x1f] ss:$16 sm:%s191_s2]   ;;  %s278_s8 = smov 32  }
  0x11   :  { %v189_v44 = vsel %vm20_vm0, %v260_v42, %v259_v41  ;;  %v262_v46 = vld [vmem:[%s414_s0 - $0x37] ss:$16 sm:%s196_s3]   ;;  %172 = vrot.lane.b32.xlu1 %v171_v43, %s278_s8  ;;  %v2_v48 = vld [vmem:[%s414_s0] ss:$8 sm:$0xf]  }
  0x12   :  { %v194_v47 = vsel %vm25_vm1, %v261_v45, %v189_v44  ;;  %v3_v49 = vld [vmem:[%s414_s0] ss:$8 sm:$0xf0]   ;;  %s279_s0 = smov 16  }
  0x13   :  { %v199_v50 = vsel %vm30_vm2, %v262_v46, %v194_v47  ;;  %v5_v51 = vsel %vm4_vm3, %v3_v49, %v2_v48 }
  0x14   :  { %200 = vrot.lane.b32.xlu0 %v199_v50, %s279_s0  ;;  %7 = vst.msk [vmem:[#allocation0] ss:$8 sm:$0x3] %vm6_vm4, %v5_v51   ;;  %9 = vst.msk [vmem:[#allocation0 - $0xf] ss:$8 sm:$0xc] %vm6_vm4, %v5_v51  }
  0x15   :  { %11 = vst.msk [vmem:[#allocation0 - $0x10] ss:$8 sm:$0x30] %vm6_vm4, %v5_v51   ;;  %13 = vst.msk [vmem:[#allocation0 - $0x1f] ss:$8 sm:$0xc0] %vm6_vm4, %v5_v51  }
  0x77   :  { %v33_v52 = vpop.permute.xlu0 %32  }
  0x78   :  { %35 = vst.msk [vmem:[#allocation0] sm:$0x3] %vm34_vm5, %v33_v52   ;;  %37 = vst.msk [vmem:[#allocation0 + $0x6] sm:$0xc] %vm34_vm5, %v33_v52  }
  0x79   :  { %39 = vst.msk [vmem:[#allocation0 + $0xc] sm:$0x30] %vm34_vm5, %v33_v52   ;;  %41 = vst.msk [vmem:[#allocation0 + $0x12] sm:$0xc0] %vm34_vm5, %v33_v52  }
  0x7a   :  { %v89_v53 = vpop.permute.xlu1 %88  }
  0x7c   :  { %v61_v54 = vpop.permute.xlu0 %60  }
  0x7d   :  { %63 = vst.msk [vmem:[#allocation0] sm:$0x3] %vm62_vm6, %v61_v54   ;;  %65 = vst.msk [vmem:[#allocation0 + $0x6] sm:$0xc] %vm62_vm6, %v61_v54  }
  0x7e   :  { %67 = vst.msk [vmem:[#allocation0 + $0xc] sm:$0x30] %vm62_vm6, %v61_v54   ;;  %69 = vst.msk [vmem:[#allocation0 + $0x12] sm:$0xc0] %vm62_vm6, %v61_v54  }
  0x7f   :  { %91 = vst.msk [vmem:[#allocation0] sm:$0x3] %vm90_vm7, %v89_v53   ;;  %93 = vst.msk [vmem:[#allocation0 + $0x6] sm:$0xc] %vm90_vm7, %v89_v53   ;;  %v117_v55 = vpop.permute.xlu1 %116  }
  0x80   :  { %95 = vst.msk [vmem:[#allocation0 + $0xc] sm:$0x30] %vm90_vm7, %v89_v53   ;;  %97 = vst.msk [vmem:[#allocation0 + $0x12] sm:$0xc0] %vm90_vm7, %v89_v53  }
  0x81   :  { %119 = vst.msk [vmem:[#allocation0] sm:$0x3] %vm118_vm8, %v117_v55   ;;  %121 = vst.msk [vmem:[#allocation0 + $0x6] sm:$0xc] %vm118_vm8, %v117_v55   ;;  %v145_v56 = vpop.permute.xlu0 %144  }
  0x82   :  { %123 = vst.msk [vmem:[#allocation0 + $0xc] sm:$0x30] %vm118_vm8, %v117_v55   ;;  %125 = vst.msk [vmem:[#allocation0 + $0x12] sm:$0xc0] %vm118_vm8, %v117_v55  }
  0x83   :  { %147 = vst.msk [vmem:[#allocation0] sm:$0x3] %vm146_vm9, %v145_v56   ;;  %149 = vst.msk [vmem:[#allocation0 + $0x6] sm:$0xc] %vm146_vm9, %v145_v56   ;;  %v173_v57 = vpop.permute.xlu1 %172  }
  0x84   :  { %151 = vst.msk [vmem:[#allocation0 + $0xc] sm:$0x30] %vm146_vm9, %v145_v56   ;;  %153 = vst.msk [vmem:[#allocation0 + $0x12] sm:$0xc0] %vm146_vm9, %v145_v56  }
  0x85   :  { %175 = vst.msk [vmem:[#allocation0] sm:$0x3] %vm174_vm10, %v173_v57   ;;  %177 = vst.msk [vmem:[#allocation0 + $0x6] sm:$0xc] %vm174_vm10, %v173_v57  }
  0x86   :  { %179 = vst.msk [vmem:[#allocation0 + $0xc] sm:$0x30] %vm174_vm10, %v173_v57   ;;  %181 = vst.msk [vmem:[#allocation0 + $0x12] sm:$0xc0] %vm174_vm10, %v173_v57   ;;  %v201_v58 = vpop.permute.xlu0 %200  }
  0x87   :  { %203 = vst.msk [vmem:[#allocation0] sm:$0x3] %vm202_vm11, %v201_v58   ;;  %205 = vst.msk [vmem:[#allocation0 + $0x6] sm:$0xc] %vm202_vm11, %v201_v58  }
  0x88   :  { %207 = vst.msk [vmem:[#allocation0 + $0xc] sm:$0x30] %vm202_vm11, %v201_v58   ;;  %209 = vst.msk [vmem:[#allocation0 + $0x12] sm:$0xc0] %vm202_vm11, %v201_v58  }
  0x8e   :  { %v213_v59 = vld [vmem:[#allocation0] sm:$0x3]  ;;  %v217_v60 = vld [vmem:[#allocation0 + $0x8] sm:$0x3] }
  0x8f   :  { %v222_v61 = vld [vmem:[#allocation0 + $0x10] sm:$0x3]  ;;  %215 = vst [vmem:[%s415_s1] sm:$0x3] %v213_v59  ;;  %263 = vst [vmem:[%s415_s1 + $0x2] sm:$0x3] %v217_v60 }
  0x90   :  { %264 = vst [vmem:[%s415_s1 + $0x4] sm:$0x3] %v222_v61  ;;  %v228_v62 = vld [vmem:[#allocation0 + $0x18] sm:$0x3] }
  0x91   :  { %265 = vst [vmem:[%s415_s1 + $0x6] sm:$0x3] %v228_v62 }

// kernel: sensitivity_network_forward.1
= control target key start
LH: loop header
LB: loop body
LE: loop exit
PB: predicated region body
PF: predicated region fallthrough
CT: control target
= control target key end

     0   :  { %s10278_s0 = inlined_call_operand.vmem [shape: f32[4], index: 0, kind: input, shape index: {}]   ;;  %s10279_s1 = inlined_call_operand.vmem [shape: f32[8], index: 1, kind: input, shape index: {}]   ;;  %s10280_s2 = inlined_call_operand.vmem [shape: f32[8], index: 2, kind: input, shape index: {}]   ;;  %s10281_s3 = inlined_call_operand.vmem [shape: f32[2,2,256], index: 3, kind: input, shape index: {}]   ;;  %s10282_s4 = inlined_call_operand.vmem [shape: f32[2,2,256], index: 4, kind: input, shape index: {}]   ;;  %s10283_s5 = inlined_call_operand.vmem [shape: f32[2,8,256], index: 5, kind: input, shape index: {}]   ;;  %s10284_s6 = inlined_call_operand.vmem [shape: f32[2,8,256], index: 6, kind: input, shape index: {}]   ;;  %s10285_s7 = inlined_call_operand.vmem [shape: f32[2,8,512], index: 7, kind: input, shape index: {}]   ;;  %s10286_s8 = inlined_call_operand.vmem [shape: f32[2,8,512], index: 8, kind: input, shape index: {}]   ;;  %s10287_s9 = inlined_call_operand.vmem [shape: f32[512,512], index: 9, kind: input, shape index: {}]   ;;  %s10288_s10 = inlined_call_operand.vmem [shape: f32[512,512], index: 10, kind: input, shape index: {}]   ;;  %s10289_s11 = inlined_call_operand.vmem [shape: f32[8,18], index: 11, kind: input, shape index: {}]   ;;  %s10290_s12 = inlined_call_operand.vmem [shape: f32[8,1], index: 12, kind: input, shape index: {}]   ;;  %s10291_s13 = inlined_call_operand.vmem [shape: f32[2,72], index: 13, kind: input, shape index: {}]   ;;  %s10292_s14 = inlined_call_operand.vmem [shape: f32[2,1], index: 14, kind: input, shape index: {}]   ;;  %s10293_s15 = inlined_call_operand.vmem [shape: f32[9,256], index: 15, kind: input, shape index: {}]   ;;  %s10294_s16 = inlined_call_operand.vmem [shape: f32[8,2], index: 16, kind: input, shape index: {}]   ;;  %s10295_s17 = inlined_call_operand.vmem [shape: f32[2,8], index: 17, kind: input, shape index: {}]   ;;  %s10296_s18 = inlined_call_operand.vmem [shape: f32[2,2,256], index: 18, kind: output, shape index: {0}]   ;;  %s10297_s19 = inlined_call_operand.vmem [shape: f32[2,2,256], index: 19, kind: output, shape index: {1}]  }
   0x1   :  { %10590 = sst [smem:[#allocation261_spill]] %s10278_s0 }
   0x2   :  { %10591 = sst [smem:[#allocation262_spill]] %s10279_s1 }
   0x3   :  { %10592 = sst [smem:[#allocation263_spill]] %s10280_s2 }
   0x4   :  { %10593 = sst [smem:[#allocation264_spill]] %s10281_s3 }
   0x5   :  { %10594 = sst [smem:[#allocation265_spill]] %s10282_s4 }
   0x6   :  { %10595 = sst [smem:[#allocation266_spill]] %s10283_s5 }
   0x7   :  { %10596 = sst [smem:[#allocation267_spill]] %s10289_s11 }
   0x8   :  { %10597 = sst [smem:[#allocation268_spill]] %s10290_s12 }
   0x9   :  { %10598 = sst [smem:[#allocation269_spill]] %s10291_s13 }
   0xa   :  { %10599 = sst [smem:[#allocation270_spill]] %s10292_s14 }
   0xb   :  { %10600 = sst [smem:[#allocation271_spill]] %s10293_s15 }
   0xc   :  { %10601 = sst [smem:[#allocation272_spill]] %s10296_s18 }
   0xd   :  { %10602 = sst [smem:[#allocation273_spill]] %s10297_s19 }
   0xe   :  { %25 = vsyncpa [#allocation3], 0 }
   0xf   :  { %26 = vsyncpa [#allocation5], 0  ;;  %s6445_s0 = smov 0  }
  0x10 LB: > { %10603 = sst [smem:[#allocation9_spill]] %s6329_s0  ;;  %s6451_s30 = sadd.s32 4294967295, %s6329_s0   ;;  %s6329_s0 = sphi %s6445_s0, %s32_s0  }
  0x11   : > { %p5004_p0 = scmp.ge.s32.totalorder %s6329_s0, 1  ;;  %p497_p1 = scmp.lt.s32.totalorder %s6329_s0, 3 }
  0x12   : > { %s10604_s1 = sld [smem:[#allocation262_spill]]  ;;  %p10298_p3 = scmp.eq.s32.totalorder %s6451_s30, 0 }
  0x13   : > { %p6458_p2 = pnand %p5004_p0, %p497_p1  ;;  %s10606_s25 = sld [smem:[#allocation261_spill]] }
  0x14   : > { %s10607_s28 = sld [smem:[#allocation263_spill]] }
  0x15   : > { %s10605_s2 = scalar_select %p6458_p2, 1, 0 }
  0x16   : > { %p6207_p4 = pneg %p6458_p2 }
  0x18   : > { %s521_s22 = sshll.u32 %s10604_s1, 4  ;;  %p6473_p5 = pnand %p10298_p3, %p6207_p4  ;;  %s522_s22 = int_to_ptr.vmem [resolvable:$true] %s521_s22 }
  0x19   : > { %s510_s3 = sshll.u32 %s10606_s25, 4  ;;  %s6270_s21 = scalar_lea.vmem %s522_s22, 16  ;;  %s511_s3 = int_to_ptr.vmem [resolvable:$true] %s510_s3 }
  0x1a   : > { %s532_s29 = sshll.u32 %s10607_s28, 4  ;;  %p6271_p6 = scmp.ne.s32.totalorder %s522_s22, %s6270_s21  ;;  %s6477_s29 = int_to_ptr.vmem [resolvable:$true] %s532_s29 }
  0x1b   : > { %p6272_p7 = pneg %p6473_p5  ;;  %p6278_p10 = scmp.lt.s32.totalorder %s522_s22, %s522_s22 }
  0x1c   : > { %p6279_p11 = scmp.lt.s32.totalorder %s6270_s21, %s6270_s21 }
  0x1d   : > { %p6273_p8 = pnand %p6272_p7, %p6271_p6 }
  0x1e   : > { %p6280_p12 = por %p6279_p11, %p6278_p10 }
  0x1f   : > { %p6274_p9 = pneg %p6273_p8 }
  0x21   : > { %p6281_p13 = pnand %p6280_p12, %p6274_p9 }
  0x23   : > { %6284 = shalt.err (!%p6281_p13)
}
  0x24   : > { %s6331_s1 = smov [#allocation4]   ;;  %s6285_s23 = scalar_lea.vmem %s511_s3, 16 }
  0x25   : > { %6213 = dma.vmem_to_smem (!%p6473_p5), %s522_s22, 16, %s6331_s1, [#allocation5]  }
  0x26   : > { %p6286_p0 = scmp.ne.s32.totalorder %s511_s3, %s6285_s23  ;;  %p6293_p3 = scmp.lt.s32.totalorder %s511_s3, %s511_s3 }
  0x27   : > { %p6294_p2 = scmp.lt.s32.totalorder %s6285_s23, %s6285_s23 }
  0x28   : > { %p6288_p1 = pnand %p6286_p0, %p6272_p7 }
  0x29   : > { %p6295_p6 = por %p6294_p2, %p6293_p3 }
  0x2a   : > { %p6289_p4 = pneg %p6288_p1 }
  0x2c   : > { %p6296_p8 = pnand %p6295_p6, %p6289_p4 }
  0x2e   : > { %6299 = shalt.err (!%p6296_p8)
}
  0x2f   : > { %s6332_s24 = smov [#allocation2]   ;;  %s6300_s22 = scalar_lea.vmem %s6477_s29, 16 }
  0x30   : > { %6210 = dma.vmem_to_smem (!%p6473_p5), %s511_s3, 16, %s6332_s24, [#allocation3]  }
  0x31   : > { %p6301_p9 = scmp.ne.s32.totalorder %s6477_s29, %s6300_s22  ;;  %p6308_p12 = scmp.lt.s32.totalorder %s6477_s29, %s6477_s29 }
  0x32   : > { %p6309_p13 = scmp.lt.s32.totalorder %s6300_s22, %s6300_s22 }
  0x33   : > { %p6303_p10 = pnand %p6301_p9, %p6272_p7 }
  0x34   : > { %p6310_p2 = por %p6309_p13, %p6308_p12 }
  0x35   : > { %p6304_p11 = pneg %p6303_p10 }
  0x37   : > { %p6311_p3 = pnand %p6310_p2, %p6304_p11 }
  0x39   : > { %6314 = shalt.err (!%p6311_p3)
}
  0x3a   : > { %s6333_s25 = smov [#allocation6]   ;;  %p10609_p0 = scmp.ne.s32.totalorder %s10605_s2, 0 }
  0x3b   : > { %6216 = dma.vmem_to_smem (!%p6473_p5), %s6477_s29, 16, %s6333_s25, [#allocation5]  }
  0x3c   : > { %620 = sbr.rel (%p10609_p0) target bundleno = 3748 (0xea4), region = 92 }
  0x43   : > { %p10610_p1 = scmp.eq.s32.totalorder %s6451_s30, 0 }
  0x45   : > { %6320 = dma.done.wait (%p10610_p1), [#allocation3], 16   ;;  %p10611_p7 = pmov %p10610_p1 }
  0x46   : > { %p10612_p4 = pmov %p10610_p1 }
  0x47   : > { %6322 = vsyncadd (%p10611_p7), [#allocation3], 4294967280 }
  0x48   : > { %6324 = dma.done.wait (%p10612_p4), [#allocation5], 32   ;;  %p10613_p6 = pmov %p10610_p1 }
  0x4a   : > { %6326 = vsyncadd (%p10613_p6), [#allocation5], 4294967264 }
  0x4b   : > { %634 = sfence }
  0x4c   : > { %p715_p5 = scmp.lt.s32.totalorder %s6451_s30, 1  ;;  %s5029_s2 = sshll.u32 %s6451_s30, 1  ;;  %v1322_v1 = vlaneseq  ;;  %vm1343_vm0 = vcmask 1040384   ;;  %v10330_v34 = vmov 0.0   ;;  %v6342_v35 = vmov 0  }
  0x4d   : > { %s756_s3 = sld [smem:[#allocation2 + %s5029_s2]]  ;;  %s757_s26 = sadd.s32 1, %s5029_s2  ;;  %1614 = vmatprep.mubr.f32.mxu0 %v10330_v34  ;;  %1760 = vmatprep.mubr.f32.mxu1 %v10330_v34  ;;  %vm1520_vm7 = vcmask 1041408   ;;  %vm1523_vm9 = vcmask 1043456   ;;  %vm1526_vm10 = vcmask 1045504   ;;  %vm1540_vm12 = vcmask 146432  }
  0x4e   : > { %s6514_s27 = scalar_select %p715_p5, %s6451_s30, 1  ;;  %v6562_v8 = vshrl.u32 %v1322_v1, 7  ;;  %6245 = vset.pattern.permute.xlu0 %v6342_v35  ;;  %v6677_v41 = vand.u32 127, %v1322_v1  ;;  %vm1692_vm13 = vcmask 588800   ;;  %vm2184_vm14 = vcmask 15360  }
  0x4f   : > { %s758_s28 = sld [smem:[#allocation2 + %s757_s26]]  ;;  %s6517_s29 = sshll.u32 %s6451_s30, 2  ;;  %vm2947_vm15 = vcmask 64512  }
  0x50   : > { %s6520_s20 = sshll.u32 %s6514_s27, 2  ;;  %s6523_s21 = sld [smem:[#allocation4 + %s6517_s29]]  ;;  %v6573_v14 = vsub.s32 0, %v6562_v8  ;;  %v6579_v18 = vsub.s32 2, %v6562_v8  ;;  %v6612_v26 = vsub.s32 3, %v6562_v8  ;;  %v6615_v27 = vsub.s32 1, %v6562_v8 }
  0x51   : > { %10614 = sst [smem:[#allocation10_spill]] %s6520_s20  ;;  %s10615_s24 = sld [smem:[#allocation264_spill]]  ;;  %v1425_v42 = vsub.s32 5, %v6562_v8  ;;  %v1442_v47 = vsub.s32 6, %v6562_v8  ;;  %vm1420_vm1 = vcmp.lt.s32.totalorder %v6677_v41, 127  ;;  %vm1369_vm2 = vcmp.lt.s32.totalorder %v6677_v41, 16 }
  0x52   : > { %s10616_s4 = sld [smem:[#allocation265_spill]]  ;;  %s10303_s26 = sadd.s32 1, %s6517_s29  ;;  %vm1386_vm3 = vcmp.lt.s32.totalorder %v6677_v41, 15  ;;  %vm1437_vm4 = vcmp.lt.s32.totalorder %v6677_v41, 113  ;;  %vm1352_vm5 = vcmp.lt.s32.totalorder %v6677_v41, 17  ;;  %vm1403_vm6 = vcmp.lt.s32.totalorder %v6677_v41, 1 }
  0x53   : > { %s10301_s0 = sadd.s32 2, %s6517_s29  ;;  %s6542_s19 = sld [smem:[#allocation4 + %s10303_s26]]  ;;  %v6549_v3 = vstv %s756_s3  ;;  %vm1454_vm8 = vcmp.lt.s32.totalorder %v6677_v41, 112  ;;  %vm1471_vm11 = vcmp.lt.s32.totalorder %v6677_v41, 111 }
  0x54   : > { %s6546_s1 = sld [smem:[#allocation4 + %s10301_s0]]  ;;  %10617 = vst [vmem:[#allocation11_spill] sm:$0xff] %v6549_v3  ;;  %s10302_s23 = sadd.s32 3, %s6517_s29 }
  0x55   : > { %v6557_v5 = vstv %s758_s28  ;;  %s10306_s3 = smov 127   ;;  %s10318_s28 = smov 16  }
  0x56   : > { %10618 = vst [vmem:[#allocation12_spill] sm:$0xff] %v6557_v5  ;;  %v10329_v7 = vstv %s6523_s21  ;;  %s10312_s30 = smov 15   ;;  %s10304_s25 = smov 113  }
  0x57   : > { %s6529_s22 = scalar_lea.vmem %s10615_s24, %s6520_s20  ;;  %s6555_s24 = sld [smem:[#allocation4 + %s10302_s23]] }
  0x58   : > { %s6535_s2 = scalar_lea.vmem %s10616_s4, %s6520_s20  ;;  %v1305_v0 = vld [vmem:[%s6529_s22] sm:$0xf]  ;;  %s10316_s0 = smov 17  }
  0x59   : > { %v1306_v2 = vld [vmem:[%s6535_s2] sm:$0xf]  ;;  %v1308_v4 = vsub.f32 %v1305_v0, %v6549_v3  ;;  %v10327_v10 = vstv %s6542_s19  ;;  %s10308_s23 = smov 1   ;;  %s10310_s26 = smov 112  }
  0x5a   : > { %v1310_v6 = vsub.f32 %v1306_v2, %v6557_v5  ;;  %v10328_v11 = vstv %s6546_s1  ;;  %s10619_s12 = sld [smem:[#allocation268_spill]]  ;;  %s10620_s15 = sld [smem:[#allocation271_spill]] }
  0x5b   : > { %v1312_v9 = vmul.f32 %v10329_v7, %v1308_v4  ;;  %v1317_v13 = vmul.f32 %v10328_v11, %v1308_v4  ;;  %s10621_s11 = sld [smem:[#allocation267_spill]]  ;;  %s10628_s4 = smov 111  }
  0x5c   : > { %v1314_v12 = vmul.f32 %v10327_v10, %v1310_v6  ;;  %s10629_s14 = sld [smem:[#allocation270_spill]]  ;;  %s10630_s13 = sld [smem:[#allocation269_spill]]  ;;  %v6344_v10 = vmov 1983009808  }
  0x5d   : > { %v10326_v15 = vstv %s6555_s24  ;;  %s10645_s18 = sadd.s32 2, %s6517_s29  ;;  %v2155_v11 = vunpack.c.l.s4 %v6344_v10  ;;  %s10691_s5 = sld [smem:[#allocation266_spill]] }
  0x5e   : > { %v1315_v16 = vadd.f32 %v1314_v12, %v1312_v9  ;;  %v1319_v17 = vmul.f32 %v10326_v15, %v1310_v6 }
  0x60   : > { %v1320_v19 = vadd.f32 %v1319_v17, %v1317_v13  ;;  %v1325_v20 = vrot.slane %v1315_v16, %v6573_v14  ;;  %v1329_v22 = vrot.slane %v1315_v16, %v6579_v18  ;;  %v1774_v28 = vrot.slane %v1315_v16, %v6612_v26  ;;  %v1296_v36 = vld [vmem:[%s10619_s12] sm:$0xff]  ;;  %v1300_v46 = vld [vmem:[%s10620_s15 + $0x8] sm:$0xff] }
  0x61   : > { %v1770_v30 = vrot.slane %v1315_v16, %v6615_v27  ;;  %v1299_v45 = vld [vmem:[%s10620_s15] sm:$0xff]  ;;  %v6690_v49 = vrot.slane %v1300_v46, %v1425_v42  ;;  %v6697_v53 = vrot.slane %v1300_v46, %v6615_v27  ;;  %v6704_v55 = vrot.slane %v1300_v46, %v6579_v18 }
  0x62   : > { %v1336_v21 = vrot.slane %v1320_v19, %v6573_v14  ;;  %v1340_v23 = vrot.slane %v1320_v19, %v6579_v18  ;;  %v1784_v29 = vrot.slane %v1320_v19, %v6612_v26  ;;  %v1780_v31 = vrot.slane %v1320_v19, %v6615_v27 }
  0x63   : > { %v6688_v48 = vrot.slane %v1299_v45, %v1425_v42  ;;  %v6694_v52 = vrot.slane %v1299_v45, %v6615_v27  ;;  %v6701_v54 = vrot.slane %v1299_v45, %v6579_v18  ;;  %v6707_v56 = vrot.slane %v1299_v45, %v1442_v47 }
  0x64   : > { %v6586_v24 = vsel %vm1343_vm0, %v1325_v20, %v1336_v21  ;;  %v6593_v25 = vsel %vm1343_vm0, %v1329_v22, %v1340_v23  ;;  %v6630_v32 = vsel %vm1343_vm0, %v1774_v28, %v1784_v29  ;;  %v6633_v33 = vsel %vm1343_vm0, %v1770_v30, %v1780_v31 }
  0x65   : > { %1416 = vrot.lane.b32.xlu1 %v6586_v24, %s10306_s3  ;;  %1365 = vrot.lane.b32.xlu0 %v6586_v24, %s10318_s28  ;;  %v6709_v57 = vrot.slane %v1300_v46, %v1442_v47  ;;  %v6713_v58 = vrot.slane %v1299_v45, %v6573_v14  ;;  %v6716_v59 = vrot.slane %v1300_v46, %v6573_v14  ;;  %v1459_v16 = vsub.s32 7, %v6562_v8 }
  0x66   : > { %v6732_v6 = vrot.slane %v1299_v45, %v6612_v26  ;;  %v6735_v9 = vrot.slane %v1300_v46, %v6612_v26 }
  0x67   : > { %v6761_v42 = vrot.slane %v1299_v45, %v1459_v16 }
  0x69   : > { %1418 = vrot.lane.b32.xlu1 %v6593_v25, %s10306_s3  ;;  %1367 = vrot.lane.b32.xlu0 %v6593_v25, %s10318_s28 }
  0x6d   : > { %1384 = vrot.lane.b32.xlu1 %v6593_v25, %s10312_s30  ;;  %1382 = vrot.lane.b32.xlu0 %v6586_v24, %s10312_s30 }
  0x71   : > { %1435 = vrot.lane.b32.xlu1 %v6593_v25, %s10304_s25  ;;  %1433 = vrot.lane.b32.xlu0 %v6586_v24, %s10304_s25 }
  0x75   : > { %1348 = vrot.lane.b32.xlu1 %v6593_v25, %s10316_s0  ;;  %1346 = vrot.lane.b32.xlu0 %v6586_v24, %s10316_s0 }
  0x79   : > { %1401 = vrot.lane.b32.xlu1 %v6593_v25, %s10308_s23  ;;  %1399 = vrot.lane.b32.xlu0 %v6586_v24, %s10308_s23 }
  0x7d   : > { %1452 = vrot.lane.b32.xlu1 %v6593_v25, %s10310_s26  ;;  %1450 = vrot.lane.b32.xlu0 %v6586_v24, %s10310_s26 }
  0x81   : > { %1799 = vrot.lane.b32.xlu1 %v6630_v32, %s10318_s28  ;;  %1797 = vrot.lane.b32.xlu0 %v6633_v33, %s10318_s28 }
  0x85   : > { %1823 = vrot.lane.b32.xlu1 %v6630_v32, %s10306_s3  ;;  %1821 = vrot.lane.b32.xlu0 %v6633_v33, %s10306_s3  ;;  %s10625_s3 = smov 127  }
  0x89   : > { %1807 = vrot.lane.b32.xlu1 %v6630_v32, %s10312_s30  ;;  %1805 = vrot.lane.b32.xlu0 %v6633_v33, %s10312_s30  ;;  %s10626_s30 = smov 113  }
  0x8d   : > { %1831 = vrot.lane.b32.xlu1 %v6630_v32, %s10304_s25  ;;  %1829 = vrot.lane.b32.xlu0 %v6633_v33, %s10304_s25  ;;  %s10314_s25 = smov 111  }
  0x91   : > { %1791 = vrot.lane.b32.xlu1 %v6630_v32, %s10316_s0  ;;  %1789 = vrot.lane.b32.xlu0 %v6633_v33, %s10316_s0  ;;  %s10622_s0 = smov 17  }
  0x95   : > { %1815 = vrot.lane.b32.xlu1 %v6630_v32, %s10308_s23  ;;  %1813 = vrot.lane.b32.xlu0 %v6633_v33, %s10308_s23  ;;  %s10624_s23 = smov 1  }
  0x99   : > { %1839 = vrot.lane.b32.xlu1 %v6630_v32, %s10310_s26  ;;  %1837 = vrot.lane.b32.xlu0 %v6633_v33, %s10310_s26  ;;  %s10623_s26 = smov 15  }
  0x9d   : > { %1469 = vrot.lane.b32.xlu1 %v6593_v25, %s10314_s25  ;;  %1467 = vrot.lane.b32.xlu0 %v6586_v24, %s10314_s25 }
  0xa1   : > { %1847 = vrot.lane.b32.xlu1 %v6630_v32, %s10314_s25  ;;  %1845 = vrot.lane.b32.xlu0 %v6633_v33, %s10314_s25  ;;  %s10627_s25 = smov 112  }
  0xa5   : > { %1537 = vperm.xlu0 %6245, %v1296_v36  }
  0xd7   : > { %v1417_v37 = vpop.permute.xlu1 %1416  ;;  %v1366_v38 = vpop.permute.xlu0 %1365 }
  0xdb   : > { %v1419_v39 = vpop.permute.xlu1 %1418  ;;  %v1368_v40 = vpop.permute.xlu0 %1367 }
  0xdc   : > { %v1421_v60 = vsel %vm1420_vm1, %v1417_v37, %v1419_v39  ;;  %v1422_v61 = vsel %vm1420_vm1, %v1419_v39, %v1417_v37  ;;  %v1370_v62 = vsel %vm1369_vm2, %v1366_v38, %v1368_v40  ;;  %v1371_v63 = vsel %vm1369_vm2, %v1368_v40, %v1366_v38 }
  0xdd   : > { %v1431_v17 = vmul.f32 %v6688_v48, %v1421_v60  ;;  %v1432_v19 = vmul.f32 %v6690_v49, %v1422_v61  ;;  %v1380_v20 = vmul.f32 %v6694_v52, %v1371_v63  ;;  %v1381_v21 = vmul.f32 %v6697_v53, %v1370_v62 }
  0xdf   : > { %v1385_v43 = vpop.permute.xlu1 %1384  ;;  %v1383_v44 = vpop.permute.xlu0 %1382  ;;  %v1487_v47 = vrot.slane %v1381_v21, 6  ;;  %v1504_v60 = vrot.slane %v1431_v17, 6  ;;  %v1505_v61 = vrot.slane %v1432_v19, 6 }
  0xe0   : > { %v1387_v22 = vsel %vm1386_vm3, %v1383_v44, %v1385_v43  ;;  %v1388_v23 = vsel %vm1386_vm3, %v1385_v43, %v1383_v44  ;;  %v6763_v43 = vrot.slane %v1300_v46, %v1459_v16  ;;  %v1486_v44 = vrot.slane %v1380_v20, 6 }
  0xe3   : > { %v1436_v50 = vpop.permute.xlu1 %1435  ;;  %v1434_v51 = vpop.permute.xlu0 %1433 }
  0xe4   : > { %v1438_v2 = vsel %vm1437_vm4, %v1434_v51, %v1436_v50  ;;  %v1439_v4 = vsel %vm1437_vm4, %v1436_v50, %v1434_v51  ;;  %v1397_v50 = vmul.f32 %v6701_v54, %v1388_v23  ;;  %v1398_v51 = vmul.f32 %v6704_v55, %v1387_v22 }
  0xe5   : > { %v1448_v28 = vmul.f32 %v6707_v56, %v1438_v2  ;;  %v1449_v29 = vmul.f32 %v6709_v57, %v1439_v4 }
  0xe6   : > { %v1492_v19 = vrot.slane %v1397_v50, 4  ;;  %v1493_v20 = vrot.slane %v1398_v51, 4 }
  0xe7   : > { %v1349_v0 = vpop.permute.xlu1 %1348  ;;  %v1347_v1 = vpop.permute.xlu0 %1346  ;;  %v1510_v62 = vrot.slane %v1448_v28, 4  ;;  %v1511_v63 = vrot.slane %v1449_v29, 4  ;;  %v1530_v29 = vsel %vm1520_vm7, %v6593_v25, %v1505_v61 }
  0xe8   : > { %v1353_v12 = vsel %vm1352_vm5, %v1347_v1, %v1349_v0  ;;  %v1354_v13 = vsel %vm1352_vm5, %v1349_v0, %v1347_v1 }
  0xe9   : > { %v1363_v35 = vmul.f32 %v6713_v58, %v1354_v13  ;;  %v1364_v36 = vmul.f32 %v6716_v59, %v1353_v12 }
  0xeb   : > { %v1402_v30 = vpop.permute.xlu1 %1401  ;;  %v1400_v31 = vpop.permute.xlu0 %1399  ;;  %v1522_v46 = vsel %vm1520_vm7, %v1364_v36, %v1487_v47  ;;  %v1521_v4 = vsel %vm1520_vm7, %v1363_v35, %v1486_v44  ;;  %v1532_v35 = vsel %vm1523_vm9, %v1530_v29, %v1511_v63 }
  0xec   : > { %v1404_v37 = vsel %vm1403_vm6, %v1400_v31, %v1402_v30  ;;  %v1405_v38 = vsel %vm1403_vm6, %v1402_v30, %v1400_v31  ;;  %v1529_v30 = vsel %vm1520_vm7, %v6586_v24, %v1504_v60  ;;  %v1525_v31 = vsel %vm1523_vm9, %v1522_v46, %v1493_v20 }
  0xed   : > { %v1414_v39 = vmul.f32 %v6732_v6, %v1405_v38  ;;  %v1415_v40 = vmul.f32 %v6735_v9, %v1404_v37  ;;  %v1524_v36 = vsel %vm1523_vm9, %v1521_v4, %v1492_v19  ;;  %v1531_v37 = vsel %vm1523_vm9, %v1529_v30, %v1510_v62 }
  0xef   : > { %v1453_v0 = vpop.permute.xlu1 %1452  ;;  %v1451_v1 = vpop.permute.xlu0 %1450  ;;  %v1498_v12 = vrot.slane %v1414_v39, 2  ;;  %v1499_v13 = vrot.slane %v1415_v40, 2 }
  0xf0   : > { %v1455_v2 = vsel %vm1454_vm8, %v1451_v1, %v1453_v0  ;;  %v1456_v45 = vsel %vm1454_vm8, %v1453_v0, %v1451_v1 }
  0xf1   : > { %v1465_v16 = vmul.f32 %v6761_v42, %v1455_v2  ;;  %v1466_v17 = vmul.f32 %v6763_v43, %v1456_v45  ;;  %v1528_v38 = vsel %vm1526_vm10, %v1525_v31, %v1499_v13  ;;  %v1527_v40 = vsel %vm1526_vm10, %v1524_v36, %v1498_v12 }
  0xf3   : > { %v1516_v21 = vrot.slane %v1465_v16, 2  ;;  %v1517_v22 = vrot.slane %v1466_v17, 2  ;;  %v1800_v23 = vpop.permute.xlu1 %1799  ;;  %v1798_v28 = vpop.permute.xlu0 %1797 }
  0xf4   : > { %v1801_v62 = vsel %vm1369_vm2, %v1798_v28, %v1800_v23  ;;  %v1802_v4 = vsel %vm1369_vm2, %v1800_v23, %v1798_v28 }
  0xf5   : > { %v1534_v39 = vsel %vm1526_vm10, %v1532_v35, %v1517_v22  ;;  %v1533_v44 = vsel %vm1526_vm10, %v1531_v37, %v1516_v21  ;;  %v1804_v13 = vmul.f32 %v1801_v62, %v6697_v53  ;;  %v1803_v22 = vmul.f32 %v1802_v4, %v6694_v52 }
  0xf6   : > { %v5075_v25 = vpack.c.bf16 %v1534_v39, %v1528_v38  ;;  %v5077_v47 = vpack.c.bf16 %v1533_v44, %v1527_v40 }
  0xf7   : > { %v1824_v50 = vpop.permute.xlu1 %1823  ;;  %v1822_v24 = vpop.permute.xlu0 %1821  ;;  %v1856_v38 = vrot.slane %v1804_v13, 6 }
  0xf8   : > { %5076 = vmatprep.subr.bf16.mxu0 %v5075_v25  ;;  %v1825_v0 = vsel %vm1420_vm1, %v1822_v24, %v1824_v50  ;;  %v1826_v1 = vsel %vm1420_vm1, %v1824_v50, %v1822_v24 }
  0xf9   : > { %5078 = vmatpush1.bf16.msra.mxu0 %v5077_v47  ;;  %v1827_v16 = vmul.f32 %v1825_v0, %v6688_v48  ;;  %v1828_v19 = vmul.f32 %v1826_v1, %v6690_v49 }
  0xfb   : > { %v1808_v51 = vpop.permute.xlu1 %1807  ;;  %v1806_v60 = vpop.permute.xlu0 %1805  ;;  %v1873_v39 = vrot.slane %v1827_v16, 6  ;;  %v1874_v25 = vrot.slane %v1828_v19, 6 }
  0xfc   : > { %v1809_v20 = vsel %vm1386_vm3, %v1806_v60, %v1808_v51  ;;  %v1810_v23 = vsel %vm1386_vm3, %v1808_v51, %v1806_v60  ;;  %v1855_v51 = vrot.slane %v1803_v22, 6 }
  0xfd   : > { %v1812_v40 = vmul.f32 %v1809_v20, %v6704_v55  ;;  %v1811_v47 = vmul.f32 %v1810_v23, %v6701_v54  ;;  %v6838_v20 = vld [vmem:[%s10620_s15 + $0x10] ss:$0 sm:$0xff] }
  0xff   : > { %v1832_v61 = vpop.permute.xlu1 %1831  ;;  %v1830_v63 = vpop.permute.xlu0 %1829  ;;  %v1862_v4 = vrot.slane %v1812_v40, 4  ;;  %v1861_v16 = vrot.slane %v1811_v47, 4 }
 0x100   : > { %v1833_v2 = vsel %vm1437_vm4, %v1830_v63, %v1832_v61  ;;  %v1834_v12 = vsel %vm1437_vm4, %v1832_v61, %v1830_v63 }
 0x101   : > { %v1835_v21 = vmul.f32 %v1833_v2, %v6707_v56  ;;  %v1836_v28 = vmul.f32 %v1834_v12, %v6709_v57 }
 0x103   : > { %v1792_v45 = vpop.permute.xlu1 %1791  ;;  %v1790_v46 = vpop.permute.xlu0 %1789  ;;  %v1879_v50 = vrot.slane %v1835_v21, 4  ;;  %v1880_v60 = vrot.slane %v1836_v28, 4  ;;  %v6843_v21 = vld [vmem:[%s10620_s15 + $0x18] ss:$0 sm:$0xff] }
 0x104   : > { %v1793_v17 = vsel %vm1352_vm5, %v1790_v46, %v1792_v45  ;;  %v1794_v29 = vsel %vm1352_vm5, %v1792_v45, %v1790_v46  ;;  %v1895_v46 = vsel %vm1520_vm7, %v6633_v33, %v1873_v39  ;;  %v1896_v33 = vsel %vm1520_vm7, %v6630_v32, %v1874_v25  ;;  %v1295_v25 = vld [vmem:[%s10621_s11] sm:$0xff]  ;;  %s10644_s11 = sadd.s32 3, %s6517_s29 }
 0x105   : > { %v1796_v35 = vmul.f32 %v1793_v17, %v6716_v59  ;;  %v1795_v24 = vmul.f32 %v1794_v29, %v6713_v58  ;;  %v1897_v17 = vsel %vm1523_vm9, %v1895_v46, %v1879_v50  ;;  %s770_s15 = sld [smem:[#allocation6 + %s10644_s11]] }
 0x107   : > { %v1816_v30 = vpop.permute.xlu1 %1815  ;;  %v1814_v31 = vpop.permute.xlu0 %1813  ;;  %v1890_v0 = vsel %vm1520_vm7, %v1796_v35, %v1856_v38  ;;  %v1889_v19 = vsel %vm1520_vm7, %v1795_v24, %v1855_v51  ;;  %v1898_v38 = vsel %vm1523_vm9, %v1896_v33, %v1880_v60 }
 0x108   : > { %v1817_v36 = vsel %vm1403_vm6, %v1814_v31, %v1816_v30  ;;  %v1818_v37 = vsel %vm1403_vm6, %v1816_v30, %v1814_v31  ;;  %v1892_v31 = vsel %vm1523_vm9, %v1890_v0, %v1862_v4  ;;  %v1891_v50 = vsel %vm1523_vm9, %v1889_v19, %v1861_v16 }
 0x109   : > { %v1820_v44 = vmul.f32 %v1817_v36, %v6735_v9  ;;  %v1819_v61 = vmul.f32 %v1818_v37, %v6732_v6 }
 0x10b   : > { %v1840_v63 = vpop.permute.xlu1 %1839  ;;  %v1838_v62 = vpop.permute.xlu0 %1837  ;;  %v1868_v1 = vrot.slane %v1820_v44, 2  ;;  %v1867_v22 = vrot.slane %v1819_v61, 2 }
 0x10c   : > { %v1841_v2 = vsel %vm1454_vm8, %v1838_v62, %v1840_v63  ;;  %v1842_v45 = vsel %vm1454_vm8, %v1840_v63, %v1838_v62 }
 0x10d   : > { %v1843_v12 = vmul.f32 %v1841_v2, %v6761_v42  ;;  %v1844_v13 = vmul.f32 %v1842_v45, %v6763_v43  ;;  %v1894_v37 = vsel %vm1526_vm10, %v1892_v31, %v1868_v1  ;;  %v1893_v60 = vsel %vm1526_vm10, %v1891_v50, %v1867_v22 }
 0x10f   : > { %v1885_v23 = vrot.slane %v1843_v12, 2  ;;  %v1886_v28 = vrot.slane %v1844_v13, 2  ;;  %v1470_v29 = vpop.permute.xlu1 %1469  ;;  %v1468_v30 = vpop.permute.xlu0 %1467 }
 0x110   : > { %v1472_v35 = vsel %vm1471_vm11, %v1468_v30, %v1470_v29  ;;  %v1473_v36 = vsel %vm1471_vm11, %v1470_v29, %v1468_v30  ;;  %v1298_v29 = vld [vmem:[%s10629_s14] sm:$0x3] }
 0x111   : > { %v1482_v39 = vmul.f32 %v6838_v20, %v1472_v35  ;;  %v1483_v32 = vmul.f32 %v6843_v21, %v1473_v36  ;;  %v1900_v40 = vsel %vm1526_vm10, %v1898_v38, %v1886_v28  ;;  %v1899_v44 = vsel %vm1526_vm10, %v1897_v17, %v1885_v23 }
 0x112   : > { %v5095_v47 = vpack.c.bf16 %v1900_v40, %v1894_v37  ;;  %v5097_v62 = vpack.c.bf16 %v1899_v44, %v1893_v60 }
 0x113   : > { %5033 = vmatprep.subr.msk.mxu0 %vm1520_vm7, %v1483_v32  ;;  %v1848_v24 = vpop.permute.xlu1 %1847  ;;  %v1846_v51 = vpop.permute.xlu0 %1845 }
 0x114   : > { %5034 = vmatpush1.msk.msra.mxu0 %vm1520_vm7, %v1482_v39  ;;  %v1849_v61 = vsel %vm1471_vm11, %v1846_v51, %v1848_v24  ;;  %v1850_v63 = vsel %vm1471_vm11, %v1848_v24, %v1846_v51 }
 0x115   : > { %5035 = vmatmul.mubr.msk.f32.vlgmr.msra.gmra.mrb[0].mxu0 %vm1540_vm12, %v1295_v25  ;;  %5096 = vmatprep.subr.bf16.mxu0 %v5095_v47  ;;  %v1852_v0 = vmul.f32 %v6843_v21, %v1850_v63  ;;  %v1851_v1 = vmul.f32 %v6838_v20, %v1849_v61 }
 0x116   : > { %5098 = vmatpush1.bf16.msra.mxu0 %v5097_v62  ;;  %1971 = vmatprep.mubr.f32.mxu0 %v10330_v34 }
 0x117   : > { %5037 = vmatprep.subr.msk.mxu0 %vm1520_vm7, %v1852_v0 }
 0x11a   : > { %5038 = vmatpush1.msk.msra.mxu0 %vm1520_vm7, %v1851_v1 }
 0x11b   : > { %5039 = vmatmul.mubr.msk.f32.vlgmr.msra.gmra.mrb[2].mxu0 %vm1540_vm12, %v1295_v25 }
 0x11c   : > { %2108 = vmatprep.mubr.f32.mxu0 %v10330_v34 }
 0x124   : > { %v6877_v2 = vpop.permute.xlu0 %1537 }
 0x1e8   : > { %v1616_v45 = vpop.f32.mrb[0].mxu0 }
 0x1e9   : > { %v1617_v46 = vadd.f32 %v1616_v45, %v6877_v2  ;;  %v1618_v4 = vpop.f32.mrb[1].mxu0 }
 0x1ea   : > { %v1619_v13 = vadd.f32 %v1618_v4, %v6877_v2 }
 0x1eb   : > { %v6880_v12 = vmax.f32 %v1617_v46, 0.0 }
 0x1ec   : > { %v6887_v17 = vmax.f32 %v1619_v13, 0.0 }
 0x1ed   : > { %1631 = vrot.lane.b32.xlu0 %v6880_v12, %s10318_s28  ;;  %1623 = vrot.lane.b32.xlu1 %v6880_v12, %s10622_s0 }
 0x1ee   : > { %v1973_v16 = vpop.f32.mrb[2].mxu0 }
 0x1ef   : > { %v1975_v19 = vpop.f32.mrb[3].mxu0  ;;  %v1974_v33 = vadd.f32 %v1973_v16, %v6877_v2 }
 0x1f0   : > { %v1976_v23 = vadd.f32 %v1975_v19, %v6877_v2 }
 0x1f1   : > { %1639 = vrot.lane.b32.xlu0 %v6880_v12, %s10623_s26  ;;  %1625 = vrot.lane.b32.xlu1 %v6887_v17, %s10622_s0  ;;  %v6910_v22 = vmax.f32 %v1974_v33, 0.0 }
 0x1f2   : > { %v6921_v28 = vmax.f32 %v1976_v23, 0.0 }
 0x1f5   : > { %1647 = vrot.lane.b32.xlu0 %v6880_v12, %s10624_s23  ;;  %1633 = vrot.lane.b32.xlu1 %v6887_v17, %s10318_s28 }
 0x1f9   : > { %1655 = vrot.lane.b32.xlu0 %v6880_v12, %s10625_s3  ;;  %1641 = vrot.lane.b32.xlu1 %v6887_v17, %s10623_s26 }
 0x1fd   : > { %1663 = vrot.lane.b32.xlu0 %v6880_v12, %s10626_s30  ;;  %1649 = vrot.lane.b32.xlu1 %v6887_v17, %s10624_s23 }
 0x201   : > { %1671 = vrot.lane.b32.xlu0 %v6880_v12, %s10627_s25  ;;  %1657 = vrot.lane.b32.xlu1 %v6887_v17, %s10625_s3 }
 0x205   : > { %1980 = vrot.lane.b32.xlu0 %v6910_v22, %s10622_s0  ;;  %1665 = vrot.lane.b32.xlu1 %v6887_v17, %s10626_s30 }
 0x209   : > { %1988 = vrot.lane.b32.xlu0 %v6910_v22, %s10318_s28  ;;  %1673 = vrot.lane.b32.xlu1 %v6887_v17, %s10627_s25 }
 0x20d   : > { %1996 = vrot.lane.b32.xlu0 %v6910_v22, %s10623_s26  ;;  %1982 = vrot.lane.b32.xlu1 %v6921_v28, %s10622_s0 }
 0x211   : > { %2004 = vrot.lane.b32.xlu0 %v6910_v22, %s10624_s23  ;;  %1990 = vrot.lane.b32.xlu1 %v6921_v28, %s10318_s28  ;;  %s10893_s28 = sld [smem:[#allocation267_spill]] }
 0x215   : > { %2012 = vrot.lane.b32.xlu0 %v6910_v22, %s10625_s3  ;;  %1998 = vrot.lane.b32.xlu1 %v6921_v28, %s10623_s26 }
 0x219   : > { %2020 = vrot.lane.b32.xlu0 %v6910_v22, %s10626_s30  ;;  %2006 = vrot.lane.b32.xlu1 %v6921_v28, %s10624_s23  ;;  %s769_s23 = sld [smem:[#allocation6 + %s10645_s18]] }
 0x21a   : > { %s10892_s18 = sld [smem:[#allocation271_spill]] }
 0x21d   : > { %2028 = vrot.lane.b32.xlu0 %v6910_v22, %s10627_s25  ;;  %2014 = vrot.lane.b32.xlu1 %v6921_v28, %s10625_s3 }
 0x221   : > { %1679 = vrot.lane.b32.xlu0 %v6880_v12, %s10628_s4  ;;  %2022 = vrot.lane.b32.xlu1 %v6921_v28, %s10626_s30 }
 0x225   : > { %2036 = vrot.lane.b32.xlu0 %v6910_v22, %s10628_s4  ;;  %2030 = vrot.lane.b32.xlu1 %v6921_v28, %s10627_s25 }
 0x229   : > { %1689 = vperm.xlu0 %6245, %v1298_v29   ;;  %1681 = vrot.lane.b32.xlu1 %v6887_v17, %s10628_s4 }
 0x22d   : > { %2038 = vrot.lane.b32.xlu1 %v6921_v28, %s10628_s4  ;;  %s767_s4 = sld [smem:[#allocation6 + %s6517_s29]] }
 0x25f   : > { %v1632_v30 = vpop.permute.xlu0 %1631  ;;  %v1624_v31 = vpop.permute.xlu1 %1623 }
 0x263   : > { %v1640_v35 = vpop.permute.xlu0 %1639  ;;  %v1626_v36 = vpop.permute.xlu1 %1625 }
 0x264   : > { %v1627_v37 = vsel %vm1352_vm5, %v1624_v31, %v1626_v36  ;;  %v1628_v38 = vsel %vm1352_vm5, %v1626_v36, %v1624_v31 }
 0x265   : > { %v1629_v25 = vmul.f32 %v1628_v38, %v6713_v58  ;;  %v1630_v50 = vmul.f32 %v1627_v37, %v6716_v59 }
 0x267   : > { %v1648_v39 = vpop.permute.xlu0 %1647  ;;  %v1634_v32 = vpop.permute.xlu1 %1633 }
 0x268   : > { %v1635_v40 = vsel %vm1369_vm2, %v1632_v30, %v1634_v32  ;;  %v1636_v44 = vsel %vm1369_vm2, %v1634_v32, %v1632_v30 }
 0x269   : > { %v1637_v47 = vmul.f32 %v1636_v44, %v6694_v52  ;;  %v1638_v24 = vmul.f32 %v1635_v40, %v6697_v53 }
 0x26b   : > { %v1656_v51 = vpop.permute.xlu0 %1655  ;;  %v1642_v60 = vpop.permute.xlu1 %1641  ;;  %v5079_v61 = vpack.c.bf16 %v1638_v24, %v1630_v50  ;;  %v5081_v63 = vpack.c.bf16 %v1637_v47, %v1629_v25 }
 0x26c   : > { %v1643_v62 = vsel %vm1386_vm3, %v1640_v35, %v1642_v60  ;;  %v1644_v0 = vsel %vm1386_vm3, %v1642_v60, %v1640_v35 }
 0x26d   : > { %5080 = vmatprep.subr.bf16.mxu1 %v5079_v61  ;;  %v1645_v13 = vmul.f32 %v1644_v0, %v6701_v54  ;;  %v1646_v16 = vmul.f32 %v1643_v62, %v6704_v55 }
 0x26e   : > { %5082 = vmatpush1.bf16.msra.mxu1 %v5081_v63 }
 0x26f   : > { %v1664_v1 = vpop.permute.xlu0 %1663  ;;  %v1650_v45 = vpop.permute.xlu1 %1649 }
 0x270   : > { %v1651_v46 = vsel %vm1403_vm6, %v1648_v39, %v1650_v45  ;;  %v1652_v4 = vsel %vm1403_vm6, %v1650_v45, %v1648_v39 }
 0x271   : > { %v1653_v19 = vmul.f32 %v1652_v4, %v6732_v6  ;;  %v1654_v33 = vmul.f32 %v1651_v46, %v6735_v9 }
 0x273   : > { %v1672_v23 = vpop.permute.xlu0 %1671  ;;  %v1658_v29 = vpop.permute.xlu1 %1657  ;;  %v5083_v30 = vpack.c.bf16 %v1654_v33, %v1646_v16  ;;  %v5085_v31 = vpack.c.bf16 %v1653_v19, %v1645_v13 }
 0x274   : > { %v1659_v35 = vsel %vm1420_vm1, %v1656_v51, %v1658_v29  ;;  %v1660_v36 = vsel %vm1420_vm1, %v1658_v29, %v1656_v51 }
 0x275   : > { %v1661_v37 = vmul.f32 %v1659_v35, %v6688_v48  ;;  %v1662_v38 = vmul.f32 %v1660_v36, %v6690_v49  ;;  %5084 = vmatprep.subr.bf16.mxu1 %v5083_v30 }
 0x276   : > { %5086 = vmatpush1.bf16.msra.mxu1 %v5085_v31 }
 0x277   : > { %v1981_v39 = vpop.permute.xlu0 %1980  ;;  %v1666_v32 = vpop.permute.xlu1 %1665  ;;  %v5087_v40 = vpack.c.bf16 %v1662_v38, %v6887_v17  ;;  %v5089_v44 = vpack.c.bf16 %v1661_v37, %v6880_v12 }
 0x278   : > { %v1667_v25 = vsel %vm1437_vm4, %v1664_v1, %v1666_v32  ;;  %v1668_v47 = vsel %vm1437_vm4, %v1666_v32, %v1664_v1 }
 0x279   : > { %5088 = vmatprep.subr.bf16.mxu1 %v5087_v40  ;;  %v1669_v17 = vmul.f32 %v1667_v25, %v6707_v56  ;;  %v1670_v12 = vmul.f32 %v1668_v47, %v6709_v57 }
 0x27a   : > { %5090 = vmatpush1.bf16.msra.mxu1 %v5089_v44 }
 0x27b   : > { %v1989_v50 = vpop.permute.xlu0 %1988  ;;  %v1674_v24 = vpop.permute.xlu1 %1673 }
 0x27c   : > { %v1675_v51 = vsel %vm1454_vm8, %v1672_v23, %v1674_v24  ;;  %v1676_v60 = vsel %vm1454_vm8, %v1674_v24, %v1672_v23 }
 0x27d   : > { %v1677_v61 = vmul.f32 %v1675_v51, %v6761_v42  ;;  %v1678_v63 = vmul.f32 %v1676_v60, %v6763_v43 }
 0x27f   : > { %v1997_v62 = vpop.permute.xlu0 %1996  ;;  %v1983_v0 = vpop.permute.xlu1 %1982  ;;  %v5091_v1 = vpack.c.bf16 %v1678_v63, %v1670_v12  ;;  %v5093_v45 = vpack.c.bf16 %v1677_v61, %v1669_v17 }
 0x280   : > { %v1984_v46 = vsel %vm1352_vm5, %v1981_v39, %v1983_v0  ;;  %v1985_v4 = vsel %vm1352_vm5, %v1983_v0, %v1981_v39 }
 0x281   : > { %5092 = vmatprep.subr.bf16.mxu1 %v5091_v1  ;;  %v1986_v23 = vmul.f32 %v1985_v4, %v6713_v58  ;;  %v1987_v29 = vmul.f32 %v1984_v46, %v6716_v59 }
 0x282   : > { %5094 = vmatpush1.bf16.msra.mxu1 %v5093_v45 }
 0x283   : > { %v2005_v13 = vpop.permute.xlu0 %2004  ;;  %v1991_v16 = vpop.permute.xlu1 %1990 }
 0x284   : > { %v1992_v19 = vsel %vm1369_vm2, %v1989_v50, %v1991_v16  ;;  %v1993_v33 = vsel %vm1369_vm2, %v1991_v16, %v1989_v50 }
 0x285   : > { %v1994_v30 = vmul.f32 %v1993_v33, %v6694_v52  ;;  %v1995_v31 = vmul.f32 %v1992_v19, %v6697_v53 }
 0x287   : > { %v5101_v35 = vpack.c.bf16 %v1994_v30, %v1986_v23  ;;  %v2013_v36 = vpop.permute.xlu0 %2012  ;;  %v1999_v37 = vpop.permute.xlu1 %1998  ;;  %v5099_v38 = vpack.c.bf16 %v1995_v31, %v1987_v29 }
 0x288   : > { %v2000_v39 = vsel %vm1386_vm3, %v1997_v62, %v1999_v37  ;;  %v2001_v32 = vsel %vm1386_vm3, %v1999_v37, %v1997_v62 }
 0x289   : > { %5100 = vmatprep.subr.bf16.mxu0 %v5099_v38  ;;  %v2002_v47 = vmul.f32 %v2001_v32, %v6701_v54  ;;  %v2003_v50 = vmul.f32 %v2000_v39, %v6704_v55 }
 0x28a   : > { %5102 = vmatpush1.bf16.msra.mxu0 %v5101_v35 }
 0x28b   : > { %v2007_v40 = vpop.permute.xlu1 %2006  ;;  %v2021_v24 = vpop.permute.xlu0 %2020 }
 0x28c   : > { %v2008_v44 = vsel %vm1403_vm6, %v2005_v13, %v2007_v40  ;;  %v2009_v25 = vsel %vm1403_vm6, %v2007_v40, %v2005_v13 }
 0x28d   : > { %v2010_v51 = vmul.f32 %v2009_v25, %v6732_v6  ;;  %v2011_v60 = vmul.f32 %v2008_v44, %v6735_v9  ;;  %v1297_v25 = vld [vmem:[%s10630_s13] sm:$0x3]  ;;  %s10643_s13 = sadd.s32 1, %s6517_s29  ;;  %s5069_s29 = sshll.u32 %s6514_s27, 4 }
 0x28e   : > { %s768_s14 = sld [smem:[#allocation6 + %s10643_s13]]  ;;  %s7724_s25 = scalar_lea.vmem %s10691_s5, %s5069_s29 }
 0x28f   : > { %v5105_v17 = vpack.c.bf16 %v2010_v51, %v2002_v47  ;;  %v2015_v12 = vpop.permute.xlu1 %2014  ;;  %v5103_v61 = vpack.c.bf16 %v2011_v60, %v2003_v50  ;;  %v2029_v45 = vpop.permute.xlu0 %2028  ;;  %s11146_s5 = sld [smem:[#allocation272_spill]] }
 0x290   : > { %v2016_v63 = vsel %vm1420_vm1, %v2013_v36, %v2015_v12  ;;  %v2017_v62 = vsel %vm1420_vm1, %v2015_v12, %v2013_v36  ;;  %v786_v12 = vld [vmem:[%s10287_s9 + $0x18] sm:$0xff] }
 0x291   : > { %v2018_v0 = vmul.f32 %v2016_v63, %v6688_v48  ;;  %v2019_v1 = vmul.f32 %v2017_v62, %v6690_v49  ;;  %5104 = vmatprep.subr.bf16.mxu0 %v5103_v61  ;;  %v790_v61 = vld [vmem:[%s10287_s9 + $0x38] sm:$0xff] }
 0x292   : > { %5106 = vmatpush1.bf16.msra.mxu0 %v5105_v17  ;;  %v7070_v63 = vpack.c.bf16 %v790_v61, %v786_v12  ;;  %v834_v12 = vld [vmem:[%s10287_s9 + $0x198] sm:$0xff] }
 0x293   : > { %v5109_v46 = vpack.c.bf16 %v2018_v0, %v6910_v22  ;;  %v2023_v4 = vpop.permute.xlu1 %2022  ;;  %v5107_v13 = vpack.c.bf16 %v2019_v1, %v6921_v28  ;;  %v1680_v30 = vpop.permute.xlu0 %1679  ;;  %v794_v0 = vld [vmem:[%s10287_s9 + $0x58] sm:$0xff] }
 0x294   : > { %v2024_v16 = vsel %vm1437_vm4, %v2021_v24, %v2023_v4  ;;  %v2025_v19 = vsel %vm1437_vm4, %v2023_v4, %v2021_v24  ;;  %v798_v1 = vld [vmem:[%s10287_s9 + $0x78] sm:$0xff]  ;;  %v797_v4 = vld [vmem:[%s10287_s9 + $0x70] sm:$0xff] }
 0x295   : > { %5108 = vmatprep.subr.bf16.mxu0 %v5107_v13  ;;  %v2026_v22 = vmul.f32 %v2024_v16, %v6707_v56  ;;  %v2027_v28 = vmul.f32 %v2025_v19, %v6709_v57  ;;  %v802_v16 = vld [vmem:[%s10287_s9 + $0x98] sm:$0xff] }
 0x296   : > { %5110 = vmatpush1.bf16.msra.mxu0 %v5109_v46  ;;  %v793_v46 = vld [vmem:[%s10287_s9 + $0x50] sm:$0xff]  ;;  %v806_v19 = vld [vmem:[%s10287_s9 + $0xb8] sm:$0xff] }
 0x297   : > { %v2031_v33 = vpop.permute.xlu1 %2030  ;;  %v2037_v47 = vpop.permute.xlu0 %2036  ;;  %v7097_v13 = vpack.c.bf16 %v797_v4, %v793_v46  ;;  %v838_v61 = vld [vmem:[%s10287_s9 + $0x1b8] sm:$0xff] }
 0x298   : > { %v2032_v23 = vsel %vm1454_vm8, %v2029_v45, %v2031_v33  ;;  %v2033_v29 = vsel %vm1454_vm8, %v2031_v33, %v2029_v45  ;;  %v7087_v45 = vpack.c.bf16 %v798_v1, %v794_v0  ;;  %v7105_v33 = vpack.c.bf16 %v806_v19, %v802_v16  ;;  %v837_v0 = vld [vmem:[%s10287_s9 + $0x1b0] sm:$0xff]  ;;  %v842_v46 = vld [vmem:[%s10287_s9 + $0x1d8] sm:$0xff] }
 0x299   : > { %v2034_v31 = vmul.f32 %v2032_v23, %v6761_v42  ;;  %v2035_v35 = vmul.f32 %v2033_v29, %v6763_v43  ;;  %v801_v23 = vld [vmem:[%s10287_s9 + $0x90] sm:$0xff]  ;;  %v846_v4 = vld [vmem:[%s10287_s9 + $0x1f8] sm:$0xff] }
 0x29a   : > { %v805_v29 = vld [vmem:[%s10287_s9 + $0xb0] sm:$0xff]  ;;  %v7195_v16 = vpack.c.bf16 %v846_v4, %v842_v46 }
 0x29b   : > { %v5113_v36 = vpack.c.bf16 %v2034_v31, %v2026_v22  ;;  %v1682_v37 = vpop.permute.xlu1 %1681  ;;  %v5111_v38 = vpack.c.bf16 %v2035_v35, %v2027_v28  ;;  %v810_v22 = vld [vmem:[%s10287_s9 + $0xd8] sm:$0xff]  ;;  %v809_v35 = vld [vmem:[%s10287_s9 + $0xd0] sm:$0xff] }
 0x29c   : > { %v1683_v39 = vsel %vm1471_vm11, %v1680_v30, %v1682_v37  ;;  %v1684_v32 = vsel %vm1471_vm11, %v1682_v37, %v1680_v30  ;;  %v7115_v30 = vpack.c.bf16 %v805_v29, %v801_v23  ;;  %v814_v28 = vld [vmem:[%s10287_s9 + $0xf8] sm:$0xff]  ;;  %v841_v19 = vld [vmem:[%s10287_s9 + $0x1d0] sm:$0xff] }
 0x29d   : > { %v1685_v40 = vmul.f32 %v6838_v20, %v1683_v39  ;;  %v1686_v44 = vmul.f32 %v6843_v21, %v1684_v32  ;;  %5112 = vmatprep.subr.bf16.mxu0 %v5111_v38  ;;  %v7123_v31 = vpack.c.bf16 %v814_v28, %v810_v22  ;;  %v818_v38 = vld [vmem:[%s10287_s9 + $0x118] sm:$0xff]  ;;  %v845_v23 = vld [vmem:[%s10287_s9 + $0x1f0] sm:$0xff] }
 0x29e   : > { %5114 = vmatpush1.bf16.msra.mxu0 %v5113_v36  ;;  %v813_v36 = vld [vmem:[%s10287_s9 + $0xf0] sm:$0xff]  ;;  %v822_v39 = vld [vmem:[%s10287_s9 + $0x138] sm:$0xff]  ;;  %v7205_v29 = vpack.c.bf16 %v845_v23, %v841_v19 }
 0x29f   : > { %1712 = vmatprep.subr.mxu1 %v1686_v44  ;;  %v2039_v50 = vpop.permute.xlu1 %2038  ;;  %v7133_v37 = vpack.c.bf16 %v813_v36, %v809_v35  ;;  %v7141_v32 = vpack.c.bf16 %v822_v39, %v818_v38  ;;  %v821_v44 = vld [vmem:[%s10287_s9 + $0x130] sm:$0xff]  ;;  %v850_v22 = vld [vmem:[%s10287_s9 + $0x218] sm:$0xff] }
 0x2a0   : > { %v2040_v24 = vsel %vm1471_vm11, %v2037_v47, %v2039_v50  ;;  %v2041_v51 = vsel %vm1471_vm11, %v2039_v50, %v2037_v47  ;;  %1713 = vmatpush1.msra.mxu1 %v1685_v40  ;;  %v817_v40 = vld [vmem:[%s10287_s9 + $0x110] sm:$0xff]  ;;  %v826_v47 = vld [vmem:[%s10287_s9 + $0x158] sm:$0xff] }
 0x2a1   : > { %v2042_v60 = vmul.f32 %v6838_v20, %v2040_v24  ;;  %v2043_v17 = vmul.f32 %v6843_v21, %v2041_v51  ;;  %5036 = vmatmul.mubr.msk.f32.vlgmr.msra.gmra.mrb[0].mxu1 %vm1692_vm13, %v1297_v25  ;;  %v785_v20 = vld [vmem:[%s10287_s9 + $0x10] sm:$0xff]  ;;  %v830_v50 = vld [vmem:[%s10287_s9 + $0x178] sm:$0xff] }
 0x2a2   : > { %2256 = vmatprep.mubr.f32.mxu1 %v10330_v34  ;;  %v789_v21 = vld [vmem:[%s10287_s9 + $0x30] sm:$0xff]  ;;  %v7159_v24 = vpack.c.bf16 %v830_v50, %v826_v47  ;;  %v854_v28 = vld [vmem:[%s10287_s9 + $0x238] sm:$0xff]  ;;  %v7328_v34 = vstv %s768_s14 }
 0x2a3   : > { %2060 = vmatprep.subr.mxu0 %v2043_v17  ;;  %v7078_v62 = vpack.c.bf16 %v789_v21, %v785_v20  ;;  %v825_v51 = vld [vmem:[%s10287_s9 + $0x150] sm:$0xff]  ;;  %v7177_v20 = vpack.c.bf16 %v838_v61, %v834_v12  ;;  %v7213_v35 = vpack.c.bf16 %v854_v28, %v850_v22  ;;  %v866_v12 = vld [vmem:[%s10287_s9 + $0x298] sm:$0xff]  ;;  %10647 = vst [vmem:[#allocation26_spill] sm:$0xff] %v7328_v34 }
 0x2a4   : > { %2061 = vmatpush1.msra.mxu0 %v2042_v60  ;;  %v829_v60 = vld [vmem:[%s10287_s9 + $0x170] sm:$0xff]  ;;  %v870_v61 = vld [vmem:[%s10287_s9 + $0x2b8] sm:$0xff] }
 0x2a5   : > { %5040 = vmatmul.mubr.msk.f32.vlgmr.msra.gmra.mrb[4].mxu0 %vm1692_vm13, %v1297_v25  ;;  %5244 = vmatprep.subr.bf16.mxu0 %v7070_v63  ;;  %v7151_v25 = vpack.c.bf16 %v821_v44, %v817_v40  ;;  %v7169_v17 = vpack.c.bf16 %v829_v60, %v825_v51  ;;  %v833_v21 = vld [vmem:[%s10287_s9 + $0x190] sm:$0xff]  ;;  %10631 = vst [vmem:[#allocation13_spill] sm:$0xff] %v7213_v35  ;;  %v858_v40 = vld [vmem:[%s10287_s9 + $0x258] sm:$0xff] }
 0x2a6   : > { %5246 = vmatpush1.bf16.msra.mxu0 %v7078_v62  ;;  %v7187_v1 = vpack.c.bf16 %v837_v0, %v833_v21  ;;  %v849_v36 = vld [vmem:[%s10287_s9 + $0x210] sm:$0xff]  ;;  %v862_v44 = vld [vmem:[%s10287_s9 + $0x278] sm:$0xff]  ;;  %v7249_v21 = vpack.c.bf16 %v870_v61, %v866_v12 }
 0x2a7   : > { %5248 = vmatprep.subr.bf16.mxu0 %v7087_v45  ;;  %v853_v38 = vld [vmem:[%s10287_s9 + $0x230] sm:$0xff]  ;;  %v7231_v47 = vpack.c.bf16 %v862_v44, %v858_v40  ;;  %v874_v19 = vld [vmem:[%s10287_s9 + $0x2d8] sm:$0xff] }
 0x2a8   : > { %v7223_v39 = vpack.c.bf16 %v853_v38, %v849_v36  ;;  %v857_v50 = vld [vmem:[%s10287_s9 + $0x250] sm:$0xff]  ;;  %10635 = vst [vmem:[#allocation17_spill] sm:$0xff] %v7249_v21  ;;  %v878_v23 = vld [vmem:[%s10287_s9 + $0x2f8] sm:$0xff] }
 0x2a9   : > { %10633 = vst [vmem:[#allocation15_spill] sm:$0xff] %v7231_v47  ;;  %v861_v51 = vld [vmem:[%s10287_s9 + $0x270] sm:$0xff]  ;;  %v7267_v22 = vpack.c.bf16 %v878_v23, %v874_v19  ;;  %v882_v40 = vld [vmem:[%s10287_s9 + $0x318] sm:$0xff] }
 0x2aa   : > { %5250 = vmatpush1.bf16.msra.mxu0 %v7097_v13  ;;  %10632 = vst [vmem:[#allocation14_spill] sm:$0xff] %v7223_v39  ;;  %v7241_v60 = vpack.c.bf16 %v861_v51, %v857_v50  ;;  %v865_v0 = vld [vmem:[%s10287_s9 + $0x290] sm:$0xff]  ;;  %v886_v44 = vld [vmem:[%s10287_s9 + $0x338] sm:$0xff] }
 0x2ab   : > { %5252 = vmatprep.subr.bf16.mxu0 %v7105_v33  ;;  %v869_v46 = vld [vmem:[%s10287_s9 + $0x2b0] sm:$0xff]  ;;  %10637 = vst [vmem:[#allocation19_spill] sm:$0xff] %v7267_v22  ;;  %v7285_v50 = vpack.c.bf16 %v886_v44, %v882_v40  ;;  %v7323_v40 = vpop.permute.xlu0 %1689 }
 0x2ac   : > { %10634 = vst [vmem:[#allocation16_spill] sm:$0xff] %v7241_v60  ;;  %v7259_v4 = vpack.c.bf16 %v869_v46, %v865_v0  ;;  %v873_v28 = vld [vmem:[%s10287_s9 + $0x2d0] sm:$0xff]  ;;  %v890_v0 = vld [vmem:[%s10287_s9 + $0x358] sm:$0xff]  ;;  %10646 = vst [vmem:[#allocation25_spill] sm:$0xff] %v7323_v40 }
 0x2ad   : > { %v877_v36 = vld [vmem:[%s10287_s9 + $0x2f0] sm:$0xff]  ;;  %10639 = vst [vmem:[#allocation21_spill] sm:$0xff] %v7285_v50  ;;  %v894_v46 = vld [vmem:[%s10287_s9 + $0x378] sm:$0xff] }
 0x2ae   : > { %5254 = vmatpush1.bf16.msra.mxu0 %v7115_v30  ;;  %10636 = vst [vmem:[#allocation18_spill] sm:$0xff] %v7259_v4  ;;  %v7277_v38 = vpack.c.bf16 %v877_v36, %v873_v28  ;;  %v881_v51 = vld [vmem:[%s10287_s9 + $0x310] sm:$0xff]  ;;  %v7303_v19 = vpack.c.bf16 %v894_v46, %v890_v0 }
 0x2af   : > { %5256 = vmatprep.subr.bf16.mxu0 %v7123_v31  ;;  %v885_v12 = vld [vmem:[%s10287_s9 + $0x330] sm:$0xff] }
 0x2b0   : > { %10638 = vst [vmem:[#allocation20_spill] sm:$0xff] %v7277_v38  ;;  %v7295_v61 = vpack.c.bf16 %v885_v12, %v881_v51  ;;  %10641 = vst [vmem:[#allocation23_spill] sm:$0xff] %v7303_v19  ;;  %v889_v23 = vld [vmem:[%s10287_s9 + $0x350] sm:$0xff] }
 0x2b1   : > { %v893_v28 = vld [vmem:[%s10287_s9 + $0x370] sm:$0xff] }
 0x2b2   : > { %5258 = vmatpush1.bf16.msra.mxu0 %v7133_v37  ;;  %10640 = vst [vmem:[#allocation22_spill] sm:$0xff] %v7295_v61  ;;  %v7313_v36 = vpack.c.bf16 %v893_v28, %v889_v23  ;;  %v10895_v41 = vld [vmem:[#allocation13_spill] sm:$0xff] }
 0x2b3   : > { %5260 = vmatprep.subr.bf16.mxu0 %v7141_v32 }
 0x2b4   : > { %10642 = vst [vmem:[#allocation24_spill] sm:$0xff] %v7313_v36 }
 0x2b6   : > { %5262 = vmatpush1.bf16.msra.mxu0 %v7151_v25 }
 0x2b7   : > { %5264 = vmatprep.subr.bf16.mxu0 %v7159_v24 }
 0x2ba   : > { %5266 = vmatpush1.bf16.msra.mxu0 %v7169_v17 }
 0x2bb   : > { %5268 = vmatprep.subr.bf16.mxu0 %v7177_v20 }
 0x2be   : > { %5270 = vmatpush1.bf16.msra.mxu0 %v7187_v1 }
 0x2bf   : > { %5272 = vmatprep.subr.bf16.mxu0 %v7195_v16 }
 0x2c2   : > { %5274 = vmatpush1.bf16.msra.mxu0 %v7205_v29 }
 0x2c3   : > { %5276 = vmatprep.subr.bf16.mxu0 %v7213_v35 }
 0x2c6   : > { %5278 = vmatpush1.bf16.msra.mxu0 %v7223_v39  ;;  %v922_v39 = vld [vmem:[%s10287_s9 + $0x458] sm:$0xff] }
 0x2c7   : > { %5280 = vmatprep.subr.bf16.mxu0 %v7231_v47 }
 0x2ca   : > { %5282 = vmatpush1.bf16.msra.mxu0 %v7241_v60 }
 0x2cb   : > { %5284 = vmatprep.subr.bf16.mxu0 %v7249_v21 }
 0x2ce   : > { %5286 = vmatpush1.bf16.msra.mxu0 %v7259_v4  ;;  %v2156_v4 = vunpack.c.0.s8 %v2155_v11 }
 0x2cf   : > { %5288 = vmatprep.subr.bf16.mxu0 %v7267_v22 }
 0x2d2   : > { %5290 = vmatpush1.bf16.msra.mxu0 %v7277_v38 }
 0x2d3   : > { %5292 = vmatprep.subr.bf16.mxu0 %v7285_v50  ;;  %v7334_v50 = vstv %s767_s4 }
 0x2d4   : > { %10649 = vst [vmem:[#allocation28_spill] sm:$0xff] %v7334_v50 }
 0x2d6   : > { %5294 = vmatpush1.bf16.msra.mxu0 %v7295_v61 }
 0x2d7   : > { %5296 = vmatprep.subr.bf16.mxu0 %v7303_v19 }
 0x2da   : > { %5298 = vmatpush1.bf16.msra.mxu0 %v7313_v36  ;;  %v7330_v36 = vstv %s770_s15 }
 0x2db   : > { %10648 = vst [vmem:[#allocation27_spill] sm:$0xff] %v7330_v36 }
 0x374   : > { %v1762_v44 = vpop.f32.mrb[0].mxu1 }
 0x375   : > { %v1763_v51 = vadd.f32 %v1762_v44, %v7323_v40  ;;  %v1764_v12 = vpop.f32.mrb[1].mxu1 }
 0x376   : > { %v1765_v0 = vadd.f32 %v1764_v12, %v7323_v40  ;;  %v7336_v12 = vstv %s769_s23  ;;  %s5071_s23 = sshll.u32 %s6514_s27, 5 }
 0x377   : > { %v2125_v23 = vrot.slane %v1763_v51, 1  ;;  %10650 = vst [vmem:[#allocation29_spill] sm:$0xff] %v7336_v12  ;;  %s8895_s12 = scalar_lea.vmem %s10285_s7, %s5071_s23  ;;  %s8900_s14 = scalar_lea.vmem %s10286_s8, %s5071_s23 }
 0x378   : > { %v2110_v46 = vpop.f32.mrb[4].mxu0  ;;  %v2126_v7 = vrot.slane %v1765_v0, 1 }
 0x379   : > { %v2111_v28 = vadd.f32 %v2110_v46, %v7323_v40  ;;  %v2112_v15 = vpop.f32.mrb[5].mxu0 }
 0x37a   : > { %v2113_v19 = vadd.f32 %v2112_v15, %v7323_v40 }
 0x37b   : > { %v2117_v61 = vrot.slane %v2111_v28, 7  ;;  %v2129_v44 = vsel %vm1343_vm0, %v2125_v23, %v2111_v28 }
 0x37c   : > { %v2118_v38 = vrot.slane %v2113_v19, 7  ;;  %v2130_v46 = vsel %vm1343_vm0, %v2126_v7, %v2113_v19  ;;  %v2135_v10 = vmul.f32 %v7328_v34, %v2129_v44  ;;  %v2145_v15 = vmul.f32 %v7330_v36, %v2129_v44 }
 0x37d   : > { %v2121_v22 = vsel %vm1343_vm0, %v1763_v51, %v2117_v61  ;;  %v2136_v40 = vmul.f32 %v7328_v34, %v2130_v46  ;;  %v2146_v61 = vmul.f32 %v7330_v36, %v2130_v46  ;;  %v915_v36 = vld [vmem:[%s10287_s9 + $0x420] sm:$0xff] }
 0x37e   : > { %v2132_v21 = vmul.f32 %v7334_v50, %v2121_v22  ;;  %v2142_v60 = vmul.f32 %v7336_v12, %v2121_v22  ;;  %v2122_v23 = vsel %vm1343_vm0, %v1765_v0, %v2118_v38 }
 0x37f   : > { %v2133_v28 = vmul.f32 %v7334_v50, %v2122_v23  ;;  %v2143_v7 = vmul.f32 %v7336_v12, %v2122_v23  ;;  %v7354_v50 = vsub.s32 %v2156_v4, %v6562_v8  ;;  %v784_v8 = vld [vmem:[%s10287_s9 + $0x8] sm:$0xff]  ;;  %v913_v12 = vld [vmem:[%s10287_s9 + $0x410] sm:$0xff] }
 0x380   : > { %v2137_v19 = vadd.f32 %v2135_v10, %v2132_v21  ;;  %v2147_v11 = vadd.f32 %v2145_v15, %v2142_v60  ;;  %v6246_v60 = vld [vmem:[%s6529_s22] sm:$0xf] }
 0x381   : > { %v2138_v51 = vadd.f32 %v2136_v40, %v2133_v28  ;;  %v2148_v47 = vadd.f32 %v2146_v61, %v2143_v7  ;;  %10651 = vst [vmem:[#allocation30_spill] sm:$0xff] %v7354_v50  ;;  %v6247_v10 = vld [vmem:[%s6535_s2] sm:$0xf]  ;;  %s7729_s2 = scalar_lea.vmem %s10284_s6, %s5069_s29 }
 0x382   : > { %v2139_v22 = vadd.f32 %v2137_v19, %v6549_v3  ;;  %v2149_v44 = vadd.f32 %v2147_v11, %v6557_v5  ;;  %v1303_v7 = vld [vmem:[%s10294_s16] sm:$0xff] }
 0x383   : > { %v2140_v38 = vadd.f32 %v2138_v51, %v6549_v3  ;;  %v2150_v0 = vadd.f32 %v2148_v47, %v6557_v5  ;;  %v783_v11 = vld [vmem:[%s10287_s9] sm:$0xff] }
 0x384   : > { %v787_v51 = vld [vmem:[%s10287_s9 + $0x20] sm:$0xff] }
 0x385   : > { %v2153_v34 = vcombine.low %v2139_v22, %v2140_v38  ;;  %v2165_v23 = vcombine.low %v2149_v44, %v2150_v0  ;;  %v792_v22 = vld [vmem:[%s10287_s9 + $0x48] sm:$0xff]  ;;  %v10653_v38 = vmov 0.0   ;;  %v7397_v0 = vpack.c.bf16 %v787_v51, %v783_v11  ;;  %v807_v51 = vld [vmem:[%s10287_s9 + $0xc0] sm:$0xff] }
 0x386   : > { %v796_v44 = vld [vmem:[%s10287_s9 + $0x68] sm:$0xff] }
 0x387   : > { %v2160_v46 = vrot.slane %v2153_v34, %v7354_v50  ;;  %v2172_v21 = vrot.slane %v2165_v23, %v7354_v50  ;;  %v788_v34 = vld [vmem:[%s10287_s9 + $0x28] sm:$0xff]  ;;  %10654 = vst [vmem:[#allocation32_spill] sm:$0xff] %v7397_v0  ;;  %v7400_v23 = vpack.c.bf16 %v796_v44, %v792_v22  ;;  %v811_v22 = vld [vmem:[%s10287_s9 + $0xe0] sm:$0xff] }
 0x388   : > { %v7378_v19 = vpack.c.bf16 %v788_v34, %v784_v8  ;;  %v799_v8 = vld [vmem:[%s10287_s9 + $0x80] sm:$0xff]  ;;  %v816_v44 = vld [vmem:[%s10287_s9 + $0x108] sm:$0xff] }
 0x389   : > { %v7359_v40 = vsub.f32 %v6246_v60, %v2160_v46  ;;  %v7362_v15 = vsub.f32 %v6247_v10, %v2172_v21  ;;  %10655 = vst [vmem:[#allocation33_spill] sm:$0xff] %v7400_v23  ;;  %v791_v46 = vld [vmem:[%s10287_s9 + $0x40] sm:$0xff]  ;;  %v800_v60 = vld [vmem:[%s10287_s9 + $0x88] sm:$0xff] }
 0x38a   : > { %10652 = vst [vmem:[#allocation31_spill] sm:$0xff] %v7378_v19  ;;  %v795_v21 = vld [vmem:[%s10287_s9 + $0x60] sm:$0xff]  ;;  %v804_v10 = vld [vmem:[%s10287_s9 + $0xa8] sm:$0xff] }
 0x38b   : > { %v2182_v28 = vrot.slane %v7359_v40, %v7354_v50  ;;  %v2270_v47 = vrot.slane %v7362_v15, %v7354_v50  ;;  %v803_v34 = vld [vmem:[%s10287_s9 + $0xa0] sm:$0xff] }
 0x38d   : > { %v2183_v4 = vcombine.high %v2182_v28, %v2182_v28  ;;  %v2271_v61 = vcombine.high %v2270_v47, %v2270_v47 }
 0x38f   : > { %5041 = vmatprep.subr.msk.mxu1 %vm1520_vm7, %v2183_v4  ;;  %v808_v4 = vld [vmem:[%s10287_s9 + $0xc8] sm:$0xff] }
 0x390   : > { %5042 = vmatpush1.msk.msra.mxu1 %vm1520_vm7, %v2182_v28  ;;  %v7416_v28 = vpack.c.bf16 %v795_v21, %v791_v46  ;;  %v820_v46 = vld [vmem:[%s10287_s9 + $0x128] sm:$0xff]  ;;  %v7452_v21 = vpack.c.bf16 %v811_v22, %v807_v51  ;;  %v823_v22 = vld [vmem:[%s10287_s9 + $0x140] sm:$0xff] }
 0x391   : > { %5043 = vmatmul.mubr.msk.f32.vlgmr.msra.gmra.mrb[2].mxu1 %vm2184_vm14, %v1303_v7  ;;  %5044 = vmatprep.subr.msk.mxu1 %vm1520_vm7, %v2271_v61  ;;  %v7434_v61 = vpack.c.bf16 %v803_v34, %v799_v8  ;;  %v819_v8 = vld [vmem:[%s10287_s9 + $0x120] sm:$0xff]  ;;  %v824_v34 = vld [vmem:[%s10287_s9 + $0x148] sm:$0xff] }
 0x392   : > { %5045 = vmatpush1.msk.msra.mxu1 %vm1520_vm7, %v2270_v47  ;;  %2340 = vmatprep.mubr.f32.mxu1 %v10653_v38  ;;  %10656 = vst [vmem:[#allocation34_spill] sm:$0xff] %v7416_v28  ;;  %v7419_v47 = vpack.c.bf16 %v804_v10, %v800_v60  ;;  %10660 = vst [vmem:[#allocation38_spill] sm:$0xff] %v7452_v21  ;;  %v7455_v60 = vpack.c.bf16 %v820_v46, %v816_v44  ;;  %v815_v10 = vld [vmem:[%s10287_s9 + $0x100] sm:$0xff]  ;;  %v832_v46 = vld [vmem:[%s10287_s9 + $0x188] sm:$0xff] }
 0x393   : > { %5116 = vmatprep.subr.bf16.mxu1 %v7378_v19  ;;  %10658 = vst [vmem:[#allocation36_spill] sm:$0xff] %v7434_v61  ;;  %v827_v44 = vld [vmem:[%s10287_s9 + $0x160] sm:$0xff] }
 0x394   : > { %10657 = vst [vmem:[#allocation35_spill] sm:$0xff] %v7419_v47  ;;  %10661 = vst [vmem:[#allocation39_spill] sm:$0xff] %v7455_v60 }
 0x395   : > { %5046 = vmatmul.mubr.msk.f32.vlgmr.msra.gmra.mrb[4].mxu1 %vm2184_vm14, %v1303_v7  ;;  %v812_v7 = vld [vmem:[%s10287_s9 + $0xe8] sm:$0xff] }
 0x396   : > { %5118 = vmatpush1.bf16.msra.mxu1 %v7397_v0  ;;  %v7437_v11 = vpack.c.bf16 %v812_v7, %v808_v4  ;;  %v828_v4 = vld [vmem:[%s10287_s9 + $0x168] sm:$0xff]  ;;  %v7470_v7 = vpack.c.bf16 %v819_v8, %v815_v10  ;;  %v7488_v8 = vpack.c.bf16 %v827_v44, %v823_v22 }
 0x397   : > { %5120 = vmatprep.subr.bf16.mxu1 %v7400_v23  ;;  %v7473_v51 = vpack.c.bf16 %v828_v4, %v824_v34  ;;  %v836_v10 = vld [vmem:[%s10287_s9 + $0x1a8] sm:$0xff]  ;;  %v831_v4 = vld [vmem:[%s10287_s9 + $0x180] sm:$0xff] }
 0x398   : > { %10659 = vst [vmem:[#allocation37_spill] sm:$0xff] %v7437_v11  ;;  %10662 = vst [vmem:[#allocation40_spill] sm:$0xff] %v7470_v7  ;;  %v7491_v34 = vpack.c.bf16 %v836_v10, %v832_v46  ;;  %v844_v22 = vld [vmem:[%s10287_s9 + $0x1e8] sm:$0xff]  ;;  %v839_v10 = vld [vmem:[%s10287_s9 + $0x1c0] sm:$0xff] }
 0x399   : > { %10663 = vst [vmem:[#allocation41_spill] sm:$0xff] %v7473_v51  ;;  %10664 = vst [vmem:[#allocation42_spill] sm:$0xff] %v7488_v8 }
 0x39a   : > { %5122 = vmatpush1.bf16.msra.mxu1 %v7416_v28  ;;  %10665 = vst [vmem:[#allocation43_spill] sm:$0xff] %v7491_v34 }
 0x39b   : > { %5124 = vmatprep.subr.bf16.mxu1 %v7419_v47 }
 0x39e   : > { %5126 = vmatpush1.bf16.msra.mxu1 %v7434_v61  ;;  %v911_v61 = vld [vmem:[%s10287_s9 + $0x400] sm:$0xff] }
 0x39f   : > { %5128 = vmatprep.subr.bf16.mxu1 %v7437_v11 }
 0x3a2   : > { %5130 = vmatpush1.bf16.msra.mxu1 %v7452_v21  ;;  %v840_v21 = vld [vmem:[%s10287_s9 + $0x1c8] sm:$0xff] }
 0x3a3   : > { %5132 = vmatprep.subr.bf16.mxu1 %v7455_v60  ;;  %v835_v60 = vld [vmem:[%s10287_s9 + $0x1a0] sm:$0xff]  ;;  %v7509_v46 = vpack.c.bf16 %v844_v22, %v840_v21 }
 0x3a4   : > { %v7506_v44 = vpack.c.bf16 %v835_v60, %v831_v4  ;;  %v852_v60 = vld [vmem:[%s10287_s9 + $0x228] sm:$0xff]  ;;  %v847_v22 = vld [vmem:[%s10287_s9 + $0x200] sm:$0xff] }
 0x3a5   : > { %10667 = vst [vmem:[#allocation45_spill] sm:$0xff] %v7509_v46 }
 0x3a6   : > { %5134 = vmatpush1.bf16.msra.mxu1 %v7470_v7  ;;  %10666 = vst [vmem:[#allocation44_spill] sm:$0xff] %v7506_v44  ;;  %v848_v7 = vld [vmem:[%s10287_s9 + $0x208] sm:$0xff] }
 0x3a7   : > { %5136 = vmatprep.subr.bf16.mxu1 %v7473_v51  ;;  %v843_v51 = vld [vmem:[%s10287_s9 + $0x1e0] sm:$0xff]  ;;  %v7527_v4 = vpack.c.bf16 %v852_v60, %v848_v7 }
 0x3a8   : > { %v7524_v21 = vpack.c.bf16 %v843_v51, %v839_v10  ;;  %v860_v51 = vld [vmem:[%s10287_s9 + $0x268] sm:$0xff]  ;;  %v855_v60 = vld [vmem:[%s10287_s9 + $0x240] sm:$0xff] }
 0x3a9   : > { %10669 = vst [vmem:[#allocation47_spill] sm:$0xff] %v7527_v4 }
 0x3aa   : > { %5138 = vmatpush1.bf16.msra.mxu1 %v7488_v8  ;;  %10668 = vst [vmem:[#allocation46_spill] sm:$0xff] %v7524_v21  ;;  %v856_v8 = vld [vmem:[%s10287_s9 + $0x248] sm:$0xff] }
 0x3ab   : > { %5140 = vmatprep.subr.bf16.mxu1 %v7491_v34  ;;  %v851_v34 = vld [vmem:[%s10287_s9 + $0x220] sm:$0xff]  ;;  %v7545_v10 = vpack.c.bf16 %v860_v51, %v856_v8 }
 0x3ac   : > { %v7542_v7 = vpack.c.bf16 %v851_v34, %v847_v22  ;;  %v868_v34 = vld [vmem:[%s10287_s9 + $0x2a8] sm:$0xff]  ;;  %v863_v51 = vld [vmem:[%s10287_s9 + $0x280] sm:$0xff] }
 0x3ad   : > { %10671 = vst [vmem:[#allocation49_spill] sm:$0xff] %v7545_v10 }
 0x3ae   : > { %5142 = vmatpush1.bf16.msra.mxu1 %v7506_v44  ;;  %10670 = vst [vmem:[#allocation48_spill] sm:$0xff] %v7542_v7  ;;  %v864_v44 = vld [vmem:[%s10287_s9 + $0x288] sm:$0xff] }
 0x3af   : > { %5144 = vmatprep.subr.bf16.mxu1 %v7509_v46  ;;  %v859_v46 = vld [vmem:[%s10287_s9 + $0x260] sm:$0xff]  ;;  %v7563_v22 = vpack.c.bf16 %v868_v34, %v864_v44 }
 0x3b0   : > { %v7560_v8 = vpack.c.bf16 %v859_v46, %v855_v60  ;;  %v876_v46 = vld [vmem:[%s10287_s9 + $0x2e8] sm:$0xff]  ;;  %v871_v34 = vld [vmem:[%s10287_s9 + $0x2c0] sm:$0xff] }
 0x3b1   : > { %10673 = vst [vmem:[#allocation51_spill] sm:$0xff] %v7563_v22 }
 0x3b2   : > { %5146 = vmatpush1.bf16.msra.mxu1 %v7524_v21  ;;  %10672 = vst [vmem:[#allocation50_spill] sm:$0xff] %v7560_v8  ;;  %v872_v21 = vld [vmem:[%s10287_s9 + $0x2c8] sm:$0xff] }
 0x3b3   : > { %5148 = vmatprep.subr.bf16.mxu1 %v7527_v4  ;;  %v867_v4 = vld [vmem:[%s10287_s9 + $0x2a0] sm:$0xff]  ;;  %v7581_v60 = vpack.c.bf16 %v876_v46, %v872_v21 }
 0x3b4   : > { %v7578_v44 = vpack.c.bf16 %v867_v4, %v863_v51  ;;  %v884_v4 = vld [vmem:[%s10287_s9 + $0x328] sm:$0xff]  ;;  %v879_v46 = vld [vmem:[%s10287_s9 + $0x300] sm:$0xff] }
 0x3b5   : > { %10675 = vst [vmem:[#allocation53_spill] sm:$0xff] %v7581_v60 }
 0x3b6   : > { %5150 = vmatpush1.bf16.msra.mxu1 %v7542_v7  ;;  %10674 = vst [vmem:[#allocation52_spill] sm:$0xff] %v7578_v44  ;;  %v880_v7 = vld [vmem:[%s10287_s9 + $0x308] sm:$0xff] }
 0x3b7   : > { %5152 = vmatprep.subr.bf16.mxu1 %v7545_v10  ;;  %v875_v10 = vld [vmem:[%s10287_s9 + $0x2e0] sm:$0xff]  ;;  %v7599_v51 = vpack.c.bf16 %v884_v4, %v880_v7 }
 0x3b8   : > { %v7596_v21 = vpack.c.bf16 %v875_v10, %v871_v34  ;;  %v892_v10 = vld [vmem:[%s10287_s9 + $0x368] sm:$0xff]  ;;  %v887_v4 = vld [vmem:[%s10287_s9 + $0x340] sm:$0xff] }
 0x3b9   : > { %10677 = vst [vmem:[#allocation55_spill] sm:$0xff] %v7599_v51 }
 0x3ba   : > { %5154 = vmatpush1.bf16.msra.mxu1 %v7560_v8  ;;  %10676 = vst [vmem:[#allocation54_spill] sm:$0xff] %v7596_v21  ;;  %v888_v8 = vld [vmem:[%s10287_s9 + $0x348] sm:$0xff] }
 0x3bb   : > { %5156 = vmatprep.subr.bf16.mxu1 %v7563_v22  ;;  %v883_v22 = vld [vmem:[%s10287_s9 + $0x320] sm:$0xff]  ;;  %v7617_v34 = vpack.c.bf16 %v892_v10, %v888_v8  ;;  %v896_v8 = vld [vmem:[%s10287_s9 + $0x388] sm:$0xff] }
 0x3bc   : > { %v7614_v7 = vpack.c.bf16 %v883_v22, %v879_v46  ;;  %v900_v22 = vld [vmem:[%s10287_s9 + $0x3a8] sm:$0xff]  ;;  %v898_v46 = vld [vmem:[%s10287_s9 + $0x398] sm:$0xff] }
 0x3bd   : > { %10679 = vst [vmem:[#allocation57_spill] sm:$0xff] %v7617_v34  ;;  %v7639_v10 = vpack.c.bf16 %v900_v22, %v896_v8  ;;  %v897_v8 = vld [vmem:[%s10287_s9 + $0x390] sm:$0xff] }
 0x3be   : > { %5158 = vmatpush1.bf16.msra.mxu1 %v7578_v44  ;;  %10678 = vst [vmem:[#allocation56_spill] sm:$0xff] %v7614_v7  ;;  %v901_v22 = vld [vmem:[%s10287_s9 + $0x3b0] sm:$0xff] }
 0x3bf   : > { %5160 = vmatprep.subr.bf16.mxu1 %v7581_v60  ;;  %v891_v60 = vld [vmem:[%s10287_s9 + $0x360] sm:$0xff]  ;;  %10681 = vst [vmem:[#allocation59_spill] sm:$0xff] %v7639_v10 }
 0x3c0   : > { %v7626_v44 = vpack.c.bf16 %v891_v60, %v887_v4  ;;  %v902_v60 = vld [vmem:[%s10287_s9 + $0x3b8] sm:$0xff]  ;;  %v895_v4 = vld [vmem:[%s10287_s9 + $0x380] sm:$0xff] }
 0x3c2   : > { %5162 = vmatpush1.bf16.msra.mxu1 %v7596_v21  ;;  %10680 = vst [vmem:[#allocation58_spill] sm:$0xff] %v7626_v44 }
 0x3c3   : > { %5164 = vmatprep.subr.bf16.mxu1 %v7599_v51  ;;  %v7663_v51 = vpack.c.bf16 %v901_v22, %v897_v8  ;;  %v903_v8 = vld [vmem:[%s10287_s9 + $0x3c0] sm:$0xff] }
 0x3c4   : > { %v907_v22 = vld [vmem:[%s10287_s9 + $0x3e0] sm:$0xff] }
 0x3c5   : > { %10684 = vst [vmem:[#allocation62_spill] sm:$0xff] %v7663_v51  ;;  %v7688_v21 = vpack.c.bf16 %v907_v22, %v903_v8  ;;  %v914_v8 = vld [vmem:[%s10287_s9 + $0x418] sm:$0xff] }
 0x3c6   : > { %5166 = vmatpush1.bf16.msra.mxu1 %v7614_v7 }
 0x3c7   : > { %5168 = vmatprep.subr.bf16.mxu1 %v7617_v34  ;;  %v7650_v34 = vpack.c.bf16 %v902_v60, %v898_v46  ;;  %v908_v46 = vld [vmem:[%s10287_s9 + $0x3e8] sm:$0xff]  ;;  %v906_v60 = vld [vmem:[%s10287_s9 + $0x3d8] sm:$0xff]  ;;  %10687 = vst [vmem:[#allocation65_spill] sm:$0xff] %v7688_v21 }
 0x3c9   : > { %10682 = vst [vmem:[#allocation60_spill] sm:$0xff] %v7650_v34  ;;  %5300 = vmatprep.subr.bf16.mxu0 %v7650_v34 }
 0x3ca   : > { %5170 = vmatpush1.bf16.msra.mxu1 %v7626_v44  ;;  %v899_v44 = vld [vmem:[%s10287_s9 + $0x3a0] sm:$0xff]  ;;  %5302 = vmatpush1.bf16.msra.mxu0 %v7663_v51 }
 0x3cb   : > { %v7652_v7 = vpack.c.bf16 %v899_v44, %v895_v4  ;;  %5172 = vmatprep.subr.bf16.mxu1 %v7639_v10  ;;  %v904_v44 = vld [vmem:[%s10287_s9 + $0x3c8] sm:$0xff] }
 0x3cc   : > { %v7674_v4 = vpack.c.bf16 %v908_v46, %v904_v44  ;;  %v905_v44 = vld [vmem:[%s10287_s9 + $0x3d0] sm:$0xff] }
 0x3cd   : > { %10683 = vst [vmem:[#allocation61_spill] sm:$0xff] %v7652_v7  ;;  %v909_v46 = vld [vmem:[%s10287_s9 + $0x3f0] sm:$0xff] }
 0x3ce   : > { %5174 = vmatpush1.bf16.msra.mxu1 %v7652_v7  ;;  %10685 = vst [vmem:[#allocation63_spill] sm:$0xff] %v7674_v4  ;;  %v910_v7 = vld [vmem:[%s10287_s9 + $0x3f8] sm:$0xff]  ;;  %v7697_v11 = vpack.c.bf16 %v909_v46, %v905_v44 }
 0x3cf   : > { %v7686_v10 = vpack.c.bf16 %v910_v7, %v906_v60  ;;  %5176 = vmatprep.subr.bf16.mxu1 %v7674_v4  ;;  %v912_v7 = vld [vmem:[%s10287_s9 + $0x408] sm:$0xff]  ;;  %v918_v44 = vld [vmem:[%s10287_s9 + $0x438] sm:$0xff] }
 0x3d0   : > { %10688 = vst [vmem:[#allocation66_spill] sm:$0xff] %v7697_v11  ;;  %v916_v60 = vld [vmem:[%s10287_s9 + $0x428] sm:$0xff]  ;;  %v7716_v46 = vpack.c.bf16 %v918_v44, %v914_v8  ;;  %v771_v8 = vld [vmem:[%s7724_s25] sm:$0xff] }
 0x3d1   : > { %10686 = vst [vmem:[#allocation64_spill] sm:$0xff] %v7686_v10  ;;  %5304 = vmatprep.subr.bf16.mxu0 %v7686_v10  ;;  %v7710_v22 = vpack.c.bf16 %v916_v60, %v912_v7  ;;  %v773_v44 = vld [vmem:[%s7729_s2] sm:$0xff] }
 0x3d2   : > { %5178 = vmatpush1.bf16.msra.mxu1 %v7688_v21  ;;  %5306 = vmatpush1.bf16.msra.mxu0 %v7697_v11  ;;  %10690 = vst [vmem:[#allocation68_spill] sm:$0xff] %v7716_v46  ;;  %v774_v21 = vld [vmem:[%s7729_s2 + $0x8] sm:$0xff] }
 0x3d3   : > { %10689 = vst [vmem:[#allocation67_spill] sm:$0xff] %v7710_v22  ;;  %5180 = vmatprep.subr.bf16.mxu1 %v7710_v22  ;;  %5308 = vmatprep.subr.bf16.mxu0 %v7716_v46  ;;  %v772_v22 = vld [vmem:[%s7724_s25 + $0x8] sm:$0xff]  ;;  %v917_v46 = vld [vmem:[%s10287_s9 + $0x430] sm:$0xff] }
 0x3d4   : > { %v7763_v35 = vpack.c.bf16 %v917_v46, %v913_v12  ;;  %v927_v46 = vld [vmem:[%s10287_s9 + $0x480] sm:$0xff] }
 0x3d6   : > { %10693 = vst [vmem:[#allocation70_spill] sm:$0xff] %v7763_v35 }
 0x464   : > { %v2258_v7 = vpop.f32.mrb[2].mxu1 }
 0x465   : > { %v2260_v60 = vpop.f32.mrb[3].mxu1  ;;  %v2347_v47 = vmul.f32 %v2258_v7, %v771_v8  ;;  %v2355_v28 = vmul.f32 %v2258_v7, %v773_v44 }
 0x466   : > { %v2348_v11 = vmul.f32 %v2260_v60, %v772_v22  ;;  %v2356_v10 = vmul.f32 %v2260_v60, %v774_v21  ;;  %v7761_v60 = vpack.c.bf16 %v915_v36, %v911_v61  ;;  %v928_v36 = vld [vmem:[%s10287_s9 + $0x488] sm:$0xff] }
 0x468   : > { %v2342_v4 = vpop.f32.mrb[4].mxu1  ;;  %10692 = vst [vmem:[#allocation69_spill] sm:$0xff] %v7761_v60 }
 0x469   : > { %v2349_v23 = vmul.f32 %v2342_v4, %v773_v44  ;;  %v2353_v0 = vmul.f32 %v2342_v4, %v771_v8  ;;  %v2344_v19 = vpop.f32.mrb[5].mxu1  ;;  %v920_v4 = vld [vmem:[%s10287_s9 + $0x448] sm:$0xff] }
 0x46a   : > { %v2350_v51 = vmul.f32 %v2344_v19, %v774_v21  ;;  %v2354_v34 = vmul.f32 %v2344_v19, %v772_v22  ;;  %v924_v44 = vld [vmem:[%s10287_s9 + $0x468] sm:$0xff]  ;;  %v926_v21 = vld [vmem:[%s10287_s9 + $0x478] sm:$0xff] }
 0x46b   : > { %v2351_v7 = vsub.f32 %v2347_v47, %v2349_v23  ;;  %v7750_v8 = vadd.f32 %v2355_v28, %v2353_v0  ;;  %v919_v0 = vld [vmem:[%s10287_s9 + $0x440] sm:$0xff]  ;;  %v921_v28 = vld [vmem:[%s10287_s9 + $0x450] sm:$0xff]  ;;  %v7780_v12 = vpack.c.bf16 %v924_v44, %v920_v4  ;;  %v7782_v61 = vpack.c.bf16 %v926_v21, %v922_v39 }
 0x46c   : > { %v2352_v19 = vsub.f32 %v2348_v11, %v2350_v51  ;;  %v2358_v22 = vadd.f32 %v2356_v10, %v2354_v34  ;;  %v923_v23 = vld [vmem:[%s10287_s9 + $0x460] sm:$0xff]  ;;  %v925_v47 = vld [vmem:[%s10287_s9 + $0x470] sm:$0xff]  ;;  %v932_v11 = vld [vmem:[%s10287_s9 + $0x4a8] sm:$0xff] }
 0x46d   : > { %10694 = vst [vmem:[#allocation71_spill] sm:$0xff] %v7780_v12  ;;  %10695 = vst [vmem:[#allocation72_spill] sm:$0xff] %v7782_v61  ;;  %v930_v51 = vld [vmem:[%s10287_s9 + $0x498] sm:$0xff]  ;;  %v7795_v39 = vpack.c.bf16 %v923_v23, %v919_v0  ;;  %v7797_v10 = vpack.c.bf16 %v925_v47, %v921_v28  ;;  %v931_v4 = vld [vmem:[%s10287_s9 + $0x4a0] sm:$0xff]  ;;  %v7805_v44 = vpack.c.bf16 %v932_v11, %v928_v36 }
 0x46e   : > { %2423 = vmatprep.mubr.f32.mxu1 %v2352_v19  ;;  %2565 = vmatprep.mubr.f32.mxu0 %v2352_v19  ;;  %v934_v34 = vld [vmem:[%s10287_s9 + $0x4b8] sm:$0xff]  ;;  %v929_v21 = vld [vmem:[%s10287_s9 + $0x490] sm:$0xff]  ;;  %v936_v0 = vld [vmem:[%s10287_s9 + $0x4c8] sm:$0xff]  ;;  %v7831_v47 = vpack.c.bf16 %v931_v4, %v927_v46 }
 0x46f   : > { %2424 = vmatmul.mubr.f32.vlgmr.msra.gmra.mrb[6].mxu1 %v2351_v7  ;;  %2566 = vmatmul.mubr.f32.vlgmr.msra.gmra.mrb[6].mxu0 %v2351_v7  ;;  %10696 = vst [vmem:[#allocation73_spill] sm:$0xff] %v7795_v39  ;;  %10697 = vst [vmem:[#allocation74_spill] sm:$0xff] %v7797_v10  ;;  %v7807_v7 = vpack.c.bf16 %v934_v34, %v930_v51  ;;  %v933_v19 = vld [vmem:[%s10287_s9 + $0x4b0] sm:$0xff]  ;;  %v938_v23 = vld [vmem:[%s10287_s9 + $0x4d8] sm:$0xff] }
 0x470   : > { %5182 = vmatpush1.bf16.msra.mxu1 %v7761_v60  ;;  %5310 = vmatpush1.bf16.msra.mxu0 %v7763_v35  ;;  %10698 = vst [vmem:[#allocation75_spill] sm:$0xff] %v7805_v44  ;;  %v942_v28 = vld [vmem:[%s10287_s9 + $0x4f8] sm:$0xff]  ;;  %10700 = vst [vmem:[#allocation77_spill] sm:$0xff] %v7831_v47  ;;  %v7833_v36 = vpack.c.bf16 %v933_v19, %v929_v21  ;;  %v935_v11 = vld [vmem:[%s10287_s9 + $0x4c0] sm:$0xff] }
 0x471   : > { %2494 = vmatprep.mubr.f32.mxu1 %v2358_v22  ;;  %2636 = vmatprep.mubr.f32.mxu0 %v2358_v22  ;;  %10699 = vst [vmem:[#allocation76_spill] sm:$0xff] %v7807_v7  ;;  %v940_v22 = vld [vmem:[%s10287_s9 + $0x4e8] sm:$0xff]  ;;  %v939_v51 = vld [vmem:[%s10287_s9 + $0x4e0] sm:$0xff]  ;;  %v937_v46 = vld [vmem:[%s10287_s9 + $0x4d0] sm:$0xff] }
 0x472   : > { %5184 = vmatprep.subr.bf16.mxu1 %v7780_v12  ;;  %5312 = vmatprep.subr.bf16.mxu0 %v7782_v61  ;;  %10701 = vst [vmem:[#allocation78_spill] sm:$0xff] %v7833_v36  ;;  %v7843_v34 = vpack.c.bf16 %v940_v22, %v936_v0  ;;  %v941_v4 = vld [vmem:[%s10287_s9 + $0x4f0] sm:$0xff]  ;;  %v944_v21 = vld [vmem:[%s10287_s9 + $0x508] sm:$0xff]  ;;  %v946_v0 = vld [vmem:[%s10287_s9 + $0x518] sm:$0xff] }
 0x473   : > { %v948_v19 = vld [vmem:[%s10287_s9 + $0x528] sm:$0xff]  ;;  %v950_v22 = vld [vmem:[%s10287_s9 + $0x538] sm:$0xff]  ;;  %v1177_v60 = vld [vmem:[%s10288_s10 + $0x450] sm:$0xff] }
 0x474   : > { %5186 = vmatpush1.bf16.msra.mxu1 %v7795_v39  ;;  %5314 = vmatpush1.bf16.msra.mxu0 %v7797_v10  ;;  %10702 = vst [vmem:[#allocation79_spill] sm:$0xff] %v7843_v34  ;;  %v7845_v39 = vpack.c.bf16 %v942_v28, %v938_v23  ;;  %v7867_v23 = vpack.c.bf16 %v939_v51, %v935_v11  ;;  %v945_v11 = vld [vmem:[%s10287_s9 + $0x510] sm:$0xff]  ;;  %v782_v12 = vld [vmem:[%s8900_s14 + $0x18] sm:$0xff] }
 0x475   : > { %5188 = vmatprep.subr.bf16.mxu1 %v7805_v44  ;;  %5316 = vmatprep.subr.bf16.mxu0 %v7807_v7  ;;  %v7869_v28 = vpack.c.bf16 %v941_v4, %v937_v46  ;;  %v943_v7 = vld [vmem:[%s10287_s9 + $0x500] sm:$0xff]  ;;  %v7879_v10 = vpack.c.bf16 %v948_v19, %v944_v21  ;;  %v949_v51 = vld [vmem:[%s10287_s9 + $0x530] sm:$0xff]  ;;  %v952_v46 = vld [vmem:[%s10287_s9 + $0x548] sm:$0xff] }
 0x476   : > { %10703 = vst [vmem:[#allocation80_spill] sm:$0xff] %v7845_v39  ;;  %10704 = vst [vmem:[#allocation81_spill] sm:$0xff] %v7867_v23  ;;  %v947_v44 = vld [vmem:[%s10287_s9 + $0x520] sm:$0xff]  ;;  %v956_v4 = vld [vmem:[%s10287_s9 + $0x568] sm:$0xff] }
 0x477   : > { %10705 = vst [vmem:[#allocation82_spill] sm:$0xff] %v7869_v28  ;;  %10706 = vst [vmem:[#allocation83_spill] sm:$0xff] %v7879_v10  ;;  %v954_v21 = vld [vmem:[%s10287_s9 + $0x558] sm:$0xff] }
 0x478   : > { %5190 = vmatpush1.bf16.msra.mxu1 %v7831_v47  ;;  %5318 = vmatpush1.bf16.msra.mxu0 %v7833_v36  ;;  %v7881_v47 = vpack.c.bf16 %v950_v22, %v946_v0  ;;  %v958_v19 = vld [vmem:[%s10287_s9 + $0x578] sm:$0xff]  ;;  %v7903_v0 = vpack.c.bf16 %v947_v44, %v943_v7  ;;  %v7905_v22 = vpack.c.bf16 %v949_v51, %v945_v11  ;;  %v953_v44 = vld [vmem:[%s10287_s9 + $0x550] sm:$0xff]  ;;  %v960_v11 = vld [vmem:[%s10287_s9 + $0x588] sm:$0xff] }
 0x479   : > { %5192 = vmatprep.subr.bf16.mxu1 %v7843_v34  ;;  %5320 = vmatprep.subr.bf16.mxu0 %v7845_v39  ;;  %v951_v39 = vld [vmem:[%s10287_s9 + $0x540] sm:$0xff]  ;;  %v7915_v36 = vpack.c.bf16 %v956_v4, %v952_v46  ;;  %v957_v7 = vld [vmem:[%s10287_s9 + $0x570] sm:$0xff]  ;;  %v964_v51 = vld [vmem:[%s10287_s9 + $0x5a8] sm:$0xff] }
 0x47a   : > { %10707 = vst [vmem:[#allocation84_spill] sm:$0xff] %v7881_v47  ;;  %10708 = vst [vmem:[#allocation85_spill] sm:$0xff] %v7903_v0  ;;  %v955_v34 = vld [vmem:[%s10287_s9 + $0x560] sm:$0xff]  ;;  %v962_v46 = vld [vmem:[%s10287_s9 + $0x598] sm:$0xff] }
 0x47b   : > { %10709 = vst [vmem:[#allocation86_spill] sm:$0xff] %v7905_v22  ;;  %10710 = vst [vmem:[#allocation87_spill] sm:$0xff] %v7915_v36  ;;  %v966_v4 = vld [vmem:[%s10287_s9 + $0x5b8] sm:$0xff] }
 0x47c   : > { %5194 = vmatpush1.bf16.msra.mxu1 %v7867_v23  ;;  %5322 = vmatpush1.bf16.msra.mxu0 %v7869_v28  ;;  %v7917_v23 = vpack.c.bf16 %v958_v19, %v954_v21  ;;  %v7939_v21 = vpack.c.bf16 %v955_v34, %v951_v39  ;;  %v7941_v19 = vpack.c.bf16 %v957_v7, %v953_v44  ;;  %v961_v39 = vld [vmem:[%s10287_s9 + $0x590] sm:$0xff]  ;;  %v968_v44 = vld [vmem:[%s10287_s9 + $0x5c8] sm:$0xff] }
 0x47d   : > { %5196 = vmatprep.subr.bf16.mxu1 %v7879_v10  ;;  %5324 = vmatprep.subr.bf16.mxu0 %v7881_v47  ;;  %v959_v47 = vld [vmem:[%s10287_s9 + $0x580] sm:$0xff]  ;;  %v7951_v28 = vpack.c.bf16 %v964_v51, %v960_v11  ;;  %v965_v34 = vld [vmem:[%s10287_s9 + $0x5b0] sm:$0xff]  ;;  %v972_v7 = vld [vmem:[%s10287_s9 + $0x5e8] sm:$0xff] }
 0x47e   : > { %10711 = vst [vmem:[#allocation88_spill] sm:$0xff] %v7917_v23  ;;  %10712 = vst [vmem:[#allocation89_spill] sm:$0xff] %v7939_v21  ;;  %v963_v10 = vld [vmem:[%s10287_s9 + $0x5a0] sm:$0xff]  ;;  %v970_v11 = vld [vmem:[%s10287_s9 + $0x5d8] sm:$0xff] }
 0x47f   : > { %10713 = vst [vmem:[#allocation90_spill] sm:$0xff] %v7941_v19  ;;  %10714 = vst [vmem:[#allocation91_spill] sm:$0xff] %v7951_v28  ;;  %v974_v51 = vld [vmem:[%s10287_s9 + $0x5f8] sm:$0xff] }
 0x480   : > { %5198 = vmatpush1.bf16.msra.mxu1 %v7903_v0  ;;  %5326 = vmatpush1.bf16.msra.mxu0 %v7905_v22  ;;  %v7953_v0 = vpack.c.bf16 %v966_v4, %v962_v46  ;;  %v7975_v46 = vpack.c.bf16 %v963_v10, %v959_v47  ;;  %v7977_v4 = vpack.c.bf16 %v965_v34, %v961_v39  ;;  %v969_v10 = vld [vmem:[%s10287_s9 + $0x5d0] sm:$0xff]  ;;  %v976_v39 = vld [vmem:[%s10287_s9 + $0x608] sm:$0xff] }
 0x481   : > { %5200 = vmatprep.subr.bf16.mxu1 %v7915_v36  ;;  %5328 = vmatprep.subr.bf16.mxu0 %v7917_v23  ;;  %v967_v23 = vld [vmem:[%s10287_s9 + $0x5c0] sm:$0xff]  ;;  %v7987_v22 = vpack.c.bf16 %v972_v7, %v968_v44  ;;  %v973_v47 = vld [vmem:[%s10287_s9 + $0x5f0] sm:$0xff]  ;;  %v980_v34 = vld [vmem:[%s10287_s9 + $0x628] sm:$0xff] }
 0x482   : > { %10715 = vst [vmem:[#allocation92_spill] sm:$0xff] %v7953_v0  ;;  %10716 = vst [vmem:[#allocation93_spill] sm:$0xff] %v7975_v46  ;;  %v971_v36 = vld [vmem:[%s10287_s9 + $0x5e0] sm:$0xff]  ;;  %v978_v44 = vld [vmem:[%s10287_s9 + $0x618] sm:$0xff] }
 0x483   : > { %10717 = vst [vmem:[#allocation94_spill] sm:$0xff] %v7977_v4  ;;  %10718 = vst [vmem:[#allocation95_spill] sm:$0xff] %v7987_v22  ;;  %v982_v7 = vld [vmem:[%s10287_s9 + $0x638] sm:$0xff] }
 0x484   : > { %5202 = vmatpush1.bf16.msra.mxu1 %v7939_v21  ;;  %5330 = vmatpush1.bf16.msra.mxu0 %v7941_v19  ;;  %v7989_v21 = vpack.c.bf16 %v974_v51, %v970_v11  ;;  %v8011_v11 = vpack.c.bf16 %v971_v36, %v967_v23  ;;  %v8013_v51 = vpack.c.bf16 %v973_v47, %v969_v10  ;;  %v977_v36 = vld [vmem:[%s10287_s9 + $0x610] sm:$0xff]  ;;  %v984_v10 = vld [vmem:[%s10287_s9 + $0x648] sm:$0xff] }
 0x485   : > { %5204 = vmatprep.subr.bf16.mxu1 %v7951_v28  ;;  %5332 = vmatprep.subr.bf16.mxu0 %v7953_v0  ;;  %v975_v0 = vld [vmem:[%s10287_s9 + $0x600] sm:$0xff]  ;;  %v8023_v19 = vpack.c.bf16 %v980_v34, %v976_v39  ;;  %v981_v23 = vld [vmem:[%s10287_s9 + $0x630] sm:$0xff]  ;;  %v988_v47 = vld [vmem:[%s10287_s9 + $0x668] sm:$0xff] }
 0x486   : > { %10719 = vst [vmem:[#allocation96_spill] sm:$0xff] %v7989_v21  ;;  %10720 = vst [vmem:[#allocation97_spill] sm:$0xff] %v8011_v11  ;;  %v979_v28 = vld [vmem:[%s10287_s9 + $0x620] sm:$0xff]  ;;  %v986_v39 = vld [vmem:[%s10287_s9 + $0x658] sm:$0xff] }
 0x487   : > { %10721 = vst [vmem:[#allocation98_spill] sm:$0xff] %v8013_v51  ;;  %10722 = vst [vmem:[#allocation99_spill] sm:$0xff] %v8023_v19  ;;  %v990_v34 = vld [vmem:[%s10287_s9 + $0x678] sm:$0xff] }
 0x488   : > { %5206 = vmatpush1.bf16.msra.mxu1 %v7975_v46  ;;  %5334 = vmatpush1.bf16.msra.mxu0 %v7977_v4  ;;  %v8025_v46 = vpack.c.bf16 %v982_v7, %v978_v44  ;;  %v8047_v44 = vpack.c.bf16 %v979_v28, %v975_v0  ;;  %v8049_v7 = vpack.c.bf16 %v981_v23, %v977_v36  ;;  %v985_v28 = vld [vmem:[%s10287_s9 + $0x650] sm:$0xff]  ;;  %v992_v36 = vld [vmem:[%s10287_s9 + $0x688] sm:$0xff] }
 0x489   : > { %5208 = vmatprep.subr.bf16.mxu1 %v7987_v22  ;;  %5336 = vmatprep.subr.bf16.mxu0 %v7989_v21  ;;  %v983_v21 = vld [vmem:[%s10287_s9 + $0x640] sm:$0xff]  ;;  %v8059_v4 = vpack.c.bf16 %v988_v47, %v984_v10  ;;  %v989_v0 = vld [vmem:[%s10287_s9 + $0x670] sm:$0xff]  ;;  %v996_v23 = vld [vmem:[%s10287_s9 + $0x6a8] sm:$0xff] }
 0x48a   : > { %10723 = vst [vmem:[#allocation100_spill] sm:$0xff] %v8025_v46  ;;  %10724 = vst [vmem:[#allocation101_spill] sm:$0xff] %v8047_v44  ;;  %v987_v22 = vld [vmem:[%s10287_s9 + $0x660] sm:$0xff]  ;;  %v994_v10 = vld [vmem:[%s10287_s9 + $0x698] sm:$0xff] }
 0x48b   : > { %10725 = vst [vmem:[#allocation102_spill] sm:$0xff] %v8049_v7  ;;  %10726 = vst [vmem:[#allocation103_spill] sm:$0xff] %v8059_v4  ;;  %v998_v47 = vld [vmem:[%s10287_s9 + $0x6b8] sm:$0xff] }
 0x48c   : > { %5210 = vmatpush1.bf16.msra.mxu1 %v8011_v11  ;;  %5338 = vmatpush1.bf16.msra.mxu0 %v8013_v51  ;;  %v8061_v11 = vpack.c.bf16 %v990_v34, %v986_v39  ;;  %v8083_v39 = vpack.c.bf16 %v987_v22, %v983_v21  ;;  %v8085_v34 = vpack.c.bf16 %v989_v0, %v985_v28  ;;  %v993_v22 = vld [vmem:[%s10287_s9 + $0x690] sm:$0xff]  ;;  %v1000_v28 = vld [vmem:[%s10287_s9 + $0x6c8] sm:$0xff] }
 0x48d   : > { %5212 = vmatprep.subr.bf16.mxu1 %v8023_v19  ;;  %5340 = vmatprep.subr.bf16.mxu0 %v8025_v46  ;;  %v991_v46 = vld [vmem:[%s10287_s9 + $0x680] sm:$0xff]  ;;  %v8095_v51 = vpack.c.bf16 %v996_v23, %v992_v36  ;;  %v997_v21 = vld [vmem:[%s10287_s9 + $0x6b0] sm:$0xff]  ;;  %v1004_v0 = vld [vmem:[%s10287_s9 + $0x6e8] sm:$0xff] }
 0x48e   : > { %10727 = vst [vmem:[#allocation104_spill] sm:$0xff] %v8061_v11  ;;  %10728 = vst [vmem:[#allocation105_spill] sm:$0xff] %v8083_v39  ;;  %v995_v19 = vld [vmem:[%s10287_s9 + $0x6a0] sm:$0xff]  ;;  %v1002_v36 = vld [vmem:[%s10287_s9 + $0x6d8] sm:$0xff] }
 0x48f   : > { %10729 = vst [vmem:[#allocation106_spill] sm:$0xff] %v8085_v34  ;;  %10730 = vst [vmem:[#allocation107_spill] sm:$0xff] %v8095_v51  ;;  %v1006_v23 = vld [vmem:[%s10287_s9 + $0x6f8] sm:$0xff] }
 0x490   : > { %5214 = vmatpush1.bf16.msra.mxu1 %v8047_v44  ;;  %5342 = vmatpush1.bf16.msra.mxu0 %v8049_v7  ;;  %v8097_v44 = vpack.c.bf16 %v998_v47, %v994_v10  ;;  %v8119_v10 = vpack.c.bf16 %v995_v19, %v991_v46  ;;  %v8121_v47 = vpack.c.bf16 %v997_v21, %v993_v22  ;;  %v1001_v19 = vld [vmem:[%s10287_s9 + $0x6d0] sm:$0xff]  ;;  %v1008_v22 = vld [vmem:[%s10287_s9 + $0x708] sm:$0xff] }
 0x491   : > { %5216 = vmatprep.subr.bf16.mxu1 %v8059_v4  ;;  %5344 = vmatprep.subr.bf16.mxu0 %v8061_v11  ;;  %v999_v11 = vld [vmem:[%s10287_s9 + $0x6c0] sm:$0xff]  ;;  %v8131_v7 = vpack.c.bf16 %v1004_v0, %v1000_v28  ;;  %v1005_v46 = vld [vmem:[%s10287_s9 + $0x6f0] sm:$0xff]  ;;  %v1012_v21 = vld [vmem:[%s10287_s9 + $0x728] sm:$0xff] }
 0x492   : > { %10731 = vst [vmem:[#allocation108_spill] sm:$0xff] %v8097_v44  ;;  %10732 = vst [vmem:[#allocation109_spill] sm:$0xff] %v8119_v10  ;;  %v1003_v4 = vld [vmem:[%s10287_s9 + $0x6e0] sm:$0xff]  ;;  %v1010_v28 = vld [vmem:[%s10287_s9 + $0x718] sm:$0xff] }
 0x493   : > { %10733 = vst [vmem:[#allocation110_spill] sm:$0xff] %v8121_v47  ;;  %10734 = vst [vmem:[#allocation111_spill] sm:$0xff] %v8131_v7  ;;  %v1014_v0 = vld [vmem:[%s10287_s9 + $0x738] sm:$0xff] }
 0x494   : > { %5218 = vmatpush1.bf16.msra.mxu1 %v8083_v39  ;;  %5346 = vmatpush1.bf16.msra.mxu0 %v8085_v34  ;;  %v8133_v39 = vpack.c.bf16 %v1006_v23, %v1002_v36  ;;  %v8155_v36 = vpack.c.bf16 %v1003_v4, %v999_v11  ;;  %v8157_v23 = vpack.c.bf16 %v1005_v46, %v1001_v19  ;;  %v1009_v4 = vld [vmem:[%s10287_s9 + $0x710] sm:$0xff]  ;;  %v1016_v19 = vld [vmem:[%s10287_s9 + $0x748] sm:$0xff] }
 0x495   : > { %5220 = vmatprep.subr.bf16.mxu1 %v8095_v51  ;;  %5348 = vmatprep.subr.bf16.mxu0 %v8097_v44  ;;  %v1007_v44 = vld [vmem:[%s10287_s9 + $0x700] sm:$0xff]  ;;  %v8167_v34 = vpack.c.bf16 %v1012_v21, %v1008_v22  ;;  %v1013_v11 = vld [vmem:[%s10287_s9 + $0x730] sm:$0xff]  ;;  %v1020_v46 = vld [vmem:[%s10287_s9 + $0x768] sm:$0xff] }
 0x496   : > { %10735 = vst [vmem:[#allocation112_spill] sm:$0xff] %v8133_v39  ;;  %10736 = vst [vmem:[#allocation113_spill] sm:$0xff] %v8155_v36  ;;  %v1011_v51 = vld [vmem:[%s10287_s9 + $0x720] sm:$0xff]  ;;  %v1018_v22 = vld [vmem:[%s10287_s9 + $0x758] sm:$0xff] }
 0x497   : > { %10737 = vst [vmem:[#allocation114_spill] sm:$0xff] %v8157_v23  ;;  %10738 = vst [vmem:[#allocation115_spill] sm:$0xff] %v8167_v34  ;;  %v1022_v21 = vld [vmem:[%s10287_s9 + $0x778] sm:$0xff] }
 0x498   : > { %5222 = vmatpush1.bf16.msra.mxu1 %v8119_v10  ;;  %5350 = vmatpush1.bf16.msra.mxu0 %v8121_v47  ;;  %v8169_v10 = vpack.c.bf16 %v1014_v0, %v1010_v28  ;;  %v8191_v28 = vpack.c.bf16 %v1011_v51, %v1007_v44  ;;  %v8193_v0 = vpack.c.bf16 %v1013_v11, %v1009_v4  ;;  %v1017_v51 = vld [vmem:[%s10287_s9 + $0x750] sm:$0xff]  ;;  %v1024_v4 = vld [vmem:[%s10287_s9 + $0x788] sm:$0xff] }
 0x499   : > { %5224 = vmatprep.subr.bf16.mxu1 %v8131_v7  ;;  %5352 = vmatprep.subr.bf16.mxu0 %v8133_v39  ;;  %v1015_v39 = vld [vmem:[%s10287_s9 + $0x740] sm:$0xff]  ;;  %v8203_v47 = vpack.c.bf16 %v1020_v46, %v1016_v19  ;;  %v1021_v44 = vld [vmem:[%s10287_s9 + $0x770] sm:$0xff]  ;;  %v1028_v11 = vld [vmem:[%s10287_s9 + $0x7a8] sm:$0xff] }
 0x49a   : > { %10739 = vst [vmem:[#allocation116_spill] sm:$0xff] %v8169_v10  ;;  %10740 = vst [vmem:[#allocation117_spill] sm:$0xff] %v8191_v28  ;;  %v1019_v7 = vld [vmem:[%s10287_s9 + $0x760] sm:$0xff]  ;;  %v1026_v19 = vld [vmem:[%s10287_s9 + $0x798] sm:$0xff] }
 0x49b   : > { %10741 = vst [vmem:[#allocation118_spill] sm:$0xff] %v8193_v0  ;;  %10742 = vst [vmem:[#allocation119_spill] sm:$0xff] %v8203_v47  ;;  %v1030_v46 = vld [vmem:[%s10287_s9 + $0x7b8] sm:$0xff] }
 0x49c   : > { %5226 = vmatpush1.bf16.msra.mxu1 %v8155_v36  ;;  %5354 = vmatpush1.bf16.msra.mxu0 %v8157_v23  ;;  %v8205_v36 = vpack.c.bf16 %v1022_v21, %v1018_v22  ;;  %v8227_v22 = vpack.c.bf16 %v1019_v7, %v1015_v39  ;;  %v8229_v21 = vpack.c.bf16 %v1021_v44, %v1017_v51  ;;  %v1025_v7 = vld [vmem:[%s10287_s9 + $0x790] sm:$0xff]  ;;  %v1032_v51 = vld [vmem:[%s10287_s9 + $0x7c8] sm:$0xff] }
 0x49d   : > { %5228 = vmatprep.subr.bf16.mxu1 %v8167_v34  ;;  %5356 = vmatprep.subr.bf16.mxu0 %v8169_v10  ;;  %v1023_v10 = vld [vmem:[%s10287_s9 + $0x780] sm:$0xff]  ;;  %v8239_v23 = vpack.c.bf16 %v1028_v11, %v1024_v4  ;;  %v1029_v39 = vld [vmem:[%s10287_s9 + $0x7b0] sm:$0xff]  ;;  %v1036_v44 = vld [vmem:[%s10287_s9 + $0x7e8] sm:$0xff] }
 0x49e   : > { %10743 = vst [vmem:[#allocation120_spill] sm:$0xff] %v8205_v36  ;;  %10744 = vst [vmem:[#allocation121_spill] sm:$0xff] %v8227_v22  ;;  %v1027_v34 = vld [vmem:[%s10287_s9 + $0x7a0] sm:$0xff]  ;;  %v1034_v4 = vld [vmem:[%s10287_s9 + $0x7d8] sm:$0xff] }
 0x49f   : > { %10745 = vst [vmem:[#allocation122_spill] sm:$0xff] %v8229_v21  ;;  %10746 = vst [vmem:[#allocation123_spill] sm:$0xff] %v8239_v23  ;;  %v1038_v11 = vld [vmem:[%s10287_s9 + $0x7f8] sm:$0xff] }
 0x4a0   : > { %5230 = vmatpush1.bf16.msra.mxu1 %v8191_v28  ;;  %5358 = vmatpush1.bf16.msra.mxu0 %v8193_v0  ;;  %v8241_v28 = vpack.c.bf16 %v1030_v46, %v1026_v19  ;;  %v8263_v19 = vpack.c.bf16 %v1027_v34, %v1023_v10  ;;  %v8265_v46 = vpack.c.bf16 %v1029_v39, %v1025_v7  ;;  %v1033_v34 = vld [vmem:[%s10287_s9 + $0x7d0] sm:$0xff]  ;;  %v1040_v7 = vld [vmem:[%s10288_s10 + $0x8] sm:$0xff] }
 0x4a1   : > { %5232 = vmatprep.subr.bf16.mxu1 %v8203_v47  ;;  %5360 = vmatprep.subr.bf16.mxu0 %v8205_v36  ;;  %v1031_v36 = vld [vmem:[%s10287_s9 + $0x7c0] sm:$0xff]  ;;  %v8275_v0 = vpack.c.bf16 %v1036_v44, %v1032_v51  ;;  %v1037_v10 = vld [vmem:[%s10287_s9 + $0x7f0] sm:$0xff]  ;;  %v1044_v39 = vld [vmem:[%s10288_s10 + $0x28] sm:$0xff] }
 0x4a2   : > { %10747 = vst [vmem:[#allocation124_spill] sm:$0xff] %v8241_v28  ;;  %10748 = vst [vmem:[#allocation125_spill] sm:$0xff] %v8263_v19  ;;  %v1035_v47 = vld [vmem:[%s10287_s9 + $0x7e0] sm:$0xff]  ;;  %v1042_v51 = vld [vmem:[%s10288_s10 + $0x18] sm:$0xff] }
 0x4a3   : > { %10749 = vst [vmem:[#allocation126_spill] sm:$0xff] %v8265_v46  ;;  %10750 = vst [vmem:[#allocation127_spill] sm:$0xff] %v8275_v0  ;;  %v1046_v44 = vld [vmem:[%s10288_s10 + $0x38] sm:$0xff] }
 0x4a4   : > { %5234 = vmatpush1.bf16.msra.mxu1 %v8227_v22  ;;  %5362 = vmatpush1.bf16.msra.mxu0 %v8229_v21  ;;  %v8277_v22 = vpack.c.bf16 %v1038_v11, %v1034_v4  ;;  %v8299_v4 = vpack.c.bf16 %v1035_v47, %v1031_v36  ;;  %v8301_v11 = vpack.c.bf16 %v1037_v10, %v1033_v34  ;;  %v1041_v47 = vld [vmem:[%s10288_s10 + $0x10] sm:$0xff]  ;;  %v1048_v34 = vld [vmem:[%s10288_s10 + $0x48] sm:$0xff] }
 0x4a5   : > { %5236 = vmatprep.subr.bf16.mxu1 %v8239_v23  ;;  %5364 = vmatprep.subr.bf16.mxu0 %v8241_v28  ;;  %v1039_v28 = vld [vmem:[%s10288_s10] sm:$0xff]  ;;  %v8311_v21 = vpack.c.bf16 %v1044_v39, %v1040_v7  ;;  %v1045_v36 = vld [vmem:[%s10288_s10 + $0x30] sm:$0xff]  ;;  %v1052_v10 = vld [vmem:[%s10288_s10 + $0x68] sm:$0xff] }
 0x4a6   : > { %10751 = vst [vmem:[#allocation128_spill] sm:$0xff] %v8277_v22  ;;  %10752 = vst [vmem:[#allocation129_spill] sm:$0xff] %v8299_v4  ;;  %v1043_v23 = vld [vmem:[%s10288_s10 + $0x20] sm:$0xff]  ;;  %v1050_v7 = vld [vmem:[%s10288_s10 + $0x58] sm:$0xff] }
 0x4a7   : > { %10753 = vst [vmem:[#allocation130_spill] sm:$0xff] %v8301_v11  ;;  %10754 = vst [vmem:[#allocation131_spill] sm:$0xff] %v8311_v21  ;;  %v1054_v39 = vld [vmem:[%s10288_s10 + $0x78] sm:$0xff] }
 0x4a8   : > { %5238 = vmatpush1.bf16.msra.mxu1 %v8263_v19  ;;  %5366 = vmatpush1.bf16.msra.mxu0 %v8265_v46  ;;  %v8313_v19 = vpack.c.bf16 %v1046_v44, %v1042_v51  ;;  %v8335_v51 = vpack.c.bf16 %v1043_v23, %v1039_v28  ;;  %v8337_v44 = vpack.c.bf16 %v1045_v36, %v1041_v47  ;;  %v1049_v23 = vld [vmem:[%s10288_s10 + $0x50] sm:$0xff]  ;;  %v1056_v47 = vld [vmem:[%s10288_s10 + $0x88] sm:$0xff] }
 0x4a9   : > { %5240 = vmatprep.subr.bf16.mxu1 %v8275_v0  ;;  %5368 = vmatprep.subr.bf16.mxu0 %v8277_v22  ;;  %v1047_v22 = vld [vmem:[%s10288_s10 + $0x40] sm:$0xff]  ;;  %v8347_v46 = vpack.c.bf16 %v1052_v10, %v1048_v34  ;;  %v1053_v28 = vld [vmem:[%s10288_s10 + $0x70] sm:$0xff]  ;;  %v1060_v36 = vld [vmem:[%s10288_s10 + $0xa8] sm:$0xff] }
 0x4aa   : > { %10755 = vst [vmem:[#allocation132_spill] sm:$0xff] %v8313_v19  ;;  %10756 = vst [vmem:[#allocation133_spill] sm:$0xff] %v8335_v51  ;;  %v1051_v0 = vld [vmem:[%s10288_s10 + $0x60] sm:$0xff]  ;;  %v1058_v34 = vld [vmem:[%s10288_s10 + $0x98] sm:$0xff] }
 0x4ab   : > { %10757 = vst [vmem:[#allocation134_spill] sm:$0xff] %v8337_v44  ;;  %10758 = vst [vmem:[#allocation135_spill] sm:$0xff] %v8347_v46  ;;  %v1062_v10 = vld [vmem:[%s10288_s10 + $0xb8] sm:$0xff] }
 0x4ac   : > { %5242 = vmatpush1.bf16.msra.mxu1 %v8299_v4  ;;  %5370 = vmatpush1.bf16.msra.mxu0 %v8301_v11  ;;  %v8349_v4 = vpack.c.bf16 %v1054_v39, %v1050_v7  ;;  %v8373_v7 = vpack.c.bf16 %v1051_v0, %v1047_v22  ;;  %v8375_v39 = vpack.c.bf16 %v1053_v28, %v1049_v23  ;;  %v1057_v0 = vld [vmem:[%s10288_s10 + $0x90] sm:$0xff]  ;;  %v1064_v23 = vld [vmem:[%s10288_s10 + $0xc8] sm:$0xff]  ;;  %v1182_v11 = vld [vmem:[%s10288_s10 + $0x478] sm:$0xff] }
 0x4ad   : > { %5372 = vmatprep.subr.bf16.mxu1 %v8311_v21  ;;  %5500 = vmatprep.subr.bf16.mxu0 %v8313_v19  ;;  %v1055_v19 = vld [vmem:[%s10288_s10 + $0x80] sm:$0xff]  ;;  %v1061_v22 = vld [vmem:[%s10288_s10 + $0xb0] sm:$0xff]  ;;  %v1068_v28 = vld [vmem:[%s10288_s10 + $0xe8] sm:$0xff] }
 0x4ae   : > { %10759 = vst [vmem:[#allocation136_spill] sm:$0xff] %v8349_v4  ;;  %10760 = vst [vmem:[#allocation137_spill] sm:$0xff] %v8373_v7  ;;  %v1059_v21 = vld [vmem:[%s10288_s10 + $0xa0] sm:$0xff] }
 0x4af   : > { %2495 = vmatmul.mubr.f32.vlgmr.msra.gmra.mrb[6].mxu1 %v7750_v8  ;;  %2637 = vmatmul.mubr.f32.vlgmr.msra.gmra.mrb[6].mxu0 %v7750_v8  ;;  %10761 = vst [vmem:[#allocation138_spill] sm:$0xff] %v8375_v39  ;;  %v8385_v8 = vpack.c.bf16 %v1060_v36, %v1056_v47  ;;  %v1066_v47 = vld [vmem:[%s10288_s10 + $0xd8] sm:$0xff] }
 0x4b0   : > { %5374 = vmatpush1.bf16.msra.mxu1 %v8335_v51  ;;  %5502 = vmatpush1.bf16.msra.mxu0 %v8337_v44  ;;  %v8387_v51 = vpack.c.bf16 %v1062_v10, %v1058_v34  ;;  %v1070_v36 = vld [vmem:[%s10288_s10 + $0xf8] sm:$0xff]  ;;  %v8409_v34 = vpack.c.bf16 %v1059_v21, %v1055_v19  ;;  %v8411_v10 = vpack.c.bf16 %v1061_v22, %v1057_v0  ;;  %v1065_v21 = vld [vmem:[%s10288_s10 + $0xd0] sm:$0xff]  ;;  %v1072_v0 = vld [vmem:[%s10288_s10 + $0x108] sm:$0xff] }
 0x4b1   : > { %5376 = vmatprep.subr.bf16.mxu1 %v8347_v46  ;;  %5504 = vmatprep.subr.bf16.mxu0 %v8349_v4  ;;  %10762 = vst [vmem:[#allocation139_spill] sm:$0xff] %v8385_v8  ;;  %v1063_v4 = vld [vmem:[%s10288_s10 + $0xc0] sm:$0xff]  ;;  %v8421_v44 = vpack.c.bf16 %v1068_v28, %v1064_v23  ;;  %v1069_v19 = vld [vmem:[%s10288_s10 + $0xf0] sm:$0xff]  ;;  %v1076_v22 = vld [vmem:[%s10288_s10 + $0x128] sm:$0xff] }
 0x4b2   : > { %10763 = vst [vmem:[#allocation140_spill] sm:$0xff] %v8387_v51  ;;  %10764 = vst [vmem:[#allocation141_spill] sm:$0xff] %v8409_v34  ;;  %v1067_v46 = vld [vmem:[%s10288_s10 + $0xe0] sm:$0xff]  ;;  %v1074_v23 = vld [vmem:[%s10288_s10 + $0x118] sm:$0xff] }
 0x4b3   : > { %10765 = vst [vmem:[#allocation142_spill] sm:$0xff] %v8411_v10  ;;  %10766 = vst [vmem:[#allocation143_spill] sm:$0xff] %v8421_v44  ;;  %v1078_v28 = vld [vmem:[%s10288_s10 + $0x138] sm:$0xff] }
 0x4b4   : > { %5378 = vmatpush1.bf16.msra.mxu1 %v8373_v7  ;;  %5506 = vmatpush1.bf16.msra.mxu0 %v8375_v39  ;;  %v8423_v7 = vpack.c.bf16 %v1070_v36, %v1066_v47  ;;  %v8445_v47 = vpack.c.bf16 %v1067_v46, %v1063_v4  ;;  %v8447_v36 = vpack.c.bf16 %v1069_v19, %v1065_v21  ;;  %v1073_v46 = vld [vmem:[%s10288_s10 + $0x110] sm:$0xff]  ;;  %v1080_v21 = vld [vmem:[%s10288_s10 + $0x148] sm:$0xff] }
 0x4b5   : > { %5380 = vmatprep.subr.bf16.mxu1 %v8385_v8  ;;  %5508 = vmatprep.subr.bf16.mxu0 %v8387_v51  ;;  %v1071_v51 = vld [vmem:[%s10288_s10 + $0x100] sm:$0xff]  ;;  %v8457_v39 = vpack.c.bf16 %v1076_v22, %v1072_v0  ;;  %v1077_v4 = vld [vmem:[%s10288_s10 + $0x130] sm:$0xff]  ;;  %v1084_v19 = vld [vmem:[%s10288_s10 + $0x168] sm:$0xff] }
 0x4b6   : > { %10767 = vst [vmem:[#allocation144_spill] sm:$0xff] %v8423_v7  ;;  %10768 = vst [vmem:[#allocation145_spill] sm:$0xff] %v8445_v47  ;;  %v1075_v8 = vld [vmem:[%s10288_s10 + $0x120] sm:$0xff]  ;;  %v1082_v0 = vld [vmem:[%s10288_s10 + $0x158] sm:$0xff] }
 0x4b7   : > { %10769 = vst [vmem:[#allocation146_spill] sm:$0xff] %v8447_v36  ;;  %10770 = vst [vmem:[#allocation147_spill] sm:$0xff] %v8457_v39  ;;  %v1086_v22 = vld [vmem:[%s10288_s10 + $0x178] sm:$0xff] }
 0x4b8   : > { %5382 = vmatpush1.bf16.msra.mxu1 %v8409_v34  ;;  %5510 = vmatpush1.bf16.msra.mxu0 %v8411_v10  ;;  %v8459_v34 = vpack.c.bf16 %v1078_v28, %v1074_v23  ;;  %v8481_v23 = vpack.c.bf16 %v1075_v8, %v1071_v51  ;;  %v8483_v28 = vpack.c.bf16 %v1077_v4, %v1073_v46  ;;  %v1081_v51 = vld [vmem:[%s10288_s10 + $0x150] sm:$0xff]  ;;  %v1088_v46 = vld [vmem:[%s10288_s10 + $0x188] sm:$0xff] }
 0x4b9   : > { %5384 = vmatprep.subr.bf16.mxu1 %v8421_v44  ;;  %5512 = vmatprep.subr.bf16.mxu0 %v8423_v7  ;;  %v1079_v7 = vld [vmem:[%s10288_s10 + $0x140] sm:$0xff]  ;;  %v8493_v10 = vpack.c.bf16 %v1084_v19, %v1080_v21  ;;  %v1085_v8 = vld [vmem:[%s10288_s10 + $0x170] sm:$0xff]  ;;  %v1092_v4 = vld [vmem:[%s10288_s10 + $0x1a8] sm:$0xff] }
 0x4ba   : > { %10771 = vst [vmem:[#allocation148_spill] sm:$0xff] %v8459_v34  ;;  %10772 = vst [vmem:[#allocation149_spill] sm:$0xff] %v8481_v23  ;;  %v1083_v44 = vld [vmem:[%s10288_s10 + $0x160] sm:$0xff]  ;;  %v1090_v21 = vld [vmem:[%s10288_s10 + $0x198] sm:$0xff] }
 0x4bb   : > { %10773 = vst [vmem:[#allocation150_spill] sm:$0xff] %v8483_v28  ;;  %10774 = vst [vmem:[#allocation151_spill] sm:$0xff] %v8493_v10  ;;  %v1094_v19 = vld [vmem:[%s10288_s10 + $0x1b8] sm:$0xff] }
 0x4bc   : > { %5386 = vmatpush1.bf16.msra.mxu1 %v8445_v47  ;;  %5514 = vmatpush1.bf16.msra.mxu0 %v8447_v36  ;;  %v8495_v47 = vpack.c.bf16 %v1086_v22, %v1082_v0  ;;  %v8517_v0 = vpack.c.bf16 %v1083_v44, %v1079_v7  ;;  %v8519_v22 = vpack.c.bf16 %v1085_v8, %v1081_v51  ;;  %v1089_v44 = vld [vmem:[%s10288_s10 + $0x190] sm:$0xff]  ;;  %v1096_v51 = vld [vmem:[%s10288_s10 + $0x1c8] sm:$0xff] }
 0x4bd   : > { %5388 = vmatprep.subr.bf16.mxu1 %v8457_v39  ;;  %5516 = vmatprep.subr.bf16.mxu0 %v8459_v34  ;;  %v1087_v34 = vld [vmem:[%s10288_s10 + $0x180] sm:$0xff]  ;;  %v8529_v36 = vpack.c.bf16 %v1092_v4, %v1088_v46  ;;  %v1093_v7 = vld [vmem:[%s10288_s10 + $0x1b0] sm:$0xff]  ;;  %v1100_v8 = vld [vmem:[%s10288_s10 + $0x1e8] sm:$0xff] }
 0x4be   : > { %10775 = vst [vmem:[#allocation152_spill] sm:$0xff] %v8495_v47  ;;  %10776 = vst [vmem:[#allocation153_spill] sm:$0xff] %v8517_v0  ;;  %v1091_v39 = vld [vmem:[%s10288_s10 + $0x1a0] sm:$0xff]  ;;  %v1098_v46 = vld [vmem:[%s10288_s10 + $0x1d8] sm:$0xff] }
 0x4bf   : > { %10777 = vst [vmem:[#allocation154_spill] sm:$0xff] %v8519_v22  ;;  %10778 = vst [vmem:[#allocation155_spill] sm:$0xff] %v8529_v36  ;;  %v1102_v4 = vld [vmem:[%s10288_s10 + $0x1f8] sm:$0xff] }
 0x4c0   : > { %5390 = vmatpush1.bf16.msra.mxu1 %v8481_v23  ;;  %5518 = vmatpush1.bf16.msra.mxu0 %v8483_v28  ;;  %v8531_v23 = vpack.c.bf16 %v1094_v19, %v1090_v21  ;;  %v8553_v21 = vpack.c.bf16 %v1091_v39, %v1087_v34  ;;  %v8555_v19 = vpack.c.bf16 %v1093_v7, %v1089_v44  ;;  %v1097_v39 = vld [vmem:[%s10288_s10 + $0x1d0] sm:$0xff]  ;;  %v1104_v44 = vld [vmem:[%s10288_s10 + $0x208] sm:$0xff] }
 0x4c1   : > { %5392 = vmatprep.subr.bf16.mxu1 %v8493_v10  ;;  %5520 = vmatprep.subr.bf16.mxu0 %v8495_v47  ;;  %v1095_v47 = vld [vmem:[%s10288_s10 + $0x1c0] sm:$0xff]  ;;  %v8565_v28 = vpack.c.bf16 %v1100_v8, %v1096_v51  ;;  %v1101_v34 = vld [vmem:[%s10288_s10 + $0x1f0] sm:$0xff]  ;;  %v1108_v7 = vld [vmem:[%s10288_s10 + $0x228] sm:$0xff] }
 0x4c2   : > { %10779 = vst [vmem:[#allocation156_spill] sm:$0xff] %v8531_v23  ;;  %10780 = vst [vmem:[#allocation157_spill] sm:$0xff] %v8553_v21  ;;  %v1099_v10 = vld [vmem:[%s10288_s10 + $0x1e0] sm:$0xff]  ;;  %v1106_v51 = vld [vmem:[%s10288_s10 + $0x218] sm:$0xff] }
 0x4c3   : > { %10781 = vst [vmem:[#allocation158_spill] sm:$0xff] %v8555_v19  ;;  %10782 = vst [vmem:[#allocation159_spill] sm:$0xff] %v8565_v28  ;;  %v1110_v8 = vld [vmem:[%s10288_s10 + $0x238] sm:$0xff] }
 0x4c4   : > { %5394 = vmatpush1.bf16.msra.mxu1 %v8517_v0  ;;  %5522 = vmatpush1.bf16.msra.mxu0 %v8519_v22  ;;  %v8567_v0 = vpack.c.bf16 %v1102_v4, %v1098_v46  ;;  %v8589_v46 = vpack.c.bf16 %v1099_v10, %v1095_v47  ;;  %v8591_v4 = vpack.c.bf16 %v1101_v34, %v1097_v39  ;;  %v1105_v10 = vld [vmem:[%s10288_s10 + $0x210] sm:$0xff]  ;;  %v1112_v39 = vld [vmem:[%s10288_s10 + $0x248] sm:$0xff] }
 0x4c5   : > { %5396 = vmatprep.subr.bf16.mxu1 %v8529_v36  ;;  %5524 = vmatprep.subr.bf16.mxu0 %v8531_v23  ;;  %v1103_v23 = vld [vmem:[%s10288_s10 + $0x200] sm:$0xff]  ;;  %v8601_v22 = vpack.c.bf16 %v1108_v7, %v1104_v44  ;;  %v1109_v47 = vld [vmem:[%s10288_s10 + $0x230] sm:$0xff]  ;;  %v1116_v34 = vld [vmem:[%s10288_s10 + $0x268] sm:$0xff] }
 0x4c6   : > { %10783 = vst [vmem:[#allocation160_spill] sm:$0xff] %v8567_v0  ;;  %10784 = vst [vmem:[#allocation161_spill] sm:$0xff] %v8589_v46  ;;  %v1107_v36 = vld [vmem:[%s10288_s10 + $0x220] sm:$0xff]  ;;  %v1114_v44 = vld [vmem:[%s10288_s10 + $0x258] sm:$0xff] }
 0x4c7   : > { %10785 = vst [vmem:[#allocation162_spill] sm:$0xff] %v8591_v4  ;;  %10786 = vst [vmem:[#allocation163_spill] sm:$0xff] %v8601_v22  ;;  %v1118_v7 = vld [vmem:[%s10288_s10 + $0x278] sm:$0xff] }
 0x4c8   : > { %5398 = vmatpush1.bf16.msra.mxu1 %v8553_v21  ;;  %5526 = vmatpush1.bf16.msra.mxu0 %v8555_v19  ;;  %v8603_v21 = vpack.c.bf16 %v1110_v8, %v1106_v51  ;;  %v8625_v51 = vpack.c.bf16 %v1107_v36, %v1103_v23  ;;  %v8627_v8 = vpack.c.bf16 %v1109_v47, %v1105_v10  ;;  %v1113_v36 = vld [vmem:[%s10288_s10 + $0x250] sm:$0xff]  ;;  %v1120_v10 = vld [vmem:[%s10288_s10 + $0x288] sm:$0xff] }
 0x4c9   : > { %5400 = vmatprep.subr.bf16.mxu1 %v8565_v28  ;;  %5528 = vmatprep.subr.bf16.mxu0 %v8567_v0  ;;  %v1111_v0 = vld [vmem:[%s10288_s10 + $0x240] sm:$0xff]  ;;  %v8637_v19 = vpack.c.bf16 %v1116_v34, %v1112_v39  ;;  %v1117_v23 = vld [vmem:[%s10288_s10 + $0x270] sm:$0xff]  ;;  %v1124_v47 = vld [vmem:[%s10288_s10 + $0x2a8] sm:$0xff] }
 0x4ca   : > { %10787 = vst [vmem:[#allocation164_spill] sm:$0xff] %v8603_v21  ;;  %10788 = vst [vmem:[#allocation165_spill] sm:$0xff] %v8625_v51  ;;  %v1115_v28 = vld [vmem:[%s10288_s10 + $0x260] sm:$0xff]  ;;  %v1122_v39 = vld [vmem:[%s10288_s10 + $0x298] sm:$0xff] }
 0x4cb   : > { %10789 = vst [vmem:[#allocation166_spill] sm:$0xff] %v8627_v8  ;;  %10790 = vst [vmem:[#allocation167_spill] sm:$0xff] %v8637_v19  ;;  %v1126_v34 = vld [vmem:[%s10288_s10 + $0x2b8] sm:$0xff] }
 0x4cc   : > { %5402 = vmatpush1.bf16.msra.mxu1 %v8589_v46  ;;  %5530 = vmatpush1.bf16.msra.mxu0 %v8591_v4  ;;  %v8639_v46 = vpack.c.bf16 %v1118_v7, %v1114_v44  ;;  %v8661_v44 = vpack.c.bf16 %v1115_v28, %v1111_v0  ;;  %v8663_v7 = vpack.c.bf16 %v1117_v23, %v1113_v36  ;;  %v1121_v28 = vld [vmem:[%s10288_s10 + $0x290] sm:$0xff]  ;;  %v1128_v36 = vld [vmem:[%s10288_s10 + $0x2c8] sm:$0xff] }
 0x4cd   : > { %5404 = vmatprep.subr.bf16.mxu1 %v8601_v22  ;;  %5532 = vmatprep.subr.bf16.mxu0 %v8603_v21  ;;  %v1119_v21 = vld [vmem:[%s10288_s10 + $0x280] sm:$0xff]  ;;  %v8673_v4 = vpack.c.bf16 %v1124_v47, %v1120_v10  ;;  %v1125_v0 = vld [vmem:[%s10288_s10 + $0x2b0] sm:$0xff]  ;;  %v1132_v23 = vld [vmem:[%s10288_s10 + $0x2e8] sm:$0xff] }
 0x4ce   : > { %10791 = vst [vmem:[#allocation168_spill] sm:$0xff] %v8639_v46  ;;  %10792 = vst [vmem:[#allocation169_spill] sm:$0xff] %v8661_v44  ;;  %v1123_v22 = vld [vmem:[%s10288_s10 + $0x2a0] sm:$0xff]  ;;  %v1130_v10 = vld [vmem:[%s10288_s10 + $0x2d8] sm:$0xff] }
 0x4cf   : > { %10793 = vst [vmem:[#allocation170_spill] sm:$0xff] %v8663_v7  ;;  %10794 = vst [vmem:[#allocation171_spill] sm:$0xff] %v8673_v4  ;;  %v1134_v47 = vld [vmem:[%s10288_s10 + $0x2f8] sm:$0xff] }
 0x4d0   : > { %5406 = vmatpush1.bf16.msra.mxu1 %v8625_v51  ;;  %5534 = vmatpush1.bf16.msra.mxu0 %v8627_v8  ;;  %v8675_v51 = vpack.c.bf16 %v1126_v34, %v1122_v39  ;;  %v8697_v39 = vpack.c.bf16 %v1123_v22, %v1119_v21  ;;  %v8699_v34 = vpack.c.bf16 %v1125_v0, %v1121_v28  ;;  %v1129_v22 = vld [vmem:[%s10288_s10 + $0x2d0] sm:$0xff]  ;;  %v1136_v28 = vld [vmem:[%s10288_s10 + $0x308] sm:$0xff] }
 0x4d1   : > { %5408 = vmatprep.subr.bf16.mxu1 %v8637_v19  ;;  %5536 = vmatprep.subr.bf16.mxu0 %v8639_v46  ;;  %v1127_v46 = vld [vmem:[%s10288_s10 + $0x2c0] sm:$0xff]  ;;  %v8709_v8 = vpack.c.bf16 %v1132_v23, %v1128_v36  ;;  %v1133_v21 = vld [vmem:[%s10288_s10 + $0x2f0] sm:$0xff]  ;;  %v1140_v0 = vld [vmem:[%s10288_s10 + $0x328] sm:$0xff] }
 0x4d2   : > { %10795 = vst [vmem:[#allocation172_spill] sm:$0xff] %v8675_v51  ;;  %10796 = vst [vmem:[#allocation173_spill] sm:$0xff] %v8697_v39  ;;  %v1131_v19 = vld [vmem:[%s10288_s10 + $0x2e0] sm:$0xff]  ;;  %v1138_v36 = vld [vmem:[%s10288_s10 + $0x318] sm:$0xff] }
 0x4d3   : > { %10797 = vst [vmem:[#allocation174_spill] sm:$0xff] %v8699_v34  ;;  %10798 = vst [vmem:[#allocation175_spill] sm:$0xff] %v8709_v8  ;;  %v1142_v23 = vld [vmem:[%s10288_s10 + $0x338] sm:$0xff] }
 0x4d4   : > { %5410 = vmatpush1.bf16.msra.mxu1 %v8661_v44  ;;  %5538 = vmatpush1.bf16.msra.mxu0 %v8663_v7  ;;  %v8711_v44 = vpack.c.bf16 %v1134_v47, %v1130_v10  ;;  %v8733_v10 = vpack.c.bf16 %v1131_v19, %v1127_v46  ;;  %v8735_v47 = vpack.c.bf16 %v1133_v21, %v1129_v22  ;;  %v1137_v19 = vld [vmem:[%s10288_s10 + $0x310] sm:$0xff]  ;;  %v1144_v22 = vld [vmem:[%s10288_s10 + $0x348] sm:$0xff] }
 0x4d5   : > { %5412 = vmatprep.subr.bf16.mxu1 %v8673_v4  ;;  %5540 = vmatprep.subr.bf16.mxu0 %v8675_v51  ;;  %v1135_v51 = vld [vmem:[%s10288_s10 + $0x300] sm:$0xff]  ;;  %v8745_v7 = vpack.c.bf16 %v1140_v0, %v1136_v28  ;;  %v1141_v46 = vld [vmem:[%s10288_s10 + $0x330] sm:$0xff]  ;;  %v1148_v21 = vld [vmem:[%s10288_s10 + $0x368] sm:$0xff] }
 0x4d6   : > { %10799 = vst [vmem:[#allocation176_spill] sm:$0xff] %v8711_v44  ;;  %10800 = vst [vmem:[#allocation177_spill] sm:$0xff] %v8733_v10  ;;  %v1139_v4 = vld [vmem:[%s10288_s10 + $0x320] sm:$0xff]  ;;  %v1146_v28 = vld [vmem:[%s10288_s10 + $0x358] sm:$0xff] }
 0x4d7   : > { %10801 = vst [vmem:[#allocation178_spill] sm:$0xff] %v8735_v47  ;;  %10802 = vst [vmem:[#allocation179_spill] sm:$0xff] %v8745_v7  ;;  %v1150_v0 = vld [vmem:[%s10288_s10 + $0x378] sm:$0xff] }
 0x4d8   : > { %5414 = vmatpush1.bf16.msra.mxu1 %v8697_v39  ;;  %5542 = vmatpush1.bf16.msra.mxu0 %v8699_v34  ;;  %v8747_v39 = vpack.c.bf16 %v1142_v23, %v1138_v36  ;;  %v8769_v36 = vpack.c.bf16 %v1139_v4, %v1135_v51  ;;  %v8771_v23 = vpack.c.bf16 %v1141_v46, %v1137_v19  ;;  %v1145_v4 = vld [vmem:[%s10288_s10 + $0x350] sm:$0xff]  ;;  %v1152_v19 = vld [vmem:[%s10288_s10 + $0x388] sm:$0xff] }
 0x4d9   : > { %5416 = vmatprep.subr.bf16.mxu1 %v8709_v8  ;;  %5544 = vmatprep.subr.bf16.mxu0 %v8711_v44  ;;  %v1143_v44 = vld [vmem:[%s10288_s10 + $0x340] sm:$0xff]  ;;  %v8781_v34 = vpack.c.bf16 %v1148_v21, %v1144_v22  ;;  %v1149_v51 = vld [vmem:[%s10288_s10 + $0x370] sm:$0xff]  ;;  %v1156_v46 = vld [vmem:[%s10288_s10 + $0x3a8] sm:$0xff] }
 0x4da   : > { %10803 = vst [vmem:[#allocation180_spill] sm:$0xff] %v8747_v39  ;;  %10804 = vst [vmem:[#allocation181_spill] sm:$0xff] %v8769_v36  ;;  %v1147_v8 = vld [vmem:[%s10288_s10 + $0x360] sm:$0xff]  ;;  %v1154_v22 = vld [vmem:[%s10288_s10 + $0x398] sm:$0xff] }
 0x4db   : > { %10805 = vst [vmem:[#allocation182_spill] sm:$0xff] %v8771_v23  ;;  %10806 = vst [vmem:[#allocation183_spill] sm:$0xff] %v8781_v34  ;;  %v1158_v21 = vld [vmem:[%s10288_s10 + $0x3b8] sm:$0xff] }
 0x4dc   : > { %5418 = vmatpush1.bf16.msra.mxu1 %v8733_v10  ;;  %5546 = vmatpush1.bf16.msra.mxu0 %v8735_v47  ;;  %v8783_v10 = vpack.c.bf16 %v1150_v0, %v1146_v28  ;;  %v8805_v28 = vpack.c.bf16 %v1147_v8, %v1143_v44  ;;  %v8807_v0 = vpack.c.bf16 %v1149_v51, %v1145_v4  ;;  %v1153_v8 = vld [vmem:[%s10288_s10 + $0x390] sm:$0xff] }
 0x4dd   : > { %5420 = vmatprep.subr.bf16.mxu1 %v8745_v7  ;;  %5548 = vmatprep.subr.bf16.mxu0 %v8747_v39  ;;  %v1151_v39 = vld [vmem:[%s10288_s10 + $0x380] sm:$0xff]  ;;  %v8814_v7 = vpack.c.bf16 %v1156_v46, %v1152_v19  ;;  %v8816_v47 = vpack.c.bf16 %v1158_v21, %v1154_v22  ;;  %v1157_v44 = vld [vmem:[%s10288_s10 + $0x3b0] sm:$0xff]  ;;  %v1160_v19 = vld [vmem:[%s10288_s10 + $0x3c8] sm:$0xff] }
 0x4de   : > { %10807 = vst [vmem:[#allocation184_spill] sm:$0xff] %v8783_v10  ;;  %10808 = vst [vmem:[#allocation185_spill] sm:$0xff] %v8805_v28  ;;  %v8831_v51 = vpack.c.bf16 %v1157_v44, %v1153_v8  ;;  %v1164_v46 = vld [vmem:[%s10288_s10 + $0x3e8] sm:$0xff]  ;;  %v1166_v22 = vld [vmem:[%s10288_s10 + $0x3f8] sm:$0xff] }
 0x4df   : > { %10809 = vst [vmem:[#allocation186_spill] sm:$0xff] %v8807_v0  ;;  %10810 = vst [vmem:[#allocation187_spill] sm:$0xff] %v8814_v7  ;;  %v1159_v21 = vld [vmem:[%s10288_s10 + $0x3c0] sm:$0xff] }
 0x4e0   : > { %5422 = vmatpush1.bf16.msra.mxu1 %v8769_v36  ;;  %5550 = vmatpush1.bf16.msra.mxu0 %v8771_v23  ;;  %10811 = vst [vmem:[#allocation188_spill] sm:$0xff] %v8816_v47  ;;  %v1155_v23 = vld [vmem:[%s10288_s10 + $0x3a0] sm:$0xff]  ;;  %10813 = vst [vmem:[#allocation190_spill] sm:$0xff] %v8831_v51  ;;  %v1178_v36 = vld [vmem:[%s10288_s10 + $0x458] sm:$0xff] }
 0x4e1   : > { %5424 = vmatprep.subr.bf16.mxu1 %v8781_v34  ;;  %5552 = vmatprep.subr.bf16.mxu0 %v8783_v10  ;;  %v8829_v4 = vpack.c.bf16 %v1155_v23, %v1151_v39  ;;  %v1162_v39 = vld [vmem:[%s10288_s10 + $0x3d8] sm:$0xff]  ;;  %v8846_v23 = vpack.c.bf16 %v1164_v46, %v1160_v19  ;;  %v1163_v44 = vld [vmem:[%s10288_s10 + $0x3e0] sm:$0xff]  ;;  %v1161_v19 = vld [vmem:[%s10288_s10 + $0x3d0] sm:$0xff] }
 0x4e2   : > { %v8854_v8 = vpack.c.bf16 %v1166_v22, %v1162_v39  ;;  %v1165_v46 = vld [vmem:[%s10288_s10 + $0x3f0] sm:$0xff]  ;;  %v1168_v22 = vld [vmem:[%s10288_s10 + $0x408] sm:$0xff] }
 0x4e3   : > { %10812 = vst [vmem:[#allocation189_spill] sm:$0xff] %v8829_v4  ;;  %10814 = vst [vmem:[#allocation191_spill] sm:$0xff] %v8846_v23  ;;  %v8869_v39 = vpack.c.bf16 %v1165_v46, %v1161_v19  ;;  %v1180_v34 = vld [vmem:[%s10288_s10 + $0x468] sm:$0xff] }
 0x4e4   : > { %5426 = vmatpush1.bf16.msra.mxu1 %v8805_v28  ;;  %5554 = vmatpush1.bf16.msra.mxu0 %v8807_v0  ;;  %10815 = vst [vmem:[#allocation192_spill] sm:$0xff] %v8854_v8  ;;  %v1173_v0 = vld [vmem:[%s10288_s10 + $0x430] sm:$0xff]  ;;  %v779_v28 = vld [vmem:[%s8900_s14] sm:$0xff] }
 0x4e5   : > { %5428 = vmatprep.subr.bf16.mxu1 %v8814_v7  ;;  %5556 = vmatprep.subr.bf16.mxu0 %v8816_v47  ;;  %10817 = vst [vmem:[#allocation194_spill] sm:$0xff] %v8869_v39  ;;  %v1171_v47 = vld [vmem:[%s10288_s10 + $0x420] sm:$0xff]  ;;  %v1169_v7 = vld [vmem:[%s10288_s10 + $0x410] sm:$0xff] }
 0x4e8   : > { %5430 = vmatpush1.bf16.msra.mxu1 %v8829_v4  ;;  %5558 = vmatpush1.bf16.msra.mxu0 %v8831_v51  ;;  %v8860_v51 = vpack.c.bf16 %v1163_v44, %v1159_v21  ;;  %v1172_v21 = vld [vmem:[%s10288_s10 + $0x428] sm:$0xff]  ;;  %v1170_v44 = vld [vmem:[%s10288_s10 + $0x418] sm:$0xff] }
 0x4e9   : > { %5432 = vmatprep.subr.bf16.mxu1 %v8846_v23  ;;  %5560 = vmatprep.subr.bf16.mxu0 %v8854_v8  ;;  %v1174_v8 = vld [vmem:[%s10288_s10 + $0x438] sm:$0xff]  ;;  %v8885_v19 = vpack.c.bf16 %v1172_v21, %v1168_v22  ;;  %v776_v22 = vld [vmem:[%s8895_s12 + $0x8] sm:$0xff] }
 0x4ea   : > { %10816 = vst [vmem:[#allocation193_spill] sm:$0xff] %v8860_v51  ;;  %v8887_v46 = vpack.c.bf16 %v1174_v8, %v1170_v44  ;;  %v775_v8 = vld [vmem:[%s8895_s12] sm:$0xff] }
 0x4eb   : > { %10818 = vst [vmem:[#allocation195_spill] sm:$0xff] %v8885_v19 }
 0x4ec   : > { %5434 = vmatpush1.bf16.msra.mxu1 %v8860_v51  ;;  %5562 = vmatpush1.bf16.msra.mxu0 %v8869_v39  ;;  %10819 = vst [vmem:[#allocation196_spill] sm:$0xff] %v8887_v46  ;;  %v1167_v39 = vld [vmem:[%s10288_s10 + $0x400] sm:$0xff] }
 0x4ed   : > { %5436 = vmatprep.subr.bf16.mxu1 %v8885_v19  ;;  %5564 = vmatprep.subr.bf16.mxu0 %v8887_v46  ;;  %v780_v46 = vld [vmem:[%s8900_s14 + $0x8] sm:$0xff]  ;;  %v778_v19 = vld [vmem:[%s8895_s12 + $0x18] sm:$0xff] }
 0x582   : > { %v2496_v21 = vpop.f32.mrb[6].mxu1  ;;  %v8904_v44 = vpop.f32.mrb[6].mxu0 }
 0x583   : > { %v2643_v51 = vmul.f32 %v2496_v21, %v775_v8  ;;  %v2498_v23 = vpop.f32.mrb[7].mxu1  ;;  %v2640_v4 = vpop.f32.mrb[7].mxu0  ;;  %v1176_v8 = vld [vmem:[%s10288_s10 + $0x448] sm:$0xff] }
 0x584   : > { %v2644_v10 = vmul.f32 %v2498_v23, %v776_v22  ;;  %v2646_v21 = vmul.f32 %v2640_v4, %v778_v19  ;;  %v8934_v23 = vpack.c.bf16 %v1171_v47, %v1167_v39  ;;  %v8936_v22 = vpack.c.bf16 %v1173_v0, %v1169_v7  ;;  %v1175_v4 = vld [vmem:[%s10288_s10 + $0x440] sm:$0xff]  ;;  %v1184_v7 = vld [vmem:[%s10288_s10 + $0x488] sm:$0xff]  ;;  %v1190_v39 = vld [vmem:[%s10288_s10 + $0x4b8] sm:$0xff] }
 0x585   : > { %v1179_v19 = vld [vmem:[%s10288_s10 + $0x460] sm:$0xff]  ;;  %v2647_v35 = vsub.f32 %v2643_v51, %v779_v28  ;;  %v8953_v47 = vpack.c.bf16 %v1180_v34, %v1176_v8  ;;  %v8955_v0 = vpack.c.bf16 %v1182_v11, %v1178_v36  ;;  %v1188_v28 = vld [vmem:[%s10288_s10 + $0x4a8] sm:$0xff]  ;;  %v1186_v51 = vld [vmem:[%s10288_s10 + $0x498] sm:$0xff] }
 0x586   : > { %v2648_v61 = vsub.f32 %v2644_v10, %v780_v46  ;;  %10820 = vst [vmem:[#allocation197_spill] sm:$0xff] %v8934_v23  ;;  %10821 = vst [vmem:[#allocation198_spill] sm:$0xff] %v8936_v22  ;;  %v1181_v10 = vld [vmem:[%s10288_s10 + $0x470] sm:$0xff]  ;;  %v2650_v46 = vsub.f32 %v2646_v21, %v782_v12  ;;  %v1183_v34 = vld [vmem:[%s10288_s10 + $0x480] sm:$0xff]  ;;  %v8978_v12 = vpack.c.bf16 %v1188_v28, %v1184_v7 }
 0x587   : > { %10822 = vst [vmem:[#allocation199_spill] sm:$0xff] %v8953_v47  ;;  %10823 = vst [vmem:[#allocation200_spill] sm:$0xff] %v8955_v0  ;;  %v8970_v11 = vpack.c.bf16 %v1181_v10, %v1177_v60  ;;  %v1187_v36 = vld [vmem:[%s10288_s10 + $0x4a0] sm:$0xff]  ;;  %v1185_v8 = vld [vmem:[%s10288_s10 + $0x490] sm:$0xff] }
 0x588   : > { %2715 = vmatprep.mubr.f32.mxu1 %v2648_v61  ;;  %2857 = vmatprep.mubr.f32.mxu0 %v2648_v61  ;;  %v8968_v61 = vpack.c.bf16 %v1179_v19, %v1175_v4  ;;  %10826 = vst [vmem:[#allocation203_spill] sm:$0xff] %v8978_v12  ;;  %v1189_v60 = vld [vmem:[%s10288_s10 + $0x4b0] sm:$0xff]  ;;  %v1192_v21 = vld [vmem:[%s10288_s10 + $0x4c8] sm:$0xff]  ;;  %v1194_v19 = vld [vmem:[%s10288_s10 + $0x4d8] sm:$0xff]  ;;  %v9004_v7 = vpack.c.bf16 %v1187_v36, %v1183_v34 }
 0x589   : > { %2716 = vmatmul.mubr.f32.vlgmr.msra.gmra.mrb[8].mxu1 %v2647_v35  ;;  %2858 = vmatmul.mubr.f32.vlgmr.msra.gmra.mrb[8].mxu0 %v2647_v35  ;;  %10825 = vst [vmem:[#allocation202_spill] sm:$0xff] %v8970_v11  ;;  %v8980_v35 = vpack.c.bf16 %v1190_v39, %v1186_v51  ;;  %v1196_v4 = vld [vmem:[%s10288_s10 + $0x4e8] sm:$0xff]  ;;  %v1198_v10 = vld [vmem:[%s10288_s10 + $0x4f8] sm:$0xff]  ;;  %v9006_v28 = vpack.c.bf16 %v1189_v60, %v1185_v8  ;;  %v1191_v51 = vld [vmem:[%s10288_s10 + $0x4c0] sm:$0xff] }
 0x58a   : > { %5438 = vmatpush1.bf16.msra.mxu1 %v8934_v23  ;;  %5566 = vmatpush1.bf16.msra.mxu0 %v8936_v22  ;;  %10824 = vst [vmem:[#allocation201_spill] sm:$0xff] %v8968_v61  ;;  %10828 = vst [vmem:[#allocation205_spill] sm:$0xff] %v9004_v7  ;;  %v1195_v39 = vld [vmem:[%s10288_s10 + $0x4e0] sm:$0xff]  ;;  %v1193_v34 = vld [vmem:[%s10288_s10 + $0x4d0] sm:$0xff] }
 0x58b   : > { %2786 = vmatprep.mubr.f32.mxu1 %v2650_v46  ;;  %2928 = vmatprep.mubr.f32.mxu0 %v2650_v46  ;;  %10827 = vst [vmem:[#allocation204_spill] sm:$0xff] %v8980_v35  ;;  %10829 = vst [vmem:[#allocation206_spill] sm:$0xff] %v9006_v28  ;;  %v9016_v46 = vpack.c.bf16 %v1196_v4, %v1192_v21  ;;  %v1197_v36 = vld [vmem:[%s10288_s10 + $0x4f0] sm:$0xff]  ;;  %v1200_v8 = vld [vmem:[%s10288_s10 + $0x508] sm:$0xff] }
 0x58c   : > { %5440 = vmatprep.subr.bf16.mxu1 %v8953_v47  ;;  %5568 = vmatprep.subr.bf16.mxu0 %v8955_v0  ;;  %v1204_v60 = vld [vmem:[%s10288_s10 + $0x528] sm:$0xff]  ;;  %v1202_v21 = vld [vmem:[%s10288_s10 + $0x518] sm:$0xff]  ;;  %v1304_v22 = vld [vmem:[%s10295_s17] sm:$0x3] }
 0x58d   : > { %10830 = vst [vmem:[#allocation207_spill] sm:$0xff] %v9016_v46  ;;  %v1206_v4 = vld [vmem:[%s10288_s10 + $0x538] sm:$0xff] }
 0x58e   : > { %5442 = vmatpush1.bf16.msra.mxu1 %v8968_v61  ;;  %5570 = vmatpush1.bf16.msra.mxu0 %v8970_v11  ;;  %v9018_v61 = vpack.c.bf16 %v1198_v10, %v1194_v19  ;;  %v9040_v19 = vpack.c.bf16 %v1195_v39, %v1191_v51  ;;  %v9042_v10 = vpack.c.bf16 %v1197_v36, %v1193_v34  ;;  %v1201_v51 = vld [vmem:[%s10288_s10 + $0x510] sm:$0xff]  ;;  %v1208_v34 = vld [vmem:[%s10288_s10 + $0x548] sm:$0xff] }
 0x58f   : > { %5444 = vmatprep.subr.bf16.mxu1 %v8978_v12  ;;  %5572 = vmatprep.subr.bf16.mxu0 %v8980_v35  ;;  %v1199_v35 = vld [vmem:[%s10288_s10 + $0x500] sm:$0xff]  ;;  %v9052_v11 = vpack.c.bf16 %v1204_v60, %v1200_v8  ;;  %v1205_v39 = vld [vmem:[%s10288_s10 + $0x530] sm:$0xff]  ;;  %v1212_v36 = vld [vmem:[%s10288_s10 + $0x568] sm:$0xff] }
 0x590   : > { %10831 = vst [vmem:[#allocation208_spill] sm:$0xff] %v9018_v61  ;;  %10832 = vst [vmem:[#allocation209_spill] sm:$0xff] %v9040_v19  ;;  %v1203_v12 = vld [vmem:[%s10288_s10 + $0x520] sm:$0xff]  ;;  %v1210_v8 = vld [vmem:[%s10288_s10 + $0x558] sm:$0xff] }
 0x591   : > { %10833 = vst [vmem:[#allocation210_spill] sm:$0xff] %v9042_v10  ;;  %10834 = vst [vmem:[#allocation211_spill] sm:$0xff] %v9052_v11  ;;  %v1214_v60 = vld [vmem:[%s10288_s10 + $0x578] sm:$0xff] }
 0x592   : > { %5446 = vmatpush1.bf16.msra.mxu1 %v9004_v7  ;;  %5574 = vmatpush1.bf16.msra.mxu0 %v9006_v28  ;;  %v9054_v7 = vpack.c.bf16 %v1206_v4, %v1202_v21  ;;  %v9076_v21 = vpack.c.bf16 %v1203_v12, %v1199_v35  ;;  %v9078_v4 = vpack.c.bf16 %v1205_v39, %v1201_v51  ;;  %v1209_v12 = vld [vmem:[%s10288_s10 + $0x550] sm:$0xff]  ;;  %v1216_v51 = vld [vmem:[%s10288_s10 + $0x588] sm:$0xff] }
 0x593   : > { %5448 = vmatprep.subr.bf16.mxu1 %v9016_v46  ;;  %5576 = vmatprep.subr.bf16.mxu0 %v9018_v61  ;;  %v1207_v61 = vld [vmem:[%s10288_s10 + $0x540] sm:$0xff]  ;;  %v9088_v28 = vpack.c.bf16 %v1212_v36, %v1208_v34  ;;  %v1213_v35 = vld [vmem:[%s10288_s10 + $0x570] sm:$0xff]  ;;  %v1220_v39 = vld [vmem:[%s10288_s10 + $0x5a8] sm:$0xff] }
 0x594   : > { %10835 = vst [vmem:[#allocation212_spill] sm:$0xff] %v9054_v7  ;;  %10836 = vst [vmem:[#allocation213_spill] sm:$0xff] %v9076_v21  ;;  %v1211_v46 = vld [vmem:[%s10288_s10 + $0x560] sm:$0xff]  ;;  %v1218_v34 = vld [vmem:[%s10288_s10 + $0x598] sm:$0xff] }
 0x595   : > { %10837 = vst [vmem:[#allocation214_spill] sm:$0xff] %v9078_v4  ;;  %10838 = vst [vmem:[#allocation215_spill] sm:$0xff] %v9088_v28  ;;  %v1222_v36 = vld [vmem:[%s10288_s10 + $0x5b8] sm:$0xff] }
 0x596   : > { %5450 = vmatpush1.bf16.msra.mxu1 %v9040_v19  ;;  %5578 = vmatpush1.bf16.msra.mxu0 %v9042_v10  ;;  %v9090_v19 = vpack.c.bf16 %v1214_v60, %v1210_v8  ;;  %v9112_v8 = vpack.c.bf16 %v1211_v46, %v1207_v61  ;;  %v9114_v60 = vpack.c.bf16 %v1213_v35, %v1209_v12  ;;  %v1217_v61 = vld [vmem:[%s10288_s10 + $0x590] sm:$0xff]  ;;  %v1224_v12 = vld [vmem:[%s10288_s10 + $0x5c8] sm:$0xff] }
 0x597   : > { %5452 = vmatprep.subr.bf16.mxu1 %v9052_v11  ;;  %5580 = vmatprep.subr.bf16.mxu0 %v9054_v7  ;;  %v1215_v7 = vld [vmem:[%s10288_s10 + $0x580] sm:$0xff]  ;;  %v9124_v10 = vpack.c.bf16 %v1220_v39, %v1216_v51  ;;  %v1221_v46 = vld [vmem:[%s10288_s10 + $0x5b0] sm:$0xff]  ;;  %v1228_v35 = vld [vmem:[%s10288_s10 + $0x5e8] sm:$0xff] }
 0x598   : > { %10839 = vst [vmem:[#allocation216_spill] sm:$0xff] %v9090_v19  ;;  %10840 = vst [vmem:[#allocation217_spill] sm:$0xff] %v9112_v8  ;;  %v1219_v11 = vld [vmem:[%s10288_s10 + $0x5a0] sm:$0xff]  ;;  %v1226_v51 = vld [vmem:[%s10288_s10 + $0x5d8] sm:$0xff] }
 0x599   : > { %10841 = vst [vmem:[#allocation218_spill] sm:$0xff] %v9114_v60  ;;  %10842 = vst [vmem:[#allocation219_spill] sm:$0xff] %v9124_v10  ;;  %v1230_v39 = vld [vmem:[%s10288_s10 + $0x5f8] sm:$0xff] }
 0x59a   : > { %5454 = vmatpush1.bf16.msra.mxu1 %v9076_v21  ;;  %5582 = vmatpush1.bf16.msra.mxu0 %v9078_v4  ;;  %v9126_v21 = vpack.c.bf16 %v1222_v36, %v1218_v34  ;;  %v9148_v34 = vpack.c.bf16 %v1219_v11, %v1215_v7  ;;  %v9150_v36 = vpack.c.bf16 %v1221_v46, %v1217_v61  ;;  %v1225_v11 = vld [vmem:[%s10288_s10 + $0x5d0] sm:$0xff]  ;;  %v1232_v61 = vld [vmem:[%s10288_s10 + $0x608] sm:$0xff] }
 0x59b   : > { %5456 = vmatprep.subr.bf16.mxu1 %v9088_v28  ;;  %5584 = vmatprep.subr.bf16.mxu0 %v9090_v19  ;;  %v1223_v19 = vld [vmem:[%s10288_s10 + $0x5c0] sm:$0xff]  ;;  %v9160_v4 = vpack.c.bf16 %v1228_v35, %v1224_v12  ;;  %v1229_v7 = vld [vmem:[%s10288_s10 + $0x5f0] sm:$0xff]  ;;  %v1236_v46 = vld [vmem:[%s10288_s10 + $0x628] sm:$0xff] }
 0x59c   : > { %10843 = vst [vmem:[#allocation220_spill] sm:$0xff] %v9126_v21  ;;  %10844 = vst [vmem:[#allocation221_spill] sm:$0xff] %v9148_v34  ;;  %v1227_v28 = vld [vmem:[%s10288_s10 + $0x5e0] sm:$0xff]  ;;  %v1234_v12 = vld [vmem:[%s10288_s10 + $0x618] sm:$0xff] }
 0x59d   : > { %10845 = vst [vmem:[#allocation222_spill] sm:$0xff] %v9150_v36  ;;  %10846 = vst [vmem:[#allocation223_spill] sm:$0xff] %v9160_v4  ;;  %v1238_v35 = vld [vmem:[%s10288_s10 + $0x638] sm:$0xff] }
 0x59e   : > { %5458 = vmatpush1.bf16.msra.mxu1 %v9112_v8  ;;  %5586 = vmatpush1.bf16.msra.mxu0 %v9114_v60  ;;  %v9162_v8 = vpack.c.bf16 %v1230_v39, %v1226_v51  ;;  %v9184_v51 = vpack.c.bf16 %v1227_v28, %v1223_v19  ;;  %v9186_v39 = vpack.c.bf16 %v1229_v7, %v1225_v11  ;;  %v1233_v28 = vld [vmem:[%s10288_s10 + $0x610] sm:$0xff]  ;;  %v1240_v11 = vld [vmem:[%s10288_s10 + $0x648] sm:$0xff] }
 0x59f   : > { %5460 = vmatprep.subr.bf16.mxu1 %v9124_v10  ;;  %5588 = vmatprep.subr.bf16.mxu0 %v9126_v21  ;;  %v1231_v21 = vld [vmem:[%s10288_s10 + $0x600] sm:$0xff]  ;;  %v9196_v60 = vpack.c.bf16 %v1236_v46, %v1232_v61  ;;  %v1237_v19 = vld [vmem:[%s10288_s10 + $0x630] sm:$0xff]  ;;  %v1244_v7 = vld [vmem:[%s10288_s10 + $0x668] sm:$0xff] }
 0x5a0   : > { %10847 = vst [vmem:[#allocation224_spill] sm:$0xff] %v9162_v8  ;;  %10848 = vst [vmem:[#allocation225_spill] sm:$0xff] %v9184_v51  ;;  %v1235_v10 = vld [vmem:[%s10288_s10 + $0x620] sm:$0xff]  ;;  %v1242_v61 = vld [vmem:[%s10288_s10 + $0x658] sm:$0xff] }
 0x5a1   : > { %10849 = vst [vmem:[#allocation226_spill] sm:$0xff] %v9186_v39  ;;  %10850 = vst [vmem:[#allocation227_spill] sm:$0xff] %v9196_v60  ;;  %v1246_v46 = vld [vmem:[%s10288_s10 + $0x678] sm:$0xff] }
 0x5a2   : > { %5462 = vmatpush1.bf16.msra.mxu1 %v9148_v34  ;;  %5590 = vmatpush1.bf16.msra.mxu0 %v9150_v36  ;;  %v9198_v34 = vpack.c.bf16 %v1238_v35, %v1234_v12  ;;  %v9220_v12 = vpack.c.bf16 %v1235_v10, %v1231_v21  ;;  %v9222_v35 = vpack.c.bf16 %v1237_v19, %v1233_v28  ;;  %v1241_v10 = vld [vmem:[%s10288_s10 + $0x650] sm:$0xff]  ;;  %v1248_v28 = vld [vmem:[%s10288_s10 + $0x688] sm:$0xff] }
 0x5a3   : > { %5464 = vmatprep.subr.bf16.mxu1 %v9160_v4  ;;  %5592 = vmatprep.subr.bf16.mxu0 %v9162_v8  ;;  %v1239_v8 = vld [vmem:[%s10288_s10 + $0x640] sm:$0xff]  ;;  %v9232_v36 = vpack.c.bf16 %v1244_v7, %v1240_v11  ;;  %v1245_v21 = vld [vmem:[%s10288_s10 + $0x670] sm:$0xff]  ;;  %v1252_v19 = vld [vmem:[%s10288_s10 + $0x6a8] sm:$0xff] }
 0x5a4   : > { %10851 = vst [vmem:[#allocation228_spill] sm:$0xff] %v9198_v34  ;;  %10852 = vst [vmem:[#allocation229_spill] sm:$0xff] %v9220_v12  ;;  %v1243_v4 = vld [vmem:[%s10288_s10 + $0x660] sm:$0xff]  ;;  %v1250_v11 = vld [vmem:[%s10288_s10 + $0x698] sm:$0xff] }
 0x5a5   : > { %10853 = vst [vmem:[#allocation230_spill] sm:$0xff] %v9222_v35  ;;  %10854 = vst [vmem:[#allocation231_spill] sm:$0xff] %v9232_v36  ;;  %v1254_v7 = vld [vmem:[%s10288_s10 + $0x6b8] sm:$0xff] }
 0x5a6   : > { %5466 = vmatpush1.bf16.msra.mxu1 %v9184_v51  ;;  %5594 = vmatpush1.bf16.msra.mxu0 %v9186_v39  ;;  %v9234_v51 = vpack.c.bf16 %v1246_v46, %v1242_v61  ;;  %v9256_v61 = vpack.c.bf16 %v1243_v4, %v1239_v8  ;;  %v9258_v46 = vpack.c.bf16 %v1245_v21, %v1241_v10  ;;  %v1249_v4 = vld [vmem:[%s10288_s10 + $0x690] sm:$0xff]  ;;  %v1256_v10 = vld [vmem:[%s10288_s10 + $0x6c8] sm:$0xff] }
 0x5a7   : > { %5468 = vmatprep.subr.bf16.mxu1 %v9196_v60  ;;  %5596 = vmatprep.subr.bf16.mxu0 %v9198_v34  ;;  %v1247_v34 = vld [vmem:[%s10288_s10 + $0x680] sm:$0xff]  ;;  %v9268_v39 = vpack.c.bf16 %v1252_v19, %v1248_v28  ;;  %v1253_v8 = vld [vmem:[%s10288_s10 + $0x6b0] sm:$0xff]  ;;  %v1260_v21 = vld [vmem:[%s10288_s10 + $0x6e8] sm:$0xff] }
 0x5a8   : > { %10855 = vst [vmem:[#allocation232_spill] sm:$0xff] %v9234_v51  ;;  %10856 = vst [vmem:[#allocation233_spill] sm:$0xff] %v9256_v61  ;;  %v1251_v60 = vld [vmem:[%s10288_s10 + $0x6a0] sm:$0xff]  ;;  %v1258_v28 = vld [vmem:[%s10288_s10 + $0x6d8] sm:$0xff] }
 0x5a9   : > { %10857 = vst [vmem:[#allocation234_spill] sm:$0xff] %v9258_v46  ;;  %10858 = vst [vmem:[#allocation235_spill] sm:$0xff] %v9268_v39  ;;  %v1262_v19 = vld [vmem:[%s10288_s10 + $0x6f8] sm:$0xff] }
 0x5aa   : > { %5470 = vmatpush1.bf16.msra.mxu1 %v9220_v12  ;;  %5598 = vmatpush1.bf16.msra.mxu0 %v9222_v35  ;;  %v9270_v12 = vpack.c.bf16 %v1254_v7, %v1250_v11  ;;  %v9292_v11 = vpack.c.bf16 %v1251_v60, %v1247_v34  ;;  %v9294_v7 = vpack.c.bf16 %v1253_v8, %v1249_v4  ;;  %v1257_v60 = vld [vmem:[%s10288_s10 + $0x6d0] sm:$0xff]  ;;  %v1264_v4 = vld [vmem:[%s10288_s10 + $0x708] sm:$0xff] }
 0x5ab   : > { %5472 = vmatprep.subr.bf16.mxu1 %v9232_v36  ;;  %5600 = vmatprep.subr.bf16.mxu0 %v9234_v51  ;;  %v1255_v51 = vld [vmem:[%s10288_s10 + $0x6c0] sm:$0xff]  ;;  %v9304_v35 = vpack.c.bf16 %v1260_v21, %v1256_v10  ;;  %v1261_v34 = vld [vmem:[%s10288_s10 + $0x6f0] sm:$0xff]  ;;  %v1268_v8 = vld [vmem:[%s10288_s10 + $0x728] sm:$0xff] }
 0x5ac   : > { %10859 = vst [vmem:[#allocation236_spill] sm:$0xff] %v9270_v12  ;;  %10860 = vst [vmem:[#allocation237_spill] sm:$0xff] %v9292_v11  ;;  %v1259_v36 = vld [vmem:[%s10288_s10 + $0x6e0] sm:$0xff]  ;;  %v1266_v10 = vld [vmem:[%s10288_s10 + $0x718] sm:$0xff] }
 0x5ad   : > { %10861 = vst [vmem:[#allocation238_spill] sm:$0xff] %v9294_v7  ;;  %10862 = vst [vmem:[#allocation239_spill] sm:$0xff] %v9304_v35  ;;  %v1270_v21 = vld [vmem:[%s10288_s10 + $0x738] sm:$0xff] }
 0x5ae   : > { %5474 = vmatpush1.bf16.msra.mxu1 %v9256_v61  ;;  %5602 = vmatpush1.bf16.msra.mxu0 %v9258_v46  ;;  %v9306_v61 = vpack.c.bf16 %v1262_v19, %v1258_v28  ;;  %v9328_v28 = vpack.c.bf16 %v1259_v36, %v1255_v51  ;;  %v9330_v19 = vpack.c.bf16 %v1261_v34, %v1257_v60  ;;  %v1265_v36 = vld [vmem:[%s10288_s10 + $0x710] sm:$0xff]  ;;  %v1272_v60 = vld [vmem:[%s10288_s10 + $0x748] sm:$0xff] }
 0x5af   : > { %5476 = vmatprep.subr.bf16.mxu1 %v9268_v39  ;;  %5604 = vmatprep.subr.bf16.mxu0 %v9270_v12  ;;  %v1263_v12 = vld [vmem:[%s10288_s10 + $0x700] sm:$0xff]  ;;  %v9340_v46 = vpack.c.bf16 %v1268_v8, %v1264_v4  ;;  %v1269_v51 = vld [vmem:[%s10288_s10 + $0x730] sm:$0xff]  ;;  %v1276_v34 = vld [vmem:[%s10288_s10 + $0x768] sm:$0xff] }
 0x5b0   : > { %10863 = vst [vmem:[#allocation240_spill] sm:$0xff] %v9306_v61  ;;  %10864 = vst [vmem:[#allocation241_spill] sm:$0xff] %v9328_v28  ;;  %v1267_v39 = vld [vmem:[%s10288_s10 + $0x720] sm:$0xff]  ;;  %v1274_v4 = vld [vmem:[%s10288_s10 + $0x758] sm:$0xff] }
 0x5b1   : > { %10865 = vst [vmem:[#allocation242_spill] sm:$0xff] %v9330_v19  ;;  %10866 = vst [vmem:[#allocation243_spill] sm:$0xff] %v9340_v46  ;;  %v1278_v8 = vld [vmem:[%s10288_s10 + $0x778] sm:$0xff] }
 0x5b2   : > { %5478 = vmatpush1.bf16.msra.mxu1 %v9292_v11  ;;  %5606 = vmatpush1.bf16.msra.mxu0 %v9294_v7  ;;  %v9342_v11 = vpack.c.bf16 %v1270_v21, %v1266_v10  ;;  %v9364_v10 = vpack.c.bf16 %v1267_v39, %v1263_v12  ;;  %v9366_v21 = vpack.c.bf16 %v1269_v51, %v1265_v36  ;;  %v1273_v39 = vld [vmem:[%s10288_s10 + $0x750] sm:$0xff]  ;;  %v1280_v36 = vld [vmem:[%s10288_s10 + $0x788] sm:$0xff] }
 0x5b3   : > { %5480 = vmatprep.subr.bf16.mxu1 %v9304_v35  ;;  %5608 = vmatprep.subr.bf16.mxu0 %v9306_v61  ;;  %v1271_v61 = vld [vmem:[%s10288_s10 + $0x740] sm:$0xff]  ;;  %v9376_v7 = vpack.c.bf16 %v1276_v34, %v1272_v60  ;;  %v1277_v12 = vld [vmem:[%s10288_s10 + $0x770] sm:$0xff]  ;;  %v1284_v51 = vld [vmem:[%s10288_s10 + $0x7a8] sm:$0xff] }
 0x5b4   : > { %10867 = vst [vmem:[#allocation244_spill] sm:$0xff] %v9342_v11  ;;  %10868 = vst [vmem:[#allocation245_spill] sm:$0xff] %v9364_v10  ;;  %v1275_v35 = vld [vmem:[%s10288_s10 + $0x760] sm:$0xff]  ;;  %v1282_v60 = vld [vmem:[%s10288_s10 + $0x798] sm:$0xff] }
 0x5b5   : > { %10869 = vst [vmem:[#allocation246_spill] sm:$0xff] %v9366_v21  ;;  %10870 = vst [vmem:[#allocation247_spill] sm:$0xff] %v9376_v7  ;;  %v1286_v34 = vld [vmem:[%s10288_s10 + $0x7b8] sm:$0xff] }
 0x5b6   : > { %5482 = vmatpush1.bf16.msra.mxu1 %v9328_v28  ;;  %5610 = vmatpush1.bf16.msra.mxu0 %v9330_v19  ;;  %v9378_v28 = vpack.c.bf16 %v1278_v8, %v1274_v4  ;;  %v9400_v4 = vpack.c.bf16 %v1275_v35, %v1271_v61  ;;  %v9402_v8 = vpack.c.bf16 %v1277_v12, %v1273_v39  ;;  %v1281_v35 = vld [vmem:[%s10288_s10 + $0x790] sm:$0xff]  ;;  %v1288_v39 = vld [vmem:[%s10288_s10 + $0x7c8] sm:$0xff] }
 0x5b7   : > { %5484 = vmatprep.subr.bf16.mxu1 %v9340_v46  ;;  %5612 = vmatprep.subr.bf16.mxu0 %v9342_v11  ;;  %v1279_v11 = vld [vmem:[%s10288_s10 + $0x780] sm:$0xff]  ;;  %v9412_v19 = vpack.c.bf16 %v1284_v51, %v1280_v36  ;;  %v1285_v61 = vld [vmem:[%s10288_s10 + $0x7b0] sm:$0xff]  ;;  %v1292_v12 = vld [vmem:[%s10288_s10 + $0x7e8] sm:$0xff] }
 0x5b8   : > { %10871 = vst [vmem:[#allocation248_spill] sm:$0xff] %v9378_v28  ;;  %10872 = vst [vmem:[#allocation249_spill] sm:$0xff] %v9400_v4  ;;  %v1283_v46 = vld [vmem:[%s10288_s10 + $0x7a0] sm:$0xff]  ;;  %v1290_v36 = vld [vmem:[%s10288_s10 + $0x7d8] sm:$0xff] }
 0x5b9   : > { %10873 = vst [vmem:[#allocation250_spill] sm:$0xff] %v9402_v8  ;;  %10874 = vst [vmem:[#allocation251_spill] sm:$0xff] %v9412_v19  ;;  %v1294_v51 = vld [vmem:[%s10288_s10 + $0x7f8] sm:$0xff] }
 0x5ba   : > { %5486 = vmatpush1.bf16.msra.mxu1 %v9364_v10  ;;  %5614 = vmatpush1.bf16.msra.mxu0 %v9366_v21  ;;  %v9414_v10 = vpack.c.bf16 %v1286_v34, %v1282_v60  ;;  %v9436_v60 = vpack.c.bf16 %v1283_v46, %v1279_v11  ;;  %v9438_v34 = vpack.c.bf16 %v1285_v61, %v1281_v35  ;;  %v1291_v46 = vld [vmem:[%s10288_s10 + $0x7e0] sm:$0xff]  ;;  %v1289_v11 = vld [vmem:[%s10288_s10 + $0x7d0] sm:$0xff] }
 0x5bb   : > { %5488 = vmatprep.subr.bf16.mxu1 %v9376_v7  ;;  %5616 = vmatprep.subr.bf16.mxu0 %v9378_v28  ;;  %v1287_v28 = vld [vmem:[%s10288_s10 + $0x7c0] sm:$0xff]  ;;  %v9445_v7 = vpack.c.bf16 %v1292_v12, %v1288_v39  ;;  %v9447_v21 = vpack.c.bf16 %v1294_v51, %v1290_v36  ;;  %v1293_v35 = vld [vmem:[%s10288_s10 + $0x7f0] sm:$0xff] }
 0x5bc   : > { %10875 = vst [vmem:[#allocation252_spill] sm:$0xff] %v9414_v10  ;;  %10876 = vst [vmem:[#allocation253_spill] sm:$0xff] %v9436_v60  ;;  %v777_v61 = vld [vmem:[%s8895_s12 + $0x10] sm:$0xff]  ;;  %v9461_v39 = vpack.c.bf16 %v1291_v46, %v1287_v28  ;;  %v9463_v12 = vpack.c.bf16 %v1293_v35, %v1289_v11  ;;  %v6248_v46 = vld [vmem:[%s7724_s25] sm:$0xff] }
 0x5bd   : > { %10877 = vst [vmem:[#allocation254_spill] sm:$0xff] %v9438_v34  ;;  %10878 = vst [vmem:[#allocation255_spill] sm:$0xff] %v9445_v7  ;;  %v2645_v36 = vmul.f32 %v8904_v44, %v777_v61  ;;  %v781_v51 = vld [vmem:[%s8900_s14 + $0x10] sm:$0xff]  ;;  %v6249_v35 = vld [vmem:[%s7729_s2] sm:$0xff] }
 0x5be   : > { %5490 = vmatpush1.bf16.msra.mxu1 %v9400_v4  ;;  %5618 = vmatpush1.bf16.msra.mxu0 %v9402_v8  ;;  %10879 = vst [vmem:[#allocation256_spill] sm:$0xff] %v9447_v21  ;;  %10880 = vst [vmem:[#allocation257_spill] sm:$0xff] %v9461_v39 }
 0x5bf   : > { %5492 = vmatprep.subr.bf16.mxu1 %v9412_v19  ;;  %5620 = vmatprep.subr.bf16.mxu0 %v9414_v10  ;;  %10881 = vst [vmem:[#allocation258_spill] sm:$0xff] %v9463_v12 }
 0x5c2   : > { %5494 = vmatpush1.bf16.msra.mxu1 %v9436_v60  ;;  %5622 = vmatpush1.bf16.msra.mxu0 %v9438_v34  ;;  %v2649_v60 = vsub.f32 %v2645_v36, %v781_v51  ;;  %v6251_v36 = vld [vmem:[%s7729_s2 + $0x8] sm:$0xff] }
 0x5c3   : > { %5496 = vmatprep.subr.bf16.mxu1 %v9445_v7  ;;  %5624 = vmatprep.subr.bf16.mxu0 %v9447_v21 }
 0x5c6   : > { %5498 = vmatpush1.bf16.msra.mxu1 %v9461_v39  ;;  %5626 = vmatpush1.bf16.msra.mxu0 %v9463_v12  ;;  %v6250_v12 = vld [vmem:[%s7724_s25 + $0x8] sm:$0xff] }
 0x5c9   : > { %2787 = vmatmul.mubr.f32.vlgmr.msra.gmra.mrb[8].mxu1 %v2649_v60  ;;  %2929 = vmatmul.mubr.f32.vlgmr.msra.gmra.mrb[8].mxu0 %v2649_v60 }
 0x5ca   : > { %3015 = vmatprep.mubr.f32.mxu1 %v10653_v38  ;;  %3086 = vmatprep.mubr.f32.mxu0 %v10653_v38 }
 0x69c   : > { %v2788_v28 = vpop.f32.mrb[8].mxu1  ;;  %v2930_v44 = vpop.f32.mrb[8].mxu0 }
 0x69d   : > { %v2935_v11 = vmul.f32 %v6248_v46, %v2788_v28  ;;  %v2943_v61 = vmul.f32 %v6249_v35, %v2788_v28  ;;  %v2937_v21 = vmul.f32 %v6249_v35, %v2930_v44  ;;  %v2941_v7 = vmul.f32 %v6248_v46, %v2930_v44  ;;  %v2790_v39 = vpop.f32.mrb[9].mxu1  ;;  %v2932_v34 = vpop.f32.mrb[9].mxu0 }
 0x69e   : > { %v2936_v10 = vmul.f32 %v6250_v12, %v2790_v39  ;;  %v2944_v51 = vmul.f32 %v6251_v36, %v2790_v39  ;;  %v2938_v19 = vmul.f32 %v6251_v36, %v2932_v34  ;;  %v2942_v60 = vmul.f32 %v6250_v12, %v2932_v34 }
 0x69f   : > { %v2939_v8 = vadd.f32 %v2937_v21, %v2935_v11  ;;  %v2945_v4 = vsub.f32 %v2941_v7, %v2943_v61  ;;  %v10884_v35 = vstv %s6523_s21  ;;  %v10885_v36 = vstv %s6546_s1  ;;  %s10889_s21 = smov 1   ;;  %s10890_s1 = smov 112  }
 0x6a0   : > { %v2940_v0 = vadd.f32 %v2938_v19, %v2936_v10  ;;  %v2946_v47 = vsub.f32 %v2942_v60, %v2944_v51  ;;  %v10886_v60 = vstv %s6542_s19  ;;  %s10888_s19 = smov 16  }
 0x6a2   : > { %2951 = vmatprep.subr.mxu1 %v2940_v0  ;;  %3022 = vmatprep.subr.mxu0 %v2946_v47 }
 0x6a3   : > { %2952 = vmatpush1.msra.mxu1 %v2939_v8  ;;  %3023 = vmatpush1.msra.mxu0 %v2945_v4 }
 0x6a4   : > { %5047 = vmatmul.mubr.msk.f32.vlgmr.msra.gmra.mrb[10].mxu1 %vm2947_vm15, %v1304_v22  ;;  %5048 = vmatmul.mubr.msk.f32.vlgmr.msra.gmra.mrb[10].mxu0 %vm2947_vm15, %v1304_v22 }
 0x6a5   : > { %3335 = vmatprep.mubr.f32.mxu1 %v10653_v38  ;;  %3472 = vmatprep.mubr.f32.mxu0 %v10653_v38 }
 0x777   : > { %v3017_v7 = vpop.f32.mrb[10].mxu1  ;;  %v3088_v19 = vpop.f32.mrb[10].mxu0 }
 0x778   : > { %v3093_v10 = vmul.f32 0.05, %v3017_v7  ;;  %v3107_v21 = vmul.f32 0.05, %v3088_v19  ;;  %v3019_v0 = vpop.f32.mrb[11].mxu1  ;;  %v3090_v47 = vpop.f32.mrb[11].mxu0  ;;  %v10887_v19 = vstv %s6555_s24 }
 0x779   : > { %v3094_v8 = vmul.f32 0.05, %v3019_v0  ;;  %v3108_v4 = vmul.f32 0.05, %v3090_v47  ;;  %s10891_s24 = smov 111  }
 0x77b   : > { %v3097_v34 = vcombine.low %v3093_v10, %v3094_v8  ;;  %v3111_v39 = vcombine.low %v3107_v21, %v3108_v4 }
 0x77d   : > { %v3104_v22 = vrot.slane %v3097_v34, %v7354_v50  ;;  %v3118_v12 = vrot.slane %v3111_v39, %v7354_v50 }
 0x77f   : > { %v9487_v28 = vsub.f32 %v7359_v40, %v3104_v22  ;;  %v9490_v44 = vsub.f32 %v7362_v15, %v3118_v12 }
 0x781   : > { %10882 = vst [vmem:[#allocation259_spill] sm:$0xff] %v9487_v28  ;;  %10883 = vst [vmem:[#allocation260_spill] sm:$0xff] %v9490_v44  ;;  %v3121_v46 = vsub.f32 %v9487_v28, %v6549_v3  ;;  %v3122_v11 = vsub.f32 %v9490_v44, %v6557_v5 }
 0x783   : > { %v3123_v61 = vmul.f32 %v3121_v46, %v10884_v35  ;;  %v3126_v51 = vmul.f32 %v3121_v46, %v10885_v36  ;;  %v3124_v7 = vmul.f32 %v3122_v11, %v10886_v60  ;;  %v3127_v10 = vmul.f32 %v3122_v11, %v10887_v19 }
 0x785   : > { %v3125_v21 = vadd.f32 %v3124_v7, %v3123_v61  ;;  %v3128_v40 = vadd.f32 %v3127_v10, %v3126_v51 }
 0x787   : > { %v3133_v0 = vrot.slane %v3125_v21, %v6573_v14  ;;  %v3137_v15 = vrot.slane %v3125_v21, %v6579_v18  ;;  %v3144_v47 = vrot.slane %v3128_v40, %v6573_v14  ;;  %v3148_v8 = vrot.slane %v3128_v40, %v6579_v18 }
 0x788   : > { %v3482_v14 = vrot.slane %v3125_v21, %v6615_v27  ;;  %v3486_v18 = vrot.slane %v3125_v21, %v6612_v26  ;;  %v3492_v39 = vrot.slane %v3128_v40, %v6615_v27  ;;  %v3496_v22 = vrot.slane %v3128_v40, %v6612_v26 }
 0x789   : > { %v9509_v4 = vsel %vm1343_vm0, %v3137_v15, %v3148_v8  ;;  %v9512_v34 = vsel %vm1343_vm0, %v3133_v0, %v3144_v47 }
 0x78a   : > { %3163 = vrot.lane.b32.xlu0 %v9509_v4, %s10888_s19  ;;  %3161 = vrot.lane.b32.xlu1 %v9512_v34, %s10888_s19  ;;  %v9547_v12 = vsel %vm1343_vm0, %v3486_v18, %v3496_v22  ;;  %v9550_v46 = vsel %vm1343_vm0, %v3482_v14, %v3492_v39 }
 0x78e   : > { %3187 = vrot.lane.b32.xlu0 %v9509_v4, %s10625_s3  ;;  %3185 = vrot.lane.b32.xlu1 %v9512_v34, %s10625_s3 }
 0x792   : > { %3171 = vrot.lane.b32.xlu0 %v9509_v4, %s10623_s26  ;;  %3169 = vrot.lane.b32.xlu1 %v9512_v34, %s10623_s26 }
 0x796   : > { %3195 = vrot.lane.b32.xlu0 %v9509_v4, %s10626_s30  ;;  %3193 = vrot.lane.b32.xlu1 %v9512_v34, %s10626_s30 }
 0x79a   : > { %3155 = vrot.lane.b32.xlu0 %v9509_v4, %s10622_s0  ;;  %3153 = vrot.lane.b32.xlu1 %v9512_v34, %s10622_s0 }
 0x79e   : > { %3179 = vrot.lane.b32.xlu0 %v9509_v4, %s10889_s21  ;;  %3177 = vrot.lane.b32.xlu1 %v9512_v34, %s10889_s21 }
 0x7a2   : > { %3203 = vrot.lane.b32.xlu0 %v9509_v4, %s10890_s1  ;;  %3201 = vrot.lane.b32.xlu1 %v9512_v34, %s10890_s1 }
 0x7a6   : > { %3511 = vrot.lane.b32.xlu0 %v9547_v12, %s10888_s19  ;;  %3509 = vrot.lane.b32.xlu1 %v9550_v46, %s10888_s19 }
 0x7aa   : > { %3535 = vrot.lane.b32.xlu0 %v9547_v12, %s10625_s3  ;;  %3533 = vrot.lane.b32.xlu1 %v9550_v46, %s10625_s3 }
 0x7ae   : > { %3519 = vrot.lane.b32.xlu0 %v9547_v12, %s10623_s26  ;;  %3517 = vrot.lane.b32.xlu1 %v9550_v46, %s10623_s26 }
 0x7b2   : > { %3543 = vrot.lane.b32.xlu0 %v9547_v12, %s10626_s30  ;;  %3541 = vrot.lane.b32.xlu1 %v9550_v46, %s10626_s30 }
 0x7b6   : > { %3503 = vrot.lane.b32.xlu0 %v9547_v12, %s10622_s0  ;;  %3501 = vrot.lane.b32.xlu1 %v9550_v46, %s10622_s0 }
 0x7ba   : > { %3527 = vrot.lane.b32.xlu0 %v9547_v12, %s10889_s21  ;;  %3525 = vrot.lane.b32.xlu1 %v9550_v46, %s10889_s21 }
 0x7be   : > { %3551 = vrot.lane.b32.xlu0 %v9547_v12, %s10890_s1  ;;  %3549 = vrot.lane.b32.xlu1 %v9550_v46, %s10890_s1 }
 0x7c2   : > { %3211 = vrot.lane.b32.xlu0 %v9509_v4, %s10891_s24  ;;  %3209 = vrot.lane.b32.xlu1 %v9512_v34, %s10891_s24 }
 0x7c6   : > { %3559 = vrot.lane.b32.xlu0 %v9547_v12, %s10891_s24  ;;  %3557 = vrot.lane.b32.xlu1 %v9550_v46, %s10891_s24 }
 0x7fc   : > { %v3164_v26 = vpop.permute.xlu0 %3163  ;;  %v3162_v27 = vpop.permute.xlu1 %3161 }
 0x7fd   : > { %v3165_v7 = vsel %vm1369_vm2, %v3162_v27, %v3164_v26  ;;  %v3166_v19 = vsel %vm1369_vm2, %v3164_v26, %v3162_v27 }
 0x7fe   : > { %v3167_v18 = vmul.f32 %v3166_v19, %v6694_v52  ;;  %v3168_v39 = vmul.f32 %v3165_v7, %v6697_v53 }
 0x800   : > { %v3188_v11 = vpop.permute.xlu0 %3187  ;;  %v3186_v35 = vpop.permute.xlu1 %3185 }
 0x801   : > { %v3189_v10 = vsel %vm1420_vm1, %v3186_v35, %v3188_v11  ;;  %v3190_v21 = vsel %vm1420_vm1, %v3188_v11, %v3186_v35 }
 0x802   : > { %v3191_v22 = vmul.f32 %v3189_v10, %v6688_v48  ;;  %v3192_v26 = vmul.f32 %v3190_v21, %v6690_v49 }
 0x804   : > { %v3172_v61 = vpop.permute.xlu0 %3171  ;;  %v3170_v36 = vpop.permute.xlu1 %3169  ;;  %v3237_v44 = vrot.slane %v3191_v22, 6 }
 0x805   : > { %v3173_v27 = vsel %vm1386_vm3, %v3170_v36, %v3172_v61  ;;  %v3174_v11 = vsel %vm1386_vm3, %v3172_v61, %v3170_v36  ;;  %v3219_v36 = vrot.slane %v3167_v18, 6 }
 0x806   : > { %v3176_v23 = vmul.f32 %v3173_v27, %v6704_v55 }
 0x808   : > { %v3196_v51 = vpop.permute.xlu0 %3195  ;;  %v3194_v60 = vpop.permute.xlu1 %3193 }
 0x809   : > { %v3197_v15 = vsel %vm1437_vm4, %v3194_v60, %v3196_v51  ;;  %v3198_v47 = vsel %vm1437_vm4, %v3196_v51, %v3194_v60 }
 0x80a   : > { %v3199_v35 = vmul.f32 %v3197_v15, %v6707_v56  ;;  %v3200_v51 = vmul.f32 %v3198_v47, %v6709_v57  ;;  %v3220_v15 = vrot.slane %v3168_v39, 6  ;;  %v3175_v47 = vmul.f32 %v3174_v11, %v6701_v54 }
 0x80c   : > { %v3156_v40 = vpop.permute.xlu0 %3155  ;;  %v3154_v0 = vpop.permute.xlu1 %3153  ;;  %v3243_v28 = vrot.slane %v3199_v35, 4  ;;  %v3226_v35 = vrot.slane %v3176_v23, 4 }
 0x80d   : > { %v3157_v8 = vsel %vm1352_vm5, %v3154_v0, %v3156_v40  ;;  %v3158_v14 = vsel %vm1352_vm5, %v3156_v40, %v3154_v0 }
 0x80e   : > { %v3159_v19 = vmul.f32 %v3158_v14, %v6713_v58  ;;  %v3160_v7 = vmul.f32 %v3157_v8, %v6716_v59  ;;  %v3238_v14 = vrot.slane %v3192_v26, 6  ;;  %v3244_v8 = vrot.slane %v3200_v51, 4 }
 0x80f   : > { %v3225_v26 = vrot.slane %v3175_v47, 4  ;;  %v3259_v51 = vsel %vm1520_vm7, %v9512_v34, %v3237_v44 }
 0x810   : > { %v3180_v60 = vpop.permute.xlu0 %3179  ;;  %v3178_v40 = vpop.permute.xlu1 %3177  ;;  %v3253_v3 = vsel %vm1520_vm7, %v3159_v19, %v3219_v36  ;;  %v3260_v19 = vsel %vm1520_vm7, %v9509_v4, %v3238_v14 }
 0x811   : > { %v3181_v10 = vsel %vm1403_vm6, %v3178_v40, %v3180_v60  ;;  %v3182_v21 = vsel %vm1403_vm6, %v3180_v60, %v3178_v40  ;;  %v3254_v60 = vsel %vm1520_vm7, %v3160_v7, %v3220_v15 }
 0x812   : > { %v3183_v0 = vmul.f32 %v3182_v21, %v6732_v6  ;;  %v3184_v61 = vmul.f32 %v3181_v10, %v6735_v9 }
 0x814   : > { %v3204_v50 = vpop.permute.xlu0 %3203  ;;  %v3202_v5 = vpop.permute.xlu1 %3201  ;;  %v3231_v39 = vrot.slane %v3183_v0, 2  ;;  %v3232_v11 = vrot.slane %v3184_v61, 2  ;;  %v3256_v0 = vsel %vm1523_vm9, %v3254_v60, %v3226_v35  ;;  %v3262_v61 = vsel %vm1523_vm9, %v3260_v19, %v3244_v8 }
 0x815   : > { %v3205_v40 = vsel %vm1454_vm8, %v3202_v5, %v3204_v50  ;;  %v3206_v18 = vsel %vm1454_vm8, %v3204_v50, %v3202_v5  ;;  %v3261_v5 = vsel %vm1523_vm9, %v3259_v51, %v3243_v28  ;;  %v3255_v50 = vsel %vm1523_vm9, %v3253_v3, %v3225_v26 }
 0x816   : > { %v3207_v27 = vmul.f32 %v3205_v40, %v6761_v42  ;;  %v3208_v22 = vmul.f32 %v3206_v18, %v6763_v43  ;;  %v3257_v23 = vsel %vm1526_vm10, %v3255_v50, %v3231_v39  ;;  %v3258_v44 = vsel %vm1526_vm10, %v3256_v0, %v3232_v11 }
 0x818   : > { %v3249_v7 = vrot.slane %v3207_v27, 2  ;;  %v3250_v10 = vrot.slane %v3208_v22, 2  ;;  %v3512_v21 = vpop.permute.xlu0 %3511  ;;  %v3510_v36 = vpop.permute.xlu1 %3509 }
 0x819   : > { %v3513_v8 = vsel %vm1369_vm2, %v3510_v36, %v3512_v21  ;;  %v3514_v35 = vsel %vm1369_vm2, %v3512_v21, %v3510_v36 }
 0x81a   : > { %v3263_v15 = vsel %vm1526_vm10, %v3261_v5, %v3249_v7  ;;  %v3264_v4 = vsel %vm1526_vm10, %v3262_v61, %v3250_v10  ;;  %v3516_v19 = vmul.f32 %v3513_v8, %v6697_v53  ;;  %v3515_v61 = vmul.f32 %v3514_v35, %v6694_v52 }
 0x81b   : > { %v5627_v34 = vpack.c.bf16 %v3264_v4, %v3258_v44  ;;  %v5629_v47 = vpack.c.bf16 %v3263_v15, %v3257_v23 }
 0x81c   : > { %v3536_v14 = vpop.permute.xlu0 %3535  ;;  %v3534_v40 = vpop.permute.xlu1 %3533 }
 0x81d   : > { %5628 = vmatprep.subr.bf16.mxu1 %v5627_v34  ;;  %v3537_v39 = vsel %vm1420_vm1, %v3534_v40, %v3536_v14  ;;  %v3538_v11 = vsel %vm1420_vm1, %v3536_v14, %v3534_v40  ;;  %v3568_v14 = vrot.slane %v3516_v19, 6 }
 0x81e   : > { %5630 = vmatpush1.bf16.msra.mxu1 %v5629_v47  ;;  %v3539_v7 = vmul.f32 %v3537_v39, %v6688_v48  ;;  %v3540_v5 = vmul.f32 %v3538_v11, %v6690_v49  ;;  %v3567_v11 = vrot.slane %v3515_v61, 6 }
 0x820   : > { %v3520_v28 = vpop.permute.xlu0 %3519  ;;  %v3518_v3 = vpop.permute.xlu1 %3517  ;;  %v3585_v40 = vrot.slane %v3539_v7, 6 }
 0x821   : > { %v3521_v50 = vsel %vm1386_vm3, %v3518_v3, %v3520_v28  ;;  %v3522_v21 = vsel %vm1386_vm3, %v3520_v28, %v3518_v3  ;;  %v3586_v3 = vrot.slane %v3540_v5, 6 }
 0x822   : > { %v3607_v5 = vsel %vm1520_vm7, %v9550_v46, %v3585_v40 }
 0x824   : > { %v3544_v18 = vpop.permute.xlu0 %3543  ;;  %v3542_v60 = vpop.permute.xlu1 %3541 }
 0x825   : > { %v3545_v27 = vsel %vm1437_vm4, %v3542_v60, %v3544_v18  ;;  %v3546_v51 = vsel %vm1437_vm4, %v3544_v18, %v3542_v60  ;;  %v3524_v18 = vmul.f32 %v3521_v50, %v6704_v55  ;;  %v3523_v60 = vmul.f32 %v3522_v21, %v6701_v54 }
 0x826   : > { %v3547_v0 = vmul.f32 %v3545_v27, %v6707_v56  ;;  %v3548_v36 = vmul.f32 %v3546_v51, %v6709_v57  ;;  %v3608_v21 = vsel %vm1520_vm7, %v9547_v12, %v3586_v3 }
 0x827   : > { %v3574_v50 = vrot.slane %v3524_v18, 4 }
 0x828   : > { %v3504_v22 = vpop.permute.xlu0 %3503  ;;  %v3502_v26 = vpop.permute.xlu1 %3501  ;;  %v3591_v8 = vrot.slane %v3547_v0, 4  ;;  %v3592_v27 = vrot.slane %v3548_v36, 4  ;;  %v3573_v36 = vrot.slane %v3523_v60, 4  ;;  %v9704_v60 = vld [vmem:[%s10892_s18 + $0x10] ss:$0 sm:$0xff] }
 0x829   : > { %v3505_v10 = vsel %vm1352_vm5, %v3502_v26, %v3504_v22  ;;  %v3506_v23 = vsel %vm1352_vm5, %v3504_v22, %v3502_v26 }
 0x82a   : > { %v3508_v4 = vmul.f32 %v3505_v10, %v6716_v59  ;;  %v3507_v39 = vmul.f32 %v3506_v23, %v6713_v58  ;;  %v3609_v23 = vsel %vm1523_vm9, %v3607_v5, %v3591_v8 }
 0x82c   : > { %v3528_v15 = vpop.permute.xlu0 %3527  ;;  %v3526_v44 = vpop.permute.xlu1 %3525  ;;  %v3602_v51 = vsel %vm1520_vm7, %v3508_v4, %v3568_v14 }
 0x82d   : > { %v3529_v34 = vsel %vm1403_vm6, %v3526_v44, %v3528_v15  ;;  %v3530_v47 = vsel %vm1403_vm6, %v3528_v15, %v3526_v44  ;;  %v3601_v15 = vsel %vm1520_vm7, %v3507_v39, %v3567_v11  ;;  %v3604_v46 = vsel %vm1523_vm9, %v3602_v51, %v3574_v50  ;;  %v9710_v39 = vld [vmem:[%s10892_s18 + $0x18] ss:$0 sm:$0xff] }
 0x82e   : > { %v3532_v28 = vmul.f32 %v3529_v34, %v6735_v9  ;;  %v3531_v22 = vmul.f32 %v3530_v47, %v6732_v6 }
 0x830   : > { %v3552_v26 = vpop.permute.xlu0 %3551  ;;  %v3550_v35 = vpop.permute.xlu1 %3549  ;;  %v3580_v19 = vrot.slane %v3532_v28, 2  ;;  %v3579_v44 = vrot.slane %v3531_v22, 2  ;;  %v3610_v28 = vsel %vm1523_vm9, %v3608_v21, %v3592_v27  ;;  %v3603_v27 = vsel %vm1523_vm9, %v3601_v15, %v3573_v36 }
 0x831   : > { %v3553_v7 = vsel %vm1454_vm8, %v3550_v35, %v3552_v26  ;;  %v3554_v10 = vsel %vm1454_vm8, %v3552_v26, %v3550_v35 }
 0x832   : > { %v3555_v0 = vmul.f32 %v3553_v7, %v6761_v42  ;;  %v3556_v61 = vmul.f32 %v3554_v10, %v6763_v43  ;;  %v3606_v12 = vsel %vm1526_vm10, %v3604_v46, %v3580_v19  ;;  %v3605_v35 = vsel %vm1526_vm10, %v3603_v27, %v3579_v44 }
 0x834   : > { %v3597_v4 = vrot.slane %v3555_v0, 2  ;;  %v3598_v34 = vrot.slane %v3556_v61, 2  ;;  %v3212_v47 = vpop.permute.xlu0 %3211  ;;  %v3210_v14 = vpop.permute.xlu1 %3209  ;;  %v6254_v0 = vld [vmem:[%s10893_s28] sm:$0xff] }
 0x835   : > { %v3213_v40 = vsel %vm1471_vm11, %v3210_v14, %v3212_v47  ;;  %v3214_v18 = vsel %vm1471_vm11, %v3212_v47, %v3210_v14 }
 0x836   : > { %v3611_v3 = vsel %vm1526_vm10, %v3609_v23, %v3597_v4  ;;  %v3215_v8 = vmul.f32 %v9704_v60, %v3213_v40  ;;  %v3216_v11 = vmul.f32 %v9710_v39, %v3214_v18  ;;  %v3612_v22 = vsel %vm1526_vm10, %v3610_v28, %v3598_v34 }
 0x837   : > { %v5647_v26 = vpack.c.bf16 %v3612_v22, %v3606_v12  ;;  %v5649_v10 = vpack.c.bf16 %v3611_v3, %v3605_v35 }
 0x838   : > { %v3560_v51 = vpop.permute.xlu0 %3559  ;;  %5049 = vmatprep.subr.msk.mxu1 %vm1520_vm7, %v3216_v11  ;;  %v3558_v19 = vpop.permute.xlu1 %3557 }
 0x839   : > { %v3562_v7 = vsel %vm1471_vm11, %v3560_v51, %v3558_v19  ;;  %5050 = vmatpush1.msk.msra.mxu1 %vm1520_vm7, %v3215_v8  ;;  %v3561_v5 = vsel %vm1471_vm11, %v3558_v19, %v3560_v51 }
 0x83a   : > { %v3564_v50 = vmul.f32 %v9710_v39, %v3562_v7  ;;  %5051 = vmatmul.mubr.msk.f32.vlgmr.msra.gmra.mrb[12].mxu1 %vm1540_vm12, %v6254_v0  ;;  %5648 = vmatprep.subr.bf16.mxu1 %v5647_v26  ;;  %v3563_v61 = vmul.f32 %v9704_v60, %v3561_v5 }
 0x83b   : > { %5650 = vmatpush1.bf16.msra.mxu1 %v5649_v10  ;;  %3683 = vmatprep.mubr.f32.mxu1 %v10653_v38 }
 0x83c   : > { %5053 = vmatprep.subr.msk.mxu1 %vm1520_vm7, %v3564_v50 }
 0x83f   : > { %5054 = vmatpush1.msk.msra.mxu1 %vm1520_vm7, %v3563_v61 }
 0x840   : > { %5055 = vmatmul.mubr.msk.f32.vlgmr.msra.gmra.mrb[14].mxu1 %vm1540_vm12, %v6254_v0 }
 0x841   : > { %3820 = vmatprep.mubr.f32.mxu1 %v10653_v38 }
 0x90d   : > { %v3337_v21 = vpop.f32.mrb[12].mxu1 }
 0x90e   : > { %v3338_v36 = vadd.f32 %v3337_v21, %v6877_v2  ;;  %v3339_v23 = vpop.f32.mrb[13].mxu1 }
 0x90f   : > { %v3340_v15 = vadd.f32 %v3339_v23, %v6877_v2 }
 0x910   : > { %v9735_v44 = vmax.f32 %v3338_v36, 0.0 }
 0x911   : > { %v9737_v4 = vmax.f32 %v3340_v15, 0.0 }
 0x912   : > { %3344 = vrot.lane.b32.xlu1 %v9735_v44, %s10622_s0 }
 0x913   : > { %3346 = vrot.lane.b32.xlu0 %v9737_v4, %s10622_s0  ;;  %v3685_v34 = vpop.f32.mrb[14].mxu1 }
 0x914   : > { %v3687_v47 = vpop.f32.mrb[15].mxu1  ;;  %v3686_v14 = vadd.f32 %v3685_v34, %v6877_v2 }
 0x915   : > { %v3688_v46 = vadd.f32 %v3687_v47, %v6877_v2 }
 0x916   : > { %3352 = vrot.lane.b32.xlu1 %v9735_v44, %s10888_s19  ;;  %v9769_v40 = vmax.f32 %v3686_v14, 0.0 }
 0x917   : > { %3354 = vrot.lane.b32.xlu0 %v9737_v4, %s10888_s19  ;;  %v9771_v18 = vmax.f32 %v3688_v46, 0.0 }
 0x91a   : > { %3360 = vrot.lane.b32.xlu1 %v9735_v44, %s10623_s26 }
 0x91b   : > { %3362 = vrot.lane.b32.xlu0 %v9737_v4, %s10623_s26 }
 0x91e   : > { %3368 = vrot.lane.b32.xlu1 %v9735_v44, %s10889_s21 }
 0x91f   : > { %3370 = vrot.lane.b32.xlu0 %v9737_v4, %s10889_s21 }
 0x922   : > { %3376 = vrot.lane.b32.xlu1 %v9735_v44, %s10625_s3 }
 0x923   : > { %3378 = vrot.lane.b32.xlu0 %v9737_v4, %s10625_s3 }
 0x926   : > { %3384 = vrot.lane.b32.xlu1 %v9735_v44, %s10626_s30 }
 0x927   : > { %3386 = vrot.lane.b32.xlu0 %v9737_v4, %s10626_s30 }
 0x92a   : > { %3392 = vrot.lane.b32.xlu1 %v9735_v44, %s10890_s1 }
 0x92b   : > { %3394 = vrot.lane.b32.xlu0 %v9737_v4, %s10890_s1 }
 0x92e   : > { %3692 = vrot.lane.b32.xlu1 %v9769_v40, %s10622_s0 }
 0x92f   : > { %3694 = vrot.lane.b32.xlu0 %v9771_v18, %s10622_s0 }
 0x932   : > { %3700 = vrot.lane.b32.xlu1 %v9769_v40, %s10888_s19 }
 0x933   : > { %3702 = vrot.lane.b32.xlu0 %v9771_v18, %s10888_s19 }
 0x936   : > { %3708 = vrot.lane.b32.xlu1 %v9769_v40, %s10623_s26 }
 0x937   : > { %3710 = vrot.lane.b32.xlu0 %v9771_v18, %s10623_s26 }
 0x93a   : > { %3716 = vrot.lane.b32.xlu1 %v9769_v40, %s10889_s21 }
 0x93b   : > { %3718 = vrot.lane.b32.xlu0 %v9771_v18, %s10889_s21 }
 0x93e   : > { %3724 = vrot.lane.b32.xlu1 %v9769_v40, %s10625_s3 }
 0x93f   : > { %3726 = vrot.lane.b32.xlu0 %v9771_v18, %s10625_s3  ;;  %s10894_s3 = sld [smem:[#allocation269_spill]] }
 0x942   : > { %3732 = vrot.lane.b32.xlu1 %v9769_v40, %s10626_s30 }
 0x943   : > { %3734 = vrot.lane.b32.xlu0 %v9771_v18, %s10626_s30 }
 0x946   : > { %3740 = vrot.lane.b32.xlu1 %v9769_v40, %s10890_s1 }
 0x947   : > { %3742 = vrot.lane.b32.xlu0 %v9771_v18, %s10890_s1  ;;  %s11147_s1 = sld [smem:[#allocation273_spill]] }
 0x94a   : > { %3400 = vrot.lane.b32.xlu1 %v9735_v44, %s10891_s24 }
 0x94b   : > { %3402 = vrot.lane.b32.xlu0 %v9737_v4, %s10891_s24 }
 0x94e   : > { %3748 = vrot.lane.b32.xlu1 %v9769_v40, %s10891_s24 }
 0x94f   : > { %3750 = vrot.lane.b32.xlu0 %v9771_v18, %s10891_s24 }
 0x984   : > { %v3345_v2 = vpop.permute.xlu1 %3344 }
 0x985   : > { %v3347_v12 = vpop.permute.xlu0 %3346 }
 0x986   : > { %v3348_v28 = vsel %vm1352_vm5, %v3345_v2, %v3347_v12  ;;  %v3349_v3 = vsel %vm1352_vm5, %v3347_v12, %v3345_v2 }
 0x987   : > { %v3350_v26 = vmul.f32 %v3349_v3, %v6713_v58  ;;  %v3351_v35 = vmul.f32 %v3348_v28, %v6716_v59 }
 0x988   : > { %v3353_v8 = vpop.permute.xlu1 %3352 }
 0x989   : > { %v3355_v11 = vpop.permute.xlu0 %3354 }
 0x98a   : > { %v3356_v22 = vsel %vm1369_vm2, %v3353_v8, %v3355_v11  ;;  %v3357_v27 = vsel %vm1369_vm2, %v3355_v11, %v3353_v8 }
 0x98b   : > { %v3358_v51 = vmul.f32 %v3357_v27, %v6694_v52  ;;  %v3359_v19 = vmul.f32 %v3356_v22, %v6697_v53 }
 0x98c   : > { %v3361_v7 = vpop.permute.xlu1 %3360 }
 0x98d   : > { %v5633_v10 = vpack.c.bf16 %v3358_v51, %v3350_v26  ;;  %v3363_v5 = vpop.permute.xlu0 %3362  ;;  %v5631_v50 = vpack.c.bf16 %v3359_v19, %v3351_v35 }
 0x98e   : > { %v3364_v0 = vsel %vm1386_vm3, %v3361_v7, %v3363_v5  ;;  %v3365_v61 = vsel %vm1386_vm3, %v3363_v5, %v3361_v7 }
 0x98f   : > { %5632 = vmatprep.subr.bf16.mxu0 %v5631_v50  ;;  %v3366_v34 = vmul.f32 %v3365_v61, %v6701_v54  ;;  %v3367_v47 = vmul.f32 %v3364_v0, %v6704_v55 }
 0x990   : > { %5634 = vmatpush1.bf16.msra.mxu0 %v5633_v10  ;;  %v3369_v21 = vpop.permute.xlu1 %3368 }
 0x991   : > { %v3371_v36 = vpop.permute.xlu0 %3370 }
 0x992   : > { %v3372_v23 = vsel %vm1403_vm6, %v3369_v21, %v3371_v36  ;;  %v3373_v15 = vsel %vm1403_vm6, %v3371_v36, %v3369_v21 }
 0x993   : > { %v3374_v14 = vmul.f32 %v3373_v15, %v6732_v6  ;;  %v3375_v46 = vmul.f32 %v3372_v23, %v6735_v9 }
 0x994   : > { %v3377_v2 = vpop.permute.xlu1 %3376 }
 0x995   : > { %v5637_v12 = vpack.c.bf16 %v3374_v14, %v3366_v34  ;;  %v3379_v28 = vpop.permute.xlu0 %3378  ;;  %v5635_v3 = vpack.c.bf16 %v3375_v46, %v3367_v47 }
 0x996   : > { %v3380_v8 = vsel %vm1420_vm1, %v3377_v2, %v3379_v28  ;;  %v3381_v11 = vsel %vm1420_vm1, %v3379_v28, %v3377_v2 }
 0x997   : > { %v3382_v22 = vmul.f32 %v3380_v8, %v6688_v48  ;;  %v3383_v27 = vmul.f32 %v3381_v11, %v6690_v49  ;;  %5636 = vmatprep.subr.bf16.mxu0 %v5635_v3 }
 0x998   : > { %5638 = vmatpush1.bf16.msra.mxu0 %v5637_v12  ;;  %v3385_v26 = vpop.permute.xlu1 %3384 }
 0x999   : > { %v5641_v35 = vpack.c.bf16 %v3382_v22, %v9735_v44  ;;  %v3387_v51 = vpop.permute.xlu0 %3386  ;;  %v5639_v19 = vpack.c.bf16 %v3383_v27, %v9737_v4 }
 0x99a   : > { %v3388_v7 = vsel %vm1437_vm4, %v3385_v26, %v3387_v51  ;;  %v3389_v10 = vsel %vm1437_vm4, %v3387_v51, %v3385_v26 }
 0x99b   : > { %5640 = vmatprep.subr.bf16.mxu0 %v5639_v19  ;;  %v3390_v44 = vmul.f32 %v3388_v7, %v6707_v56  ;;  %v3391_v4 = vmul.f32 %v3389_v10, %v6709_v57 }
 0x99c   : > { %5642 = vmatpush1.bf16.msra.mxu0 %v5641_v35  ;;  %v3393_v5 = vpop.permute.xlu1 %3392 }
 0x99d   : > { %v3395_v50 = vpop.permute.xlu0 %3394 }
 0x99e   : > { %v3396_v0 = vsel %vm1454_vm8, %v3393_v5, %v3395_v50  ;;  %v3397_v61 = vsel %vm1454_vm8, %v3395_v50, %v3393_v5 }
 0x99f   : > { %v3398_v21 = vmul.f32 %v3396_v0, %v6761_v42  ;;  %v3399_v36 = vmul.f32 %v3397_v61, %v6763_v43 }
 0x9a0   : > { %v3693_v23 = vpop.permute.xlu1 %3692 }
 0x9a1   : > { %v5645_v15 = vpack.c.bf16 %v3398_v21, %v3390_v44  ;;  %v3695_v34 = vpop.permute.xlu0 %3694  ;;  %v5643_v47 = vpack.c.bf16 %v3399_v36, %v3391_v4 }
 0x9a2   : > { %v3696_v14 = vsel %vm1352_vm5, %v3693_v23, %v3695_v34  ;;  %v3697_v46 = vsel %vm1352_vm5, %v3695_v34, %v3693_v23 }
 0x9a3   : > { %5644 = vmatprep.subr.bf16.mxu0 %v5643_v47  ;;  %v3698_v8 = vmul.f32 %v3697_v46, %v6713_v58  ;;  %v3699_v11 = vmul.f32 %v3696_v14, %v6716_v59 }
 0x9a4   : > { %5646 = vmatpush1.bf16.msra.mxu0 %v5645_v15  ;;  %v3701_v2 = vpop.permute.xlu1 %3700 }
 0x9a5   : > { %v3703_v12 = vpop.permute.xlu0 %3702 }
 0x9a6   : > { %v3704_v28 = vsel %vm1369_vm2, %v3701_v2, %v3703_v12  ;;  %v3705_v3 = vsel %vm1369_vm2, %v3703_v12, %v3701_v2 }
 0x9a7   : > { %v3706_v22 = vmul.f32 %v3705_v3, %v6694_v52  ;;  %v3707_v27 = vmul.f32 %v3704_v28, %v6697_v53 }
 0x9a8   : > { %v3709_v26 = vpop.permute.xlu1 %3708 }
 0x9a9   : > { %v5653_v35 = vpack.c.bf16 %v3706_v22, %v3698_v8  ;;  %v3711_v51 = vpop.permute.xlu0 %3710  ;;  %v5651_v19 = vpack.c.bf16 %v3707_v27, %v3699_v11 }
 0x9aa   : > { %v3712_v7 = vsel %vm1386_vm3, %v3709_v26, %v3711_v51  ;;  %v3713_v10 = vsel %vm1386_vm3, %v3711_v51, %v3709_v26 }
 0x9ab   : > { %5652 = vmatprep.subr.bf16.mxu1 %v5651_v19  ;;  %v3714_v53 = vmul.f32 %v3713_v10, %v6701_v54  ;;  %v3715_v50 = vmul.f32 %v3712_v7, %v6704_v55 }
 0x9ac   : > { %5654 = vmatpush1.bf16.msra.mxu1 %v5653_v35  ;;  %v3717_v5 = vpop.permute.xlu1 %3716 }
 0x9ad   : > { %v3719_v58 = vpop.permute.xlu0 %3718 }
 0x9ae   : > { %v3720_v59 = vsel %vm1403_vm6, %v3717_v5, %v3719_v58  ;;  %v3721_v52 = vsel %vm1403_vm6, %v3719_v58, %v3717_v5  ;;  %v6255_v5 = vld [vmem:[%s10894_s3] sm:$0x3] }
 0x9af   : > { %v3722_v0 = vmul.f32 %v3721_v52, %v6732_v6  ;;  %v3723_v61 = vmul.f32 %v3720_v59, %v6735_v9 }
 0x9b0   : > { %v3725_v44 = vpop.permute.xlu1 %3724 }
 0x9b1   : > { %v5657_v4 = vpack.c.bf16 %v3722_v0, %v3714_v53  ;;  %v3727_v21 = vpop.permute.xlu0 %3726  ;;  %v5655_v36 = vpack.c.bf16 %v3723_v61, %v3715_v50 }
 0x9b2   : > { %v3728_v23 = vsel %vm1420_vm1, %v3725_v44, %v3727_v21  ;;  %v3729_v15 = vsel %vm1420_vm1, %v3727_v21, %v3725_v44 }
 0x9b3   : > { %v3730_v34 = vmul.f32 %v3728_v23, %v6688_v48  ;;  %v3731_v54 = vmul.f32 %v3729_v15, %v6690_v49  ;;  %5656 = vmatprep.subr.bf16.mxu1 %v5655_v36 }
 0x9b4   : > { %5658 = vmatpush1.bf16.msra.mxu1 %v5657_v4  ;;  %v3733_v55 = vpop.permute.xlu1 %3732 }
 0x9b5   : > { %v5661_v6 = vpack.c.bf16 %v3730_v34, %v9769_v40  ;;  %v3735_v9 = vpop.permute.xlu0 %3734  ;;  %v5659_v47 = vpack.c.bf16 %v3731_v54, %v9771_v18  ;;  %v10913_v54 = vld [vmem:[#allocation26_spill] sm:$0xff] }
 0x9b6   : > { %v3736_v14 = vsel %vm1437_vm4, %v3733_v55, %v3735_v9  ;;  %v3737_v46 = vsel %vm1437_vm4, %v3735_v9, %v3733_v55 }
 0x9b7   : > { %5660 = vmatprep.subr.bf16.mxu1 %v5659_v47  ;;  %v3738_v40 = vmul.f32 %v3736_v14, %v6707_v56  ;;  %v3739_v18 = vmul.f32 %v3737_v46, %v6709_v57  ;;  %v10915_v47 = vld [vmem:[#allocation29_spill] sm:$0xff]  ;;  %v10916_v46 = vld [vmem:[#allocation27_spill] sm:$0xff] }
 0x9b8   : > { %5662 = vmatpush1.bf16.msra.mxu1 %v5661_v6  ;;  %v3741_v2 = vpop.permute.xlu1 %3740  ;;  %v10914_v6 = vld [vmem:[#allocation28_spill] sm:$0xff] }
 0x9b9   : > { %v3743_v48 = vpop.permute.xlu0 %3742 }
 0x9ba   : > { %v3744_v49 = vsel %vm1454_vm8, %v3741_v2, %v3743_v48  ;;  %v3745_v12 = vsel %vm1454_vm8, %v3743_v48, %v3741_v2 }
 0x9bb   : > { %v3746_v28 = vmul.f32 %v3744_v49, %v6761_v42  ;;  %v3747_v3 = vmul.f32 %v3745_v12, %v6763_v43 }
 0x9bc   : > { %v3401_v8 = vpop.permute.xlu1 %3400 }
 0x9bd   : > { %v5665_v11 = vpack.c.bf16 %v3746_v28, %v3738_v40  ;;  %v3403_v22 = vpop.permute.xlu0 %3402  ;;  %v5663_v27 = vpack.c.bf16 %v3747_v3, %v3739_v18 }
 0x9be   : > { %v3404_v26 = vsel %vm1471_vm11, %v3401_v8, %v3403_v22  ;;  %v3405_v35 = vsel %vm1471_vm11, %v3403_v22, %v3401_v8  ;;  %v10917_v22 = vld [vmem:[#allocation11_spill] sm:$0xff] }
 0x9bf   : > { %v3406_v51 = vmul.f32 %v9704_v60, %v3404_v26  ;;  %v3407_v56 = vmul.f32 %v9710_v39, %v3405_v35  ;;  %5664 = vmatprep.subr.bf16.mxu1 %v5663_v27  ;;  %v10918_v26 = vld [vmem:[#allocation12_spill] sm:$0xff] }
 0x9c0   : > { %5666 = vmatpush1.bf16.msra.mxu1 %v5665_v11  ;;  %v3749_v57 = vpop.permute.xlu1 %3748 }
 0x9c1   : > { %v3751_v42 = vpop.permute.xlu0 %3750  ;;  %3424 = vmatprep.subr.mxu0 %v3407_v56 }
 0x9c2   : > { %v3752_v43 = vsel %vm1471_vm11, %v3749_v57, %v3751_v42  ;;  %v3753_v19 = vsel %vm1471_vm11, %v3751_v42, %v3749_v57  ;;  %3425 = vmatpush1.msra.mxu0 %v3406_v51 }
 0x9c3   : > { %v3754_v7 = vmul.f32 %v9704_v60, %v3752_v43  ;;  %v3755_v10 = vmul.f32 %v9710_v39, %v3753_v19  ;;  %5052 = vmatmul.mubr.msk.f32.vlgmr.msra.gmra.mrb[12].mxu0 %vm1692_vm13, %v6255_v5  ;;  %v10912_v39 = vld [vmem:[#allocation25_spill] sm:$0xff]  ;;  %v10919_v43 = vld [vmem:[#allocation30_spill] sm:$0xff] }
 0x9c4   : > { %3960 = vmatprep.mubr.f32.mxu0 %v10653_v38 }
 0x9c5   : > { %3772 = vmatprep.subr.mxu1 %v3755_v10  ;;  %v10920_v10 = vld [vmem:[#allocation259_spill] sm:$0xff] }
 0x9c6   : > { %3773 = vmatpush1.msra.mxu1 %v3754_v7 }
 0x9c7   : > { %5056 = vmatmul.mubr.msk.f32.vlgmr.msra.gmra.mrb[16].mxu1 %vm1692_vm13, %v6255_v5  ;;  %5796 = vmatprep.subr.bf16.mxu1 %v7070_v63  ;;  %v10896_v63 = vld [vmem:[#allocation14_spill] sm:$0xff] }
 0x9c8   : > { %5798 = vmatpush1.bf16.msra.mxu1 %v7078_v62  ;;  %v10897_v62 = vld [vmem:[#allocation15_spill] sm:$0xff] }
 0x9c9   : > { %5800 = vmatprep.subr.bf16.mxu1 %v7087_v45  ;;  %v10898_v45 = vld [vmem:[#allocation16_spill] sm:$0xff] }
 0x9cc   : > { %5802 = vmatpush1.bf16.msra.mxu1 %v7097_v13  ;;  %v10899_v13 = vld [vmem:[#allocation17_spill] sm:$0xff] }
 0x9cd   : > { %5804 = vmatprep.subr.bf16.mxu1 %v7105_v33  ;;  %v10900_v33 = vld [vmem:[#allocation18_spill] sm:$0xff] }
 0x9d0   : > { %5806 = vmatpush1.bf16.msra.mxu1 %v7115_v30  ;;  %v10901_v30 = vld [vmem:[#allocation19_spill] sm:$0xff] }
 0x9d1   : > { %5808 = vmatprep.subr.bf16.mxu1 %v7123_v31  ;;  %v10902_v31 = vld [vmem:[#allocation20_spill] sm:$0xff] }
 0x9d4   : > { %5810 = vmatpush1.bf16.msra.mxu1 %v7133_v37  ;;  %v10903_v37 = vld [vmem:[#allocation21_spill] sm:$0xff] }
 0x9d5   : > { %5812 = vmatprep.subr.bf16.mxu1 %v7141_v32  ;;  %v10904_v32 = vld [vmem:[#allocation22_spill] sm:$0xff] }
 0x9d8   : > { %5814 = vmatpush1.bf16.msra.mxu1 %v7151_v25  ;;  %v10905_v25 = vld [vmem:[#allocation23_spill] sm:$0xff] }
 0x9d9   : > { %5816 = vmatprep.subr.bf16.mxu1 %v7159_v24  ;;  %v10906_v24 = vld [vmem:[#allocation24_spill] sm:$0xff] }
 0x9dc   : > { %5818 = vmatpush1.bf16.msra.mxu1 %v7169_v17  ;;  %v10907_v17 = vld [vmem:[#allocation60_spill] sm:$0xff] }
 0x9dd   : > { %5820 = vmatprep.subr.bf16.mxu1 %v7177_v20  ;;  %v10908_v20 = vld [vmem:[#allocation62_spill] sm:$0xff] }
 0x9e0   : > { %5822 = vmatpush1.bf16.msra.mxu1 %v7187_v1  ;;  %v10909_v1 = vld [vmem:[#allocation64_spill] sm:$0xff] }
 0x9e1   : > { %5824 = vmatprep.subr.bf16.mxu1 %v7195_v16  ;;  %v10910_v16 = vld [vmem:[#allocation66_spill] sm:$0xff] }
 0x9e4   : > { %5826 = vmatpush1.bf16.msra.mxu1 %v7205_v29  ;;  %v10911_v29 = vld [vmem:[#allocation68_spill] sm:$0xff] }
 0x9e5   : > { %5828 = vmatprep.subr.bf16.mxu1 %v10895_v41  ;;  %v10921_v41 = vld [vmem:[#allocation260_spill] sm:$0xff] }
 0x9e8   : > { %5830 = vmatpush1.bf16.msra.mxu1 %v10896_v63 }
 0x9e9   : > { %5832 = vmatprep.subr.bf16.mxu1 %v10897_v62 }
 0x9ec   : > { %5834 = vmatpush1.bf16.msra.mxu1 %v10898_v45 }
 0x9ed   : > { %5836 = vmatprep.subr.bf16.mxu1 %v10899_v13 }
 0x9f0   : > { %5838 = vmatpush1.bf16.msra.mxu1 %v10900_v33 }
 0x9f1   : > { %5840 = vmatprep.subr.bf16.mxu1 %v10901_v30  ;;  %v6256_v30 = vld [vmem:[%s10294_s16] sm:$0xff] }
 0x9f4   : > { %5842 = vmatpush1.bf16.msra.mxu1 %v10902_v31  ;;  %v10922_v31 = vld [vmem:[#allocation31_spill] sm:$0xff] }
 0x9f5   : > { %5844 = vmatprep.subr.bf16.mxu1 %v10903_v37  ;;  %v10923_v37 = vld [vmem:[#allocation32_spill] sm:$0xff] }
 0x9f8   : > { %5846 = vmatpush1.bf16.msra.mxu1 %v10904_v32  ;;  %v10924_v32 = vld [vmem:[#allocation33_spill] sm:$0xff] }
 0x9f9   : > { %5848 = vmatprep.subr.bf16.mxu1 %v10905_v25  ;;  %v10925_v25 = vld [vmem:[#allocation34_spill] sm:$0xff] }
 0x9fc   : > { %5850 = vmatpush1.bf16.msra.mxu1 %v10906_v24  ;;  %v10926_v24 = vld [vmem:[#allocation35_spill] sm:$0xff] }
 0x9fd   : > { %5852 = vmatprep.subr.bf16.mxu1 %v10907_v17  ;;  %v10927_v17 = vld [vmem:[#allocation36_spill] sm:$0xff] }
 0xa00   : > { %5854 = vmatpush1.bf16.msra.mxu1 %v10908_v20  ;;  %v10928_v20 = vld [vmem:[#allocation37_spill] sm:$0xff] }
 0xa01   : > { %5856 = vmatprep.subr.bf16.mxu1 %v10909_v1  ;;  %v10929_v1 = vld [vmem:[#allocation38_spill] sm:$0xff] }
 0xa04   : > { %5858 = vmatpush1.bf16.msra.mxu1 %v10910_v16  ;;  %v10930_v16 = vld [vmem:[#allocation39_spill] sm:$0xff] }
 0xa05   : > { %5860 = vmatprep.subr.bf16.mxu1 %v10911_v29  ;;  %v10931_v29 = vld [vmem:[#allocation40_spill] sm:$0xff] }
 0xa96   : > { %v3474_v60 = vpop.f32.mrb[12].mxu0 }
 0xa97   : > { %v3475_v58 = vadd.f32 %v3474_v60, %v10912_v39  ;;  %v3476_v59 = vpop.f32.mrb[13].mxu0  ;;  %v10932_v60 = vld [vmem:[#allocation41_spill] sm:$0xff] }
 0xa98   : > { %v3477_v52 = vadd.f32 %v3476_v59, %v10912_v39  ;;  %v10935_v59 = vld [vmem:[#allocation44_spill] sm:$0xff] }
 0xa99   : > { %v3837_v50 = vrot.slane %v3475_v58, 1 }
 0xa9a   : > { %v3822_v53 = vpop.f32.mrb[16].mxu1  ;;  %v3838_v44 = vrot.slane %v3477_v52, 1 }
 0xa9b   : > { %v3823_v0 = vadd.f32 %v3822_v53, %v10912_v39  ;;  %v3824_v61 = vpop.f32.mrb[17].mxu1  ;;  %v10937_v53 = vld [vmem:[#allocation46_spill] sm:$0xff] }
 0xa9c   : > { %v3825_v4 = vadd.f32 %v3824_v61, %v10912_v39  ;;  %v10933_v39 = vld [vmem:[#allocation42_spill] sm:$0xff]  ;;  %v10940_v61 = vld [vmem:[#allocation49_spill] sm:$0xff] }
 0xa9d   : > { %v3829_v21 = vrot.slane %v3823_v0, 7  ;;  %v3841_v36 = vsel %vm1343_vm0, %v3837_v50, %v3823_v0  ;;  %v10938_v50 = vld [vmem:[#allocation47_spill] sm:$0xff]  ;;  %v10939_v0 = vld [vmem:[#allocation48_spill] sm:$0xff] }
 0xa9e   : > { %v3830_v23 = vrot.slane %v3825_v4, 7  ;;  %v3842_v15 = vsel %vm1343_vm0, %v3838_v44, %v3825_v4  ;;  %v3845_v55 = vmul.f32 %v3841_v36, %v10913_v54  ;;  %v3853_v2 = vmul.f32 %v3841_v36, %v10916_v46  ;;  %v10941_v44 = vld [vmem:[#allocation50_spill] sm:$0xff]  ;;  %v10942_v4 = vld [vmem:[#allocation51_spill] sm:$0xff]  ;;  %v10944_v36 = vld [vmem:[#allocation53_spill] sm:$0xff] }
 0xa9f   : > { %v3833_v34 = vsel %vm1343_vm0, %v3475_v58, %v3829_v21  ;;  %v3846_v12 = vmul.f32 %v3842_v15, %v10913_v54  ;;  %v3854_v18 = vmul.f32 %v3842_v15, %v10916_v46  ;;  %v10934_v58 = vld [vmem:[#allocation43_spill] sm:$0xff]  ;;  %v10943_v21 = vld [vmem:[#allocation52_spill] sm:$0xff]  ;;  %v10948_v54 = vld [vmem:[#allocation57_spill] sm:$0xff] }
 0xaa0   : > { %v3843_v9 = vmul.f32 %v3833_v34, %v10914_v6  ;;  %v3851_v14 = vmul.f32 %v3833_v34, %v10915_v47  ;;  %v3834_v48 = vsel %vm1343_vm0, %v3477_v52, %v3830_v23  ;;  %v10936_v52 = vld [vmem:[#allocation45_spill] sm:$0xff]  ;;  %v10945_v23 = vld [vmem:[#allocation54_spill] sm:$0xff]  ;;  %v10946_v15 = vld [vmem:[#allocation55_spill] sm:$0xff] }
 0xaa1   : > { %v3844_v49 = vmul.f32 %v3834_v48, %v10914_v6  ;;  %v3852_v40 = vmul.f32 %v3834_v48, %v10915_v47  ;;  %v10947_v34 = vld [vmem:[#allocation56_spill] sm:$0xff]  ;;  %v10950_v6 = vld [vmem:[#allocation59_spill] sm:$0xff] }
 0xaa2   : > { %v3847_v28 = vadd.f32 %v3845_v55, %v3843_v9  ;;  %v3855_v3 = vadd.f32 %v3853_v2, %v3851_v14  ;;  %v10949_v55 = vld [vmem:[#allocation58_spill] sm:$0xff]  ;;  %v10951_v9 = vld [vmem:[#allocation61_spill] sm:$0xff]  ;;  %v10952_v47 = vld [vmem:[#allocation63_spill] sm:$0xff] }
 0xaa3   : > { %v3848_v8 = vadd.f32 %v3846_v12, %v3844_v49  ;;  %v3856_v11 = vadd.f32 %v3854_v18, %v3852_v40  ;;  %v10953_v14 = vld [vmem:[#allocation65_spill] sm:$0xff]  ;;  %v10954_v46 = vld [vmem:[#allocation67_spill] sm:$0xff] }
 0xaa4   : > { %v3849_v27 = vadd.f32 %v3847_v28, %v10917_v22  ;;  %v3857_v35 = vadd.f32 %v3855_v3, %v10918_v26  ;;  %v10024_v12 = vld [vmem:[%s7724_s25] sm:$0xff] }
 0xaa5   : > { %v3850_v51 = vadd.f32 %v3848_v8, %v10917_v22  ;;  %v3858_v56 = vadd.f32 %v3856_v11, %v10918_v26  ;;  %v10028_v18 = vld [vmem:[%s7729_s2] sm:$0xff]  ;;  %v10034_v22 = vld [vmem:[%s7724_s25 + $0x8] sm:$0xff] }
 0xaa6   : > { %v10038_v26 = vld [vmem:[%s7729_s2 + $0x8] sm:$0xff] }
 0xaa7   : > { %v3861_v57 = vcombine.low %v3849_v27, %v3850_v51  ;;  %v3873_v42 = vcombine.low %v3857_v35, %v3858_v56 }
 0xaa9   : > { %v3868_v19 = vrot.slane %v3861_v57, %v10919_v43  ;;  %v3880_v7 = vrot.slane %v3873_v42, %v10919_v43 }
 0xaab   : > { %v9971_v5 = vsub.f32 %v10920_v10, %v3868_v19  ;;  %v9974_v63 = vsub.f32 %v10921_v41, %v3880_v7  ;;  %v10955_v10 = vld [vmem:[#allocation69_spill] sm:$0xff]  ;;  %v10956_v41 = vld [vmem:[#allocation70_spill] sm:$0xff] }
 0xaad   : > { %v3890_v62 = vrot.slane %v9971_v5, %v10919_v43  ;;  %v3974_v45 = vrot.slane %v9974_v63, %v10919_v43 }
 0xaaf   : > { %v3891_v13 = vcombine.high %v3890_v62, %v3890_v62  ;;  %v3975_v33 = vcombine.high %v3974_v45, %v3974_v45 }
 0xab1   : > { %5057 = vmatprep.subr.msk.mxu0 %vm1520_vm7, %v3891_v13  ;;  %v10959_v13 = vld [vmem:[#allocation73_spill] sm:$0xff] }
 0xab2   : > { %5058 = vmatpush1.msk.msra.mxu0 %vm1520_vm7, %v3890_v62  ;;  %v10957_v62 = vld [vmem:[#allocation71_spill] sm:$0xff] }
 0xab3   : > { %5059 = vmatmul.mubr.msk.f32.vlgmr.msra.gmra.mrb[14].mxu0 %vm2184_vm14, %v6256_v30  ;;  %5060 = vmatprep.subr.msk.mxu0 %vm1520_vm7, %v3975_v33  ;;  %v10960_v33 = vld [vmem:[#allocation74_spill] sm:$0xff] }
 0xab4   : > { %5061 = vmatpush1.msk.msra.mxu0 %vm1520_vm7, %v3974_v45  ;;  %4044 = vmatprep.mubr.f32.mxu0 %v10653_v38  ;;  %v10958_v45 = vld [vmem:[#allocation72_spill] sm:$0xff] }
 0xab5   : > { %5668 = vmatprep.subr.bf16.mxu0 %v10922_v31  ;;  %v10962_v31 = vld [vmem:[#allocation76_spill] sm:$0xff] }
 0xab7   : > { %5062 = vmatmul.mubr.msk.f32.vlgmr.msra.gmra.mrb[16].mxu0 %vm2184_vm14, %v6256_v30  ;;  %v10961_v30 = vld [vmem:[#allocation75_spill] sm:$0xff] }
 0xab8   : > { %5670 = vmatpush1.bf16.msra.mxu0 %v10923_v37  ;;  %v10963_v37 = vld [vmem:[#allocation77_spill] sm:$0xff] }
 0xab9   : > { %5672 = vmatprep.subr.bf16.mxu0 %v10924_v32  ;;  %v10964_v32 = vld [vmem:[#allocation78_spill] sm:$0xff] }
 0xabc   : > { %5674 = vmatpush1.bf16.msra.mxu0 %v10925_v25  ;;  %v10965_v25 = vld [vmem:[#allocation79_spill] sm:$0xff] }
 0xabd   : > { %5676 = vmatprep.subr.bf16.mxu0 %v10926_v24  ;;  %v10966_v24 = vld [vmem:[#allocation80_spill] sm:$0xff] }
 0xac0   : > { %5678 = vmatpush1.bf16.msra.mxu0 %v10927_v17  ;;  %v10967_v17 = vld [vmem:[#allocation81_spill] sm:$0xff] }
 0xac1   : > { %5680 = vmatprep.subr.bf16.mxu0 %v10928_v20  ;;  %v10968_v20 = vld [vmem:[#allocation82_spill] sm:$0xff] }
 0xac4   : > { %5682 = vmatpush1.bf16.msra.mxu0 %v10929_v1  ;;  %v10969_v1 = vld [vmem:[#allocation83_spill] sm:$0xff] }
 0xac5   : > { %5684 = vmatprep.subr.bf16.mxu0 %v10930_v16  ;;  %v10970_v16 = vld [vmem:[#allocation84_spill] sm:$0xff] }
 0xac8   : > { %5686 = vmatpush1.bf16.msra.mxu0 %v10931_v29  ;;  %v10971_v29 = vld [vmem:[#allocation85_spill] sm:$0xff] }
 0xac9   : > { %5688 = vmatprep.subr.bf16.mxu0 %v10932_v60  ;;  %v10972_v60 = vld [vmem:[#allocation86_spill] sm:$0xff] }
 0xacc   : > { %5690 = vmatpush1.bf16.msra.mxu0 %v10933_v39  ;;  %v10973_v39 = vld [vmem:[#allocation87_spill] sm:$0xff] }
 0xacd   : > { %5692 = vmatprep.subr.bf16.mxu0 %v10934_v58  ;;  %v10974_v58 = vld [vmem:[#allocation88_spill] sm:$0xff] }
 0xad0   : > { %5694 = vmatpush1.bf16.msra.mxu0 %v10935_v59  ;;  %v10975_v59 = vld [vmem:[#allocation89_spill] sm:$0xff] }
 0xad1   : > { %5696 = vmatprep.subr.bf16.mxu0 %v10936_v52  ;;  %v10976_v52 = vld [vmem:[#allocation90_spill] sm:$0xff] }
 0xad4   : > { %5698 = vmatpush1.bf16.msra.mxu0 %v10937_v53  ;;  %v10977_v53 = vld [vmem:[#allocation91_spill] sm:$0xff] }
 0xad5   : > { %5700 = vmatprep.subr.bf16.mxu0 %v10938_v50  ;;  %v10978_v50 = vld [vmem:[#allocation92_spill] sm:$0xff] }
 0xad8   : > { %5702 = vmatpush1.bf16.msra.mxu0 %v10939_v0  ;;  %v10979_v0 = vld [vmem:[#allocation93_spill] sm:$0xff] }
 0xad9   : > { %5704 = vmatprep.subr.bf16.mxu0 %v10940_v61  ;;  %v10980_v61 = vld [vmem:[#allocation94_spill] sm:$0xff] }
 0xadc   : > { %5706 = vmatpush1.bf16.msra.mxu0 %v10941_v44  ;;  %v10981_v44 = vld [vmem:[#allocation95_spill] sm:$0xff] }
 0xadd   : > { %5708 = vmatprep.subr.bf16.mxu0 %v10942_v4  ;;  %v10982_v4 = vld [vmem:[#allocation96_spill] sm:$0xff] }
 0xae0   : > { %5710 = vmatpush1.bf16.msra.mxu0 %v10943_v21  ;;  %v10983_v21 = vld [vmem:[#allocation97_spill] sm:$0xff] }
 0xae1   : > { %5712 = vmatprep.subr.bf16.mxu0 %v10944_v36  ;;  %v10984_v36 = vld [vmem:[#allocation98_spill] sm:$0xff] }
 0xae4   : > { %5714 = vmatpush1.bf16.msra.mxu0 %v10945_v23  ;;  %v10985_v23 = vld [vmem:[#allocation99_spill] sm:$0xff] }
 0xae5   : > { %5716 = vmatprep.subr.bf16.mxu0 %v10946_v15  ;;  %v10986_v15 = vld [vmem:[#allocation100_spill] sm:$0xff] }
 0xae8   : > { %5718 = vmatpush1.bf16.msra.mxu0 %v10947_v34  ;;  %v10987_v34 = vld [vmem:[#allocation101_spill] sm:$0xff] }
 0xae9   : > { %5720 = vmatprep.subr.bf16.mxu0 %v10948_v54  ;;  %v10988_v54 = vld [vmem:[#allocation102_spill] sm:$0xff] }
 0xaec   : > { %5722 = vmatpush1.bf16.msra.mxu0 %v10949_v55  ;;  %v10989_v55 = vld [vmem:[#allocation103_spill] sm:$0xff] }
 0xaed   : > { %5724 = vmatprep.subr.bf16.mxu0 %v10950_v6  ;;  %v10990_v6 = vld [vmem:[#allocation104_spill] sm:$0xff] }
 0xaf0   : > { %5726 = vmatpush1.bf16.msra.mxu0 %v10951_v9  ;;  %v10991_v9 = vld [vmem:[#allocation105_spill] sm:$0xff] }
 0xaf1   : > { %5728 = vmatprep.subr.bf16.mxu0 %v10952_v47  ;;  %v10992_v47 = vld [vmem:[#allocation106_spill] sm:$0xff] }
 0xaf4   : > { %5730 = vmatpush1.bf16.msra.mxu0 %v10953_v14  ;;  %v10993_v14 = vld [vmem:[#allocation107_spill] sm:$0xff] }
 0xaf5   : > { %5732 = vmatprep.subr.bf16.mxu0 %v10954_v46  ;;  %v10994_v46 = vld [vmem:[#allocation108_spill] sm:$0xff] }
 0xb86   : > { %v3962_v2 = vpop.f32.mrb[14].mxu0 }
 0xb87   : > { %v3964_v48 = vpop.f32.mrb[15].mxu0  ;;  %v4051_v40 = vmul.f32 %v10024_v12, %v3962_v2  ;;  %v4059_v28 = vmul.f32 %v10028_v18, %v3962_v2  ;;  %v10995_v2 = vld [vmem:[#allocation109_spill] sm:$0xff] }
 0xb88   : > { %v4052_v27 = vmul.f32 %v10034_v22, %v3964_v48  ;;  %v4060_v35 = vmul.f32 %v10038_v26, %v3964_v48  ;;  %v10996_v48 = vld [vmem:[#allocation110_spill] sm:$0xff] }
 0xb8a   : > { %v4046_v49 = vpop.f32.mrb[16].mxu0 }
 0xb8b   : > { %v4053_v3 = vmul.f32 %v10028_v18, %v4046_v49  ;;  %v4057_v8 = vmul.f32 %v10024_v12, %v4046_v49  ;;  %v4048_v11 = vpop.f32.mrb[17].mxu0  ;;  %v10997_v49 = vld [vmem:[#allocation111_spill] sm:$0xff] }
 0xb8c   : > { %v4054_v51 = vmul.f32 %v10038_v26, %v4048_v11  ;;  %v4058_v56 = vmul.f32 %v10034_v22, %v4048_v11  ;;  %v11002_v11 = vld [vmem:[#allocation116_spill] sm:$0xff] }
 0xb8d   : > { %v4055_v57 = vsub.f32 %v4051_v40, %v4053_v3  ;;  %v10043_v42 = vadd.f32 %v4059_v28, %v4057_v8  ;;  %v10998_v40 = vld [vmem:[#allocation112_spill] sm:$0xff]  ;;  %v10999_v28 = vld [vmem:[#allocation113_spill] sm:$0xff]  ;;  %v11000_v3 = vld [vmem:[#allocation114_spill] sm:$0xff] }
 0xb8e   : > { %v4056_v19 = vsub.f32 %v4052_v27, %v4054_v51  ;;  %v4062_v7 = vadd.f32 %v4060_v35, %v4058_v56  ;;  %v11001_v8 = vld [vmem:[#allocation115_spill] sm:$0xff]  ;;  %v11003_v27 = vld [vmem:[#allocation117_spill] sm:$0xff]  ;;  %v11004_v35 = vld [vmem:[#allocation118_spill] sm:$0xff] }
 0xb8f   : > { %v11005_v51 = vld [vmem:[#allocation119_spill] sm:$0xff]  ;;  %v11006_v56 = vld [vmem:[#allocation120_spill] sm:$0xff] }
 0xb90   : > { %4127 = vmatprep.mubr.f32.mxu0 %v4056_v19  ;;  %4269 = vmatprep.mubr.f32.mxu1 %v4056_v19  ;;  %v11008_v19 = vld [vmem:[#allocation122_spill] sm:$0xff] }
 0xb91   : > { %4128 = vmatmul.mubr.f32.vlgmr.msra.gmra.mrb[18].mxu0 %v4055_v57  ;;  %4270 = vmatmul.mubr.f32.vlgmr.msra.gmra.mrb[18].mxu1 %v4055_v57  ;;  %v11007_v57 = vld [vmem:[#allocation121_spill] sm:$0xff] }
 0xb92   : > { %5734 = vmatpush1.bf16.msra.mxu0 %v10955_v10  ;;  %5862 = vmatpush1.bf16.msra.mxu1 %v10956_v41  ;;  %v11010_v10 = vld [vmem:[#allocation124_spill] sm:$0xff]  ;;  %v11011_v41 = vld [vmem:[#allocation125_spill] sm:$0xff] }
 0xb93   : > { %4198 = vmatprep.mubr.f32.mxu0 %v4062_v7  ;;  %4340 = vmatprep.mubr.f32.mxu1 %v4062_v7  ;;  %v11009_v7 = vld [vmem:[#allocation123_spill] sm:$0xff] }
 0xb94   : > { %5736 = vmatprep.subr.bf16.mxu0 %v10957_v62  ;;  %5864 = vmatprep.subr.bf16.mxu1 %v10958_v45  ;;  %v11012_v62 = vld [vmem:[#allocation126_spill] sm:$0xff]  ;;  %v11013_v45 = vld [vmem:[#allocation127_spill] sm:$0xff] }
 0xb96   : > { %5738 = vmatpush1.bf16.msra.mxu0 %v10959_v13  ;;  %5866 = vmatpush1.bf16.msra.mxu1 %v10960_v33  ;;  %v11014_v13 = vld [vmem:[#allocation128_spill] sm:$0xff]  ;;  %v11015_v33 = vld [vmem:[#allocation129_spill] sm:$0xff] }
 0xb97   : > { %5740 = vmatprep.subr.bf16.mxu0 %v10961_v30  ;;  %5868 = vmatprep.subr.bf16.mxu1 %v10962_v31  ;;  %v11016_v30 = vld [vmem:[#allocation130_spill] sm:$0xff]  ;;  %v11017_v31 = vld [vmem:[#allocation131_spill] sm:$0xff] }
 0xb9a   : > { %5742 = vmatpush1.bf16.msra.mxu0 %v10963_v37  ;;  %5870 = vmatpush1.bf16.msra.mxu1 %v10964_v32  ;;  %v11018_v37 = vld [vmem:[#allocation132_spill] sm:$0xff]  ;;  %v11019_v32 = vld [vmem:[#allocation133_spill] sm:$0xff] }
 0xb9b   : > { %5744 = vmatprep.subr.bf16.mxu0 %v10965_v25  ;;  %5872 = vmatprep.subr.bf16.mxu1 %v10966_v24  ;;  %v11020_v25 = vld [vmem:[#allocation134_spill] sm:$0xff]  ;;  %v11021_v24 = vld [vmem:[#allocation135_spill] sm:$0xff] }
 0xb9e   : > { %5746 = vmatpush1.bf16.msra.mxu0 %v10967_v17  ;;  %5874 = vmatpush1.bf16.msra.mxu1 %v10968_v20  ;;  %v11022_v17 = vld [vmem:[#allocation136_spill] sm:$0xff]  ;;  %v11023_v20 = vld [vmem:[#allocation137_spill] sm:$0xff] }
 0xb9f   : > { %5748 = vmatprep.subr.bf16.mxu0 %v10969_v1  ;;  %5876 = vmatprep.subr.bf16.mxu1 %v10970_v16  ;;  %v11024_v1 = vld [vmem:[#allocation138_spill] sm:$0xff]  ;;  %v11025_v16 = vld [vmem:[#allocation139_spill] sm:$0xff] }
 0xba2   : > { %5750 = vmatpush1.bf16.msra.mxu0 %v10971_v29  ;;  %5878 = vmatpush1.bf16.msra.mxu1 %v10972_v60  ;;  %v11026_v29 = vld [vmem:[#allocation140_spill] sm:$0xff]  ;;  %v11027_v60 = vld [vmem:[#allocation141_spill] sm:$0xff] }
 0xba3   : > { %5752 = vmatprep.subr.bf16.mxu0 %v10973_v39  ;;  %5880 = vmatprep.subr.bf16.mxu1 %v10974_v58  ;;  %v11028_v39 = vld [vmem:[#allocation142_spill] sm:$0xff]  ;;  %v11030_v58 = vld [vmem:[#allocation144_spill] sm:$0xff] }
 0xba6   : > { %5754 = vmatpush1.bf16.msra.mxu0 %v10975_v59  ;;  %5882 = vmatpush1.bf16.msra.mxu1 %v10976_v52  ;;  %v11031_v59 = vld [vmem:[#allocation145_spill] sm:$0xff]  ;;  %v11032_v52 = vld [vmem:[#allocation146_spill] sm:$0xff] }
 0xba7   : > { %5756 = vmatprep.subr.bf16.mxu0 %v10977_v53  ;;  %5884 = vmatprep.subr.bf16.mxu1 %v10978_v50  ;;  %v11033_v53 = vld [vmem:[#allocation147_spill] sm:$0xff]  ;;  %v11034_v50 = vld [vmem:[#allocation148_spill] sm:$0xff] }
 0xbaa   : > { %5758 = vmatpush1.bf16.msra.mxu0 %v10979_v0  ;;  %5886 = vmatpush1.bf16.msra.mxu1 %v10980_v61  ;;  %v11035_v0 = vld [vmem:[#allocation149_spill] sm:$0xff]  ;;  %v11036_v61 = vld [vmem:[#allocation150_spill] sm:$0xff] }
 0xbab   : > { %5760 = vmatprep.subr.bf16.mxu0 %v10981_v44  ;;  %5888 = vmatprep.subr.bf16.mxu1 %v10982_v4  ;;  %v11037_v44 = vld [vmem:[#allocation151_spill] sm:$0xff]  ;;  %v11038_v4 = vld [vmem:[#allocation152_spill] sm:$0xff] }
 0xbae   : > { %5762 = vmatpush1.bf16.msra.mxu0 %v10983_v21  ;;  %5890 = vmatpush1.bf16.msra.mxu1 %v10984_v36  ;;  %v11039_v21 = vld [vmem:[#allocation153_spill] sm:$0xff]  ;;  %v11040_v36 = vld [vmem:[#allocation154_spill] sm:$0xff] }
 0xbaf   : > { %5764 = vmatprep.subr.bf16.mxu0 %v10985_v23  ;;  %5892 = vmatprep.subr.bf16.mxu1 %v10986_v15  ;;  %v11041_v23 = vld [vmem:[#allocation155_spill] sm:$0xff]  ;;  %v11042_v15 = vld [vmem:[#allocation156_spill] sm:$0xff] }
 0xbb2   : > { %5766 = vmatpush1.bf16.msra.mxu0 %v10987_v34  ;;  %5894 = vmatpush1.bf16.msra.mxu1 %v10988_v54  ;;  %v11043_v34 = vld [vmem:[#allocation157_spill] sm:$0xff]  ;;  %v11044_v54 = vld [vmem:[#allocation158_spill] sm:$0xff] }
 0xbb3   : > { %5768 = vmatprep.subr.bf16.mxu0 %v10989_v55  ;;  %5896 = vmatprep.subr.bf16.mxu1 %v10990_v6  ;;  %v11045_v55 = vld [vmem:[#allocation159_spill] sm:$0xff]  ;;  %v11046_v6 = vld [vmem:[#allocation160_spill] sm:$0xff] }
 0xbb6   : > { %5770 = vmatpush1.bf16.msra.mxu0 %v10991_v9  ;;  %5898 = vmatpush1.bf16.msra.mxu1 %v10992_v47  ;;  %v11047_v9 = vld [vmem:[#allocation161_spill] sm:$0xff]  ;;  %v11048_v47 = vld [vmem:[#allocation162_spill] sm:$0xff] }
 0xbb7   : > { %5772 = vmatprep.subr.bf16.mxu0 %v10993_v14  ;;  %5900 = vmatprep.subr.bf16.mxu1 %v10994_v46  ;;  %v11049_v14 = vld [vmem:[#allocation163_spill] sm:$0xff]  ;;  %v11050_v46 = vld [vmem:[#allocation164_spill] sm:$0xff] }
 0xbba   : > { %5774 = vmatpush1.bf16.msra.mxu0 %v10995_v2  ;;  %5902 = vmatpush1.bf16.msra.mxu1 %v10996_v48  ;;  %v11051_v2 = vld [vmem:[#allocation165_spill] sm:$0xff]  ;;  %v11052_v48 = vld [vmem:[#allocation166_spill] sm:$0xff] }
 0xbbb   : > { %5776 = vmatprep.subr.bf16.mxu0 %v10997_v49  ;;  %5904 = vmatprep.subr.bf16.mxu1 %v10998_v40  ;;  %v11053_v49 = vld [vmem:[#allocation167_spill] sm:$0xff]  ;;  %v11054_v40 = vld [vmem:[#allocation168_spill] sm:$0xff] }
 0xbbe   : > { %5778 = vmatpush1.bf16.msra.mxu0 %v10999_v28  ;;  %5906 = vmatpush1.bf16.msra.mxu1 %v11000_v3  ;;  %v11055_v28 = vld [vmem:[#allocation169_spill] sm:$0xff]  ;;  %v11056_v3 = vld [vmem:[#allocation170_spill] sm:$0xff] }
 0xbbf   : > { %5780 = vmatprep.subr.bf16.mxu0 %v11001_v8  ;;  %5908 = vmatprep.subr.bf16.mxu1 %v11002_v11  ;;  %v11057_v8 = vld [vmem:[#allocation171_spill] sm:$0xff]  ;;  %v11058_v11 = vld [vmem:[#allocation172_spill] sm:$0xff] }
 0xbc2   : > { %5782 = vmatpush1.bf16.msra.mxu0 %v11003_v27  ;;  %5910 = vmatpush1.bf16.msra.mxu1 %v11004_v35  ;;  %v11059_v27 = vld [vmem:[#allocation173_spill] sm:$0xff]  ;;  %v11060_v35 = vld [vmem:[#allocation174_spill] sm:$0xff] }
 0xbc3   : > { %5784 = vmatprep.subr.bf16.mxu0 %v11005_v51  ;;  %5912 = vmatprep.subr.bf16.mxu1 %v11006_v56  ;;  %v11061_v51 = vld [vmem:[#allocation175_spill] sm:$0xff]  ;;  %v11062_v56 = vld [vmem:[#allocation176_spill] sm:$0xff] }
 0xbc6   : > { %5786 = vmatpush1.bf16.msra.mxu0 %v11007_v57  ;;  %5914 = vmatpush1.bf16.msra.mxu1 %v11008_v19  ;;  %v11063_v57 = vld [vmem:[#allocation177_spill] sm:$0xff]  ;;  %v11064_v19 = vld [vmem:[#allocation178_spill] sm:$0xff] }
 0xbc7   : > { %5788 = vmatprep.subr.bf16.mxu0 %v11009_v7  ;;  %5916 = vmatprep.subr.bf16.mxu1 %v11010_v10  ;;  %v11065_v7 = vld [vmem:[#allocation179_spill] sm:$0xff]  ;;  %v11066_v10 = vld [vmem:[#allocation180_spill] sm:$0xff] }
 0xbca   : > { %5790 = vmatpush1.bf16.msra.mxu0 %v11011_v41  ;;  %5918 = vmatpush1.bf16.msra.mxu1 %v11012_v62  ;;  %v11067_v41 = vld [vmem:[#allocation181_spill] sm:$0xff]  ;;  %v11068_v62 = vld [vmem:[#allocation182_spill] sm:$0xff] }
 0xbcb   : > { %5792 = vmatprep.subr.bf16.mxu0 %v11013_v45  ;;  %5920 = vmatprep.subr.bf16.mxu1 %v11014_v13  ;;  %v11069_v45 = vld [vmem:[#allocation183_spill] sm:$0xff]  ;;  %v11070_v13 = vld [vmem:[#allocation184_spill] sm:$0xff] }
 0xbce   : > { %5794 = vmatpush1.bf16.msra.mxu0 %v11015_v33  ;;  %5922 = vmatpush1.bf16.msra.mxu1 %v11016_v30  ;;  %v11071_v33 = vld [vmem:[#allocation185_spill] sm:$0xff]  ;;  %v11072_v30 = vld [vmem:[#allocation186_spill] sm:$0xff] }
 0xbcf   : > { %5924 = vmatprep.subr.bf16.mxu0 %v11017_v31  ;;  %6052 = vmatprep.subr.bf16.mxu1 %v11018_v37  ;;  %v11073_v31 = vld [vmem:[#allocation187_spill] sm:$0xff]  ;;  %v11074_v37 = vld [vmem:[#allocation188_spill] sm:$0xff] }
 0xbd1   : > { %4199 = vmatmul.mubr.f32.vlgmr.msra.gmra.mrb[18].mxu0 %v10043_v42  ;;  %4341 = vmatmul.mubr.f32.vlgmr.msra.gmra.mrb[18].mxu1 %v10043_v42  ;;  %v11029_v42 = vld [vmem:[#allocation143_spill] sm:$0xff] }
 0xbd2   : > { %5926 = vmatpush1.bf16.msra.mxu0 %v11019_v32  ;;  %6054 = vmatpush1.bf16.msra.mxu1 %v11020_v25  ;;  %v11075_v32 = vld [vmem:[#allocation189_spill] sm:$0xff]  ;;  %v11076_v25 = vld [vmem:[#allocation190_spill] sm:$0xff] }
 0xbd3   : > { %5928 = vmatprep.subr.bf16.mxu0 %v11021_v24  ;;  %6056 = vmatprep.subr.bf16.mxu1 %v11022_v17  ;;  %v11077_v24 = vld [vmem:[#allocation191_spill] sm:$0xff]  ;;  %v11078_v17 = vld [vmem:[#allocation192_spill] sm:$0xff] }
 0xbd6   : > { %5930 = vmatpush1.bf16.msra.mxu0 %v11023_v20  ;;  %6058 = vmatpush1.bf16.msra.mxu1 %v11024_v1  ;;  %v11079_v20 = vld [vmem:[#allocation193_spill] sm:$0xff]  ;;  %v11080_v1 = vld [vmem:[#allocation194_spill] sm:$0xff] }
 0xbd7   : > { %5932 = vmatprep.subr.bf16.mxu0 %v11025_v16  ;;  %6060 = vmatprep.subr.bf16.mxu1 %v11026_v29  ;;  %v11081_v16 = vld [vmem:[#allocation195_spill] sm:$0xff]  ;;  %v11082_v29 = vld [vmem:[#allocation196_spill] sm:$0xff] }
 0xbda   : > { %5934 = vmatpush1.bf16.msra.mxu0 %v11027_v60  ;;  %6062 = vmatpush1.bf16.msra.mxu1 %v11028_v39 }
 0xbdb   : > { %5936 = vmatprep.subr.bf16.mxu0 %v11029_v42  ;;  %6064 = vmatprep.subr.bf16.mxu1 %v11030_v58  ;;  %v6261_v42 = vld [vmem:[%s8895_s12] sm:$0xff] }
 0xbde   : > { %5938 = vmatpush1.bf16.msra.mxu0 %v11031_v59  ;;  %6066 = vmatpush1.bf16.msra.mxu1 %v11032_v52 }
 0xbdf   : > { %5940 = vmatprep.subr.bf16.mxu0 %v11033_v53  ;;  %6068 = vmatprep.subr.bf16.mxu1 %v11034_v50  ;;  %v6262_v53 = vld [vmem:[%s8895_s12 + $0x8] sm:$0xff] }
 0xbe2   : > { %5942 = vmatpush1.bf16.msra.mxu0 %v11035_v0  ;;  %6070 = vmatpush1.bf16.msra.mxu1 %v11036_v61  ;;  %v6263_v0 = vld [vmem:[%s8895_s12 + $0x18] sm:$0xff] }
 0xbe3   : > { %5944 = vmatprep.subr.bf16.mxu0 %v11037_v44  ;;  %6072 = vmatprep.subr.bf16.mxu1 %v11038_v4  ;;  %v6264_v44 = vld [vmem:[%s8900_s14 + $0x8] sm:$0xff] }
 0xbe6   : > { %5946 = vmatpush1.bf16.msra.mxu0 %v11039_v21  ;;  %6074 = vmatpush1.bf16.msra.mxu1 %v11040_v36  ;;  %v6265_v21 = vld [vmem:[%s8900_s14] sm:$0xff] }
 0xbe7   : > { %5948 = vmatprep.subr.bf16.mxu0 %v11041_v23  ;;  %6076 = vmatprep.subr.bf16.mxu1 %v11042_v15  ;;  %v6266_v23 = vld [vmem:[%s8900_s14 + $0x18] sm:$0xff] }
 0xbea   : > { %5950 = vmatpush1.bf16.msra.mxu0 %v11043_v34  ;;  %6078 = vmatpush1.bf16.msra.mxu1 %v11044_v54  ;;  %v11083_v34 = vld [vmem:[#allocation197_spill] sm:$0xff]  ;;  %v11084_v54 = vld [vmem:[#allocation198_spill] sm:$0xff] }
 0xbeb   : > { %5952 = vmatprep.subr.bf16.mxu0 %v11045_v55  ;;  %6080 = vmatprep.subr.bf16.mxu1 %v11046_v6  ;;  %v11085_v55 = vld [vmem:[#allocation199_spill] sm:$0xff]  ;;  %v11086_v6 = vld [vmem:[#allocation200_spill] sm:$0xff] }
 0xbee   : > { %5954 = vmatpush1.bf16.msra.mxu0 %v11047_v9  ;;  %6082 = vmatpush1.bf16.msra.mxu1 %v11048_v47  ;;  %v11087_v9 = vld [vmem:[#allocation201_spill] sm:$0xff]  ;;  %v11088_v47 = vld [vmem:[#allocation202_spill] sm:$0xff] }
 0xbef   : > { %5956 = vmatprep.subr.bf16.mxu0 %v11049_v14  ;;  %6084 = vmatprep.subr.bf16.mxu1 %v11050_v46  ;;  %v11089_v14 = vld [vmem:[#allocation203_spill] sm:$0xff]  ;;  %v11090_v46 = vld [vmem:[#allocation204_spill] sm:$0xff] }
 0xbf2   : > { %5958 = vmatpush1.bf16.msra.mxu0 %v11051_v2  ;;  %6086 = vmatpush1.bf16.msra.mxu1 %v11052_v48  ;;  %v11091_v2 = vld [vmem:[#allocation205_spill] sm:$0xff]  ;;  %v11092_v48 = vld [vmem:[#allocation206_spill] sm:$0xff] }
 0xbf3   : > { %5960 = vmatprep.subr.bf16.mxu0 %v11053_v49  ;;  %6088 = vmatprep.subr.bf16.mxu1 %v11054_v40  ;;  %v11093_v49 = vld [vmem:[#allocation207_spill] sm:$0xff]  ;;  %v11094_v40 = vld [vmem:[#allocation208_spill] sm:$0xff] }
 0xbf6   : > { %5962 = vmatpush1.bf16.msra.mxu0 %v11055_v28  ;;  %6090 = vmatpush1.bf16.msra.mxu1 %v11056_v3  ;;  %v11095_v28 = vld [vmem:[#allocation209_spill] sm:$0xff]  ;;  %v11096_v3 = vld [vmem:[#allocation210_spill] sm:$0xff] }
 0xbf7   : > { %5964 = vmatprep.subr.bf16.mxu0 %v11057_v8  ;;  %6092 = vmatprep.subr.bf16.mxu1 %v11058_v11  ;;  %v11097_v8 = vld [vmem:[#allocation211_spill] sm:$0xff]  ;;  %v11098_v11 = vld [vmem:[#allocation212_spill] sm:$0xff] }
 0xbfa   : > { %5966 = vmatpush1.bf16.msra.mxu0 %v11059_v27  ;;  %6094 = vmatpush1.bf16.msra.mxu1 %v11060_v35  ;;  %v11099_v27 = vld [vmem:[#allocation213_spill] sm:$0xff]  ;;  %v11100_v35 = vld [vmem:[#allocation214_spill] sm:$0xff] }
 0xbfb   : > { %5968 = vmatprep.subr.bf16.mxu0 %v11061_v51  ;;  %6096 = vmatprep.subr.bf16.mxu1 %v11062_v56  ;;  %v11101_v51 = vld [vmem:[#allocation215_spill] sm:$0xff]  ;;  %v11102_v56 = vld [vmem:[#allocation216_spill] sm:$0xff] }
 0xbfe   : > { %5970 = vmatpush1.bf16.msra.mxu0 %v11063_v57  ;;  %6098 = vmatpush1.bf16.msra.mxu1 %v11064_v19  ;;  %v11103_v57 = vld [vmem:[#allocation217_spill] sm:$0xff]  ;;  %v11104_v19 = vld [vmem:[#allocation218_spill] sm:$0xff] }
 0xbff   : > { %5972 = vmatprep.subr.bf16.mxu0 %v11065_v7  ;;  %6100 = vmatprep.subr.bf16.mxu1 %v11066_v10  ;;  %v11105_v7 = vld [vmem:[#allocation219_spill] sm:$0xff]  ;;  %v11106_v10 = vld [vmem:[#allocation220_spill] sm:$0xff] }
 0xc02   : > { %5974 = vmatpush1.bf16.msra.mxu0 %v11067_v41  ;;  %6102 = vmatpush1.bf16.msra.mxu1 %v11068_v62  ;;  %v11107_v41 = vld [vmem:[#allocation221_spill] sm:$0xff]  ;;  %v11108_v62 = vld [vmem:[#allocation222_spill] sm:$0xff] }
 0xc03   : > { %5976 = vmatprep.subr.bf16.mxu0 %v11069_v45  ;;  %6104 = vmatprep.subr.bf16.mxu1 %v11070_v13  ;;  %v11109_v45 = vld [vmem:[#allocation223_spill] sm:$0xff]  ;;  %v11110_v13 = vld [vmem:[#allocation224_spill] sm:$0xff] }
 0xc06   : > { %5978 = vmatpush1.bf16.msra.mxu0 %v11071_v33  ;;  %6106 = vmatpush1.bf16.msra.mxu1 %v11072_v30  ;;  %v11111_v33 = vld [vmem:[#allocation225_spill] sm:$0xff]  ;;  %v11112_v30 = vld [vmem:[#allocation226_spill] sm:$0xff] }
 0xc07   : > { %5980 = vmatprep.subr.bf16.mxu0 %v11073_v31  ;;  %6108 = vmatprep.subr.bf16.mxu1 %v11074_v37  ;;  %v11113_v31 = vld [vmem:[#allocation227_spill] sm:$0xff]  ;;  %v11114_v37 = vld [vmem:[#allocation228_spill] sm:$0xff] }
 0xc0a   : > { %5982 = vmatpush1.bf16.msra.mxu0 %v11075_v32  ;;  %6110 = vmatpush1.bf16.msra.mxu1 %v11076_v25  ;;  %v11115_v32 = vld [vmem:[#allocation229_spill] sm:$0xff]  ;;  %v11116_v25 = vld [vmem:[#allocation230_spill] sm:$0xff] }
 0xc0b   : > { %5984 = vmatprep.subr.bf16.mxu0 %v11077_v24  ;;  %6112 = vmatprep.subr.bf16.mxu1 %v11078_v17  ;;  %v11117_v24 = vld [vmem:[#allocation231_spill] sm:$0xff]  ;;  %v11118_v17 = vld [vmem:[#allocation232_spill] sm:$0xff] }
 0xc0e   : > { %5986 = vmatpush1.bf16.msra.mxu0 %v11079_v20  ;;  %6114 = vmatpush1.bf16.msra.mxu1 %v11080_v1  ;;  %v11119_v20 = vld [vmem:[#allocation233_spill] sm:$0xff]  ;;  %v11120_v1 = vld [vmem:[#allocation234_spill] sm:$0xff] }
 0xc0f   : > { %5988 = vmatprep.subr.bf16.mxu0 %v11081_v16  ;;  %6116 = vmatprep.subr.bf16.mxu1 %v11082_v29  ;;  %v11121_v16 = vld [vmem:[#allocation235_spill] sm:$0xff]  ;;  %v11122_v29 = vld [vmem:[#allocation236_spill] sm:$0xff] }
 0xca4   : > { %v4200_v60 = vpop.f32.mrb[18].mxu0  ;;  %v10175_v39 = vpop.f32.mrb[18].mxu1 }
 0xca5   : > { %v4347_v58 = vmul.f32 %v6261_v42, %v4200_v60  ;;  %v4202_v59 = vpop.f32.mrb[19].mxu0  ;;  %v4344_v52 = vpop.f32.mrb[19].mxu1  ;;  %v11123_v60 = vld [vmem:[#allocation237_spill] sm:$0xff]  ;;  %v11124_v42 = vld [vmem:[#allocation238_spill] sm:$0xff] }
 0xca6   : > { %v4348_v50 = vmul.f32 %v6262_v53, %v4202_v59  ;;  %v4350_v61 = vmul.f32 %v6263_v0, %v4344_v52  ;;  %v11126_v59 = vld [vmem:[#allocation240_spill] sm:$0xff]  ;;  %v11127_v52 = vld [vmem:[#allocation241_spill] sm:$0xff]  ;;  %v11128_v53 = vld [vmem:[#allocation242_spill] sm:$0xff] }
 0xca7   : > { %v4351_v36 = vsub.f32 %v4347_v58, %v6265_v21  ;;  %v11125_v58 = vld [vmem:[#allocation239_spill] sm:$0xff]  ;;  %v11130_v0 = vld [vmem:[#allocation244_spill] sm:$0xff] }
 0xca8   : > { %v4352_v4 = vsub.f32 %v4348_v50, %v6264_v44  ;;  %v4354_v15 = vsub.f32 %v4350_v61, %v6266_v23  ;;  %v11129_v50 = vld [vmem:[#allocation243_spill] sm:$0xff]  ;;  %v11131_v61 = vld [vmem:[#allocation245_spill] sm:$0xff]  ;;  %v11132_v44 = vld [vmem:[#allocation246_spill] sm:$0xff] }
 0xca9   : > { %v11134_v21 = vld [vmem:[#allocation248_spill] sm:$0xff]  ;;  %v11136_v23 = vld [vmem:[#allocation250_spill] sm:$0xff] }
 0xcaa   : > { %4419 = vmatprep.mubr.f32.mxu0 %v4352_v4  ;;  %4561 = vmatprep.mubr.f32.mxu1 %v4352_v4  ;;  %v11133_v4 = vld [vmem:[#allocation247_spill] sm:$0xff] }
 0xcab   : > { %4420 = vmatmul.mubr.f32.vlgmr.msra.gmra.mrb[20].mxu0 %v4351_v36  ;;  %4562 = vmatmul.mubr.f32.vlgmr.msra.gmra.mrb[20].mxu1 %v4351_v36  ;;  %v11135_v36 = vld [vmem:[#allocation249_spill] sm:$0xff] }
 0xcac   : > { %5990 = vmatpush1.bf16.msra.mxu0 %v11083_v34  ;;  %6118 = vmatpush1.bf16.msra.mxu1 %v11084_v54  ;;  %v11138_v34 = vld [vmem:[#allocation252_spill] sm:$0xff]  ;;  %v11139_v54 = vld [vmem:[#allocation253_spill] sm:$0xff] }
 0xcad   : > { %4490 = vmatprep.mubr.f32.mxu0 %v4354_v15  ;;  %4632 = vmatprep.mubr.f32.mxu1 %v4354_v15  ;;  %v11137_v15 = vld [vmem:[#allocation251_spill] sm:$0xff] }
 0xcae   : > { %5992 = vmatprep.subr.bf16.mxu0 %v11085_v55  ;;  %6120 = vmatprep.subr.bf16.mxu1 %v11086_v6  ;;  %v11140_v55 = vld [vmem:[#allocation254_spill] sm:$0xff]  ;;  %v6267_v6 = vld [vmem:[%s8895_s12 + $0x10] sm:$0xff]  ;;  %s11145_s12 = sld [smem:[#allocation10_spill]] }
 0xcb0   : > { %5994 = vmatpush1.bf16.msra.mxu0 %v11087_v9  ;;  %6122 = vmatpush1.bf16.msra.mxu1 %v11088_v47  ;;  %v4349_v9 = vmul.f32 %v6267_v6, %v10175_v39  ;;  %v11141_v47 = vld [vmem:[#allocation255_spill] sm:$0xff] }
 0xcb1   : > { %5996 = vmatprep.subr.bf16.mxu0 %v11089_v14  ;;  %6124 = vmatprep.subr.bf16.mxu1 %v11090_v46  ;;  %v11142_v14 = vld [vmem:[#allocation256_spill] sm:$0xff]  ;;  %v11143_v46 = vld [vmem:[#allocation257_spill] sm:$0xff] }
 0xcb4   : > { %5998 = vmatpush1.bf16.msra.mxu0 %v11091_v2  ;;  %6126 = vmatpush1.bf16.msra.mxu1 %v11092_v48  ;;  %v11144_v2 = vld [vmem:[#allocation258_spill] sm:$0xff]  ;;  %v6268_v48 = vld [vmem:[%s8900_s14 + $0x10] sm:$0xff]  ;;  %s749_s11 = scalar_lea.vmem %s11146_s5, %s11145_s12  ;;  %s754_s24 = scalar_lea.vmem %s11147_s1, %s11145_s12 }
 0xcb5   : > { %6000 = vmatprep.subr.bf16.mxu0 %v11093_v49  ;;  %6128 = vmatprep.subr.bf16.mxu1 %v11094_v40  ;;  %v4353_v49 = vsub.f32 %v4349_v9, %v6268_v48 }
 0xcb8   : > { %6002 = vmatpush1.bf16.msra.mxu0 %v11095_v28  ;;  %6130 = vmatpush1.bf16.msra.mxu1 %v11096_v3 }
 0xcb9   : > { %6004 = vmatprep.subr.bf16.mxu0 %v11097_v8  ;;  %6132 = vmatprep.subr.bf16.mxu1 %v11098_v11 }
 0xcbc   : > { %6006 = vmatpush1.bf16.msra.mxu0 %v11099_v27  ;;  %6134 = vmatpush1.bf16.msra.mxu1 %v11100_v35 }
 0xcbd   : > { %6008 = vmatprep.subr.bf16.mxu0 %v11101_v51  ;;  %6136 = vmatprep.subr.bf16.mxu1 %v11102_v56 }
 0xcc0   : > { %6010 = vmatpush1.bf16.msra.mxu0 %v11103_v57  ;;  %6138 = vmatpush1.bf16.msra.mxu1 %v11104_v19 }
 0xcc1   : > { %6012 = vmatprep.subr.bf16.mxu0 %v11105_v7  ;;  %6140 = vmatprep.subr.bf16.mxu1 %v11106_v10 }
 0xcc4   : > { %6014 = vmatpush1.bf16.msra.mxu0 %v11107_v41  ;;  %6142 = vmatpush1.bf16.msra.mxu1 %v11108_v62 }
 0xcc5   : > { %6016 = vmatprep.subr.bf16.mxu0 %v11109_v45  ;;  %6144 = vmatprep.subr.bf16.mxu1 %v11110_v13 }
 0xcc8   : > { %6018 = vmatpush1.bf16.msra.mxu0 %v11111_v33  ;;  %6146 = vmatpush1.bf16.msra.mxu1 %v11112_v30 }
 0xcc9   : > { %6020 = vmatprep.subr.bf16.mxu0 %v11113_v31  ;;  %6148 = vmatprep.subr.bf16.mxu1 %v11114_v37 }
 0xccc   : > { %6022 = vmatpush1.bf16.msra.mxu0 %v11115_v32  ;;  %6150 = vmatpush1.bf16.msra.mxu1 %v11116_v25 }
 0xccd   : > { %6024 = vmatprep.subr.bf16.mxu0 %v11117_v24  ;;  %6152 = vmatprep.subr.bf16.mxu1 %v11118_v17 }
 0xcd0   : > { %6026 = vmatpush1.bf16.msra.mxu0 %v11119_v20  ;;  %6154 = vmatpush1.bf16.msra.mxu1 %v11120_v1 }
 0xcd1   : > { %6028 = vmatprep.subr.bf16.mxu0 %v11121_v16  ;;  %6156 = vmatprep.subr.bf16.mxu1 %v11122_v29 }
 0xcd4   : > { %6030 = vmatpush1.bf16.msra.mxu0 %v11123_v60  ;;  %6158 = vmatpush1.bf16.msra.mxu1 %v11124_v42 }
 0xcd5   : > { %6032 = vmatprep.subr.bf16.mxu0 %v11125_v58  ;;  %6160 = vmatprep.subr.bf16.mxu1 %v11126_v59 }
 0xcd8   : > { %6034 = vmatpush1.bf16.msra.mxu0 %v11127_v52  ;;  %6162 = vmatpush1.bf16.msra.mxu1 %v11128_v53 }
 0xcd9   : > { %6036 = vmatprep.subr.bf16.mxu0 %v11129_v50  ;;  %6164 = vmatprep.subr.bf16.mxu1 %v11130_v0 }
 0xcdc   : > { %6038 = vmatpush1.bf16.msra.mxu0 %v11131_v61  ;;  %6166 = vmatpush1.bf16.msra.mxu1 %v11132_v44 }
 0xcdd   : > { %6040 = vmatprep.subr.bf16.mxu0 %v11133_v4  ;;  %6168 = vmatprep.subr.bf16.mxu1 %v11134_v21 }
 0xce0   : > { %6042 = vmatpush1.bf16.msra.mxu0 %v11135_v36  ;;  %6170 = vmatpush1.bf16.msra.mxu1 %v11136_v23 }
 0xce1   : > { %6044 = vmatprep.subr.bf16.mxu0 %v11137_v15  ;;  %6172 = vmatprep.subr.bf16.mxu1 %v11138_v34 }
 0xce4   : > { %6046 = vmatpush1.bf16.msra.mxu0 %v11139_v54  ;;  %6174 = vmatpush1.bf16.msra.mxu1 %v11140_v55 }
 0xce5   : > { %6048 = vmatprep.subr.bf16.mxu0 %v11141_v47  ;;  %6176 = vmatprep.subr.bf16.mxu1 %v11142_v14 }
 0xce8   : > { %6050 = vmatpush1.bf16.msra.mxu0 %v11143_v46  ;;  %6178 = vmatpush1.bf16.msra.mxu1 %v11144_v2 }
 0xceb   : > { %4491 = vmatmul.mubr.f32.vlgmr.msra.gmra.mrb[20].mxu0 %v4353_v49  ;;  %4633 = vmatmul.mubr.f32.vlgmr.msra.gmra.mrb[20].mxu1 %v4353_v49 }
 0xcec   : > { %4715 = vmatprep.mubr.f32.mxu0 %v10653_v38  ;;  %4786 = vmatprep.mubr.f32.mxu1 %v10653_v38 }
 0xdbe   : > { %v4492_v40 = vpop.f32.mrb[20].mxu0  ;;  %v4634_v28 = vpop.f32.mrb[20].mxu1 }
 0xdbf   : > { %v4639_v39 = vmul.f32 %v10024_v12, %v4492_v40  ;;  %v4647_v3 = vmul.f32 %v10028_v18, %v4492_v40  ;;  %v4641_v8 = vmul.f32 %v10028_v18, %v4634_v28  ;;  %v4645_v11 = vmul.f32 %v10024_v12, %v4634_v28  ;;  %v4494_v27 = vpop.f32.mrb[21].mxu0  ;;  %v4636_v35 = vpop.f32.mrb[21].mxu1  ;;  %v6269_v12 = vld [vmem:[%s10295_s17] sm:$0x3] }
 0xdc0   : > { %v4640_v51 = vmul.f32 %v10034_v22, %v4494_v27  ;;  %v4648_v56 = vmul.f32 %v10038_v26, %v4494_v27  ;;  %v4642_v57 = vmul.f32 %v10038_v26, %v4636_v35  ;;  %v4646_v38 = vmul.f32 %v10034_v22, %v4636_v35 }
 0xdc1   : > { %v4643_v19 = vadd.f32 %v4641_v8, %v4639_v39  ;;  %v4649_v7 = vsub.f32 %v4645_v11, %v4647_v3 }
 0xdc2   : > { %v4644_v10 = vadd.f32 %v4642_v57, %v4640_v51  ;;  %v4650_v41 = vsub.f32 %v4646_v38, %v4648_v56 }
 0xdc4   : > { %4651 = vmatprep.subr.mxu0 %v4644_v10  ;;  %4722 = vmatprep.subr.mxu1 %v4650_v41 }
 0xdc5   : > { %4652 = vmatpush1.msra.mxu0 %v4643_v19  ;;  %4723 = vmatpush1.msra.mxu1 %v4649_v7 }
 0xdc6   : > { %5063 = vmatmul.mubr.msk.f32.vlgmr.msra.gmra.mrb[22].mxu0 %vm2947_vm15, %v6269_v12  ;;  %5064 = vmatmul.mubr.msk.f32.vlgmr.msra.gmra.mrb[22].mxu1 %vm2947_vm15, %v6269_v12 }
 0xe99   : > { %v4717_v18 = vpop.f32.mrb[22].mxu0  ;;  %v4788_v22 = vpop.f32.mrb[22].mxu1 }
 0xe9a   : > { %v4793_v26 = vmul.f32 0.05, %v4717_v18  ;;  %v4807_v62 = vmul.f32 0.05, %v4788_v22  ;;  %v4719_v45 = vpop.f32.mrb[23].mxu0  ;;  %v4790_v13 = vpop.f32.mrb[23].mxu1 }
 0xe9b   : > { %v4794_v33 = vmul.f32 0.05, %v4719_v45  ;;  %v4808_v30 = vmul.f32 0.05, %v4790_v13 }
 0xe9d   : > { %v4797_v31 = vcombine.low %v4793_v26, %v4794_v33  ;;  %v4811_v37 = vcombine.low %v4807_v62, %v4808_v30 }
 0xe9f   : > { %v4804_v32 = vrot.slane %v4797_v31, %v10919_v43  ;;  %v4818_v25 = vrot.slane %v4811_v37, %v10919_v43 }
 0xea1   : > { %v4806_v24 = vsub.f32 %v9971_v5, %v4804_v32  ;;  %v4820_v17 = vsub.f32 %v9974_v63, %v4818_v25 }
 0xea3   : > { %4821 = vst [vmem:[%s749_s11] sm:$0xf] %v4806_v24  ;;  %4822 = vst [vmem:[%s754_s24] sm:$0xf] %v4820_v17 }
 0xea4 PF: > { %s11148_s15 = sld [smem:[#allocation9_spill]] }
 0xeaa   : > { %s32_s0 = sadd.s32 1, %s11148_s15  }
 0xeab   : > { %p29_p8 = scmp.ge.s32.totalorder %s32_s0, 4  }
 0xead   :  { %31 = sbr.rel (!%p29_p8) target bundleno = 16 (0x10), region = 162 }
 0xeb4   :  { %4860 = vsyncpa [#allocation3], 1 }
 0xeb5   :  { %4862 = vsyncpa [#allocation3 + $0x1], 1 }
 0xeb6   :  { %4863 = vsyncpa [#allocation5], 1 }

</bundles_post_ra>
